<compile_context>
chip_gen: v5e
topology: v5e:2x2
jax: 0.10.0
libtpu: 0.0.40
codegen_flags: <defaults>
</compile_context>

<pallas_src>
import jax
import jax.numpy as jnp
from jax.experimental import pallas as pl
from jax.experimental.pallas import tpu as pltpu


# ----------------------------- Pallas kernels ------------------------------

def _conv_relu_pool_kernel(x_ref, w_ref, b_ref, o_ref):
    """Fused im2col-matmul + 2x2 max-pool + bias + ReLU.

    x_ref: (4, TP, K)  -- 4 pool-window offsets of TP pooled pixels
    w_ref: (K, Npad)   -- flattened conv weight, output channels padded to 128
    b_ref: (1, Npad)
    o_ref: (TP, Npad)  -- pooled output tile (lane-dense, Npad=128)
    """
    w = w_ref[...]
    acc = None
    for q in range(4):  # short fixed loop: 4 MXU pushes + VPU max combine
        a = jnp.dot(x_ref[q], w, preferred_element_type=jnp.float32)
        acc = a if acc is None else jnp.maximum(acc, a)   # 2x2 max-pool
    # bias + ReLU are monotone -> apply once after the pool max
    o_ref[...] = jnp.maximum(acc + b_ref[...], 0.0).astype(o_ref.dtype)


def _mlp_kernel(x_ref, w1_ref, b1_ref, w2_ref, b2_ref, o_ref, acc_ref):
    """fc1 (K-tiled, accumulated in VMEM) -> ReLU -> fc2, fused."""
    k = pl.program_id(0)

    @pl.when(k == 0)
    def _():
        acc_ref[...] = jnp.zeros_like(acc_ref)

    acc_ref[...] += jnp.dot(x_ref[...], w1_ref[...],
                            preferred_element_type=jnp.float32)

    @pl.when(k == pl.num_programs(0) - 1)
    def _():
        h = jnp.maximum(acc_ref[...] + b1_ref[...], 0.0)
        o = jnp.dot(h, w2_ref[...], preferred_element_type=jnp.float32)
        o_ref[...] = (o + b2_ref[...]).astype(o_ref.dtype)


# ------------------------------ wrappers -----------------------------------

def _pick_tile(m, cap=512):
    """Largest sublane-multiple tile dividing m, <= cap, keeping >=2 steps."""
    target = min(cap, m)
    if m > 8:
        target = min(target, m // 2)          # keep >=2 grid steps (pipelining / megacore)
    target = max(8, (target // 8) * 8)
    for t in range(target, 7, -8):
        if m % t == 0:
            return t
    return m


def conv_relu_pool(x_nhwc, w_oihw, b, *, n_pad=128):
    """conv3x3(pad=1) + ReLU + maxpool2x2, fused in one tiled Pallas kernel.

    Returns the pooled activation in NHWC: (B, H//2, W//2, Cout).
    """
    B, H, W, C = x_nhwc.shape
    Cout = w_oihw.shape[0]
    K = 9 * C

    # ---- glue: im2col (feature order (ky, kx, cin)) ----
    xp = jnp.pad(x_nhwc, ((0, 0), (1, 1), (1, 1), (0, 0)))
    cols = jnp.concatenate(
        [xp[:, ky:ky + H, kx:kx + W, :] for ky in range(3) for kx in range(3)],
        axis=-1)                                           # (B, H, W, 9C)

    # ---- glue: group the 4 pixels of each 2x2 pool window on a lead axis ----
    quads = jnp.stack([cols[:, dy::2, dx::2, :]
                       for dy in (0, 1) for dx in (0, 1)], axis=0)
    Mp = B * (H // 2) * (W // 2)
    patches = quads.reshape(4, Mp, K)                      # rows in (b,h',w') order

    # ---- glue: flatten conv weight OIHW -> (K, Cout), pad N to 128 ----
    w_flat = jnp.transpose(w_oihw, (2, 3, 1, 0)).reshape(K, Cout)
    w_flat = jnp.pad(w_flat, ((0, 0), (0, n_pad - Cout)))
    b_row = jnp.pad(b.reshape(1, Cout), ((0, 0), (0, n_pad - Cout)))

    tp = _pick_tile(Mp)                                    # 4*tp matmul rows / step
    grid = (Mp // tp,)
    flops = 2 * 4 * Mp * K * n_pad
    bytes_acc = 4 * (4 * Mp * K + K * n_pad + n_pad + Mp * n_pad)

    out = pl.pallas_call(
        _conv_relu_pool_kernel,
        out_shape=jax.ShapeDtypeStruct((Mp, n_pad), jnp.float32),
        grid=grid,
        in_specs=[
            pl.BlockSpec((4, tp, K), lambda i: (0, i, 0)),   # patches tile
            pl.BlockSpec((K, n_pad), lambda i: (0, 0)),      # whole weight
            pl.BlockSpec((1, n_pad), lambda i: (0, 0)),      # whole bias
        ],
        out_specs=pl.BlockSpec((tp, n_pad), lambda i: (i, 0)),
        compiler_params=pltpu.CompilerParams(
            dimension_semantics=("parallel",)),
        cost_estimate=pl.CostEstimate(flops=flops, transcendentals=0,
                                      bytes_accessed=bytes_acc),
    )(patches, w_flat, b_row)

    # drop the zero-padded channels; rows are already in (b, h', w') order
    return out[:, :Cout].reshape(B, H // 2, W // 2, Cout)


def mlp_head(x, w1, b1, w2, b2, *, tile_k=2048):
    """relu(x @ w1 + b1) @ w2 + b2, K-tiled with a VMEM accumulator."""
    B, F = x.shape
    H = w1.shape[1]
    N = w2.shape[1]
    tk = tile_k
    while F % tk:
        tk //= 2
    grid = (F // tk,)
    flops = 2 * B * F * H + 2 * B * H * N
    bytes_acc = 4 * (B * F + F * H + H + H * N + N + B * N)

    return pl.pallas_call(
        _mlp_kernel,
        out_shape=jax.ShapeDtypeStruct((B, N), jnp.float32),
        grid=grid,
        in_specs=[
            pl.BlockSpec((B, tk), lambda k: (0, k)),   # activation K-chunk
            pl.BlockSpec((tk, H), lambda k: (k, 0)),   # fc1 weight K-chunk
            pl.BlockSpec((1, H), lambda k: (0, 0)),
            pl.BlockSpec((H, N), lambda k: (0, 0)),
            pl.BlockSpec((1, N), lambda k: (0, 0)),
        ],
        out_specs=pl.BlockSpec((B, N), lambda k: (0, 0)),
        scratch_shapes=[pltpu.VMEM((B, H), jnp.float32)],
        compiler_params=pltpu.CompilerParams(
            dimension_semantics=("arbitrary",)),
        cost_estimate=pl.CostEstimate(flops=flops, transcendentals=0,
                                      bytes_accessed=bytes_acc),
    )(x, w1, b1.reshape(1, H), w2, b2.reshape(1, N))


def cnn_forward(x_nchw, params):
    B = x_nchw.shape[0]
    x = jnp.transpose(x_nchw, (0, 2, 3, 1))            # NCHW -> NHWC

    # conv1 (3 -> 32) + ReLU + MaxPool2x2   (fused kernel)
    y1 = conv_relu_pool(x, params["conv1_w"], params["conv1_b"])   # (B,H/2,W/2,32)

    # conv2 (32 -> 64) + ReLU + MaxPool2x2  (fused kernel)
    y2 = conv_relu_pool(y1, params["conv2_w"], params["conv2_b"])  # (B,H/4,W/4,64)

    # flatten exactly like PyTorch's x.view(B, -1) on NCHW: order (C, H, W)
    flat = jnp.transpose(y2, (0, 3, 1, 2)).reshape(B, -1)          # (B, 64*16*8)

    # fc1 -> ReLU -> fc2 (one K-tiled Pallas kernel)
    return mlp_head(flat, params["fc1_w"], params["fc1_b"],
                    params["fc2_w"], params["fc2_b"])


if __name__ == "__main__":
    num_classes = 10
    key = jax.random.PRNGKey(0)
    ks = jax.random.split(key, 9)

    # deterministic synthetic parameters (PyTorch shapes: conv weights OIHW,
    # linear weights stored here pre-transposed as (in, out))
    params = {
        "conv1_w": jax.random.normal(ks[0], (32, 3, 3, 3), jnp.float32) * (1.0 / (3 * 9) ** 0.5),
        "conv1_b": jax.random.normal(ks[1], (32,), jnp.float32) * 0.01,
        "conv2_w": jax.random.normal(ks[2], (64, 32, 3, 3), jnp.float32) * (1.0 / (32 * 9) ** 0.5),
        "conv2_b": jax.random.normal(ks[3], (64,), jnp.float32) * 0.01,
        "fc1_w": jax.random.normal(ks[4], (64 * 16 * 8, 128), jnp.float32) * (1.0 / (64 * 16 * 8) ** 0.5),
        "fc1_b": jax.random.normal(ks[5], (128,), jnp.float32) * 0.01,
        "fc2_w": jax.random.normal(ks[6], (128, num_classes), jnp.float32) * (1.0 / 128 ** 0.5),
        "fc2_b": jax.random.normal(ks[7], (num_classes,), jnp.float32) * 0.01,
    }

    # input consistent with fc1's 64*16*8 features: (B=2, C=3, H=64, W=32) NCHW
    x = jax.random.normal(ks[8], (2, 3, 64, 32), jnp.float32)

    out = jax.jit(cnn_forward)(x, params)
    jax.block_until_ready(out)
    assert out.shape == (2, num_classes), out.shape
    assert bool(jnp.all(jnp.isfinite(out)))
    print("KERNEL_OK")
</pallas_src>

<mosaic_0001>
module attributes {stable_mosaic.version = 11 : i64} {
  func.func @_conv_relu_pool_kernel(%arg0: i32, %arg1: memref<4x512x27xf32, #tpu.memory_space<vmem>>, %arg2: memref<27x128xf32, #tpu.memory_space<vmem>>, %arg3: memref<1x128xf32, #tpu.memory_space<vmem>>, %arg4: memref<512x128xf32, #tpu.memory_space<vmem>>) attributes {dimension_semantics = [#tpu.dimension_semantics<parallel>], iteration_bounds = array<i64: 2>, scalar_prefetch = 0 : i64, scratch_operands = 0 : i64, tpu.core_type = #tpu.core_type<tc>, window_params = [{transform_indices = @transform_0, window_bounds = array<i64: 4, 512, 27>}, {pipeline_mode = #tpu.pipeline_mode<synchronous>, transform_indices = @transform_1, window_bounds = array<i64: 27, 128>}, {pipeline_mode = #tpu.pipeline_mode<synchronous>, transform_indices = @transform_2, window_bounds = array<i64: 1, 128>}, {transform_indices = @transform_3, window_bounds = array<i64: 512, 128>}]} {
    %c0 = arith.constant 0 : index
    %c0_0 = arith.constant 0 : index
    %0 = vector.load %arg2[%c0, %c0_0] : memref<27x128xf32, #tpu.memory_space<vmem>>, vector<27x128xf32>
    %c0_1 = arith.constant 0 : index
    %c0_2 = arith.constant 0 : index
    %c0_3 = arith.constant 0 : index
    %1 = vector.load %arg1[%c0_1, %c0_2, %c0_3] : memref<4x512x27xf32, #tpu.memory_space<vmem>>, vector<1x512x27xf32>
    %2 = vector.shape_cast %1 : vector<1x512x27xf32> to vector<512x27xf32>
    %cst = arith.constant dense<0.000000e+00> : vector<512x128xf32>
    %3 = tpu.matmul %2, %0, %cst {dimension_numbers = #tpu.dot_dimension_numbers<[1], [0], [0], [1], [0, 0, 1, 1], [], []>} : vector<512x27xf32>, vector<27x128xf32>, vector<512x128xf32> -> vector<512x128xf32>
    %c1 = arith.constant 1 : index
    %c0_4 = arith.constant 0 : index
    %c0_5 = arith.constant 0 : index
    %4 = vector.load %arg1[%c1, %c0_4, %c0_5] : memref<4x512x27xf32, #tpu.memory_space<vmem>>, vector<1x512x27xf32>
    %5 = vector.shape_cast %4 : vector<1x512x27xf32> to vector<512x27xf32>
    %cst_6 = arith.constant dense<0.000000e+00> : vector<512x128xf32>
    %6 = tpu.matmul %5, %0, %cst_6 {dimension_numbers = #tpu.dot_dimension_numbers<[1], [0], [0], [1], [0, 0, 1, 1], [], []>} : vector<512x27xf32>, vector<27x128xf32>, vector<512x128xf32> -> vector<512x128xf32>
    %7 = arith.maximumf %3, %6 : vector<512x128xf32>
    %c2 = arith.constant 2 : index
    %c0_7 = arith.constant 0 : index
    %c0_8 = arith.constant 0 : index
    %8 = vector.load %arg1[%c2, %c0_7, %c0_8] : memref<4x512x27xf32, #tpu.memory_space<vmem>>, vector<1x512x27xf32>
    %9 = vector.shape_cast %8 : vector<1x512x27xf32> to vector<512x27xf32>
    %cst_9 = arith.constant dense<0.000000e+00> : vector<512x128xf32>
    %10 = tpu.matmul %9, %0, %cst_9 {dimension_numbers = #tpu.dot_dimension_numbers<[1], [0], [0], [1], [0, 0, 1, 1], [], []>} : vector<512x27xf32>, vector<27x128xf32>, vector<512x128xf32> -> vector<512x128xf32>
    %11 = arith.maximumf %7, %10 : vector<512x128xf32>
    %c3 = arith.constant 3 : index
    %c0_10 = arith.constant 0 : index
    %c0_11 = arith.constant 0 : index
    %12 = vector.load %arg1[%c3, %c0_10, %c0_11] : memref<4x512x27xf32, #tpu.memory_space<vmem>>, vector<1x512x27xf32>
    %13 = vector.shape_cast %12 : vector<1x512x27xf32> to vector<512x27xf32>
    %cst_12 = arith.constant dense<0.000000e+00> : vector<512x128xf32>
    %14 = tpu.matmul %13, %0, %cst_12 {dimension_numbers = #tpu.dot_dimension_numbers<[1], [0], [0], [1], [0, 0, 1, 1], [], []>} : vector<512x27xf32>, vector<27x128xf32>, vector<512x128xf32> -> vector<512x128xf32>
    %15 = arith.maximumf %11, %14 : vector<512x128xf32>
    %c0_13 = arith.constant 0 : index
    %c0_14 = arith.constant 0 : index
    %16 = vector.load %arg3[%c0_13, %c0_14] : memref<1x128xf32, #tpu.memory_space<vmem>>, vector<1x128xf32>
    %17 = vector.broadcast %16 : vector<1x128xf32> to vector<512x128xf32>
    %18 = arith.addf %15, %17 : vector<512x128xf32>
    %cst_15 = arith.constant 0.000000e+00 : f32
    %19 = vector.broadcast %cst_15 : f32 to vector<512x128xf32>
    %20 = arith.maximumf %18, %19 : vector<512x128xf32>
    %c0_16 = arith.constant 0 : index
    %c0_17 = arith.constant 0 : index
    %21 = vector.load %arg4[%c0_16, %c0_17] : memref<512x128xf32, #tpu.memory_space<vmem>>, vector<512x128xf32>
    tpu.vector_store %arg4[%c0_16, %c0_17], %20 {strides = array<i32>} : memref<512x128xf32, #tpu.memory_space<vmem>>, vector<512x128xf32>,
    return
  }
  func.func @transform_0(%arg0: i32) -> (i32, i32, i32) {
    %c0_i32 = arith.constant 0 : i32
    %c0_i32_0 = arith.constant 0 : i32
    %c0_i32_1 = arith.constant 0 : i32
    return %c0_i32, %arg0, %c0_i32_0 : i32, i32, i32
  }
  func.func @transform_1(%arg0: i32) -> (i32, i32) {
    %c0_i32 = arith.constant 0 : i32
    %c0_i32_0 = arith.constant 0 : i32
    %c0_i32_1 = arith.constant 0 : i32
    return %c0_i32, %c0_i32_0 : i32, i32
  }
  func.func @transform_2(%arg0: i32) -> (i32, i32) {
    %c0_i32 = arith.constant 0 : i32
    %c0_i32_0 = arith.constant 0 : i32
    %c0_i32_1 = arith.constant 0 : i32
    return %c0_i32, %c0_i32_0 : i32, i32
  }
  func.func @transform_3(%arg0: i32) -> (i32, i32) {
    %c0_i32 = arith.constant 0 : i32
    %c0_i32_0 = arith.constant 0 : i32
    return %arg0, %c0_i32 : i32, i32
  }
}

module attributes {stable_mosaic.version = 11 : i64} {
  func.func @_conv_relu_pool_kernel(%arg0: i32, %arg1: memref<4x128x288xf32, #tpu.memory_space<vmem>>, %arg2: memref<288x128xf32, #tpu.memory_space<vmem>>, %arg3: memref<1x128xf32, #tpu.memory_space<vmem>>, %arg4: memref<128x128xf32, #tpu.memory_space<vmem>>) attributes {dimension_semantics = [#tpu.dimension_semantics<parallel>], iteration_bounds = array<i64: 2>, scalar_prefetch = 0 : i64, scratch_operands = 0 : i64, tpu.core_type = #tpu.core_type<tc>, window_params = [{transform_indices = @transform_0, window_bounds = array<i64: 4, 128, 288>}, {pipeline_mode = #tpu.pipeline_mode<synchronous>, transform_indices = @transform_1, window_bounds = array<i64: 288, 128>}, {pipeline_mode = #tpu.pipeline_mode<synchronous>, transform_indices = @transform_2, window_bounds = array<i64: 1, 128>}, {transform_indices = @transform_3, window_bounds = array<i64: 128, 128>}]} {
    %c0 = arith.constant 0 : index
    %c0_0 = arith.constant 0 : index
    %0 = vector.load %arg2[%c0, %c0_0] : memref<288x128xf32, #tpu.memory_space<vmem>>, vector<288x128xf32>
    %c0_1 = arith.constant 0 : index
    %c0_2 = arith.constant 0 : index
    %c0_3 = arith.constant 0 : index
    %1 = vector.load %arg1[%c0_1, %c0_2, %c0_3] : memref<4x128x288xf32, #tpu.memory_space<vmem>>, vector<1x128x288xf32>
    %2 = vector.shape_cast %1 : vector<1x128x288xf32> to vector<128x288xf32>
    %cst = arith.constant dense<0.000000e+00> : vector<128x128xf32>
    %3 = tpu.matmul %2, %0, %cst {dimension_numbers = #tpu.dot_dimension_numbers<[1], [0], [0], [1], [0, 0, 1, 1], [], []>} : vector<128x288xf32>, vector<288x128xf32>, vector<128x128xf32> -> vector<128x128xf32>
    %c1 = arith.constant 1 : index
    %c0_4 = arith.constant 0 : index
    %c0_5 = arith.constant 0 : index
    %4 = vector.load %arg1[%c1, %c0_4, %c0_5] : memref<4x128x288xf32, #tpu.memory_space<vmem>>, vector<1x128x288xf32>
    %5 = vector.shape_cast %4 : vector<1x128x288xf32> to vector<128x288xf32>
    %cst_6 = arith.constant dense<0.000000e+00> : vector<128x128xf32>
    %6 = tpu.matmul %5, %0, %cst_6 {dimension_numbers = #tpu.dot_dimension_numbers<[1], [0], [0], [1], [0, 0, 1, 1], [], []>} : vector<128x288xf32>, vector<288x128xf32>, vector<128x128xf32> -> vector<128x128xf32>
    %7 = arith.maximumf %3, %6 : vector<128x128xf32>
    %c2 = arith.constant 2 : index
    %c0_7 = arith.constant 0 : index
    %c0_8 = arith.constant 0 : index
    %8 = vector.load %arg1[%c2, %c0_7, %c0_8] : memref<4x128x288xf32, #tpu.memory_space<vmem>>, vector<1x128x288xf32>
    %9 = vector.shape_cast %8 : vector<1x128x288xf32> to vector<128x288xf32>
    %cst_9 = arith.constant dense<0.000000e+00> : vector<128x128xf32>
    %10 = tpu.matmul %9, %0, %cst_9 {dimension_numbers = #tpu.dot_dimension_numbers<[1], [0], [0], [1], [0, 0, 1, 1], [], []>} : vector<128x288xf32>, vector<288x128xf32>, vector<128x128xf32> -> vector<128x128xf32>
    %11 = arith.maximumf %7, %10 : vector<128x128xf32>
    %c3 = arith.constant 3 : index
    %c0_10 = arith.constant 0 : index
    %c0_11 = arith.constant 0 : index
    %12 = vector.load %arg1[%c3, %c0_10, %c0_11] : memref<4x128x288xf32, #tpu.memory_space<vmem>>, vector<1x128x288xf32>
    %13 = vector.shape_cast %12 : vector<1x128x288xf32> to vector<128x288xf32>
    %cst_12 = arith.constant dense<0.000000e+00> : vector<128x128xf32>
    %14 = tpu.matmul %13, %0, %cst_12 {dimension_numbers = #tpu.dot_dimension_numbers<[1], [0], [0], [1], [0, 0, 1, 1], [], []>} : vector<128x288xf32>, vector<288x128xf32>, vector<128x128xf32> -> vector<128x128xf32>
    %15 = arith.maximumf %11, %14 : vector<128x128xf32>
    %c0_13 = arith.constant 0 : index
    %c0_14 = arith.constant 0 : index
    %16 = vector.load %arg3[%c0_13, %c0_14] : memref<1x128xf32, #tpu.memory_space<vmem>>, vector<1x128xf32>
    %17 = vector.broadcast %16 : vector<1x128xf32> to vector<128x128xf32>
    %18 = arith.addf %15, %17 : vector<128x128xf32>
    %cst_15 = arith.constant 0.000000e+00 : f32
    %19 = vector.broadcast %cst_15 : f32 to vector<128x128xf32>
    %20 = arith.maximumf %18, %19 : vector<128x128xf32>
    %c0_16 = arith.constant 0 : index
    %c0_17 = arith.constant 0 : index
    %21 = vector.load %arg4[%c0_16, %c0_17] : memref<128x128xf32, #tpu.memory_space<vmem>>, vector<128x128xf32>
    tpu.vector_store %arg4[%c0_16, %c0_17], %20 {strides = array<i32>} : memref<128x128xf32, #tpu.memory_space<vmem>>, vector<128x128xf32>,
    return
  }
  func.func @transform_0(%arg0: i32) -> (i32, i32, i32) {
    %c0_i32 = arith.constant 0 : i32
    %c0_i32_0 = arith.constant 0 : i32
    %c0_i32_1 = arith.constant 0 : i32
    return %c0_i32, %arg0, %c0_i32_0 : i32, i32, i32
  }
  func.func @transform_1(%arg0: i32) -> (i32, i32) {
    %c0_i32 = arith.constant 0 : i32
    %c0_i32_0 = arith.constant 0 : i32
    %c0_i32_1 = arith.constant 0 : i32
    return %c0_i32, %c0_i32_0 : i32, i32
  }
  func.func @transform_2(%arg0: i32) -> (i32, i32) {
    %c0_i32 = arith.constant 0 : i32
    %c0_i32_0 = arith.constant 0 : i32
    %c0_i32_1 = arith.constant 0 : i32
    return %c0_i32, %c0_i32_0 : i32, i32
  }
  func.func @transform_3(%arg0: i32) -> (i32, i32) {
    %c0_i32 = arith.constant 0 : i32
    %c0_i32_0 = arith.constant 0 : i32
    return %arg0, %c0_i32 : i32, i32
  }
}

module attributes {stable_mosaic.version = 11 : i64} {
  func.func @_mlp_kernel(%arg0: i32, %arg1: memref<2x2048xf32, #tpu.memory_space<vmem>>, %arg2: memref<2048x128xf32, #tpu.memory_space<vmem>>, %arg3: memref<1x128xf32, #tpu.memory_space<vmem>>, %arg4: memref<128x10xf32, #tpu.memory_space<vmem>>, %arg5: memref<1x10xf32, #tpu.memory_space<vmem>>, %arg6: memref<2x10xf32, #tpu.memory_space<vmem>>, %arg7: memref<2x128xf32, #tpu.memory_space<vmem>>) attributes {dimension_semantics = [#tpu.dimension_semantics<arbitrary>], iteration_bounds = array<i64: 4>, scalar_prefetch = 0 : i64, scratch_operands = 1 : i64, tpu.core_type = #tpu.core_type<tc>, window_params = [{transform_indices = @transform_0, window_bounds = array<i64: 2, 2048>}, {transform_indices = @transform_1, window_bounds = array<i64: 2048, 128>}, {pipeline_mode = #tpu.pipeline_mode<synchronous>, transform_indices = @transform_2, window_bounds = array<i64: 1, 128>}, {pipeline_mode = #tpu.pipeline_mode<synchronous>, transform_indices = @transform_3, window_bounds = array<i64: 128, 10>}, {pipeline_mode = #tpu.pipeline_mode<synchronous>, transform_indices = @transform_4, window_bounds = array<i64: 1, 10>}, {pipeline_mode = #tpu.pipeline_mode<synchronous>, transform_indices = @transform_5, window_bounds = array<i64: 2, 10>}]} {
    %c0_i32 = arith.constant 0 : i32
    %0 = arith.cmpi eq, %arg0, %c0_i32 : i32
    %1 = arith.extui %0 : i1 to i32
    %c0_i32_0 = arith.constant 0 : i32
    %2 = arith.cmpi ne, %1, %c0_i32_0 : i32
    scf.if %2 {
      %cst_9 = arith.constant 0.000000e+00 : f32
      %12 = vector.broadcast %cst_9 : f32 to vector<2x128xf32>
      %c0_10 = arith.constant 0 : index
      %c0_11 = arith.constant 0 : index
      %13 = vector.load %arg7[%c0_10, %c0_11] : memref<2x128xf32, #tpu.memory_space<vmem>>, vector<2x128xf32>
      tpu.vector_store %arg7[%c0_10, %c0_11], %12 {strides = array<i32>} : memref<2x128xf32, #tpu.memory_space<vmem>>, vector<2x128xf32>,
    } else {
    }
    %c0 = arith.constant 0 : index
    %c0_1 = arith.constant 0 : index
    %3 = vector.load %arg7[%c0, %c0_1] : memref<2x128xf32, #tpu.memory_space<vmem>>, vector<2x128xf32>
    %c0_2 = arith.constant 0 : index
    %c0_3 = arith.constant 0 : index
    %4 = vector.load %arg1[%c0_2, %c0_3] : memref<2x2048xf32, #tpu.memory_space<vmem>>, vector<2x2048xf32>
    %c0_4 = arith.constant 0 : index
    %c0_5 = arith.constant 0 : index
    %5 = vector.load %arg2[%c0_4, %c0_5] : memref<2048x128xf32, #tpu.memory_space<vmem>>, vector<2048x128xf32>
    %cst = arith.constant dense<0.000000e+00> : vector<2x128xf32>
    %6 = tpu.matmul %4, %5, %cst {dimension_numbers = #tpu.dot_dimension_numbers<[1], [0], [0], [1], [0, 0, 1, 1], [], []>} : vector<2x2048xf32>, vector<2048x128xf32>, vector<2x128xf32> -> vector<2x128xf32>
    %7 = arith.addf %3, %6 : vector<2x128xf32>
    %c0_6 = arith.constant 0 : index
    %c0_7 = arith.constant 0 : index
    %8 = vector.load %arg7[%c0_6, %c0_7] : memref<2x128xf32, #tpu.memory_space<vmem>>, vector<2x128xf32>
    tpu.vector_store %arg7[%c0_6, %c0_7], %7 {strides = array<i32>} : memref<2x128xf32, #tpu.memory_space<vmem>>, vector<2x128xf32>,
    %c3_i32 = arith.constant 3 : i32
    %9 = arith.cmpi eq, %arg0, %c3_i32 : i32
    %10 = arith.extui %9 : i1 to i32
    %c0_i32_8 = arith.constant 0 : i32
    %11 = arith.cmpi ne, %10, %c0_i32_8 : i32
    scf.if %11 {
      %c0_9 = arith.constant 0 : index
      %c0_10 = arith.constant 0 : index
      %12 = vector.load %arg7[%c0_9, %c0_10] : memref<2x128xf32, #tpu.memory_space<vmem>>, vector<2x128xf32>
      %c0_11 = arith.constant 0 : index
      %c0_12 = arith.constant 0 : index
      %13 = vector.load %arg3[%c0_11, %c0_12] : memref<1x128xf32, #tpu.memory_space<vmem>>, vector<1x128xf32>
      %14 = vector.broadcast %13 : vector<1x128xf32> to vector<2x128xf32>
      %15 = arith.addf %12, %14 : vector<2x128xf32>
      %cst_13 = arith.constant 0.000000e+00 : f32
      %16 = vector.broadcast %cst_13 : f32 to vector<2x128xf32>
      %17 = arith.maximumf %15, %16 : vector<2x128xf32>
      %c0_14 = arith.constant 0 : index
      %c0_15 = arith.constant 0 : index
      %18 = vector.load %arg4[%c0_14, %c0_15] : memref<128x10xf32, #tpu.memory_space<vmem>>, vector<128x10xf32>
      %cst_16 = arith.constant dense<0.000000e+00> : vector<2x10xf32>
      %19 = tpu.matmul %17, %18, %cst_16 {dimension_numbers = #tpu.dot_dimension_numbers<[1], [0], [0], [1], [0, 0, 1, 1], [], []>} : vector<2x128xf32>, vector<128x10xf32>, vector<2x10xf32> -> vector<2x10xf32>
      %c0_17 = arith.constant 0 : index
      %c0_18 = arith.constant 0 : index
      %20 = vector.load %arg5[%c0_17, %c0_18] : memref<1x10xf32, #tpu.memory_space<vmem>>, vector<1x10xf32>
      %21 = vector.broadcast %20 : vector<1x10xf32> to vector<2x10xf32>
      %22 = arith.addf %19, %21 : vector<2x10xf32>
      %c0_19 = arith.constant 0 : index
      %c0_20 = arith.constant 0 : index
      %23 = vector.load %arg6[%c0_19, %c0_20] : memref<2x10xf32, #tpu.memory_space<vmem>>, vector<2x10xf32>
      tpu.vector_store %arg6[%c0_19, %c0_20], %22 {strides = array<i32>} : memref<2x10xf32, #tpu.memory_space<vmem>>, vector<2x10xf32>,
    } else {
    }
    return
  }
  func.func @transform_0(%arg0: i32) -> (i32, i32) {
    %c0_i32 = arith.constant 0 : i32
    %c0_i32_0 = arith.constant 0 : i32
    return %c0_i32, %arg0 : i32, i32
  }
  func.func @transform_1(%arg0: i32) -> (i32, i32) {
    %c0_i32 = arith.constant 0 : i32
    %c0_i32_0 = arith.constant 0 : i32
    return %arg0, %c0_i32 : i32, i32
  }
  func.func @transform_2(%arg0: i32) -> (i32, i32) {
    %c0_i32 = arith.constant 0 : i32
    %c0_i32_0 = arith.constant 0 : i32
    %c0_i32_1 = arith.constant 0 : i32
    return %c0_i32, %c0_i32_0 : i32, i32
  }
  func.func @transform_3(%arg0: i32) -> (i32, i32) {
    %c0_i32 = arith.constant 0 : i32
    %c0_i32_0 = arith.constant 0 : i32
    %c0_i32_1 = arith.constant 0 : i32
    return %c0_i32, %c0_i32_0 : i32, i32
  }
  func.func @transform_4(%arg0: i32) -> (i32, i32) {
    %c0_i32 = arith.constant 0 : i32
    %c0_i32_0 = arith.constant 0 : i32
    %c0_i32_1 = arith.constant 0 : i32
    return %c0_i32, %c0_i32_0 : i32, i32
  }
  func.func @transform_5(%arg0: i32) -> (i32, i32) {
    %c0_i32 = arith.constant 0 : i32
    %c0_i32_0 = arith.constant 0 : i32
    %c0_i32_1 = arith.constant 0 : i32
    return %c0_i32, %c0_i32_0 : i32, i32
  }
}

</mosaic_0001>

<bundles_post_ra>
// kernel: cnn_forward.3
= control target key start
LH: loop header
LB: loop body
LE: loop exit
PB: predicated region body
PF: predicated region fallthrough
CT: control target
= control target key end

     0   :  { %s5156_s12 = smov 0   ;;  %s5158_s13 = smov 0   ;;  %s6390_s0 = inlined_call_operand.vmem [shape: f32[4,1024,27], index: 0, kind: input, shape index: {}]   ;;  %s6391_s1 = inlined_call_operand.vmem [shape: f32[27,128], index: 1, kind: input, shape index: {}]   ;;  %s6392_s2 = inlined_call_operand.vmem [shape: f32[1,128], index: 2, kind: input, shape index: {}]   ;;  %s6393_s3 = inlined_call_operand.vmem [shape: f32[1024,128], index: 3, kind: output, shape index: {}]  }
   0x1   :  { %s5160_s14 = smov 0  }
   0x2 LB: > { %s4620_s15 = sadd.s32 4294967295, %s5134_s14   ;;  %s5173_s16 = sadd.s32 1, %s5134_s14   ;;  %s5134_s14 = sphi %s5160_s14, %s6396_s14   ;;  %s5130_s13 = sphi %s5158_s13, %s6395_s13   ;;  %s5126_s12 = sphi %s5156_s12, %s6394_s12  }
   0x3   : > { %s17_s17 = ssub.s32 %s5134_s14, %s5173_s16  ;;  %s20_s18 = sadd.s32 1, %s5130_s13 }
   0x4   : > { %p18_p0 = scmp.eq.s32.totalorder %s17_s17, 0  ;;  %p27_p1 = scmp.ne.s32.totalorder %s5130_s13, %s5126_s12 }
   0x5   : > { %p28_p2 = scmp.eq.s32.totalorder %s5134_s14, 0  ;;  %p4623_p4 = scmp.ge.s32.totalorder %s5134_s14, 2 }
   0x6   : > { %s5182_s19 = scalar_select %p18_p0, %s5130_s13, %s20_s18  }
   0x7   : > { %p29_p3 = por %p28_p2, %p27_p1  ;;  %127 = sbr.rel (%p4623_p4) target bundleno = 272 (0x110), region = 24 }
   0xc   : > { %130 = sbr.rel (!%p29_p3) target bundleno = 272 (0x110), region = 28  ;;  %s132_s20 = sand.u32 (%p29_p3), 1, %s5130_s13  }
   0xd   : > { %s5085_s21 = sshll.u32 (%p29_p3), %s5134_s14, 9  ;;  %s4624_s22 = sshll.u32 (%p29_p3), %s132_s20, 11 }
   0xe   : > { %s5190_s25 = scalar_lea.vmem (%p29_p3), %s6390_s0, %s5085_s21  ;;  %s5195_s26 = scalar_lea.vmem (%p29_p3), [#allocation2], %s4624_s22 }
   0xf   : > { %v677_v0 = vld [vmem:[%s5190_s25] sm:$0xff] (%p29_p3)  ;;  %v679_v1 = vld [vmem:[%s5190_s25 + $0x8] sm:$0xff] (%p29_p3)  ;;  %v681_v2 = vld [vmem:[%s5190_s25 + $0x10] sm:$0xff] (%p29_p3) }
  0x10   : > { %678 = vst [vmem:[%s5195_s26] sm:$0xff] (%p29_p3), %v677_v0  ;;  %v683_v3 = vld [vmem:[%s5190_s25 + $0x18] sm:$0xff] (%p29_p3)  ;;  %v685_v4 = vld [vmem:[%s5190_s25 + $0x20] sm:$0xff] (%p29_p3)  ;;  %v687_v5 = vld [vmem:[%s5190_s25 + $0x28] sm:$0xff] (%p29_p3) }
  0x11   : > { %680 = vst [vmem:[%s5195_s26 + $0x8] sm:$0xff] %v679_v1  ;;  %v689_v6 = vld [vmem:[%s5190_s25 + $0x30] sm:$0xff]  ;;  %v691_v7 = vld [vmem:[%s5190_s25 + $0x38] sm:$0xff]  ;;  %v693_v8 = vld [vmem:[%s5190_s25 + $0x40] sm:$0xff] }
  0x12   : > { %682 = vst [vmem:[%s5195_s26 + $0x10] sm:$0xff] %v681_v2  ;;  %v695_v9 = vld [vmem:[%s5190_s25 + $0x48] sm:$0xff]  ;;  %v697_v10 = vld [vmem:[%s5190_s25 + $0x50] sm:$0xff]  ;;  %v699_v11 = vld [vmem:[%s5190_s25 + $0x58] sm:$0xff] }
  0x13   : > { %684 = vst [vmem:[%s5195_s26 + $0x18] sm:$0xff] %v683_v3  ;;  %v701_v12 = vld [vmem:[%s5190_s25 + $0x60] sm:$0xff]  ;;  %v703_v13 = vld [vmem:[%s5190_s25 + $0x68] sm:$0xff]  ;;  %v705_v14 = vld [vmem:[%s5190_s25 + $0x70] sm:$0xff] }
  0x14   : > { %686 = vst [vmem:[%s5195_s26 + $0x20] sm:$0xff] %v685_v4  ;;  %v707_v15 = vld [vmem:[%s5190_s25 + $0x78] sm:$0xff]  ;;  %v709_v16 = vld [vmem:[%s5190_s25 + $0x80] sm:$0xff]  ;;  %v711_v17 = vld [vmem:[%s5190_s25 + $0x88] sm:$0xff] }
  0x15   : > { %688 = vst [vmem:[%s5195_s26 + $0x28] sm:$0xff] %v687_v5  ;;  %v713_v18 = vld [vmem:[%s5190_s25 + $0x90] sm:$0xff]  ;;  %v715_v19 = vld [vmem:[%s5190_s25 + $0x98] sm:$0xff]  ;;  %v717_v20 = vld [vmem:[%s5190_s25 + $0xa0] sm:$0xff] }
  0x16   : > { %690 = vst [vmem:[%s5195_s26 + $0x30] sm:$0xff] %v689_v6  ;;  %v719_v21 = vld [vmem:[%s5190_s25 + $0xa8] sm:$0xff]  ;;  %v721_v22 = vld [vmem:[%s5190_s25 + $0xb0] sm:$0xff]  ;;  %v723_v23 = vld [vmem:[%s5190_s25 + $0xb8] sm:$0xff] }
  0x17   : > { %692 = vst [vmem:[%s5195_s26 + $0x38] sm:$0xff] %v691_v7  ;;  %v725_v24 = vld [vmem:[%s5190_s25 + $0xc0] sm:$0xff]  ;;  %v727_v25 = vld [vmem:[%s5190_s25 + $0xc8] sm:$0xff]  ;;  %v729_v26 = vld [vmem:[%s5190_s25 + $0xd0] sm:$0xff] }
  0x18   : > { %694 = vst [vmem:[%s5195_s26 + $0x40] sm:$0xff] %v693_v8  ;;  %v731_v27 = vld [vmem:[%s5190_s25 + $0xd8] sm:$0xff]  ;;  %v733_v28 = vld [vmem:[%s5190_s25 + $0xe0] sm:$0xff]  ;;  %v735_v29 = vld [vmem:[%s5190_s25 + $0xe8] sm:$0xff] }
  0x19   : > { %696 = vst [vmem:[%s5195_s26 + $0x48] sm:$0xff] %v695_v9  ;;  %v737_v30 = vld [vmem:[%s5190_s25 + $0xf0] sm:$0xff]  ;;  %v739_v31 = vld [vmem:[%s5190_s25 + $0xf8] sm:$0xff]  ;;  %v741_v32 = vld [vmem:[%s5190_s25 + $0x100] sm:$0xff] }
  0x1a   : > { %698 = vst [vmem:[%s5195_s26 + $0x50] sm:$0xff] %v697_v10  ;;  %v743_v33 = vld [vmem:[%s5190_s25 + $0x108] sm:$0xff]  ;;  %v745_v34 = vld [vmem:[%s5190_s25 + $0x110] sm:$0xff]  ;;  %v747_v35 = vld [vmem:[%s5190_s25 + $0x118] sm:$0xff] }
  0x1b   : > { %700 = vst [vmem:[%s5195_s26 + $0x58] sm:$0xff] %v699_v11  ;;  %v749_v36 = vld [vmem:[%s5190_s25 + $0x120] sm:$0xff]  ;;  %v751_v37 = vld [vmem:[%s5190_s25 + $0x128] sm:$0xff]  ;;  %v753_v38 = vld [vmem:[%s5190_s25 + $0x130] sm:$0xff] }
  0x1c   : > { %702 = vst [vmem:[%s5195_s26 + $0x60] sm:$0xff] %v701_v12  ;;  %v755_v39 = vld [vmem:[%s5190_s25 + $0x138] sm:$0xff]  ;;  %v757_v40 = vld [vmem:[%s5190_s25 + $0x140] sm:$0xff]  ;;  %v759_v41 = vld [vmem:[%s5190_s25 + $0x148] sm:$0xff] }
  0x1d   : > { %704 = vst [vmem:[%s5195_s26 + $0x68] sm:$0xff] %v703_v13  ;;  %v761_v42 = vld [vmem:[%s5190_s25 + $0x150] sm:$0xff]  ;;  %v763_v43 = vld [vmem:[%s5190_s25 + $0x158] sm:$0xff]  ;;  %v765_v44 = vld [vmem:[%s5190_s25 + $0x160] sm:$0xff] }
  0x1e   : > { %706 = vst [vmem:[%s5195_s26 + $0x70] sm:$0xff] %v705_v14  ;;  %v767_v45 = vld [vmem:[%s5190_s25 + $0x168] sm:$0xff]  ;;  %v769_v46 = vld [vmem:[%s5190_s25 + $0x170] sm:$0xff]  ;;  %v771_v47 = vld [vmem:[%s5190_s25 + $0x178] sm:$0xff] }
  0x1f   : > { %708 = vst [vmem:[%s5195_s26 + $0x78] sm:$0xff] %v707_v15  ;;  %v773_v48 = vld [vmem:[%s5190_s25 + $0x180] sm:$0xff]  ;;  %v775_v49 = vld [vmem:[%s5190_s25 + $0x188] sm:$0xff]  ;;  %v777_v50 = vld [vmem:[%s5190_s25 + $0x190] sm:$0xff] }
  0x20   : > { %710 = vst [vmem:[%s5195_s26 + $0x80] sm:$0xff] %v709_v16  ;;  %v779_v51 = vld [vmem:[%s5190_s25 + $0x198] sm:$0xff]  ;;  %v781_v52 = vld [vmem:[%s5190_s25 + $0x1a0] sm:$0xff]  ;;  %v783_v53 = vld [vmem:[%s5190_s25 + $0x1a8] sm:$0xff] }
  0x21   : > { %712 = vst [vmem:[%s5195_s26 + $0x88] sm:$0xff] %v711_v17  ;;  %v785_v54 = vld [vmem:[%s5190_s25 + $0x1b0] sm:$0xff]  ;;  %v787_v55 = vld [vmem:[%s5190_s25 + $0x1b8] sm:$0xff]  ;;  %v789_v56 = vld [vmem:[%s5190_s25 + $0x1c0] sm:$0xff] }
  0x22   : > { %714 = vst [vmem:[%s5195_s26 + $0x90] sm:$0xff] %v713_v18  ;;  %v791_v57 = vld [vmem:[%s5190_s25 + $0x1c8] sm:$0xff]  ;;  %v793_v58 = vld [vmem:[%s5190_s25 + $0x1d0] sm:$0xff]  ;;  %v795_v59 = vld [vmem:[%s5190_s25 + $0x1d8] sm:$0xff] }
  0x23   : > { %716 = vst [vmem:[%s5195_s26 + $0x98] sm:$0xff] %v715_v19  ;;  %v797_v60 = vld [vmem:[%s5190_s25 + $0x1e0] sm:$0xff]  ;;  %v799_v61 = vld [vmem:[%s5190_s25 + $0x1e8] sm:$0xff]  ;;  %v801_v62 = vld [vmem:[%s5190_s25 + $0x1f0] sm:$0xff] }
  0x24   : > { %718 = vst [vmem:[%s5195_s26 + $0xa0] sm:$0xff] %v717_v20  ;;  %v803_v63 = vld [vmem:[%s5190_s25 + $0x1f8] sm:$0xff]  ;;  %v805_v0 = vld [vmem:[%s5190_s25 + $0x400] sm:$0xff]  ;;  %v807_v1 = vld [vmem:[%s5190_s25 + $0x408] sm:$0xff] }
  0x25   : > { %720 = vst [vmem:[%s5195_s26 + $0xa8] sm:$0xff] %v719_v21  ;;  %v809_v2 = vld [vmem:[%s5190_s25 + $0x410] sm:$0xff]  ;;  %v811_v3 = vld [vmem:[%s5190_s25 + $0x418] sm:$0xff]  ;;  %v813_v4 = vld [vmem:[%s5190_s25 + $0x420] sm:$0xff] }
  0x26   : > { %722 = vst [vmem:[%s5195_s26 + $0xb0] sm:$0xff] %v721_v22  ;;  %v815_v5 = vld [vmem:[%s5190_s25 + $0x428] sm:$0xff]  ;;  %v817_v6 = vld [vmem:[%s5190_s25 + $0x430] sm:$0xff]  ;;  %v819_v7 = vld [vmem:[%s5190_s25 + $0x438] sm:$0xff] }
  0x27   : > { %724 = vst [vmem:[%s5195_s26 + $0xb8] sm:$0xff] %v723_v23  ;;  %v821_v8 = vld [vmem:[%s5190_s25 + $0x440] sm:$0xff]  ;;  %v823_v9 = vld [vmem:[%s5190_s25 + $0x448] sm:$0xff]  ;;  %v825_v10 = vld [vmem:[%s5190_s25 + $0x450] sm:$0xff] }
  0x28   : > { %726 = vst [vmem:[%s5195_s26 + $0xc0] sm:$0xff] %v725_v24  ;;  %v827_v11 = vld [vmem:[%s5190_s25 + $0x458] sm:$0xff]  ;;  %v829_v12 = vld [vmem:[%s5190_s25 + $0x460] sm:$0xff]  ;;  %v831_v13 = vld [vmem:[%s5190_s25 + $0x468] sm:$0xff] }
  0x29   : > { %728 = vst [vmem:[%s5195_s26 + $0xc8] sm:$0xff] %v727_v25  ;;  %v833_v14 = vld [vmem:[%s5190_s25 + $0x470] sm:$0xff]  ;;  %v835_v15 = vld [vmem:[%s5190_s25 + $0x478] sm:$0xff]  ;;  %v837_v16 = vld [vmem:[%s5190_s25 + $0x480] sm:$0xff] }
  0x2a   : > { %730 = vst [vmem:[%s5195_s26 + $0xd0] sm:$0xff] %v729_v26  ;;  %v839_v17 = vld [vmem:[%s5190_s25 + $0x488] sm:$0xff]  ;;  %v841_v18 = vld [vmem:[%s5190_s25 + $0x490] sm:$0xff]  ;;  %v843_v19 = vld [vmem:[%s5190_s25 + $0x498] sm:$0xff] }
  0x2b   : > { %732 = vst [vmem:[%s5195_s26 + $0xd8] sm:$0xff] %v731_v27  ;;  %v845_v20 = vld [vmem:[%s5190_s25 + $0x4a0] sm:$0xff]  ;;  %v847_v21 = vld [vmem:[%s5190_s25 + $0x4a8] sm:$0xff]  ;;  %v849_v22 = vld [vmem:[%s5190_s25 + $0x4b0] sm:$0xff] }
  0x2c   : > { %734 = vst [vmem:[%s5195_s26 + $0xe0] sm:$0xff] %v733_v28  ;;  %v851_v23 = vld [vmem:[%s5190_s25 + $0x4b8] sm:$0xff]  ;;  %v853_v24 = vld [vmem:[%s5190_s25 + $0x4c0] sm:$0xff]  ;;  %v855_v25 = vld [vmem:[%s5190_s25 + $0x4c8] sm:$0xff] }
  0x2d   : > { %736 = vst [vmem:[%s5195_s26 + $0xe8] sm:$0xff] %v735_v29  ;;  %v857_v26 = vld [vmem:[%s5190_s25 + $0x4d0] sm:$0xff]  ;;  %v859_v27 = vld [vmem:[%s5190_s25 + $0x4d8] sm:$0xff]  ;;  %v861_v28 = vld [vmem:[%s5190_s25 + $0x4e0] sm:$0xff] }
  0x2e   : > { %738 = vst [vmem:[%s5195_s26 + $0xf0] sm:$0xff] %v737_v30  ;;  %v863_v29 = vld [vmem:[%s5190_s25 + $0x4e8] sm:$0xff]  ;;  %v865_v30 = vld [vmem:[%s5190_s25 + $0x4f0] sm:$0xff] }
  0x2f   : > { %740 = vst [vmem:[%s5195_s26 + $0xf8] sm:$0xff] %v739_v31  ;;  %v867_v31 = vld [vmem:[%s5190_s25 + $0x4f8] sm:$0xff] }
  0x30   : > { %742 = vst [vmem:[%s5195_s26 + $0x100] sm:$0xff] %v741_v32  ;;  %v869_v32 = vld [vmem:[%s5190_s25 + $0x500] sm:$0xff] }
  0x31   : > { %744 = vst [vmem:[%s5195_s26 + $0x108] sm:$0xff] %v743_v33  ;;  %v871_v33 = vld [vmem:[%s5190_s25 + $0x508] sm:$0xff] }
  0x32   : > { %746 = vst [vmem:[%s5195_s26 + $0x110] sm:$0xff] %v745_v34  ;;  %v873_v34 = vld [vmem:[%s5190_s25 + $0x510] sm:$0xff] }
  0x33   : > { %748 = vst [vmem:[%s5195_s26 + $0x118] sm:$0xff] %v747_v35  ;;  %v875_v35 = vld [vmem:[%s5190_s25 + $0x518] sm:$0xff] }
  0x34   : > { %750 = vst [vmem:[%s5195_s26 + $0x120] sm:$0xff] %v749_v36  ;;  %v877_v36 = vld [vmem:[%s5190_s25 + $0x520] sm:$0xff] }
  0x35   : > { %752 = vst [vmem:[%s5195_s26 + $0x128] sm:$0xff] %v751_v37  ;;  %v879_v37 = vld [vmem:[%s5190_s25 + $0x528] sm:$0xff] }
  0x36   : > { %754 = vst [vmem:[%s5195_s26 + $0x130] sm:$0xff] %v753_v38  ;;  %v881_v38 = vld [vmem:[%s5190_s25 + $0x530] sm:$0xff] }
  0x37   : > { %756 = vst [vmem:[%s5195_s26 + $0x138] sm:$0xff] %v755_v39  ;;  %v883_v39 = vld [vmem:[%s5190_s25 + $0x538] sm:$0xff] }
  0x38   : > { %758 = vst [vmem:[%s5195_s26 + $0x140] sm:$0xff] %v757_v40  ;;  %v885_v40 = vld [vmem:[%s5190_s25 + $0x540] sm:$0xff] }
  0x39   : > { %760 = vst [vmem:[%s5195_s26 + $0x148] sm:$0xff] %v759_v41  ;;  %v887_v41 = vld [vmem:[%s5190_s25 + $0x548] sm:$0xff] }
  0x3a   : > { %762 = vst [vmem:[%s5195_s26 + $0x150] sm:$0xff] %v761_v42  ;;  %v889_v42 = vld [vmem:[%s5190_s25 + $0x550] sm:$0xff] }
  0x3b   : > { %764 = vst [vmem:[%s5195_s26 + $0x158] sm:$0xff] %v763_v43  ;;  %v891_v43 = vld [vmem:[%s5190_s25 + $0x558] sm:$0xff] }
  0x3c   : > { %766 = vst [vmem:[%s5195_s26 + $0x160] sm:$0xff] %v765_v44  ;;  %v893_v44 = vld [vmem:[%s5190_s25 + $0x560] sm:$0xff] }
  0x3d   : > { %768 = vst [vmem:[%s5195_s26 + $0x168] sm:$0xff] %v767_v45  ;;  %v895_v45 = vld [vmem:[%s5190_s25 + $0x568] sm:$0xff] }
  0x3e   : > { %770 = vst [vmem:[%s5195_s26 + $0x170] sm:$0xff] %v769_v46  ;;  %v897_v46 = vld [vmem:[%s5190_s25 + $0x570] sm:$0xff] }
  0x3f   : > { %772 = vst [vmem:[%s5195_s26 + $0x178] sm:$0xff] %v771_v47  ;;  %v899_v47 = vld [vmem:[%s5190_s25 + $0x578] sm:$0xff] }
  0x40   : > { %774 = vst [vmem:[%s5195_s26 + $0x180] sm:$0xff] %v773_v48  ;;  %v901_v48 = vld [vmem:[%s5190_s25 + $0x580] sm:$0xff] }
  0x41   : > { %776 = vst [vmem:[%s5195_s26 + $0x188] sm:$0xff] %v775_v49  ;;  %v903_v49 = vld [vmem:[%s5190_s25 + $0x588] sm:$0xff] }
  0x42   : > { %778 = vst [vmem:[%s5195_s26 + $0x190] sm:$0xff] %v777_v50  ;;  %v905_v50 = vld [vmem:[%s5190_s25 + $0x590] sm:$0xff] }
  0x43   : > { %780 = vst [vmem:[%s5195_s26 + $0x198] sm:$0xff] %v779_v51  ;;  %v907_v51 = vld [vmem:[%s5190_s25 + $0x598] sm:$0xff] }
  0x44   : > { %782 = vst [vmem:[%s5195_s26 + $0x1a0] sm:$0xff] %v781_v52  ;;  %v909_v52 = vld [vmem:[%s5190_s25 + $0x5a0] sm:$0xff] }
  0x45   : > { %784 = vst [vmem:[%s5195_s26 + $0x1a8] sm:$0xff] %v783_v53  ;;  %v911_v53 = vld [vmem:[%s5190_s25 + $0x5a8] sm:$0xff] }
  0x46   : > { %786 = vst [vmem:[%s5195_s26 + $0x1b0] sm:$0xff] %v785_v54  ;;  %v913_v54 = vld [vmem:[%s5190_s25 + $0x5b0] sm:$0xff] }
  0x47   : > { %788 = vst [vmem:[%s5195_s26 + $0x1b8] sm:$0xff] %v787_v55  ;;  %v915_v55 = vld [vmem:[%s5190_s25 + $0x5b8] sm:$0xff] }
  0x48   : > { %790 = vst [vmem:[%s5195_s26 + $0x1c0] sm:$0xff] %v789_v56  ;;  %v917_v56 = vld [vmem:[%s5190_s25 + $0x5c0] sm:$0xff] }
  0x49   : > { %792 = vst [vmem:[%s5195_s26 + $0x1c8] sm:$0xff] %v791_v57  ;;  %v919_v57 = vld [vmem:[%s5190_s25 + $0x5c8] sm:$0xff] }
  0x4a   : > { %794 = vst [vmem:[%s5195_s26 + $0x1d0] sm:$0xff] %v793_v58  ;;  %v921_v58 = vld [vmem:[%s5190_s25 + $0x5d0] sm:$0xff] }
  0x4b   : > { %796 = vst [vmem:[%s5195_s26 + $0x1d8] sm:$0xff] %v795_v59  ;;  %v923_v59 = vld [vmem:[%s5190_s25 + $0x5d8] sm:$0xff] }
  0x4c   : > { %798 = vst [vmem:[%s5195_s26 + $0x1e0] sm:$0xff] %v797_v60  ;;  %v925_v60 = vld [vmem:[%s5190_s25 + $0x5e0] sm:$0xff] }
  0x4d   : > { %800 = vst [vmem:[%s5195_s26 + $0x1e8] sm:$0xff] %v799_v61  ;;  %v927_v61 = vld [vmem:[%s5190_s25 + $0x5e8] sm:$0xff] }
  0x4e   : > { %802 = vst [vmem:[%s5195_s26 + $0x1f0] sm:$0xff] %v801_v62  ;;  %v929_v62 = vld [vmem:[%s5190_s25 + $0x5f0] sm:$0xff] }
  0x4f   : > { %804 = vst [vmem:[%s5195_s26 + $0x1f8] sm:$0xff] %v803_v63  ;;  %v931_v63 = vld [vmem:[%s5190_s25 + $0x5f8] sm:$0xff] }
  0x50   : > { %806 = vst [vmem:[%s5195_s26 + $0x200] sm:$0xff] %v805_v0  ;;  %v933_v0 = vld [vmem:[%s5190_s25 + $0x800] sm:$0xff] }
  0x51   : > { %808 = vst [vmem:[%s5195_s26 + $0x208] sm:$0xff] %v807_v1  ;;  %v935_v1 = vld [vmem:[%s5190_s25 + $0x808] sm:$0xff] }
  0x52   : > { %810 = vst [vmem:[%s5195_s26 + $0x210] sm:$0xff] %v809_v2  ;;  %v937_v2 = vld [vmem:[%s5190_s25 + $0x810] sm:$0xff] }
  0x53   : > { %812 = vst [vmem:[%s5195_s26 + $0x218] sm:$0xff] %v811_v3  ;;  %v939_v3 = vld [vmem:[%s5190_s25 + $0x818] sm:$0xff] }
  0x54   : > { %814 = vst [vmem:[%s5195_s26 + $0x220] sm:$0xff] %v813_v4  ;;  %v941_v4 = vld [vmem:[%s5190_s25 + $0x820] sm:$0xff] }
  0x55   : > { %816 = vst [vmem:[%s5195_s26 + $0x228] sm:$0xff] %v815_v5  ;;  %v943_v5 = vld [vmem:[%s5190_s25 + $0x828] sm:$0xff] }
  0x56   : > { %818 = vst [vmem:[%s5195_s26 + $0x230] sm:$0xff] %v817_v6  ;;  %v945_v6 = vld [vmem:[%s5190_s25 + $0x830] sm:$0xff] }
  0x57   : > { %820 = vst [vmem:[%s5195_s26 + $0x238] sm:$0xff] %v819_v7  ;;  %v947_v7 = vld [vmem:[%s5190_s25 + $0x838] sm:$0xff] }
  0x58   : > { %822 = vst [vmem:[%s5195_s26 + $0x240] sm:$0xff] %v821_v8  ;;  %v949_v8 = vld [vmem:[%s5190_s25 + $0x840] sm:$0xff] }
  0x59   : > { %824 = vst [vmem:[%s5195_s26 + $0x248] sm:$0xff] %v823_v9  ;;  %v951_v9 = vld [vmem:[%s5190_s25 + $0x848] sm:$0xff] }
  0x5a   : > { %826 = vst [vmem:[%s5195_s26 + $0x250] sm:$0xff] %v825_v10  ;;  %v953_v10 = vld [vmem:[%s5190_s25 + $0x850] sm:$0xff] }
  0x5b   : > { %828 = vst [vmem:[%s5195_s26 + $0x258] sm:$0xff] %v827_v11  ;;  %v955_v11 = vld [vmem:[%s5190_s25 + $0x858] sm:$0xff] }
  0x5c   : > { %830 = vst [vmem:[%s5195_s26 + $0x260] sm:$0xff] %v829_v12  ;;  %v957_v12 = vld [vmem:[%s5190_s25 + $0x860] sm:$0xff] }
  0x5d   : > { %832 = vst [vmem:[%s5195_s26 + $0x268] sm:$0xff] %v831_v13  ;;  %v959_v13 = vld [vmem:[%s5190_s25 + $0x868] sm:$0xff] }
  0x5e   : > { %834 = vst [vmem:[%s5195_s26 + $0x270] sm:$0xff] %v833_v14  ;;  %v961_v14 = vld [vmem:[%s5190_s25 + $0x870] sm:$0xff] }
  0x5f   : > { %836 = vst [vmem:[%s5195_s26 + $0x278] sm:$0xff] %v835_v15  ;;  %v963_v15 = vld [vmem:[%s5190_s25 + $0x878] sm:$0xff] }
  0x60   : > { %838 = vst [vmem:[%s5195_s26 + $0x280] sm:$0xff] %v837_v16  ;;  %v965_v16 = vld [vmem:[%s5190_s25 + $0x880] sm:$0xff] }
  0x61   : > { %840 = vst [vmem:[%s5195_s26 + $0x288] sm:$0xff] %v839_v17  ;;  %v967_v17 = vld [vmem:[%s5190_s25 + $0x888] sm:$0xff] }
  0x62   : > { %842 = vst [vmem:[%s5195_s26 + $0x290] sm:$0xff] %v841_v18  ;;  %v969_v18 = vld [vmem:[%s5190_s25 + $0x890] sm:$0xff] }
  0x63   : > { %844 = vst [vmem:[%s5195_s26 + $0x298] sm:$0xff] %v843_v19  ;;  %v971_v19 = vld [vmem:[%s5190_s25 + $0x898] sm:$0xff] }
  0x64   : > { %846 = vst [vmem:[%s5195_s26 + $0x2a0] sm:$0xff] %v845_v20  ;;  %v973_v20 = vld [vmem:[%s5190_s25 + $0x8a0] sm:$0xff] }
  0x65   : > { %848 = vst [vmem:[%s5195_s26 + $0x2a8] sm:$0xff] %v847_v21  ;;  %v975_v21 = vld [vmem:[%s5190_s25 + $0x8a8] sm:$0xff] }
  0x66   : > { %850 = vst [vmem:[%s5195_s26 + $0x2b0] sm:$0xff] %v849_v22  ;;  %v977_v22 = vld [vmem:[%s5190_s25 + $0x8b0] sm:$0xff] }
  0x67   : > { %852 = vst [vmem:[%s5195_s26 + $0x2b8] sm:$0xff] %v851_v23  ;;  %v979_v23 = vld [vmem:[%s5190_s25 + $0x8b8] sm:$0xff] }
  0x68   : > { %854 = vst [vmem:[%s5195_s26 + $0x2c0] sm:$0xff] %v853_v24  ;;  %v981_v24 = vld [vmem:[%s5190_s25 + $0x8c0] sm:$0xff] }
  0x69   : > { %856 = vst [vmem:[%s5195_s26 + $0x2c8] sm:$0xff] %v855_v25  ;;  %v983_v25 = vld [vmem:[%s5190_s25 + $0x8c8] sm:$0xff] }
  0x6a   : > { %858 = vst [vmem:[%s5195_s26 + $0x2d0] sm:$0xff] %v857_v26  ;;  %v985_v26 = vld [vmem:[%s5190_s25 + $0x8d0] sm:$0xff] }
  0x6b   : > { %860 = vst [vmem:[%s5195_s26 + $0x2d8] sm:$0xff] %v859_v27  ;;  %v987_v27 = vld [vmem:[%s5190_s25 + $0x8d8] sm:$0xff] }
  0x6c   : > { %862 = vst [vmem:[%s5195_s26 + $0x2e0] sm:$0xff] %v861_v28  ;;  %v989_v28 = vld [vmem:[%s5190_s25 + $0x8e0] sm:$0xff] }
  0x6d   : > { %864 = vst [vmem:[%s5195_s26 + $0x2e8] sm:$0xff] %v863_v29  ;;  %v991_v29 = vld [vmem:[%s5190_s25 + $0x8e8] sm:$0xff] }
  0x6e   : > { %866 = vst [vmem:[%s5195_s26 + $0x2f0] sm:$0xff] %v865_v30  ;;  %v993_v30 = vld [vmem:[%s5190_s25 + $0x8f0] sm:$0xff] }
  0x6f   : > { %868 = vst [vmem:[%s5195_s26 + $0x2f8] sm:$0xff] %v867_v31  ;;  %v995_v31 = vld [vmem:[%s5190_s25 + $0x8f8] sm:$0xff] }
  0x70   : > { %870 = vst [vmem:[%s5195_s26 + $0x300] sm:$0xff] %v869_v32  ;;  %v997_v32 = vld [vmem:[%s5190_s25 + $0x900] sm:$0xff] }
  0x71   : > { %872 = vst [vmem:[%s5195_s26 + $0x308] sm:$0xff] %v871_v33  ;;  %v999_v33 = vld [vmem:[%s5190_s25 + $0x908] sm:$0xff] }
  0x72   : > { %874 = vst [vmem:[%s5195_s26 + $0x310] sm:$0xff] %v873_v34  ;;  %v1001_v34 = vld [vmem:[%s5190_s25 + $0x910] sm:$0xff] }
  0x73   : > { %876 = vst [vmem:[%s5195_s26 + $0x318] sm:$0xff] %v875_v35  ;;  %v1003_v35 = vld [vmem:[%s5190_s25 + $0x918] sm:$0xff] }
  0x74   : > { %878 = vst [vmem:[%s5195_s26 + $0x320] sm:$0xff] %v877_v36  ;;  %v1005_v36 = vld [vmem:[%s5190_s25 + $0x920] sm:$0xff] }
  0x75   : > { %880 = vst [vmem:[%s5195_s26 + $0x328] sm:$0xff] %v879_v37  ;;  %v1007_v37 = vld [vmem:[%s5190_s25 + $0x928] sm:$0xff] }
  0x76   : > { %882 = vst [vmem:[%s5195_s26 + $0x330] sm:$0xff] %v881_v38  ;;  %v1009_v38 = vld [vmem:[%s5190_s25 + $0x930] sm:$0xff] }
  0x77   : > { %884 = vst [vmem:[%s5195_s26 + $0x338] sm:$0xff] %v883_v39  ;;  %v1011_v39 = vld [vmem:[%s5190_s25 + $0x938] sm:$0xff] }
  0x78   : > { %886 = vst [vmem:[%s5195_s26 + $0x340] sm:$0xff] %v885_v40  ;;  %v1013_v40 = vld [vmem:[%s5190_s25 + $0x940] sm:$0xff] }
  0x79   : > { %888 = vst [vmem:[%s5195_s26 + $0x348] sm:$0xff] %v887_v41  ;;  %v1015_v41 = vld [vmem:[%s5190_s25 + $0x948] sm:$0xff] }
  0x7a   : > { %890 = vst [vmem:[%s5195_s26 + $0x350] sm:$0xff] %v889_v42  ;;  %v1017_v42 = vld [vmem:[%s5190_s25 + $0x950] sm:$0xff] }
  0x7b   : > { %892 = vst [vmem:[%s5195_s26 + $0x358] sm:$0xff] %v891_v43  ;;  %v1019_v43 = vld [vmem:[%s5190_s25 + $0x958] sm:$0xff] }
  0x7c   : > { %894 = vst [vmem:[%s5195_s26 + $0x360] sm:$0xff] %v893_v44  ;;  %v1021_v44 = vld [vmem:[%s5190_s25 + $0x960] sm:$0xff] }
  0x7d   : > { %896 = vst [vmem:[%s5195_s26 + $0x368] sm:$0xff] %v895_v45  ;;  %v1023_v45 = vld [vmem:[%s5190_s25 + $0x968] sm:$0xff] }
  0x7e   : > { %898 = vst [vmem:[%s5195_s26 + $0x370] sm:$0xff] %v897_v46  ;;  %v1025_v46 = vld [vmem:[%s5190_s25 + $0x970] sm:$0xff] }
  0x7f   : > { %900 = vst [vmem:[%s5195_s26 + $0x378] sm:$0xff] %v899_v47  ;;  %v1027_v47 = vld [vmem:[%s5190_s25 + $0x978] sm:$0xff] }
  0x80   : > { %902 = vst [vmem:[%s5195_s26 + $0x380] sm:$0xff] %v901_v48  ;;  %v1029_v48 = vld [vmem:[%s5190_s25 + $0x980] sm:$0xff] }
  0x81   : > { %904 = vst [vmem:[%s5195_s26 + $0x388] sm:$0xff] %v903_v49  ;;  %v1031_v49 = vld [vmem:[%s5190_s25 + $0x988] sm:$0xff] }
  0x82   : > { %906 = vst [vmem:[%s5195_s26 + $0x390] sm:$0xff] %v905_v50  ;;  %v1033_v50 = vld [vmem:[%s5190_s25 + $0x990] sm:$0xff] }
  0x83   : > { %908 = vst [vmem:[%s5195_s26 + $0x398] sm:$0xff] %v907_v51  ;;  %v1035_v51 = vld [vmem:[%s5190_s25 + $0x998] sm:$0xff] }
  0x84   : > { %910 = vst [vmem:[%s5195_s26 + $0x3a0] sm:$0xff] %v909_v52  ;;  %v1037_v52 = vld [vmem:[%s5190_s25 + $0x9a0] sm:$0xff] }
  0x85   : > { %912 = vst [vmem:[%s5195_s26 + $0x3a8] sm:$0xff] %v911_v53  ;;  %v1039_v53 = vld [vmem:[%s5190_s25 + $0x9a8] sm:$0xff] }
  0x86   : > { %914 = vst [vmem:[%s5195_s26 + $0x3b0] sm:$0xff] %v913_v54  ;;  %v1041_v54 = vld [vmem:[%s5190_s25 + $0x9b0] sm:$0xff] }
  0x87   : > { %916 = vst [vmem:[%s5195_s26 + $0x3b8] sm:$0xff] %v915_v55  ;;  %v1043_v55 = vld [vmem:[%s5190_s25 + $0x9b8] sm:$0xff] }
  0x88   : > { %918 = vst [vmem:[%s5195_s26 + $0x3c0] sm:$0xff] %v917_v56  ;;  %v1045_v56 = vld [vmem:[%s5190_s25 + $0x9c0] sm:$0xff] }
  0x89   : > { %920 = vst [vmem:[%s5195_s26 + $0x3c8] sm:$0xff] %v919_v57  ;;  %v1047_v57 = vld [vmem:[%s5190_s25 + $0x9c8] sm:$0xff] }
  0x8a   : > { %922 = vst [vmem:[%s5195_s26 + $0x3d0] sm:$0xff] %v921_v58  ;;  %v1049_v58 = vld [vmem:[%s5190_s25 + $0x9d0] sm:$0xff] }
  0x8b   : > { %924 = vst [vmem:[%s5195_s26 + $0x3d8] sm:$0xff] %v923_v59  ;;  %v1051_v59 = vld [vmem:[%s5190_s25 + $0x9d8] sm:$0xff] }
  0x8c   : > { %926 = vst [vmem:[%s5195_s26 + $0x3e0] sm:$0xff] %v925_v60  ;;  %v1053_v60 = vld [vmem:[%s5190_s25 + $0x9e0] sm:$0xff] }
  0x8d   : > { %928 = vst [vmem:[%s5195_s26 + $0x3e8] sm:$0xff] %v927_v61  ;;  %v1055_v61 = vld [vmem:[%s5190_s25 + $0x9e8] sm:$0xff] }
  0x8e   : > { %930 = vst [vmem:[%s5195_s26 + $0x3f0] sm:$0xff] %v929_v62  ;;  %v1057_v62 = vld [vmem:[%s5190_s25 + $0x9f0] sm:$0xff] }
  0x8f   : > { %932 = vst [vmem:[%s5195_s26 + $0x3f8] sm:$0xff] %v931_v63  ;;  %v1059_v63 = vld [vmem:[%s5190_s25 + $0x9f8] sm:$0xff] }
  0x90   : > { %934 = vst [vmem:[%s5195_s26 + $0x400] sm:$0xff] %v933_v0  ;;  %v1061_v0 = vld [vmem:[%s5190_s25 + $0xc00] sm:$0xff] }
  0x91   : > { %936 = vst [vmem:[%s5195_s26 + $0x408] sm:$0xff] %v935_v1  ;;  %v1063_v1 = vld [vmem:[%s5190_s25 + $0xc08] sm:$0xff] }
  0x92   : > { %938 = vst [vmem:[%s5195_s26 + $0x410] sm:$0xff] %v937_v2  ;;  %v1065_v2 = vld [vmem:[%s5190_s25 + $0xc10] sm:$0xff] }
  0x93   : > { %940 = vst [vmem:[%s5195_s26 + $0x418] sm:$0xff] %v939_v3  ;;  %v1067_v3 = vld [vmem:[%s5190_s25 + $0xc18] sm:$0xff] }
  0x94   : > { %942 = vst [vmem:[%s5195_s26 + $0x420] sm:$0xff] %v941_v4  ;;  %v1069_v4 = vld [vmem:[%s5190_s25 + $0xc20] sm:$0xff] }
  0x95   : > { %944 = vst [vmem:[%s5195_s26 + $0x428] sm:$0xff] %v943_v5  ;;  %v1071_v5 = vld [vmem:[%s5190_s25 + $0xc28] sm:$0xff] }
  0x96   : > { %946 = vst [vmem:[%s5195_s26 + $0x430] sm:$0xff] %v945_v6  ;;  %v1073_v6 = vld [vmem:[%s5190_s25 + $0xc30] sm:$0xff] }
  0x97   : > { %948 = vst [vmem:[%s5195_s26 + $0x438] sm:$0xff] %v947_v7  ;;  %v1075_v7 = vld [vmem:[%s5190_s25 + $0xc38] sm:$0xff] }
  0x98   : > { %950 = vst [vmem:[%s5195_s26 + $0x440] sm:$0xff] %v949_v8  ;;  %v1077_v8 = vld [vmem:[%s5190_s25 + $0xc40] sm:$0xff] }
  0x99   : > { %952 = vst [vmem:[%s5195_s26 + $0x448] sm:$0xff] %v951_v9  ;;  %v1079_v9 = vld [vmem:[%s5190_s25 + $0xc48] sm:$0xff] }
  0x9a   : > { %954 = vst [vmem:[%s5195_s26 + $0x450] sm:$0xff] %v953_v10  ;;  %v1081_v10 = vld [vmem:[%s5190_s25 + $0xc50] sm:$0xff] }
  0x9b   : > { %956 = vst [vmem:[%s5195_s26 + $0x458] sm:$0xff] %v955_v11  ;;  %v1083_v11 = vld [vmem:[%s5190_s25 + $0xc58] sm:$0xff] }
  0x9c   : > { %958 = vst [vmem:[%s5195_s26 + $0x460] sm:$0xff] %v957_v12  ;;  %v1085_v12 = vld [vmem:[%s5190_s25 + $0xc60] sm:$0xff] }
  0x9d   : > { %960 = vst [vmem:[%s5195_s26 + $0x468] sm:$0xff] %v959_v13  ;;  %v1087_v13 = vld [vmem:[%s5190_s25 + $0xc68] sm:$0xff] }
  0x9e   : > { %962 = vst [vmem:[%s5195_s26 + $0x470] sm:$0xff] %v961_v14  ;;  %v1089_v14 = vld [vmem:[%s5190_s25 + $0xc70] sm:$0xff] }
  0x9f   : > { %964 = vst [vmem:[%s5195_s26 + $0x478] sm:$0xff] %v963_v15  ;;  %v1091_v15 = vld [vmem:[%s5190_s25 + $0xc78] sm:$0xff] }
  0xa0   : > { %966 = vst [vmem:[%s5195_s26 + $0x480] sm:$0xff] %v965_v16  ;;  %v1093_v16 = vld [vmem:[%s5190_s25 + $0xc80] sm:$0xff] }
  0xa1   : > { %968 = vst [vmem:[%s5195_s26 + $0x488] sm:$0xff] %v967_v17  ;;  %v1095_v17 = vld [vmem:[%s5190_s25 + $0xc88] sm:$0xff] }
  0xa2   : > { %970 = vst [vmem:[%s5195_s26 + $0x490] sm:$0xff] %v969_v18  ;;  %v1097_v18 = vld [vmem:[%s5190_s25 + $0xc90] sm:$0xff] }
  0xa3   : > { %972 = vst [vmem:[%s5195_s26 + $0x498] sm:$0xff] %v971_v19  ;;  %v1099_v19 = vld [vmem:[%s5190_s25 + $0xc98] sm:$0xff] }
  0xa4   : > { %974 = vst [vmem:[%s5195_s26 + $0x4a0] sm:$0xff] %v973_v20  ;;  %v1101_v20 = vld [vmem:[%s5190_s25 + $0xca0] sm:$0xff] }
  0xa5   : > { %976 = vst [vmem:[%s5195_s26 + $0x4a8] sm:$0xff] %v975_v21  ;;  %v1103_v21 = vld [vmem:[%s5190_s25 + $0xca8] sm:$0xff] }
  0xa6   : > { %978 = vst [vmem:[%s5195_s26 + $0x4b0] sm:$0xff] %v977_v22  ;;  %v1105_v22 = vld [vmem:[%s5190_s25 + $0xcb0] sm:$0xff] }
  0xa7   : > { %980 = vst [vmem:[%s5195_s26 + $0x4b8] sm:$0xff] %v979_v23  ;;  %v1107_v23 = vld [vmem:[%s5190_s25 + $0xcb8] sm:$0xff] }
  0xa8   : > { %982 = vst [vmem:[%s5195_s26 + $0x4c0] sm:$0xff] %v981_v24  ;;  %v1109_v24 = vld [vmem:[%s5190_s25 + $0xcc0] sm:$0xff] }
  0xa9   : > { %984 = vst [vmem:[%s5195_s26 + $0x4c8] sm:$0xff] %v983_v25  ;;  %v1111_v25 = vld [vmem:[%s5190_s25 + $0xcc8] sm:$0xff] }
  0xaa   : > { %986 = vst [vmem:[%s5195_s26 + $0x4d0] sm:$0xff] %v985_v26  ;;  %v1113_v26 = vld [vmem:[%s5190_s25 + $0xcd0] sm:$0xff] }
  0xab   : > { %988 = vst [vmem:[%s5195_s26 + $0x4d8] sm:$0xff] %v987_v27  ;;  %v1115_v27 = vld [vmem:[%s5190_s25 + $0xcd8] sm:$0xff] }
  0xac   : > { %990 = vst [vmem:[%s5195_s26 + $0x4e0] sm:$0xff] %v989_v28  ;;  %v1117_v28 = vld [vmem:[%s5190_s25 + $0xce0] sm:$0xff] }
  0xad   : > { %992 = vst [vmem:[%s5195_s26 + $0x4e8] sm:$0xff] %v991_v29  ;;  %v1119_v29 = vld [vmem:[%s5190_s25 + $0xce8] sm:$0xff] }
  0xae   : > { %994 = vst [vmem:[%s5195_s26 + $0x4f0] sm:$0xff] %v993_v30  ;;  %v1121_v30 = vld [vmem:[%s5190_s25 + $0xcf0] sm:$0xff] }
  0xaf   : > { %996 = vst [vmem:[%s5195_s26 + $0x4f8] sm:$0xff] %v995_v31  ;;  %v1123_v31 = vld [vmem:[%s5190_s25 + $0xcf8] sm:$0xff] }
  0xb0   : > { %998 = vst [vmem:[%s5195_s26 + $0x500] sm:$0xff] %v997_v32  ;;  %v1125_v32 = vld [vmem:[%s5190_s25 + $0xd00] sm:$0xff] }
  0xb1   : > { %1000 = vst [vmem:[%s5195_s26 + $0x508] sm:$0xff] %v999_v33  ;;  %v1127_v33 = vld [vmem:[%s5190_s25 + $0xd08] sm:$0xff] }
  0xb2   : > { %1002 = vst [vmem:[%s5195_s26 + $0x510] sm:$0xff] %v1001_v34  ;;  %v1129_v34 = vld [vmem:[%s5190_s25 + $0xd10] sm:$0xff] }
  0xb3   : > { %1004 = vst [vmem:[%s5195_s26 + $0x518] sm:$0xff] %v1003_v35  ;;  %v1131_v35 = vld [vmem:[%s5190_s25 + $0xd18] sm:$0xff] }
  0xb4   : > { %1006 = vst [vmem:[%s5195_s26 + $0x520] sm:$0xff] %v1005_v36  ;;  %v1133_v36 = vld [vmem:[%s5190_s25 + $0xd20] sm:$0xff] }
  0xb5   : > { %1008 = vst [vmem:[%s5195_s26 + $0x528] sm:$0xff] %v1007_v37  ;;  %v1135_v37 = vld [vmem:[%s5190_s25 + $0xd28] sm:$0xff] }
  0xb6   : > { %1010 = vst [vmem:[%s5195_s26 + $0x530] sm:$0xff] %v1009_v38  ;;  %v1137_v38 = vld [vmem:[%s5190_s25 + $0xd30] sm:$0xff] }
  0xb7   : > { %1012 = vst [vmem:[%s5195_s26 + $0x538] sm:$0xff] %v1011_v39  ;;  %v1139_v39 = vld [vmem:[%s5190_s25 + $0xd38] sm:$0xff] }
  0xb8   : > { %1014 = vst [vmem:[%s5195_s26 + $0x540] sm:$0xff] %v1013_v40  ;;  %v1141_v40 = vld [vmem:[%s5190_s25 + $0xd40] sm:$0xff] }
  0xb9   : > { %1016 = vst [vmem:[%s5195_s26 + $0x548] sm:$0xff] %v1015_v41  ;;  %v1143_v41 = vld [vmem:[%s5190_s25 + $0xd48] sm:$0xff] }
  0xba   : > { %1018 = vst [vmem:[%s5195_s26 + $0x550] sm:$0xff] %v1017_v42  ;;  %v1145_v42 = vld [vmem:[%s5190_s25 + $0xd50] sm:$0xff] }
  0xbb   : > { %1020 = vst [vmem:[%s5195_s26 + $0x558] sm:$0xff] %v1019_v43  ;;  %v1147_v43 = vld [vmem:[%s5190_s25 + $0xd58] sm:$0xff] }
  0xbc   : > { %1022 = vst [vmem:[%s5195_s26 + $0x560] sm:$0xff] %v1021_v44  ;;  %v1149_v44 = vld [vmem:[%s5190_s25 + $0xd60] sm:$0xff] }
  0xbd   : > { %1024 = vst [vmem:[%s5195_s26 + $0x568] sm:$0xff] %v1023_v45  ;;  %v1151_v45 = vld [vmem:[%s5190_s25 + $0xd68] sm:$0xff] }
  0xbe   : > { %1026 = vst [vmem:[%s5195_s26 + $0x570] sm:$0xff] %v1025_v46  ;;  %v1153_v46 = vld [vmem:[%s5190_s25 + $0xd70] sm:$0xff] }
  0xbf   : > { %1028 = vst [vmem:[%s5195_s26 + $0x578] sm:$0xff] %v1027_v47  ;;  %v1155_v47 = vld [vmem:[%s5190_s25 + $0xd78] sm:$0xff] }
  0xc0   : > { %1030 = vst [vmem:[%s5195_s26 + $0x580] sm:$0xff] %v1029_v48  ;;  %v1157_v48 = vld [vmem:[%s5190_s25 + $0xd80] sm:$0xff] }
  0xc1   : > { %1032 = vst [vmem:[%s5195_s26 + $0x588] sm:$0xff] %v1031_v49  ;;  %v1159_v49 = vld [vmem:[%s5190_s25 + $0xd88] sm:$0xff] }
  0xc2   : > { %1034 = vst [vmem:[%s5195_s26 + $0x590] sm:$0xff] %v1033_v50  ;;  %v1161_v50 = vld [vmem:[%s5190_s25 + $0xd90] sm:$0xff] }
  0xc3   : > { %1036 = vst [vmem:[%s5195_s26 + $0x598] sm:$0xff] %v1035_v51  ;;  %v1163_v51 = vld [vmem:[%s5190_s25 + $0xd98] sm:$0xff] }
  0xc4   : > { %1038 = vst [vmem:[%s5195_s26 + $0x5a0] sm:$0xff] %v1037_v52  ;;  %v1165_v52 = vld [vmem:[%s5190_s25 + $0xda0] sm:$0xff] }
  0xc5   : > { %1040 = vst [vmem:[%s5195_s26 + $0x5a8] sm:$0xff] %v1039_v53  ;;  %v1167_v53 = vld [vmem:[%s5190_s25 + $0xda8] sm:$0xff] }
  0xc6   : > { %1042 = vst [vmem:[%s5195_s26 + $0x5b0] sm:$0xff] %v1041_v54  ;;  %v1169_v54 = vld [vmem:[%s5190_s25 + $0xdb0] sm:$0xff] }
  0xc7   : > { %1044 = vst [vmem:[%s5195_s26 + $0x5b8] sm:$0xff] %v1043_v55  ;;  %v1171_v55 = vld [vmem:[%s5190_s25 + $0xdb8] sm:$0xff] }
  0xc8   : > { %1046 = vst [vmem:[%s5195_s26 + $0x5c0] sm:$0xff] %v1045_v56  ;;  %v1173_v56 = vld [vmem:[%s5190_s25 + $0xdc0] sm:$0xff] }
  0xc9   : > { %1048 = vst [vmem:[%s5195_s26 + $0x5c8] sm:$0xff] %v1047_v57  ;;  %v1175_v57 = vld [vmem:[%s5190_s25 + $0xdc8] sm:$0xff] }
  0xca   : > { %1050 = vst [vmem:[%s5195_s26 + $0x5d0] sm:$0xff] %v1049_v58  ;;  %v1177_v58 = vld [vmem:[%s5190_s25 + $0xdd0] sm:$0xff] }
  0xcb   : > { %1052 = vst [vmem:[%s5195_s26 + $0x5d8] sm:$0xff] %v1051_v59  ;;  %v1179_v59 = vld [vmem:[%s5190_s25 + $0xdd8] sm:$0xff] }
  0xcc   : > { %1054 = vst [vmem:[%s5195_s26 + $0x5e0] sm:$0xff] %v1053_v60  ;;  %v1181_v60 = vld [vmem:[%s5190_s25 + $0xde0] sm:$0xff] }
  0xcd   : > { %1056 = vst [vmem:[%s5195_s26 + $0x5e8] sm:$0xff] %v1055_v61  ;;  %v1183_v61 = vld [vmem:[%s5190_s25 + $0xde8] sm:$0xff] }
  0xce   : > { %1058 = vst [vmem:[%s5195_s26 + $0x5f0] sm:$0xff] %v1057_v62  ;;  %v1185_v62 = vld [vmem:[%s5190_s25 + $0xdf0] sm:$0xff] }
  0xcf   : > { %1060 = vst [vmem:[%s5195_s26 + $0x5f8] sm:$0xff] %v1059_v63  ;;  %v1187_v63 = vld [vmem:[%s5190_s25 + $0xdf8] sm:$0xff] }
  0xd0   : > { %1062 = vst [vmem:[%s5195_s26 + $0x600] sm:$0xff] %v1061_v0 }
  0xd1   : > { %1064 = vst [vmem:[%s5195_s26 + $0x608] sm:$0xff] %v1063_v1 }
  0xd2   : > { %1066 = vst [vmem:[%s5195_s26 + $0x610] sm:$0xff] %v1065_v2 }
  0xd3   : > { %1068 = vst [vmem:[%s5195_s26 + $0x618] sm:$0xff] %v1067_v3 }
  0xd4   : > { %1070 = vst [vmem:[%s5195_s26 + $0x620] sm:$0xff] %v1069_v4 }
  0xd5   : > { %1072 = vst [vmem:[%s5195_s26 + $0x628] sm:$0xff] %v1071_v5 }
  0xd6   : > { %1074 = vst [vmem:[%s5195_s26 + $0x630] sm:$0xff] %v1073_v6 }
  0xd7   : > { %1076 = vst [vmem:[%s5195_s26 + $0x638] sm:$0xff] %v1075_v7 }
  0xd8   : > { %1078 = vst [vmem:[%s5195_s26 + $0x640] sm:$0xff] %v1077_v8 }
  0xd9   : > { %1080 = vst [vmem:[%s5195_s26 + $0x648] sm:$0xff] %v1079_v9 }
  0xda   : > { %1082 = vst [vmem:[%s5195_s26 + $0x650] sm:$0xff] %v1081_v10 }
  0xdb   : > { %1084 = vst [vmem:[%s5195_s26 + $0x658] sm:$0xff] %v1083_v11 }
  0xdc   : > { %1086 = vst [vmem:[%s5195_s26 + $0x660] sm:$0xff] %v1085_v12 }
  0xdd   : > { %1088 = vst [vmem:[%s5195_s26 + $0x668] sm:$0xff] %v1087_v13 }
  0xde   : > { %1090 = vst [vmem:[%s5195_s26 + $0x670] sm:$0xff] %v1089_v14 }
  0xdf   : > { %1092 = vst [vmem:[%s5195_s26 + $0x678] sm:$0xff] %v1091_v15 }
  0xe0   : > { %1094 = vst [vmem:[%s5195_s26 + $0x680] sm:$0xff] %v1093_v16 }
  0xe1   : > { %1096 = vst [vmem:[%s5195_s26 + $0x688] sm:$0xff] %v1095_v17 }
  0xe2   : > { %1098 = vst [vmem:[%s5195_s26 + $0x690] sm:$0xff] %v1097_v18 }
  0xe3   : > { %1100 = vst [vmem:[%s5195_s26 + $0x698] sm:$0xff] %v1099_v19 }
  0xe4   : > { %1102 = vst [vmem:[%s5195_s26 + $0x6a0] sm:$0xff] %v1101_v20 }
  0xe5   : > { %1104 = vst [vmem:[%s5195_s26 + $0x6a8] sm:$0xff] %v1103_v21 }
  0xe6   : > { %1106 = vst [vmem:[%s5195_s26 + $0x6b0] sm:$0xff] %v1105_v22 }
  0xe7   : > { %1108 = vst [vmem:[%s5195_s26 + $0x6b8] sm:$0xff] %v1107_v23 }
  0xe8   : > { %1110 = vst [vmem:[%s5195_s26 + $0x6c0] sm:$0xff] %v1109_v24 }
  0xe9   : > { %1112 = vst [vmem:[%s5195_s26 + $0x6c8] sm:$0xff] %v1111_v25 }
  0xea   : > { %1114 = vst [vmem:[%s5195_s26 + $0x6d0] sm:$0xff] %v1113_v26 }
  0xeb   : > { %1116 = vst [vmem:[%s5195_s26 + $0x6d8] sm:$0xff] %v1115_v27 }
  0xec   : > { %1118 = vst [vmem:[%s5195_s26 + $0x6e0] sm:$0xff] %v1117_v28 }
  0xed   : > { %1120 = vst [vmem:[%s5195_s26 + $0x6e8] sm:$0xff] %v1119_v29 }
  0xee   : > { %1122 = vst [vmem:[%s5195_s26 + $0x6f0] sm:$0xff] %v1121_v30 }
  0xef   : > { %1124 = vst [vmem:[%s5195_s26 + $0x6f8] sm:$0xff] %v1123_v31 }
  0xf0   : > { %1126 = vst [vmem:[%s5195_s26 + $0x700] sm:$0xff] %v1125_v32 }
  0xf1   : > { %1128 = vst [vmem:[%s5195_s26 + $0x708] sm:$0xff] %v1127_v33 }
  0xf2   : > { %1130 = vst [vmem:[%s5195_s26 + $0x710] sm:$0xff] %v1129_v34 }
  0xf3   : > { %1132 = vst [vmem:[%s5195_s26 + $0x718] sm:$0xff] %v1131_v35 }
  0xf4   : > { %1134 = vst [vmem:[%s5195_s26 + $0x720] sm:$0xff] %v1133_v36 }
  0xf5   : > { %1136 = vst [vmem:[%s5195_s26 + $0x728] sm:$0xff] %v1135_v37 }
  0xf6   : > { %1138 = vst [vmem:[%s5195_s26 + $0x730] sm:$0xff] %v1137_v38 }
  0xf7   : > { %1140 = vst [vmem:[%s5195_s26 + $0x738] sm:$0xff] %v1139_v39 }
  0xf8   : > { %1142 = vst [vmem:[%s5195_s26 + $0x740] sm:$0xff] %v1141_v40 }
  0xf9   : > { %1144 = vst [vmem:[%s5195_s26 + $0x748] sm:$0xff] %v1143_v41 }
  0xfa   : > { %1146 = vst [vmem:[%s5195_s26 + $0x750] sm:$0xff] %v1145_v42 }
  0xfb   : > { %1148 = vst [vmem:[%s5195_s26 + $0x758] sm:$0xff] %v1147_v43 }
  0xfc   : > { %1150 = vst [vmem:[%s5195_s26 + $0x760] sm:$0xff] %v1149_v44 }
  0xfd   : > { %1152 = vst [vmem:[%s5195_s26 + $0x768] sm:$0xff] %v1151_v45 }
  0xfe   : > { %1154 = vst [vmem:[%s5195_s26 + $0x770] sm:$0xff] %v1153_v46 }
  0xff   : > { %1156 = vst [vmem:[%s5195_s26 + $0x778] sm:$0xff] %v1155_v47 }
 0x100   : > { %1158 = vst [vmem:[%s5195_s26 + $0x780] sm:$0xff] %v1157_v48 }
 0x101   : > { %1160 = vst [vmem:[%s5195_s26 + $0x788] sm:$0xff] %v1159_v49 }
 0x102   : > { %1162 = vst [vmem:[%s5195_s26 + $0x790] sm:$0xff] %v1161_v50 }
 0x103   : > { %1164 = vst [vmem:[%s5195_s26 + $0x798] sm:$0xff] %v1163_v51 }
 0x104   : > { %1166 = vst [vmem:[%s5195_s26 + $0x7a0] sm:$0xff] %v1165_v52 }
 0x105   : > { %1168 = vst [vmem:[%s5195_s26 + $0x7a8] sm:$0xff] %v1167_v53 }
 0x106   : > { %1170 = vst [vmem:[%s5195_s26 + $0x7b0] sm:$0xff] %v1169_v54 }
 0x107   : > { %1172 = vst [vmem:[%s5195_s26 + $0x7b8] sm:$0xff] %v1171_v55 }
 0x108   : > { %1174 = vst [vmem:[%s5195_s26 + $0x7c0] sm:$0xff] %v1173_v56 }
 0x109   : > { %1176 = vst [vmem:[%s5195_s26 + $0x7c8] sm:$0xff] %v1175_v57 }
 0x10a   : > { %1178 = vst [vmem:[%s5195_s26 + $0x7d0] sm:$0xff] %v1177_v58 }
 0x10b   : > { %1180 = vst [vmem:[%s5195_s26 + $0x7d8] sm:$0xff] %v1179_v59 }
 0x10c   : > { %1182 = vst [vmem:[%s5195_s26 + $0x7e0] sm:$0xff] %v1181_v60 }
 0x10d   : > { %1184 = vst [vmem:[%s5195_s26 + $0x7e8] sm:$0xff] %v1183_v61 }
 0x10e   : > { %1186 = vst [vmem:[%s5195_s26 + $0x7f0] sm:$0xff] %v1185_v62 }
 0x10f   : > { %1188 = vst [vmem:[%s5195_s26 + $0x7f8] sm:$0xff] %v1187_v63 }
 0x110 PF: > { %p4627_p5 = scmp.ge.s32.totalorder %s5134_s14, 1  ;;  %p2252_p6 = scmp.lt.s32.totalorder %s5134_s14, 3 }
 0x112   : > { %p2253_p7 = pnand %p4627_p5, %p2252_p6 }
 0x113   : > { %s2259_s4 = sand.u32 (!%p2253_p7), 1, %s5126_s12   ;;  %s4629_s11 = sshll.u32 (!%p2253_p7), %s4620_s15, 6 }
 0x114   : > { %2256 = sbr.rel (%p2253_p7) target bundleno = 934 (0x3a6), region = 80  ;;  %s4628_s5 = sshll.u32 (!%p2253_p7), %s2259_s4, 11 }
 0x115   : > { %s5721_s10 = scalar_lea.vmem (!%p2253_p7), [#allocation2], %s4628_s5  ;;  %p2284_p8 = scmp.lt.s32.totalorder (!%p2253_p7), %s4629_s11, 127 }
 0x119   : > { %v2292_v0 = vld [vmem:[%s6391_s1 + $0x18] sm:$0x7]  ;;  %vm2550_vm0 = vcmask 1042432   ;;  %v2291_v1 = vld [vmem:[%s6391_s1 + $0x10] sm:$0xff]  ;;  %v2290_v2 = vld [vmem:[%s6391_s1 + $0x8] sm:$0xff]  ;;  %vm2357_vm1 = vcmask 220160  }
 0x11a   : > { %4889 = vmatpush.msk.msra.mxu2 %vm2550_vm0, %v2292_v0  ;;  %5018 = vmatpush.msk.msra.mxu3 %vm2550_vm0, %v2292_v0  ;;  %v2289_v3 = vld [vmem:[%s6391_s1] sm:$0xff]  ;;  %v4826_v8 = vld [vmem:[%s5721_s10 + $0x408] sm:$0xff]  ;;  %v4827_v12 = vld [vmem:[%s5721_s10 + $0x410] sm:$0xff]  ;;  %s6398_s11 = smov (!%p2284_p8, %s4629_s11), 127 }
 0x11b   : > { %4631 = vmatpush.msk.msra.mxu0 %vm2550_vm0, %v2292_v0  ;;  %4760 = vmatpush.msk.msra.mxu1 %vm2550_vm0, %v2292_v0  ;;  %v4825_v4 = vld [vmem:[%s5721_s10 + $0x400] sm:$0xff]  ;;  %v4955_v9 = vld [vmem:[%s5721_s10 + $0x608] sm:$0xff]  ;;  %v4956_v13 = vld [vmem:[%s5721_s10 + $0x610] sm:$0xff]  ;;  %s4630_s15 = sshll.u32 %s6398_s11, 3 }
 0x11c   : > { %3563 = vmatpush.msra.mxu2 %v2291_v1  ;;  %4093 = vmatpush.msra.mxu3 %v2291_v1  ;;  %v4954_v5 = vld [vmem:[%s5721_s10 + $0x600] sm:$0xff]  ;;  %v2294_v10 = vld [vmem:[%s5721_s10 + $0x8] sm:$0xff]  ;;  %v2295_v14 = vld [vmem:[%s5721_s10 + $0x10] sm:$0xff]  ;;  %s5876_s20 = scalar_lea.vmem %s6393_s3, %s4630_s15 }
 0x11d   : > { %2567 = vmatpush.msra.mxu0 %v2291_v1  ;;  %3033 = vmatpush.msra.mxu1 %v2291_v1  ;;  %v2293_v6 = vld [vmem:[%s5721_s10] sm:$0xff]  ;;  %v4697_v11 = vld [vmem:[%s5721_s10 + $0x208] sm:$0xff]  ;;  %v4698_v15 = vld [vmem:[%s5721_s10 + $0x210] sm:$0xff] }
 0x11e   : > { %3564 = vmatpush.msra.mxu2 %v2290_v2  ;;  %4094 = vmatpush.msra.mxu3 %v2290_v2  ;;  %v4696_v7 = vld [vmem:[%s5721_s10 + $0x200] sm:$0xff]  ;;  %v4828_v16 = vld [vmem:[%s5721_s10 + $0x418] sm:$0xff]  ;;  %v4830_v24 = vld [vmem:[%s5721_s10 + $0x428] sm:$0xff] }
 0x11f   : > { %2568 = vmatpush.msra.mxu0 %v2290_v2  ;;  %3034 = vmatpush.msra.mxu1 %v2290_v2  ;;  %v4957_v17 = vld [vmem:[%s5721_s10 + $0x618] sm:$0xff]  ;;  %v4829_v20 = vld [vmem:[%s5721_s10 + $0x420] sm:$0xff]  ;;  %v4959_v25 = vld [vmem:[%s5721_s10 + $0x628] sm:$0xff] }
 0x120   : > { %3565 = vmatpush.msra.mxu2 %v2289_v3  ;;  %4095 = vmatpush.msra.mxu3 %v2289_v3  ;;  %v2296_v18 = vld [vmem:[%s5721_s10 + $0x18] sm:$0xff]  ;;  %v4958_v21 = vld [vmem:[%s5721_s10 + $0x620] sm:$0xff]  ;;  %v2298_v26 = vld [vmem:[%s5721_s10 + $0x28] sm:$0xff] }
 0x121   : > { %4890 = vmatmul.msk.f32.vlgmr.msra.gmra.mxu2 %vm2357_vm1, %v4825_v4  ;;  %5019 = vmatmul.msk.f32.vlgmr.msra.gmra.mxu3 %vm2357_vm1, %v4954_v5  ;;  %v4699_v19 = vld [vmem:[%s5721_s10 + $0x218] sm:$0xff]  ;;  %v2297_v22 = vld [vmem:[%s5721_s10 + $0x20] sm:$0xff]  ;;  %v4701_v27 = vld [vmem:[%s5721_s10 + $0x228] sm:$0xff] }
 0x122   : > { %2569 = vmatpush.msra.mxu0 %v2289_v3  ;;  %3035 = vmatpush.msra.mxu1 %v2289_v3  ;;  %v4700_v23 = vld [vmem:[%s5721_s10 + $0x220] sm:$0xff]  ;;  %v4831_v28 = vld [vmem:[%s5721_s10 + $0x430] sm:$0xff]  ;;  %v4832_v32 = vld [vmem:[%s5721_s10 + $0x438] sm:$0xff] }
 0x123   : > { %4632 = vmatmul.msk.f32.vlgmr.msra.gmra.mxu0 %vm2357_vm1, %v2293_v6  ;;  %4761 = vmatmul.msk.f32.vlgmr.msra.gmra.mxu1 %vm2357_vm1, %v4696_v7  ;;  %v4960_v29 = vld [vmem:[%s5721_s10 + $0x630] sm:$0xff]  ;;  %v4961_v33 = vld [vmem:[%s5721_s10 + $0x638] sm:$0xff]  ;;  %v4833_v36 = vld [vmem:[%s5721_s10 + $0x440] sm:$0xff] }
 0x124   : > { %v2299_v30 = vld [vmem:[%s5721_s10 + $0x30] sm:$0xff]  ;;  %v2300_v34 = vld [vmem:[%s5721_s10 + $0x38] sm:$0xff]  ;;  %v4962_v37 = vld [vmem:[%s5721_s10 + $0x640] sm:$0xff] }
 0x125   : > { %v4702_v31 = vld [vmem:[%s5721_s10 + $0x230] sm:$0xff]  ;;  %v4703_v35 = vld [vmem:[%s5721_s10 + $0x238] sm:$0xff]  ;;  %v2301_v38 = vld [vmem:[%s5721_s10 + $0x40] sm:$0xff] }
 0x126   : > { %v4704_v39 = vld [vmem:[%s5721_s10 + $0x240] sm:$0xff]  ;;  %v4834_v40 = vld [vmem:[%s5721_s10 + $0x448] sm:$0xff]  ;;  %v4835_v44 = vld [vmem:[%s5721_s10 + $0x450] sm:$0xff] }
 0x127   : > { %v4963_v41 = vld [vmem:[%s5721_s10 + $0x648] sm:$0xff]  ;;  %v4964_v45 = vld [vmem:[%s5721_s10 + $0x650] sm:$0xff]  ;;  %v4836_v48 = vld [vmem:[%s5721_s10 + $0x458] sm:$0xff] }
 0x128   : > { %v2302_v42 = vld [vmem:[%s5721_s10 + $0x48] sm:$0xff]  ;;  %v2303_v46 = vld [vmem:[%s5721_s10 + $0x50] sm:$0xff]  ;;  %v4965_v49 = vld [vmem:[%s5721_s10 + $0x658] sm:$0xff] }
 0x129   : > { %4891 = vmatmul.msk.f32.gmra.mxu2 %vm2357_vm1, %v4826_v8  ;;  %5020 = vmatmul.msk.f32.gmra.mxu3 %vm2357_vm1, %v4955_v9  ;;  %v4705_v43 = vld [vmem:[%s5721_s10 + $0x248] sm:$0xff]  ;;  %v4706_v47 = vld [vmem:[%s5721_s10 + $0x250] sm:$0xff]  ;;  %v2304_v50 = vld [vmem:[%s5721_s10 + $0x58] sm:$0xff] }
 0x12a   : > { %v4707_v51 = vld [vmem:[%s5721_s10 + $0x258] sm:$0xff]  ;;  %v4837_v52 = vld [vmem:[%s5721_s10 + $0x460] sm:$0xff]  ;;  %v4838_v56 = vld [vmem:[%s5721_s10 + $0x468] sm:$0xff] }
 0x12b   : > { %4633 = vmatmul.msk.f32.gmra.mxu0 %vm2357_vm1, %v2294_v10  ;;  %4762 = vmatmul.msk.f32.gmra.mxu1 %vm2357_vm1, %v4697_v11  ;;  %v4966_v53 = vld [vmem:[%s5721_s10 + $0x660] sm:$0xff]  ;;  %v4967_v57 = vld [vmem:[%s5721_s10 + $0x668] sm:$0xff]  ;;  %v4839_v60 = vld [vmem:[%s5721_s10 + $0x470] sm:$0xff] }
 0x12c   : > { %v2305_v54 = vld [vmem:[%s5721_s10 + $0x60] sm:$0xff]  ;;  %v2306_v58 = vld [vmem:[%s5721_s10 + $0x68] sm:$0xff]  ;;  %v4968_v61 = vld [vmem:[%s5721_s10 + $0x670] sm:$0xff] }
 0x12d   : > { %v4708_v55 = vld [vmem:[%s5721_s10 + $0x260] sm:$0xff]  ;;  %v4709_v59 = vld [vmem:[%s5721_s10 + $0x268] sm:$0xff]  ;;  %v2307_v62 = vld [vmem:[%s5721_s10 + $0x70] sm:$0xff] }
 0x12e   : > { %v4710_v63 = vld [vmem:[%s5721_s10 + $0x270] sm:$0xff]  ;;  %v4840_v0 = vld [vmem:[%s5721_s10 + $0x478] sm:$0xff]  ;;  %v4841_v4 = vld [vmem:[%s5721_s10 + $0x480] sm:$0xff] }
 0x12f   : > { %v4969_v1 = vld [vmem:[%s5721_s10 + $0x678] sm:$0xff]  ;;  %v4970_v5 = vld [vmem:[%s5721_s10 + $0x680] sm:$0xff] }
 0x130   : > { %v2308_v2 = vld [vmem:[%s5721_s10 + $0x78] sm:$0xff]  ;;  %v2309_v8 = vld [vmem:[%s5721_s10 + $0x80] sm:$0xff] }
 0x131   : > { %4892 = vmatmul.msk.f32.gmra.mxu2 %vm2357_vm1, %v4827_v12  ;;  %5021 = vmatmul.msk.f32.gmra.mxu3 %vm2357_vm1, %v4956_v13  ;;  %v4711_v3 = vld [vmem:[%s5721_s10 + $0x278] sm:$0xff]  ;;  %v4712_v9 = vld [vmem:[%s5721_s10 + $0x280] sm:$0xff] }
 0x133   : > { %4634 = vmatmul.msk.f32.gmra.mxu0 %vm2357_vm1, %v2295_v14  ;;  %4763 = vmatmul.msk.f32.gmra.mxu1 %vm2357_vm1, %v4698_v15  ;;  %v5864_v14 = vld [vmem:[%s6392_s2] ss:$0 sm:$0xff]  ;;  %v4842_v15 = vld [vmem:[%s5721_s10 + $0x488] sm:$0xff] }
 0x139   : > { %4893 = vmatmul.msk.f32.gmra.mxu2 %vm2357_vm1, %v4828_v16  ;;  %5022 = vmatmul.msk.f32.gmra.mxu3 %vm2357_vm1, %v4957_v17  ;;  %v4971_v16 = vld [vmem:[%s5721_s10 + $0x688] sm:$0xff] }
 0x13b   : > { %4635 = vmatmul.msk.f32.gmra.mxu0 %vm2357_vm1, %v2296_v18  ;;  %4764 = vmatmul.msk.f32.gmra.mxu1 %vm2357_vm1, %v4699_v19 }
 0x141   : > { %4894 = vmatmul.msk.f32.gmra.mxu2 %vm2357_vm1, %v4829_v20  ;;  %5023 = vmatmul.msk.f32.gmra.mxu3 %vm2357_vm1, %v4958_v21  ;;  %v2310_v20 = vld [vmem:[%s5721_s10 + $0x88] sm:$0xff] }
 0x142   : > { %v4713_v21 = vld [vmem:[%s5721_s10 + $0x288] sm:$0xff] }
 0x143   : > { %4636 = vmatmul.msk.f32.gmra.mxu0 %vm2357_vm1, %v2297_v22  ;;  %4765 = vmatmul.msk.f32.gmra.mxu1 %vm2357_vm1, %v4700_v23 }
 0x149   : > { %4895 = vmatmul.msk.f32.gmra.mxu2 %vm2357_vm1, %v4830_v24  ;;  %5024 = vmatmul.msk.f32.gmra.mxu3 %vm2357_vm1, %v4959_v25 }
 0x14b   : > { %4637 = vmatmul.msk.f32.gmra.mxu0 %vm2357_vm1, %v2298_v26  ;;  %4766 = vmatmul.msk.f32.gmra.mxu1 %vm2357_vm1, %v4701_v27 }
 0x151   : > { %4896 = vmatmul.msk.f32.gmra.mxu2 %vm2357_vm1, %v4831_v28  ;;  %5025 = vmatmul.msk.f32.gmra.mxu3 %vm2357_vm1, %v4960_v29  ;;  %v4843_v28 = vld [vmem:[%s5721_s10 + $0x490] sm:$0xff] }
 0x152   : > { %v4972_v29 = vld [vmem:[%s5721_s10 + $0x690] sm:$0xff] }
 0x153   : > { %4638 = vmatmul.msk.f32.gmra.mxu0 %vm2357_vm1, %v2299_v30  ;;  %4767 = vmatmul.msk.f32.gmra.mxu1 %vm2357_vm1, %v4702_v31 }
 0x159   : > { %4897 = vmatmul.msk.f32.gmra.mxu2 %vm2357_vm1, %v4832_v32  ;;  %5026 = vmatmul.msk.f32.gmra.mxu3 %vm2357_vm1, %v4961_v33  ;;  %v2311_v33 = vld [vmem:[%s5721_s10 + $0x90] sm:$0xff] }
 0x15b   : > { %4639 = vmatmul.msk.f32.gmra.mxu0 %vm2357_vm1, %v2300_v34  ;;  %4768 = vmatmul.msk.f32.gmra.mxu1 %vm2357_vm1, %v4703_v35  ;;  %v4714_v34 = vld [vmem:[%s5721_s10 + $0x290] sm:$0xff] }
 0x161   : > { %4898 = vmatmul.msk.f32.gmra.mxu2 %vm2357_vm1, %v4833_v36  ;;  %5027 = vmatmul.msk.f32.gmra.mxu3 %vm2357_vm1, %v4962_v37 }
 0x163   : > { %4640 = vmatmul.msk.f32.gmra.mxu0 %vm2357_vm1, %v2301_v38  ;;  %4769 = vmatmul.msk.f32.gmra.mxu1 %vm2357_vm1, %v4704_v39 }
 0x169   : > { %4899 = vmatmul.msk.f32.gmra.mxu2 %vm2357_vm1, %v4834_v40  ;;  %5028 = vmatmul.msk.f32.gmra.mxu3 %vm2357_vm1, %v4963_v41  ;;  %v4844_v41 = vld [vmem:[%s5721_s10 + $0x498] sm:$0xff] }
 0x16b   : > { %4641 = vmatmul.msk.f32.gmra.mxu0 %vm2357_vm1, %v2302_v42  ;;  %4770 = vmatmul.msk.f32.gmra.mxu1 %vm2357_vm1, %v4705_v43  ;;  %v4973_v42 = vld [vmem:[%s5721_s10 + $0x698] sm:$0xff] }
 0x171   : > { %4900 = vmatmul.msk.f32.gmra.mxu2 %vm2357_vm1, %v4835_v44  ;;  %5029 = vmatmul.msk.f32.gmra.mxu3 %vm2357_vm1, %v4964_v45 }
 0x173   : > { %4642 = vmatmul.msk.f32.gmra.mxu0 %vm2357_vm1, %v2303_v46  ;;  %4771 = vmatmul.msk.f32.gmra.mxu1 %vm2357_vm1, %v4706_v47  ;;  %v2312_v46 = vld [vmem:[%s5721_s10 + $0x98] sm:$0xff] }
 0x174   : > { %v4715_v47 = vld [vmem:[%s5721_s10 + $0x298] sm:$0xff] }
 0x179   : > { %4901 = vmatmul.msk.f32.gmra.mxu2 %vm2357_vm1, %v4836_v48  ;;  %5030 = vmatmul.msk.f32.gmra.mxu3 %vm2357_vm1, %v4965_v49 }
 0x17b   : > { %4643 = vmatmul.msk.f32.gmra.mxu0 %vm2357_vm1, %v2304_v50  ;;  %4772 = vmatmul.msk.f32.gmra.mxu1 %vm2357_vm1, %v4707_v51 }
 0x181   : > { %4902 = vmatmul.msk.f32.gmra.mxu2 %vm2357_vm1, %v4837_v52  ;;  %5031 = vmatmul.msk.f32.gmra.mxu3 %vm2357_vm1, %v4966_v53 }
 0x183   : > { %4644 = vmatmul.msk.f32.gmra.mxu0 %vm2357_vm1, %v2305_v54  ;;  %4773 = vmatmul.msk.f32.gmra.mxu1 %vm2357_vm1, %v4708_v55  ;;  %v4845_v54 = vld [vmem:[%s5721_s10 + $0x4a0] sm:$0xff] }
 0x184   : > { %v4974_v55 = vld [vmem:[%s5721_s10 + $0x6a0] sm:$0xff] }
 0x189   : > { %4903 = vmatmul.msk.f32.gmra.mxu2 %vm2357_vm1, %v4838_v56  ;;  %5032 = vmatmul.msk.f32.gmra.mxu3 %vm2357_vm1, %v4967_v57 }
 0x18b   : > { %4645 = vmatmul.msk.f32.gmra.mxu0 %vm2357_vm1, %v2306_v58  ;;  %4774 = vmatmul.msk.f32.gmra.mxu1 %vm2357_vm1, %v4709_v59  ;;  %v2313_v59 = vld [vmem:[%s5721_s10 + $0xa0] sm:$0xff] }
 0x191   : > { %4904 = vmatmul.msk.f32.gmra.mxu2 %vm2357_vm1, %v4839_v60  ;;  %5033 = vmatmul.msk.f32.gmra.mxu3 %vm2357_vm1, %v4968_v61  ;;  %v4716_v60 = vld [vmem:[%s5721_s10 + $0x2a0] sm:$0xff] }
 0x193   : > { %4646 = vmatmul.msk.f32.gmra.mxu0 %vm2357_vm1, %v2307_v62  ;;  %4775 = vmatmul.msk.f32.gmra.mxu1 %vm2357_vm1, %v4710_v63 }
 0x199   : > { %4905 = vmatmul.msk.f32.gmra.mxu2 %vm2357_vm1, %v4840_v0  ;;  %5034 = vmatmul.msk.f32.gmra.mxu3 %vm2357_vm1, %v4969_v1 }
 0x19b   : > { %4647 = vmatmul.msk.f32.gmra.mxu0 %vm2357_vm1, %v2308_v2  ;;  %4776 = vmatmul.msk.f32.gmra.mxu1 %vm2357_vm1, %v4711_v3  ;;  %v4846_v3 = vld [vmem:[%s5721_s10 + $0x4a8] sm:$0xff] }
 0x1a0   : > { %v2571_v6 = vpop.f32.mrf.mxu0  ;;  %v3037_v7 = vpop.f32.mrf.mxu1 }
 0x1a1   : > { %4906 = vmatmul.msk.f32.gmra.mxu2 %vm2357_vm1, %v4841_v4  ;;  %v3229_v10 = vmax.f32 %v2571_v6, %v3037_v7  ;;  %5035 = vmatmul.msk.f32.gmra.mxu3 %vm2357_vm1, %v4970_v5  ;;  %v4975_v4 = vld [vmem:[%s5721_s10 + $0x6a8] sm:$0xff] }
 0x1a3   : > { %4648 = vmatmul.msk.f32.gmra.mxu0 %vm2357_vm1, %v2309_v8  ;;  %4777 = vmatmul.msk.f32.gmra.mxu1 %vm2357_vm1, %v4712_v9  ;;  %v2314_v8 = vld [vmem:[%s5721_s10 + $0xa8] sm:$0xff] }
 0x1a4   : > { %v3567_v11 = vpop.f32.mrf.mxu2  ;;  %v4097_v12 = vpop.f32.mrf.mxu3  ;;  %v4717_v9 = vld [vmem:[%s5721_s10 + $0x2a8] sm:$0xff] }
 0x1a5   : > { %v3759_v13 = vmax.f32 %v3229_v10, %v3567_v11 }
 0x1a7   : > { %v4289_v17 = vmax.f32 %v3759_v13, %v4097_v12 }
 0x1a8   : > { %v2574_v18 = vpop.f32.mrf.mxu0  ;;  %v3040_v19 = vpop.f32.mrf.mxu1 }
 0x1a9   : > { %v4357_v22 = vadd.f32 %v5864_v14, %v4289_v17  ;;  %4907 = vmatmul.msk.f32.gmra.mxu2 %vm2357_vm1, %v4842_v15  ;;  %v3230_v23 = vmax.f32 %v2574_v18, %v3040_v19  ;;  %5036 = vmatmul.msk.f32.gmra.mxu3 %vm2357_vm1, %v4971_v16  ;;  %v4847_v17 = vld [vmem:[%s5721_s10 + $0x4b0] sm:$0xff] }
 0x1aa   : > { %v4976_v18 = vld [vmem:[%s5721_s10 + $0x6b0] sm:$0xff] }
 0x1ab   : > { %v4421_v24 = vmax.f32 %v4357_v22, 0.0  ;;  %4649 = vmatmul.msk.f32.gmra.mxu0 %vm2357_vm1, %v2310_v20  ;;  %4778 = vmatmul.msk.f32.gmra.mxu1 %vm2357_vm1, %v4713_v21  ;;  %v2315_v22 = vld [vmem:[%s5721_s10 + $0xb0] sm:$0xff] }
 0x1ac   : > { %v3570_v25 = vpop.f32.mrf.mxu2  ;;  %v4100_v26 = vpop.f32.mrf.mxu3 }
 0x1ad   : > { %4485 = vst [vmem:[%s5876_s20] sm:$0xff] %v4421_v24  ;;  %v3760_v27 = vmax.f32 %v3230_v23, %v3570_v25  ;;  %v4718_v23 = vld [vmem:[%s5721_s10 + $0x2b0] sm:$0xff] }
 0x1af   : > { %v4290_v30 = vmax.f32 %v3760_v27, %v4100_v26 }
 0x1b0   : > { %v2577_v31 = vpop.f32.mrf.mxu0  ;;  %v3043_v32 = vpop.f32.mrf.mxu1 }
 0x1b1   : > { %v4358_v35 = vadd.f32 %v5864_v14, %v4290_v30  ;;  %4908 = vmatmul.msk.f32.gmra.mxu2 %vm2357_vm1, %v4843_v28  ;;  %v3231_v36 = vmax.f32 %v2577_v31, %v3043_v32  ;;  %5037 = vmatmul.msk.f32.gmra.mxu3 %vm2357_vm1, %v4972_v29  ;;  %v4848_v30 = vld [vmem:[%s5721_s10 + $0x4b8] sm:$0xff] }
 0x1b2   : > { %v4977_v31 = vld [vmem:[%s5721_s10 + $0x6b8] sm:$0xff] }
 0x1b3   : > { %v4422_v37 = vmax.f32 %v4358_v35, 0.0  ;;  %4650 = vmatmul.msk.f32.gmra.mxu0 %vm2357_vm1, %v2311_v33  ;;  %4779 = vmatmul.msk.f32.gmra.mxu1 %vm2357_vm1, %v4714_v34  ;;  %v2316_v35 = vld [vmem:[%s5721_s10 + $0xb8] sm:$0xff] }
 0x1b4   : > { %v3573_v38 = vpop.f32.mrf.mxu2  ;;  %v4103_v39 = vpop.f32.mrf.mxu3 }
 0x1b5   : > { %4486 = vst [vmem:[%s5876_s20 + $0x8] sm:$0xff] %v4422_v37  ;;  %v3761_v40 = vmax.f32 %v3231_v36, %v3573_v38  ;;  %v4719_v36 = vld [vmem:[%s5721_s10 + $0x2b8] sm:$0xff] }
 0x1b7   : > { %v4291_v43 = vmax.f32 %v3761_v40, %v4103_v39 }
 0x1b8   : > { %v2580_v44 = vpop.f32.mrf.mxu0  ;;  %v3046_v45 = vpop.f32.mrf.mxu1 }
 0x1b9   : > { %v4359_v48 = vadd.f32 %v5864_v14, %v4291_v43  ;;  %4909 = vmatmul.msk.f32.gmra.mxu2 %vm2357_vm1, %v4844_v41  ;;  %v3232_v49 = vmax.f32 %v2580_v44, %v3046_v45  ;;  %5038 = vmatmul.msk.f32.gmra.mxu3 %vm2357_vm1, %v4973_v42  ;;  %v4849_v43 = vld [vmem:[%s5721_s10 + $0x4c0] sm:$0xff] }
 0x1ba   : > { %v4978_v44 = vld [vmem:[%s5721_s10 + $0x6c0] sm:$0xff] }
 0x1bb   : > { %v4423_v50 = vmax.f32 %v4359_v48, 0.0  ;;  %4651 = vmatmul.msk.f32.gmra.mxu0 %vm2357_vm1, %v2312_v46  ;;  %4780 = vmatmul.msk.f32.gmra.mxu1 %vm2357_vm1, %v4715_v47  ;;  %v2317_v48 = vld [vmem:[%s5721_s10 + $0xc0] sm:$0xff] }
 0x1bc   : > { %v3576_v51 = vpop.f32.mrf.mxu2  ;;  %v4106_v52 = vpop.f32.mrf.mxu3 }
 0x1bd   : > { %4487 = vst [vmem:[%s5876_s20 + $0x10] sm:$0xff] %v4423_v50  ;;  %v3762_v53 = vmax.f32 %v3232_v49, %v3576_v51  ;;  %v4720_v49 = vld [vmem:[%s5721_s10 + $0x2c0] sm:$0xff] }
 0x1bf   : > { %v4292_v56 = vmax.f32 %v3762_v53, %v4106_v52 }
 0x1c0   : > { %v2583_v57 = vpop.f32.mrf.mxu0  ;;  %v3049_v58 = vpop.f32.mrf.mxu1 }
 0x1c1   : > { %v4360_v61 = vadd.f32 %v5864_v14, %v4292_v56  ;;  %4910 = vmatmul.msk.f32.gmra.mxu2 %vm2357_vm1, %v4845_v54  ;;  %v3233_v62 = vmax.f32 %v2583_v57, %v3049_v58  ;;  %5039 = vmatmul.msk.f32.gmra.mxu3 %vm2357_vm1, %v4974_v55  ;;  %v4850_v56 = vld [vmem:[%s5721_s10 + $0x4c8] sm:$0xff] }
 0x1c2   : > { %v4979_v57 = vld [vmem:[%s5721_s10 + $0x6c8] sm:$0xff] }
 0x1c3   : > { %v4424_v63 = vmax.f32 %v4360_v61, 0.0  ;;  %4652 = vmatmul.msk.f32.gmra.mxu0 %vm2357_vm1, %v2313_v59  ;;  %4781 = vmatmul.msk.f32.gmra.mxu1 %vm2357_vm1, %v4716_v60  ;;  %v2318_v61 = vld [vmem:[%s5721_s10 + $0xc8] sm:$0xff] }
 0x1c4   : > { %v3579_v0 = vpop.f32.mrf.mxu2  ;;  %v4109_v1 = vpop.f32.mrf.mxu3 }
 0x1c5   : > { %4488 = vst [vmem:[%s5876_s20 + $0x18] sm:$0xff] %v4424_v63  ;;  %v3763_v2 = vmax.f32 %v3233_v62, %v3579_v0  ;;  %v4721_v62 = vld [vmem:[%s5721_s10 + $0x2c8] sm:$0xff] }
 0x1c7   : > { %v4293_v5 = vmax.f32 %v3763_v2, %v4109_v1 }
 0x1c8   : > { %v2586_v6 = vpop.f32.mrf.mxu0  ;;  %v3052_v7 = vpop.f32.mrf.mxu1 }
 0x1c9   : > { %v4361_v10 = vadd.f32 %v5864_v14, %v4293_v5  ;;  %4911 = vmatmul.msk.f32.gmra.mxu2 %vm2357_vm1, %v4846_v3  ;;  %v3234_v11 = vmax.f32 %v2586_v6, %v3052_v7  ;;  %5040 = vmatmul.msk.f32.gmra.mxu3 %vm2357_vm1, %v4975_v4  ;;  %v4851_v5 = vld [vmem:[%s5721_s10 + $0x4d0] sm:$0xff] }
 0x1ca   : > { %v4980_v6 = vld [vmem:[%s5721_s10 + $0x6d0] sm:$0xff] }
 0x1cb   : > { %v4425_v12 = vmax.f32 %v4361_v10, 0.0  ;;  %4653 = vmatmul.msk.f32.gmra.mxu0 %vm2357_vm1, %v2314_v8  ;;  %4782 = vmatmul.msk.f32.gmra.mxu1 %vm2357_vm1, %v4717_v9  ;;  %v2319_v10 = vld [vmem:[%s5721_s10 + $0xd0] sm:$0xff] }
 0x1cc   : > { %v3582_v13 = vpop.f32.mrf.mxu2  ;;  %v4112_v15 = vpop.f32.mrf.mxu3 }
 0x1cd   : > { %4489 = vst [vmem:[%s5876_s20 + $0x20] sm:$0xff] %v4425_v12  ;;  %v3764_v16 = vmax.f32 %v3234_v11, %v3582_v13  ;;  %v4722_v11 = vld [vmem:[%s5721_s10 + $0x2d0] sm:$0xff] }
 0x1cf   : > { %v4294_v19 = vmax.f32 %v3764_v16, %v4112_v15 }
 0x1d0   : > { %v2589_v20 = vpop.f32.mrf.mxu0  ;;  %v3055_v21 = vpop.f32.mrf.mxu1 }
 0x1d1   : > { %v4362_v24 = vadd.f32 %v5864_v14, %v4294_v19  ;;  %4912 = vmatmul.msk.f32.gmra.mxu2 %vm2357_vm1, %v4847_v17  ;;  %v3235_v25 = vmax.f32 %v2589_v20, %v3055_v21  ;;  %5041 = vmatmul.msk.f32.gmra.mxu3 %vm2357_vm1, %v4976_v18  ;;  %v4852_v19 = vld [vmem:[%s5721_s10 + $0x4d8] sm:$0xff] }
 0x1d2   : > { %v4981_v20 = vld [vmem:[%s5721_s10 + $0x6d8] sm:$0xff] }
 0x1d3   : > { %v4426_v26 = vmax.f32 %v4362_v24, 0.0  ;;  %4654 = vmatmul.msk.f32.gmra.mxu0 %vm2357_vm1, %v2315_v22  ;;  %4783 = vmatmul.msk.f32.gmra.mxu1 %vm2357_vm1, %v4718_v23  ;;  %v2320_v24 = vld [vmem:[%s5721_s10 + $0xd8] sm:$0xff] }
 0x1d4   : > { %v3585_v27 = vpop.f32.mrf.mxu2  ;;  %v4115_v28 = vpop.f32.mrf.mxu3 }
 0x1d5   : > { %4490 = vst [vmem:[%s5876_s20 + $0x28] sm:$0xff] %v4426_v26  ;;  %v3765_v29 = vmax.f32 %v3235_v25, %v3585_v27  ;;  %v4723_v25 = vld [vmem:[%s5721_s10 + $0x2d8] sm:$0xff] }
 0x1d7   : > { %v4295_v32 = vmax.f32 %v3765_v29, %v4115_v28 }
 0x1d8   : > { %v2592_v33 = vpop.f32.mrf.mxu0  ;;  %v3058_v34 = vpop.f32.mrf.mxu1 }
 0x1d9   : > { %v4363_v37 = vadd.f32 %v5864_v14, %v4295_v32  ;;  %4913 = vmatmul.msk.f32.gmra.mxu2 %vm2357_vm1, %v4848_v30  ;;  %v3236_v38 = vmax.f32 %v2592_v33, %v3058_v34  ;;  %5042 = vmatmul.msk.f32.gmra.mxu3 %vm2357_vm1, %v4977_v31  ;;  %v4853_v32 = vld [vmem:[%s5721_s10 + $0x4e0] sm:$0xff] }
 0x1da   : > { %v4982_v33 = vld [vmem:[%s5721_s10 + $0x6e0] sm:$0xff] }
 0x1db   : > { %v4427_v39 = vmax.f32 %v4363_v37, 0.0  ;;  %4655 = vmatmul.msk.f32.gmra.mxu0 %vm2357_vm1, %v2316_v35  ;;  %4784 = vmatmul.msk.f32.gmra.mxu1 %vm2357_vm1, %v4719_v36  ;;  %v2321_v37 = vld [vmem:[%s5721_s10 + $0xe0] sm:$0xff] }
 0x1dc   : > { %v3588_v40 = vpop.f32.mrf.mxu2  ;;  %v4118_v41 = vpop.f32.mrf.mxu3 }
 0x1dd   : > { %4491 = vst [vmem:[%s5876_s20 + $0x30] sm:$0xff] %v4427_v39  ;;  %v3766_v42 = vmax.f32 %v3236_v38, %v3588_v40  ;;  %v4724_v38 = vld [vmem:[%s5721_s10 + $0x2e0] sm:$0xff] }
 0x1df   : > { %v4296_v45 = vmax.f32 %v3766_v42, %v4118_v41 }
 0x1e0   : > { %v2595_v46 = vpop.f32.mrf.mxu0  ;;  %v3061_v47 = vpop.f32.mrf.mxu1 }
 0x1e1   : > { %v4364_v50 = vadd.f32 %v5864_v14, %v4296_v45  ;;  %4914 = vmatmul.msk.f32.gmra.mxu2 %vm2357_vm1, %v4849_v43  ;;  %v3237_v51 = vmax.f32 %v2595_v46, %v3061_v47  ;;  %5043 = vmatmul.msk.f32.gmra.mxu3 %vm2357_vm1, %v4978_v44  ;;  %v4854_v45 = vld [vmem:[%s5721_s10 + $0x4e8] sm:$0xff] }
 0x1e2   : > { %v4983_v46 = vld [vmem:[%s5721_s10 + $0x6e8] sm:$0xff] }
 0x1e3   : > { %v4428_v52 = vmax.f32 %v4364_v50, 0.0  ;;  %4656 = vmatmul.msk.f32.gmra.mxu0 %vm2357_vm1, %v2317_v48  ;;  %4785 = vmatmul.msk.f32.gmra.mxu1 %vm2357_vm1, %v4720_v49  ;;  %v2322_v50 = vld [vmem:[%s5721_s10 + $0xe8] sm:$0xff] }
 0x1e4   : > { %v3591_v53 = vpop.f32.mrf.mxu2  ;;  %v4121_v54 = vpop.f32.mrf.mxu3 }
 0x1e5   : > { %4492 = vst [vmem:[%s5876_s20 + $0x38] sm:$0xff] %v4428_v52  ;;  %v3767_v55 = vmax.f32 %v3237_v51, %v3591_v53  ;;  %v4725_v51 = vld [vmem:[%s5721_s10 + $0x2e8] sm:$0xff] }
 0x1e7   : > { %v4297_v58 = vmax.f32 %v3767_v55, %v4121_v54 }
 0x1e8   : > { %v2598_v59 = vpop.f32.mrf.mxu0  ;;  %v3064_v60 = vpop.f32.mrf.mxu1 }
 0x1e9   : > { %v4365_v63 = vadd.f32 %v5864_v14, %v4297_v58  ;;  %4915 = vmatmul.msk.f32.gmra.mxu2 %vm2357_vm1, %v4850_v56  ;;  %v3238_v0 = vmax.f32 %v2598_v59, %v3064_v60  ;;  %5044 = vmatmul.msk.f32.gmra.mxu3 %vm2357_vm1, %v4979_v57  ;;  %v4855_v58 = vld [vmem:[%s5721_s10 + $0x4f0] sm:$0xff] }
 0x1ea   : > { %v4984_v59 = vld [vmem:[%s5721_s10 + $0x6f0] sm:$0xff] }
 0x1eb   : > { %v4429_v1 = vmax.f32 %v4365_v63, 0.0  ;;  %4657 = vmatmul.msk.f32.gmra.mxu0 %vm2357_vm1, %v2318_v61  ;;  %4786 = vmatmul.msk.f32.gmra.mxu1 %vm2357_vm1, %v4721_v62  ;;  %v2323_v63 = vld [vmem:[%s5721_s10 + $0xf0] sm:$0xff] }
 0x1ec   : > { %v3594_v2 = vpop.f32.mrf.mxu2  ;;  %v4124_v3 = vpop.f32.mrf.mxu3 }
 0x1ed   : > { %4493 = vst [vmem:[%s5876_s20 + $0x40] sm:$0xff] %v4429_v1  ;;  %v3768_v4 = vmax.f32 %v3238_v0, %v3594_v2  ;;  %v4726_v0 = vld [vmem:[%s5721_s10 + $0x2f0] sm:$0xff] }
 0x1ef   : > { %v4298_v7 = vmax.f32 %v3768_v4, %v4124_v3 }
 0x1f0   : > { %v2601_v8 = vpop.f32.mrf.mxu0  ;;  %v3067_v9 = vpop.f32.mrf.mxu1 }
 0x1f1   : > { %v4366_v12 = vadd.f32 %v5864_v14, %v4298_v7  ;;  %4916 = vmatmul.msk.f32.gmra.mxu2 %vm2357_vm1, %v4851_v5  ;;  %v3239_v13 = vmax.f32 %v2601_v8, %v3067_v9  ;;  %5045 = vmatmul.msk.f32.gmra.mxu3 %vm2357_vm1, %v4980_v6  ;;  %v4856_v7 = vld [vmem:[%s5721_s10 + $0x4f8] sm:$0xff] }
 0x1f2   : > { %v4985_v8 = vld [vmem:[%s5721_s10 + $0x6f8] sm:$0xff] }
 0x1f3   : > { %v4430_v15 = vmax.f32 %v4366_v12, 0.0  ;;  %4658 = vmatmul.msk.f32.gmra.mxu0 %vm2357_vm1, %v2319_v10  ;;  %4787 = vmatmul.msk.f32.gmra.mxu1 %vm2357_vm1, %v4722_v11  ;;  %v2324_v12 = vld [vmem:[%s5721_s10 + $0xf8] sm:$0xff] }
 0x1f4   : > { %v3597_v16 = vpop.f32.mrf.mxu2  ;;  %v4127_v17 = vpop.f32.mrf.mxu3 }
 0x1f5   : > { %4494 = vst [vmem:[%s5876_s20 + $0x48] sm:$0xff] %v4430_v15  ;;  %v3769_v18 = vmax.f32 %v3239_v13, %v3597_v16  ;;  %v4727_v13 = vld [vmem:[%s5721_s10 + $0x2f8] sm:$0xff] }
 0x1f7   : > { %v4299_v21 = vmax.f32 %v3769_v18, %v4127_v17 }
 0x1f8   : > { %v2604_v22 = vpop.f32.mrf.mxu0  ;;  %v3070_v23 = vpop.f32.mrf.mxu1 }
 0x1f9   : > { %v4367_v26 = vadd.f32 %v5864_v14, %v4299_v21  ;;  %4917 = vmatmul.msk.f32.gmra.mxu2 %vm2357_vm1, %v4852_v19  ;;  %v3240_v27 = vmax.f32 %v2604_v22, %v3070_v23  ;;  %5046 = vmatmul.msk.f32.gmra.mxu3 %vm2357_vm1, %v4981_v20  ;;  %v4857_v21 = vld [vmem:[%s5721_s10 + $0x500] sm:$0xff] }
 0x1fa   : > { %v4986_v22 = vld [vmem:[%s5721_s10 + $0x700] sm:$0xff] }
 0x1fb   : > { %v4431_v28 = vmax.f32 %v4367_v26, 0.0  ;;  %4659 = vmatmul.msk.f32.gmra.mxu0 %vm2357_vm1, %v2320_v24  ;;  %4788 = vmatmul.msk.f32.gmra.mxu1 %vm2357_vm1, %v4723_v25  ;;  %v2325_v26 = vld [vmem:[%s5721_s10 + $0x100] sm:$0xff] }
 0x1fc   : > { %v3600_v29 = vpop.f32.mrf.mxu2  ;;  %v4130_v30 = vpop.f32.mrf.mxu3 }
 0x1fd   : > { %4495 = vst [vmem:[%s5876_s20 + $0x50] sm:$0xff] %v4431_v28  ;;  %v3770_v31 = vmax.f32 %v3240_v27, %v3600_v29  ;;  %v4728_v27 = vld [vmem:[%s5721_s10 + $0x300] sm:$0xff] }
 0x1ff   : > { %v4300_v34 = vmax.f32 %v3770_v31, %v4130_v30 }
 0x200   : > { %v2607_v35 = vpop.f32.mrf.mxu0  ;;  %v3073_v36 = vpop.f32.mrf.mxu1 }
 0x201   : > { %v4368_v39 = vadd.f32 %v5864_v14, %v4300_v34  ;;  %4918 = vmatmul.msk.f32.gmra.mxu2 %vm2357_vm1, %v4853_v32  ;;  %v3241_v40 = vmax.f32 %v2607_v35, %v3073_v36  ;;  %5047 = vmatmul.msk.f32.gmra.mxu3 %vm2357_vm1, %v4982_v33  ;;  %v4858_v34 = vld [vmem:[%s5721_s10 + $0x508] sm:$0xff] }
 0x202   : > { %v4987_v35 = vld [vmem:[%s5721_s10 + $0x708] sm:$0xff] }
 0x203   : > { %v4432_v41 = vmax.f32 %v4368_v39, 0.0  ;;  %4660 = vmatmul.msk.f32.gmra.mxu0 %vm2357_vm1, %v2321_v37  ;;  %4789 = vmatmul.msk.f32.gmra.mxu1 %vm2357_vm1, %v4724_v38  ;;  %v2326_v39 = vld [vmem:[%s5721_s10 + $0x108] sm:$0xff] }
 0x204   : > { %v3603_v42 = vpop.f32.mrf.mxu2  ;;  %v4133_v43 = vpop.f32.mrf.mxu3 }
 0x205   : > { %4496 = vst [vmem:[%s5876_s20 + $0x58] sm:$0xff] %v4432_v41  ;;  %v3771_v44 = vmax.f32 %v3241_v40, %v3603_v42  ;;  %v4729_v40 = vld [vmem:[%s5721_s10 + $0x308] sm:$0xff] }
 0x207   : > { %v4301_v47 = vmax.f32 %v3771_v44, %v4133_v43 }
 0x208   : > { %v2610_v48 = vpop.f32.mrf.mxu0  ;;  %v3076_v49 = vpop.f32.mrf.mxu1 }
 0x209   : > { %v4369_v52 = vadd.f32 %v5864_v14, %v4301_v47  ;;  %4919 = vmatmul.msk.f32.gmra.mxu2 %vm2357_vm1, %v4854_v45  ;;  %v3242_v53 = vmax.f32 %v2610_v48, %v3076_v49  ;;  %5048 = vmatmul.msk.f32.gmra.mxu3 %vm2357_vm1, %v4983_v46  ;;  %v4859_v47 = vld [vmem:[%s5721_s10 + $0x510] sm:$0xff] }
 0x20a   : > { %v4988_v48 = vld [vmem:[%s5721_s10 + $0x710] sm:$0xff] }
 0x20b   : > { %v4433_v54 = vmax.f32 %v4369_v52, 0.0  ;;  %4661 = vmatmul.msk.f32.gmra.mxu0 %vm2357_vm1, %v2322_v50  ;;  %4790 = vmatmul.msk.f32.gmra.mxu1 %vm2357_vm1, %v4725_v51  ;;  %v2327_v52 = vld [vmem:[%s5721_s10 + $0x110] sm:$0xff] }
 0x20c   : > { %v3606_v55 = vpop.f32.mrf.mxu2  ;;  %v4136_v56 = vpop.f32.mrf.mxu3 }
 0x20d   : > { %4497 = vst [vmem:[%s5876_s20 + $0x60] sm:$0xff] %v4433_v54  ;;  %v3772_v57 = vmax.f32 %v3242_v53, %v3606_v55  ;;  %v4730_v53 = vld [vmem:[%s5721_s10 + $0x310] sm:$0xff] }
 0x20f   : > { %v4302_v60 = vmax.f32 %v3772_v57, %v4136_v56 }
 0x210   : > { %v2613_v61 = vpop.f32.mrf.mxu0  ;;  %v3079_v62 = vpop.f32.mrf.mxu1 }
 0x211   : > { %v4370_v1 = vadd.f32 %v5864_v14, %v4302_v60  ;;  %4920 = vmatmul.msk.f32.gmra.mxu2 %vm2357_vm1, %v4855_v58  ;;  %v3243_v2 = vmax.f32 %v2613_v61, %v3079_v62  ;;  %5049 = vmatmul.msk.f32.gmra.mxu3 %vm2357_vm1, %v4984_v59  ;;  %v4860_v60 = vld [vmem:[%s5721_s10 + $0x518] sm:$0xff] }
 0x212   : > { %v4989_v61 = vld [vmem:[%s5721_s10 + $0x718] sm:$0xff] }
 0x213   : > { %v4434_v3 = vmax.f32 %v4370_v1, 0.0  ;;  %4662 = vmatmul.msk.f32.gmra.mxu0 %vm2357_vm1, %v2323_v63  ;;  %4791 = vmatmul.msk.f32.gmra.mxu1 %vm2357_vm1, %v4726_v0  ;;  %v2328_v1 = vld [vmem:[%s5721_s10 + $0x118] sm:$0xff] }
 0x214   : > { %v3609_v4 = vpop.f32.mrf.mxu2  ;;  %v4139_v5 = vpop.f32.mrf.mxu3 }
 0x215   : > { %4498 = vst [vmem:[%s5876_s20 + $0x68] sm:$0xff] %v4434_v3  ;;  %v3773_v6 = vmax.f32 %v3243_v2, %v3609_v4  ;;  %v4731_v2 = vld [vmem:[%s5721_s10 + $0x318] sm:$0xff] }
 0x217   : > { %v4303_v9 = vmax.f32 %v3773_v6, %v4139_v5 }
 0x218   : > { %v2616_v10 = vpop.f32.mrf.mxu0  ;;  %v3082_v11 = vpop.f32.mrf.mxu1 }
 0x219   : > { %v4371_v15 = vadd.f32 %v5864_v14, %v4303_v9  ;;  %4921 = vmatmul.msk.f32.gmra.mxu2 %vm2357_vm1, %v4856_v7  ;;  %v3244_v16 = vmax.f32 %v2616_v10, %v3082_v11  ;;  %5050 = vmatmul.msk.f32.gmra.mxu3 %vm2357_vm1, %v4985_v8  ;;  %v4861_v9 = vld [vmem:[%s5721_s10 + $0x520] sm:$0xff] }
 0x21a   : > { %v4990_v10 = vld [vmem:[%s5721_s10 + $0x720] sm:$0xff] }
 0x21b   : > { %v4435_v17 = vmax.f32 %v4371_v15, 0.0  ;;  %4663 = vmatmul.msk.f32.gmra.mxu0 %vm2357_vm1, %v2324_v12  ;;  %4792 = vmatmul.msk.f32.gmra.mxu1 %vm2357_vm1, %v4727_v13  ;;  %v2329_v15 = vld [vmem:[%s5721_s10 + $0x120] sm:$0xff] }
 0x21c   : > { %v3612_v18 = vpop.f32.mrf.mxu2  ;;  %v4142_v19 = vpop.f32.mrf.mxu3 }
 0x21d   : > { %4499 = vst [vmem:[%s5876_s20 + $0x70] sm:$0xff] %v4435_v17  ;;  %v3774_v20 = vmax.f32 %v3244_v16, %v3612_v18  ;;  %v4732_v16 = vld [vmem:[%s5721_s10 + $0x320] sm:$0xff] }
 0x21f   : > { %v4304_v23 = vmax.f32 %v3774_v20, %v4142_v19 }
 0x220   : > { %v2619_v24 = vpop.f32.mrf.mxu0  ;;  %v3085_v25 = vpop.f32.mrf.mxu1 }
 0x221   : > { %v4372_v28 = vadd.f32 %v5864_v14, %v4304_v23  ;;  %4922 = vmatmul.msk.f32.gmra.mxu2 %vm2357_vm1, %v4857_v21  ;;  %v3245_v29 = vmax.f32 %v2619_v24, %v3085_v25  ;;  %5051 = vmatmul.msk.f32.gmra.mxu3 %vm2357_vm1, %v4986_v22  ;;  %v4862_v23 = vld [vmem:[%s5721_s10 + $0x528] sm:$0xff] }
 0x222   : > { %v4991_v24 = vld [vmem:[%s5721_s10 + $0x728] sm:$0xff] }
 0x223   : > { %v4436_v30 = vmax.f32 %v4372_v28, 0.0  ;;  %4664 = vmatmul.msk.f32.gmra.mxu0 %vm2357_vm1, %v2325_v26  ;;  %4793 = vmatmul.msk.f32.gmra.mxu1 %vm2357_vm1, %v4728_v27  ;;  %v2330_v28 = vld [vmem:[%s5721_s10 + $0x128] sm:$0xff] }
 0x224   : > { %v3615_v31 = vpop.f32.mrf.mxu2  ;;  %v4145_v32 = vpop.f32.mrf.mxu3 }
 0x225   : > { %4500 = vst [vmem:[%s5876_s20 + $0x78] sm:$0xff] %v4436_v30  ;;  %v3775_v33 = vmax.f32 %v3245_v29, %v3615_v31  ;;  %v4733_v29 = vld [vmem:[%s5721_s10 + $0x328] sm:$0xff] }
 0x227   : > { %v4305_v36 = vmax.f32 %v3775_v33, %v4145_v32 }
 0x228   : > { %v2622_v37 = vpop.f32.mrf.mxu0  ;;  %v3088_v38 = vpop.f32.mrf.mxu1 }
 0x229   : > { %v4373_v41 = vadd.f32 %v5864_v14, %v4305_v36  ;;  %4923 = vmatmul.msk.f32.gmra.mxu2 %vm2357_vm1, %v4858_v34  ;;  %v3246_v42 = vmax.f32 %v2622_v37, %v3088_v38  ;;  %5052 = vmatmul.msk.f32.gmra.mxu3 %vm2357_vm1, %v4987_v35  ;;  %v4863_v36 = vld [vmem:[%s5721_s10 + $0x530] sm:$0xff] }
 0x22a   : > { %v4992_v37 = vld [vmem:[%s5721_s10 + $0x730] sm:$0xff] }
 0x22b   : > { %v4437_v43 = vmax.f32 %v4373_v41, 0.0  ;;  %4665 = vmatmul.msk.f32.gmra.mxu0 %vm2357_vm1, %v2326_v39  ;;  %4794 = vmatmul.msk.f32.gmra.mxu1 %vm2357_vm1, %v4729_v40  ;;  %v2331_v41 = vld [vmem:[%s5721_s10 + $0x130] sm:$0xff] }
 0x22c   : > { %v3618_v44 = vpop.f32.mrf.mxu2  ;;  %v4148_v45 = vpop.f32.mrf.mxu3 }
 0x22d   : > { %4501 = vst [vmem:[%s5876_s20 + $0x80] sm:$0xff] %v4437_v43  ;;  %v3776_v46 = vmax.f32 %v3246_v42, %v3618_v44  ;;  %v4734_v42 = vld [vmem:[%s5721_s10 + $0x330] sm:$0xff] }
 0x22f   : > { %v4306_v49 = vmax.f32 %v3776_v46, %v4148_v45 }
 0x230   : > { %v2625_v50 = vpop.f32.mrf.mxu0  ;;  %v3091_v51 = vpop.f32.mrf.mxu1 }
 0x231   : > { %v4374_v54 = vadd.f32 %v5864_v14, %v4306_v49  ;;  %4924 = vmatmul.msk.f32.gmra.mxu2 %vm2357_vm1, %v4859_v47  ;;  %v3247_v55 = vmax.f32 %v2625_v50, %v3091_v51  ;;  %5053 = vmatmul.msk.f32.gmra.mxu3 %vm2357_vm1, %v4988_v48  ;;  %v4864_v49 = vld [vmem:[%s5721_s10 + $0x538] sm:$0xff] }
 0x232   : > { %v4993_v50 = vld [vmem:[%s5721_s10 + $0x738] sm:$0xff] }
 0x233   : > { %v4438_v56 = vmax.f32 %v4374_v54, 0.0  ;;  %4666 = vmatmul.msk.f32.gmra.mxu0 %vm2357_vm1, %v2327_v52  ;;  %4795 = vmatmul.msk.f32.gmra.mxu1 %vm2357_vm1, %v4730_v53  ;;  %v2332_v54 = vld [vmem:[%s5721_s10 + $0x138] sm:$0xff] }
 0x234   : > { %v3621_v57 = vpop.f32.mrf.mxu2  ;;  %v4151_v58 = vpop.f32.mrf.mxu3 }
 0x235   : > { %4502 = vst [vmem:[%s5876_s20 + $0x88] sm:$0xff] %v4438_v56  ;;  %v3777_v59 = vmax.f32 %v3247_v55, %v3621_v57  ;;  %v4735_v55 = vld [vmem:[%s5721_s10 + $0x338] sm:$0xff] }
 0x237   : > { %v4307_v62 = vmax.f32 %v3777_v59, %v4151_v58 }
 0x238   : > { %v2628_v63 = vpop.f32.mrf.mxu0  ;;  %v3094_v0 = vpop.f32.mrf.mxu1 }
 0x239   : > { %v4375_v3 = vadd.f32 %v5864_v14, %v4307_v62  ;;  %4925 = vmatmul.msk.f32.gmra.mxu2 %vm2357_vm1, %v4860_v60  ;;  %v3248_v4 = vmax.f32 %v2628_v63, %v3094_v0  ;;  %5054 = vmatmul.msk.f32.gmra.mxu3 %vm2357_vm1, %v4989_v61  ;;  %v4865_v62 = vld [vmem:[%s5721_s10 + $0x540] sm:$0xff] }
 0x23a   : > { %v4994_v63 = vld [vmem:[%s5721_s10 + $0x740] sm:$0xff] }
 0x23b   : > { %v4439_v5 = vmax.f32 %v4375_v3, 0.0  ;;  %4667 = vmatmul.msk.f32.gmra.mxu0 %vm2357_vm1, %v2328_v1  ;;  %4796 = vmatmul.msk.f32.gmra.mxu1 %vm2357_vm1, %v4731_v2  ;;  %v2333_v3 = vld [vmem:[%s5721_s10 + $0x140] sm:$0xff] }
 0x23c   : > { %v3624_v6 = vpop.f32.mrf.mxu2  ;;  %v4154_v7 = vpop.f32.mrf.mxu3 }
 0x23d   : > { %4503 = vst [vmem:[%s5876_s20 + $0x90] sm:$0xff] %v4439_v5  ;;  %v3778_v8 = vmax.f32 %v3248_v4, %v3624_v6  ;;  %v4736_v4 = vld [vmem:[%s5721_s10 + $0x340] sm:$0xff] }
 0x23f   : > { %v4308_v11 = vmax.f32 %v3778_v8, %v4154_v7 }
 0x240   : > { %v2631_v12 = vpop.f32.mrf.mxu0  ;;  %v3097_v13 = vpop.f32.mrf.mxu1 }
 0x241   : > { %v4376_v17 = vadd.f32 %v5864_v14, %v4308_v11  ;;  %4926 = vmatmul.msk.f32.gmra.mxu2 %vm2357_vm1, %v4861_v9  ;;  %v3249_v18 = vmax.f32 %v2631_v12, %v3097_v13  ;;  %5055 = vmatmul.msk.f32.gmra.mxu3 %vm2357_vm1, %v4990_v10  ;;  %v4866_v11 = vld [vmem:[%s5721_s10 + $0x548] sm:$0xff] }
 0x242   : > { %v4995_v12 = vld [vmem:[%s5721_s10 + $0x748] sm:$0xff] }
 0x243   : > { %v4440_v19 = vmax.f32 %v4376_v17, 0.0  ;;  %4668 = vmatmul.msk.f32.gmra.mxu0 %vm2357_vm1, %v2329_v15  ;;  %4797 = vmatmul.msk.f32.gmra.mxu1 %vm2357_vm1, %v4732_v16  ;;  %v2334_v17 = vld [vmem:[%s5721_s10 + $0x148] sm:$0xff] }
 0x244   : > { %v3627_v20 = vpop.f32.mrf.mxu2  ;;  %v4157_v21 = vpop.f32.mrf.mxu3 }
 0x245   : > { %4504 = vst [vmem:[%s5876_s20 + $0x98] sm:$0xff] %v4440_v19  ;;  %v3779_v22 = vmax.f32 %v3249_v18, %v3627_v20  ;;  %v4737_v18 = vld [vmem:[%s5721_s10 + $0x348] sm:$0xff] }
 0x247   : > { %v4309_v25 = vmax.f32 %v3779_v22, %v4157_v21 }
 0x248   : > { %v2634_v26 = vpop.f32.mrf.mxu0  ;;  %v3100_v27 = vpop.f32.mrf.mxu1 }
 0x249   : > { %v4377_v30 = vadd.f32 %v5864_v14, %v4309_v25  ;;  %4927 = vmatmul.msk.f32.gmra.mxu2 %vm2357_vm1, %v4862_v23  ;;  %v3250_v31 = vmax.f32 %v2634_v26, %v3100_v27  ;;  %5056 = vmatmul.msk.f32.gmra.mxu3 %vm2357_vm1, %v4991_v24  ;;  %v4867_v25 = vld [vmem:[%s5721_s10 + $0x550] sm:$0xff] }
 0x24a   : > { %v4996_v26 = vld [vmem:[%s5721_s10 + $0x750] sm:$0xff] }
 0x24b   : > { %v4441_v32 = vmax.f32 %v4377_v30, 0.0  ;;  %4669 = vmatmul.msk.f32.gmra.mxu0 %vm2357_vm1, %v2330_v28  ;;  %4798 = vmatmul.msk.f32.gmra.mxu1 %vm2357_vm1, %v4733_v29  ;;  %v2335_v30 = vld [vmem:[%s5721_s10 + $0x150] sm:$0xff] }
 0x24c   : > { %v3630_v33 = vpop.f32.mrf.mxu2  ;;  %v4160_v34 = vpop.f32.mrf.mxu3 }
 0x24d   : > { %4505 = vst [vmem:[%s5876_s20 + $0xa0] sm:$0xff] %v4441_v32  ;;  %v3780_v35 = vmax.f32 %v3250_v31, %v3630_v33  ;;  %v4738_v31 = vld [vmem:[%s5721_s10 + $0x350] sm:$0xff] }
 0x24f   : > { %v4310_v38 = vmax.f32 %v3780_v35, %v4160_v34 }
 0x250   : > { %v2637_v39 = vpop.f32.mrf.mxu0  ;;  %v3103_v40 = vpop.f32.mrf.mxu1 }
 0x251   : > { %v4378_v43 = vadd.f32 %v5864_v14, %v4310_v38  ;;  %4928 = vmatmul.msk.f32.gmra.mxu2 %vm2357_vm1, %v4863_v36  ;;  %v3251_v44 = vmax.f32 %v2637_v39, %v3103_v40  ;;  %5057 = vmatmul.msk.f32.gmra.mxu3 %vm2357_vm1, %v4992_v37  ;;  %v4868_v38 = vld [vmem:[%s5721_s10 + $0x558] sm:$0xff] }
 0x252   : > { %v4997_v39 = vld [vmem:[%s5721_s10 + $0x758] sm:$0xff] }
 0x253   : > { %v4442_v45 = vmax.f32 %v4378_v43, 0.0  ;;  %4670 = vmatmul.msk.f32.gmra.mxu0 %vm2357_vm1, %v2331_v41  ;;  %4799 = vmatmul.msk.f32.gmra.mxu1 %vm2357_vm1, %v4734_v42  ;;  %v2336_v43 = vld [vmem:[%s5721_s10 + $0x158] sm:$0xff] }
 0x254   : > { %v3633_v46 = vpop.f32.mrf.mxu2  ;;  %v4163_v47 = vpop.f32.mrf.mxu3 }
 0x255   : > { %4506 = vst [vmem:[%s5876_s20 + $0xa8] sm:$0xff] %v4442_v45  ;;  %v3781_v48 = vmax.f32 %v3251_v44, %v3633_v46  ;;  %v4739_v44 = vld [vmem:[%s5721_s10 + $0x358] sm:$0xff] }
 0x257   : > { %v4311_v51 = vmax.f32 %v3781_v48, %v4163_v47 }
 0x258   : > { %v2640_v52 = vpop.f32.mrf.mxu0  ;;  %v3106_v53 = vpop.f32.mrf.mxu1 }
 0x259   : > { %v4379_v56 = vadd.f32 %v5864_v14, %v4311_v51  ;;  %4929 = vmatmul.msk.f32.gmra.mxu2 %vm2357_vm1, %v4864_v49  ;;  %v3252_v57 = vmax.f32 %v2640_v52, %v3106_v53  ;;  %5058 = vmatmul.msk.f32.gmra.mxu3 %vm2357_vm1, %v4993_v50  ;;  %v4869_v51 = vld [vmem:[%s5721_s10 + $0x560] sm:$0xff] }
 0x25a   : > { %v4998_v52 = vld [vmem:[%s5721_s10 + $0x760] sm:$0xff] }
 0x25b   : > { %v4443_v58 = vmax.f32 %v4379_v56, 0.0  ;;  %4671 = vmatmul.msk.f32.gmra.mxu0 %vm2357_vm1, %v2332_v54  ;;  %4800 = vmatmul.msk.f32.gmra.mxu1 %vm2357_vm1, %v4735_v55  ;;  %v2337_v56 = vld [vmem:[%s5721_s10 + $0x160] sm:$0xff] }
 0x25c   : > { %v3636_v59 = vpop.f32.mrf.mxu2  ;;  %v4166_v60 = vpop.f32.mrf.mxu3 }
 0x25d   : > { %4507 = vst [vmem:[%s5876_s20 + $0xb0] sm:$0xff] %v4443_v58  ;;  %v3782_v61 = vmax.f32 %v3252_v57, %v3636_v59  ;;  %v4740_v57 = vld [vmem:[%s5721_s10 + $0x360] sm:$0xff] }
 0x25f   : > { %v4312_v0 = vmax.f32 %v3782_v61, %v4166_v60 }
 0x260   : > { %v2643_v1 = vpop.f32.mrf.mxu0  ;;  %v3109_v2 = vpop.f32.mrf.mxu1 }
 0x261   : > { %v4380_v5 = vadd.f32 %v5864_v14, %v4312_v0  ;;  %4930 = vmatmul.msk.f32.gmra.mxu2 %vm2357_vm1, %v4865_v62  ;;  %v3253_v6 = vmax.f32 %v2643_v1, %v3109_v2  ;;  %5059 = vmatmul.msk.f32.gmra.mxu3 %vm2357_vm1, %v4994_v63  ;;  %v4870_v0 = vld [vmem:[%s5721_s10 + $0x568] sm:$0xff] }
 0x262   : > { %v4999_v1 = vld [vmem:[%s5721_s10 + $0x768] sm:$0xff] }
 0x263   : > { %v4444_v7 = vmax.f32 %v4380_v5, 0.0  ;;  %4672 = vmatmul.msk.f32.gmra.mxu0 %vm2357_vm1, %v2333_v3  ;;  %4801 = vmatmul.msk.f32.gmra.mxu1 %vm2357_vm1, %v4736_v4  ;;  %v2338_v4 = vld [vmem:[%s5721_s10 + $0x168] sm:$0xff] }
 0x264   : > { %v3639_v8 = vpop.f32.mrf.mxu2  ;;  %v4169_v9 = vpop.f32.mrf.mxu3  ;;  %v4741_v5 = vld [vmem:[%s5721_s10 + $0x368] sm:$0xff] }
 0x265   : > { %4508 = vst [vmem:[%s5876_s20 + $0xb8] sm:$0xff] %v4444_v7  ;;  %v3783_v10 = vmax.f32 %v3253_v6, %v3639_v8  ;;  %v6158_v6 = vld [vmem:[%s6392_s2] ss:$0 sm:$0xff] }
 0x267   : > { %v4313_v13 = vmax.f32 %v3783_v10, %v4169_v9 }
 0x268   : > { %v2646_v15 = vpop.f32.mrf.mxu0  ;;  %v3112_v16 = vpop.f32.mrf.mxu1 }
 0x269   : > { %v4381_v19 = vadd.f32 %v5864_v14, %v4313_v13  ;;  %4931 = vmatmul.msk.f32.gmra.mxu2 %vm2357_vm1, %v4866_v11  ;;  %v3254_v20 = vmax.f32 %v2646_v15, %v3112_v16  ;;  %5060 = vmatmul.msk.f32.gmra.mxu3 %vm2357_vm1, %v4995_v12  ;;  %v4871_v13 = vld [vmem:[%s5721_s10 + $0x570] sm:$0xff] }
 0x26a   : > { %v5000_v15 = vld [vmem:[%s5721_s10 + $0x770] sm:$0xff] }
 0x26b   : > { %v4445_v21 = vmax.f32 %v4381_v19, 0.0  ;;  %4673 = vmatmul.msk.f32.gmra.mxu0 %vm2357_vm1, %v2334_v17  ;;  %4802 = vmatmul.msk.f32.gmra.mxu1 %vm2357_vm1, %v4737_v18  ;;  %v2339_v19 = vld [vmem:[%s5721_s10 + $0x170] sm:$0xff] }
 0x26c   : > { %v3642_v22 = vpop.f32.mrf.mxu2  ;;  %v4172_v23 = vpop.f32.mrf.mxu3 }
 0x26d   : > { %4509 = vst [vmem:[%s5876_s20 + $0xc0] sm:$0xff] %v4445_v21  ;;  %v3784_v24 = vmax.f32 %v3254_v20, %v3642_v22  ;;  %v4742_v20 = vld [vmem:[%s5721_s10 + $0x370] sm:$0xff] }
 0x26f   : > { %v4314_v27 = vmax.f32 %v3784_v24, %v4172_v23 }
 0x270   : > { %v2649_v28 = vpop.f32.mrf.mxu0  ;;  %v3115_v29 = vpop.f32.mrf.mxu1 }
 0x271   : > { %v4382_v32 = vadd.f32 %v5864_v14, %v4314_v27  ;;  %4932 = vmatmul.msk.f32.gmra.mxu2 %vm2357_vm1, %v4867_v25  ;;  %v3255_v33 = vmax.f32 %v2649_v28, %v3115_v29  ;;  %5061 = vmatmul.msk.f32.gmra.mxu3 %vm2357_vm1, %v4996_v26  ;;  %v4872_v27 = vld [vmem:[%s5721_s10 + $0x578] sm:$0xff] }
 0x272   : > { %v5001_v28 = vld [vmem:[%s5721_s10 + $0x778] sm:$0xff] }
 0x273   : > { %v4446_v34 = vmax.f32 %v4382_v32, 0.0  ;;  %4674 = vmatmul.msk.f32.gmra.mxu0 %vm2357_vm1, %v2335_v30  ;;  %4803 = vmatmul.msk.f32.gmra.mxu1 %vm2357_vm1, %v4738_v31  ;;  %v2340_v32 = vld [vmem:[%s5721_s10 + $0x178] sm:$0xff] }
 0x274   : > { %v3645_v35 = vpop.f32.mrf.mxu2  ;;  %v4175_v36 = vpop.f32.mrf.mxu3 }
 0x275   : > { %4510 = vst [vmem:[%s5876_s20 + $0xc8] sm:$0xff] %v4446_v34  ;;  %v3785_v37 = vmax.f32 %v3255_v33, %v3645_v35  ;;  %v4743_v33 = vld [vmem:[%s5721_s10 + $0x378] sm:$0xff] }
 0x277   : > { %v4315_v40 = vmax.f32 %v3785_v37, %v4175_v36 }
 0x278   : > { %v2652_v41 = vpop.f32.mrf.mxu0  ;;  %v3118_v42 = vpop.f32.mrf.mxu1 }
 0x279   : > { %v4383_v45 = vadd.f32 %v5864_v14, %v4315_v40  ;;  %4933 = vmatmul.msk.f32.gmra.mxu2 %vm2357_vm1, %v4868_v38  ;;  %v3256_v46 = vmax.f32 %v2652_v41, %v3118_v42  ;;  %5062 = vmatmul.msk.f32.gmra.mxu3 %vm2357_vm1, %v4997_v39  ;;  %v4873_v40 = vld [vmem:[%s5721_s10 + $0x580] sm:$0xff] }
 0x27a   : > { %v5002_v41 = vld [vmem:[%s5721_s10 + $0x780] sm:$0xff] }
 0x27b   : > { %v4447_v47 = vmax.f32 %v4383_v45, 0.0  ;;  %4675 = vmatmul.msk.f32.gmra.mxu0 %vm2357_vm1, %v2336_v43  ;;  %4804 = vmatmul.msk.f32.gmra.mxu1 %vm2357_vm1, %v4739_v44  ;;  %v2341_v45 = vld [vmem:[%s5721_s10 + $0x180] sm:$0xff] }
 0x27c   : > { %v3648_v48 = vpop.f32.mrf.mxu2  ;;  %v4178_v49 = vpop.f32.mrf.mxu3 }
 0x27d   : > { %4511 = vst [vmem:[%s5876_s20 + $0xd0] sm:$0xff] %v4447_v47  ;;  %v3786_v50 = vmax.f32 %v3256_v46, %v3648_v48  ;;  %v4744_v46 = vld [vmem:[%s5721_s10 + $0x380] sm:$0xff] }
 0x27f   : > { %v4316_v53 = vmax.f32 %v3786_v50, %v4178_v49 }
 0x280   : > { %v2655_v54 = vpop.f32.mrf.mxu0  ;;  %v3121_v55 = vpop.f32.mrf.mxu1 }
 0x281   : > { %v4384_v58 = vadd.f32 %v5864_v14, %v4316_v53  ;;  %4934 = vmatmul.msk.f32.gmra.mxu2 %vm2357_vm1, %v4869_v51  ;;  %v3257_v59 = vmax.f32 %v2655_v54, %v3121_v55  ;;  %5063 = vmatmul.msk.f32.gmra.mxu3 %vm2357_vm1, %v4998_v52  ;;  %v4874_v53 = vld [vmem:[%s5721_s10 + $0x588] sm:$0xff] }
 0x282   : > { %v5003_v54 = vld [vmem:[%s5721_s10 + $0x788] sm:$0xff] }
 0x283   : > { %v4448_v60 = vmax.f32 %v4384_v58, 0.0  ;;  %4676 = vmatmul.msk.f32.gmra.mxu0 %vm2357_vm1, %v2337_v56  ;;  %4805 = vmatmul.msk.f32.gmra.mxu1 %vm2357_vm1, %v4740_v57  ;;  %v2342_v58 = vld [vmem:[%s5721_s10 + $0x188] sm:$0xff] }
 0x284   : > { %v3651_v61 = vpop.f32.mrf.mxu2  ;;  %v4181_v62 = vpop.f32.mrf.mxu3 }
 0x285   : > { %4512 = vst [vmem:[%s5876_s20 + $0xd8] sm:$0xff] %v4448_v60  ;;  %v3787_v63 = vmax.f32 %v3257_v59, %v3651_v61  ;;  %v4745_v59 = vld [vmem:[%s5721_s10 + $0x388] sm:$0xff] }
 0x287   : > { %v4317_v14 = vmax.f32 %v3787_v63, %v4181_v62 }
 0x288   : > { %v2658_v2 = vpop.f32.mrf.mxu0  ;;  %v3124_v3 = vpop.f32.mrf.mxu1 }
 0x289   : > { %v4385_v7 = vadd.f32 %v6158_v6, %v4317_v14  ;;  %4935 = vmatmul.msk.f32.gmra.mxu2 %vm2357_vm1, %v4870_v0  ;;  %v3258_v8 = vmax.f32 %v2658_v2, %v3124_v3  ;;  %5064 = vmatmul.msk.f32.gmra.mxu3 %vm2357_vm1, %v4999_v1  ;;  %v4875_v14 = vld [vmem:[%s5721_s10 + $0x590] sm:$0xff] }
 0x28a   : > { %v5004_v2 = vld [vmem:[%s5721_s10 + $0x790] sm:$0xff] }
 0x28b   : > { %v4449_v9 = vmax.f32 %v4385_v7, 0.0  ;;  %4677 = vmatmul.msk.f32.gmra.mxu0 %vm2357_vm1, %v2338_v4  ;;  %4806 = vmatmul.msk.f32.gmra.mxu1 %vm2357_vm1, %v4741_v5  ;;  %v2343_v7 = vld [vmem:[%s5721_s10 + $0x190] sm:$0xff] }
 0x28c   : > { %v3654_v10 = vpop.f32.mrf.mxu2  ;;  %v4184_v11 = vpop.f32.mrf.mxu3 }
 0x28d   : > { %4513 = vst [vmem:[%s5876_s20 + $0xe0] sm:$0xff] %v4449_v9  ;;  %v3788_v12 = vmax.f32 %v3258_v8, %v3654_v10  ;;  %v4746_v8 = vld [vmem:[%s5721_s10 + $0x390] sm:$0xff] }
 0x28f   : > { %v4318_v16 = vmax.f32 %v3788_v12, %v4184_v11 }
 0x290   : > { %v2661_v17 = vpop.f32.mrf.mxu0  ;;  %v3127_v18 = vpop.f32.mrf.mxu1 }
 0x291   : > { %v4386_v21 = vadd.f32 %v6158_v6, %v4318_v16  ;;  %4936 = vmatmul.msk.f32.gmra.mxu2 %vm2357_vm1, %v4871_v13  ;;  %v3259_v22 = vmax.f32 %v2661_v17, %v3127_v18  ;;  %5065 = vmatmul.msk.f32.gmra.mxu3 %vm2357_vm1, %v5000_v15  ;;  %v4876_v16 = vld [vmem:[%s5721_s10 + $0x598] sm:$0xff] }
 0x292   : > { %v5005_v17 = vld [vmem:[%s5721_s10 + $0x798] sm:$0xff] }
 0x293   : > { %v4450_v23 = vmax.f32 %v4386_v21, 0.0  ;;  %4678 = vmatmul.msk.f32.gmra.mxu0 %vm2357_vm1, %v2339_v19  ;;  %4807 = vmatmul.msk.f32.gmra.mxu1 %vm2357_vm1, %v4742_v20  ;;  %v2344_v21 = vld [vmem:[%s5721_s10 + $0x198] sm:$0xff] }
 0x294   : > { %v3657_v24 = vpop.f32.mrf.mxu2  ;;  %v4187_v25 = vpop.f32.mrf.mxu3 }
 0x295   : > { %4514 = vst [vmem:[%s5876_s20 + $0xe8] sm:$0xff] %v4450_v23  ;;  %v3789_v26 = vmax.f32 %v3259_v22, %v3657_v24  ;;  %v4747_v22 = vld [vmem:[%s5721_s10 + $0x398] sm:$0xff] }
 0x297   : > { %v4319_v29 = vmax.f32 %v3789_v26, %v4187_v25 }
 0x298   : > { %v2664_v30 = vpop.f32.mrf.mxu0  ;;  %v3130_v31 = vpop.f32.mrf.mxu1 }
 0x299   : > { %v4387_v34 = vadd.f32 %v6158_v6, %v4319_v29  ;;  %4937 = vmatmul.msk.f32.gmra.mxu2 %vm2357_vm1, %v4872_v27  ;;  %v3260_v35 = vmax.f32 %v2664_v30, %v3130_v31  ;;  %5066 = vmatmul.msk.f32.gmra.mxu3 %vm2357_vm1, %v5001_v28  ;;  %v4877_v29 = vld [vmem:[%s5721_s10 + $0x5a0] sm:$0xff] }
 0x29a   : > { %v5006_v30 = vld [vmem:[%s5721_s10 + $0x7a0] sm:$0xff] }
 0x29b   : > { %v4451_v36 = vmax.f32 %v4387_v34, 0.0  ;;  %4679 = vmatmul.msk.f32.gmra.mxu0 %vm2357_vm1, %v2340_v32  ;;  %4808 = vmatmul.msk.f32.gmra.mxu1 %vm2357_vm1, %v4743_v33  ;;  %v2345_v34 = vld [vmem:[%s5721_s10 + $0x1a0] sm:$0xff] }
 0x29c   : > { %v3660_v37 = vpop.f32.mrf.mxu2  ;;  %v4190_v38 = vpop.f32.mrf.mxu3 }
 0x29d   : > { %4515 = vst [vmem:[%s5876_s20 + $0xf0] sm:$0xff] %v4451_v36  ;;  %v3790_v39 = vmax.f32 %v3260_v35, %v3660_v37  ;;  %v4748_v35 = vld [vmem:[%s5721_s10 + $0x3a0] sm:$0xff] }
 0x29f   : > { %v4320_v42 = vmax.f32 %v3790_v39, %v4190_v38 }
 0x2a0   : > { %v2667_v43 = vpop.f32.mrf.mxu0  ;;  %v3133_v44 = vpop.f32.mrf.mxu1 }
 0x2a1   : > { %v4388_v47 = vadd.f32 %v6158_v6, %v4320_v42  ;;  %4938 = vmatmul.msk.f32.gmra.mxu2 %vm2357_vm1, %v4873_v40  ;;  %v3261_v48 = vmax.f32 %v2667_v43, %v3133_v44  ;;  %5067 = vmatmul.msk.f32.gmra.mxu3 %vm2357_vm1, %v5002_v41  ;;  %v4878_v42 = vld [vmem:[%s5721_s10 + $0x5a8] sm:$0xff] }
 0x2a2   : > { %v5007_v43 = vld [vmem:[%s5721_s10 + $0x7a8] sm:$0xff] }
 0x2a3   : > { %v4452_v49 = vmax.f32 %v4388_v47, 0.0  ;;  %4680 = vmatmul.msk.f32.gmra.mxu0 %vm2357_vm1, %v2341_v45  ;;  %4809 = vmatmul.msk.f32.gmra.mxu1 %vm2357_vm1, %v4744_v46  ;;  %v2346_v47 = vld [vmem:[%s5721_s10 + $0x1a8] sm:$0xff] }
 0x2a4   : > { %v3663_v50 = vpop.f32.mrf.mxu2  ;;  %v4193_v51 = vpop.f32.mrf.mxu3 }
 0x2a5   : > { %4516 = vst [vmem:[%s5876_s20 + $0xf8] sm:$0xff] %v4452_v49  ;;  %v3791_v52 = vmax.f32 %v3261_v48, %v3663_v50  ;;  %v4749_v48 = vld [vmem:[%s5721_s10 + $0x3a8] sm:$0xff] }
 0x2a7   : > { %v4321_v55 = vmax.f32 %v3791_v52, %v4193_v51 }
 0x2a8   : > { %v2670_v56 = vpop.f32.mrf.mxu0  ;;  %v3136_v57 = vpop.f32.mrf.mxu1 }
 0x2a9   : > { %v4389_v60 = vadd.f32 %v6158_v6, %v4321_v55  ;;  %4939 = vmatmul.msk.f32.gmra.mxu2 %vm2357_vm1, %v4874_v53  ;;  %v3262_v61 = vmax.f32 %v2670_v56, %v3136_v57  ;;  %5068 = vmatmul.msk.f32.gmra.mxu3 %vm2357_vm1, %v5003_v54  ;;  %v4879_v55 = vld [vmem:[%s5721_s10 + $0x5b0] sm:$0xff] }
 0x2aa   : > { %v5008_v56 = vld [vmem:[%s5721_s10 + $0x7b0] sm:$0xff] }
 0x2ab   : > { %v4453_v62 = vmax.f32 %v4389_v60, 0.0  ;;  %4681 = vmatmul.msk.f32.gmra.mxu0 %vm2357_vm1, %v2342_v58  ;;  %4810 = vmatmul.msk.f32.gmra.mxu1 %vm2357_vm1, %v4745_v59  ;;  %v2347_v60 = vld [vmem:[%s5721_s10 + $0x1b0] sm:$0xff] }
 0x2ac   : > { %v3666_v63 = vpop.f32.mrf.mxu2  ;;  %v4196_v0 = vpop.f32.mrf.mxu3 }
 0x2ad   : > { %4517 = vst [vmem:[%s5876_s20 + $0x100] sm:$0xff] %v4453_v62  ;;  %v3792_v1 = vmax.f32 %v3262_v61, %v3666_v63  ;;  %v4750_v61 = vld [vmem:[%s5721_s10 + $0x3b0] sm:$0xff] }
 0x2af   : > { %v4322_v3 = vmax.f32 %v3792_v1, %v4196_v0 }
 0x2b0   : > { %v2673_v4 = vpop.f32.mrf.mxu0  ;;  %v3139_v5 = vpop.f32.mrf.mxu1 }
 0x2b1   : > { %v4390_v9 = vadd.f32 %v6158_v6, %v4322_v3  ;;  %4940 = vmatmul.msk.f32.gmra.mxu2 %vm2357_vm1, %v4875_v14  ;;  %v3263_v10 = vmax.f32 %v2673_v4, %v3139_v5  ;;  %5069 = vmatmul.msk.f32.gmra.mxu3 %vm2357_vm1, %v5004_v2  ;;  %v4880_v3 = vld [vmem:[%s5721_s10 + $0x5b8] sm:$0xff] }
 0x2b2   : > { %v5009_v4 = vld [vmem:[%s5721_s10 + $0x7b8] sm:$0xff] }
 0x2b3   : > { %v4454_v11 = vmax.f32 %v4390_v9, 0.0  ;;  %4682 = vmatmul.msk.f32.gmra.mxu0 %vm2357_vm1, %v2343_v7  ;;  %4811 = vmatmul.msk.f32.gmra.mxu1 %vm2357_vm1, %v4746_v8  ;;  %v2348_v9 = vld [vmem:[%s5721_s10 + $0x1b8] sm:$0xff] }
 0x2b4   : > { %v3669_v12 = vpop.f32.mrf.mxu2  ;;  %v4199_v13 = vpop.f32.mrf.mxu3 }
 0x2b5   : > { %4518 = vst [vmem:[%s5876_s20 + $0x108] sm:$0xff] %v4454_v11  ;;  %v3793_v15 = vmax.f32 %v3263_v10, %v3669_v12  ;;  %v4751_v10 = vld [vmem:[%s5721_s10 + $0x3b8] sm:$0xff] }
 0x2b7   : > { %v4323_v18 = vmax.f32 %v3793_v15, %v4199_v13 }
 0x2b8   : > { %v2676_v19 = vpop.f32.mrf.mxu0  ;;  %v3142_v20 = vpop.f32.mrf.mxu1 }
 0x2b9   : > { %v4391_v23 = vadd.f32 %v6158_v6, %v4323_v18  ;;  %4941 = vmatmul.msk.f32.gmra.mxu2 %vm2357_vm1, %v4876_v16  ;;  %v3264_v24 = vmax.f32 %v2676_v19, %v3142_v20  ;;  %5070 = vmatmul.msk.f32.gmra.mxu3 %vm2357_vm1, %v5005_v17  ;;  %v4881_v18 = vld [vmem:[%s5721_s10 + $0x5c0] sm:$0xff] }
 0x2ba   : > { %v5010_v19 = vld [vmem:[%s5721_s10 + $0x7c0] sm:$0xff] }
 0x2bb   : > { %v4455_v25 = vmax.f32 %v4391_v23, 0.0  ;;  %4683 = vmatmul.msk.f32.gmra.mxu0 %vm2357_vm1, %v2344_v21  ;;  %4812 = vmatmul.msk.f32.gmra.mxu1 %vm2357_vm1, %v4747_v22  ;;  %v2349_v23 = vld [vmem:[%s5721_s10 + $0x1c0] sm:$0xff] }
 0x2bc   : > { %v3672_v26 = vpop.f32.mrf.mxu2  ;;  %v4202_v27 = vpop.f32.mrf.mxu3 }
 0x2bd   : > { %4519 = vst [vmem:[%s5876_s20 + $0x110] sm:$0xff] %v4455_v25  ;;  %v3794_v28 = vmax.f32 %v3264_v24, %v3672_v26  ;;  %v4752_v24 = vld [vmem:[%s5721_s10 + $0x3c0] sm:$0xff] }
 0x2bf   : > { %v4324_v31 = vmax.f32 %v3794_v28, %v4202_v27 }
 0x2c0   : > { %v2679_v32 = vpop.f32.mrf.mxu0  ;;  %v3145_v33 = vpop.f32.mrf.mxu1 }
 0x2c1   : > { %v4392_v36 = vadd.f32 %v6158_v6, %v4324_v31  ;;  %4942 = vmatmul.msk.f32.gmra.mxu2 %vm2357_vm1, %v4877_v29  ;;  %v3265_v37 = vmax.f32 %v2679_v32, %v3145_v33  ;;  %5071 = vmatmul.msk.f32.gmra.mxu3 %vm2357_vm1, %v5006_v30  ;;  %v4882_v31 = vld [vmem:[%s5721_s10 + $0x5c8] sm:$0xff] }
 0x2c2   : > { %v5011_v32 = vld [vmem:[%s5721_s10 + $0x7c8] sm:$0xff] }
 0x2c3   : > { %v4456_v38 = vmax.f32 %v4392_v36, 0.0  ;;  %4684 = vmatmul.msk.f32.gmra.mxu0 %vm2357_vm1, %v2345_v34  ;;  %4813 = vmatmul.msk.f32.gmra.mxu1 %vm2357_vm1, %v4748_v35  ;;  %v2350_v36 = vld [vmem:[%s5721_s10 + $0x1c8] sm:$0xff] }
 0x2c4   : > { %v3675_v39 = vpop.f32.mrf.mxu2  ;;  %v4205_v40 = vpop.f32.mrf.mxu3 }
 0x2c5   : > { %4520 = vst [vmem:[%s5876_s20 + $0x118] sm:$0xff] %v4456_v38  ;;  %v3795_v41 = vmax.f32 %v3265_v37, %v3675_v39  ;;  %v4753_v37 = vld [vmem:[%s5721_s10 + $0x3c8] sm:$0xff] }
 0x2c7   : > { %v4325_v44 = vmax.f32 %v3795_v41, %v4205_v40 }
 0x2c8   : > { %v2682_v45 = vpop.f32.mrf.mxu0  ;;  %v3148_v46 = vpop.f32.mrf.mxu1 }
 0x2c9   : > { %v4393_v49 = vadd.f32 %v6158_v6, %v4325_v44  ;;  %4943 = vmatmul.msk.f32.gmra.mxu2 %vm2357_vm1, %v4878_v42  ;;  %v3266_v50 = vmax.f32 %v2682_v45, %v3148_v46  ;;  %5072 = vmatmul.msk.f32.gmra.mxu3 %vm2357_vm1, %v5007_v43  ;;  %v4883_v44 = vld [vmem:[%s5721_s10 + $0x5d0] sm:$0xff] }
 0x2ca   : > { %v5012_v45 = vld [vmem:[%s5721_s10 + $0x7d0] sm:$0xff] }
 0x2cb   : > { %v4457_v51 = vmax.f32 %v4393_v49, 0.0  ;;  %4685 = vmatmul.msk.f32.gmra.mxu0 %vm2357_vm1, %v2346_v47  ;;  %4814 = vmatmul.msk.f32.gmra.mxu1 %vm2357_vm1, %v4749_v48  ;;  %v2351_v49 = vld [vmem:[%s5721_s10 + $0x1d0] sm:$0xff] }
 0x2cc   : > { %v3678_v52 = vpop.f32.mrf.mxu2  ;;  %v4208_v53 = vpop.f32.mrf.mxu3 }
 0x2cd   : > { %4521 = vst [vmem:[%s5876_s20 + $0x120] sm:$0xff] %v4457_v51  ;;  %v3796_v54 = vmax.f32 %v3266_v50, %v3678_v52  ;;  %v4754_v50 = vld [vmem:[%s5721_s10 + $0x3d0] sm:$0xff] }
 0x2cf   : > { %v4326_v57 = vmax.f32 %v3796_v54, %v4208_v53 }
 0x2d0   : > { %v2685_v58 = vpop.f32.mrf.mxu0  ;;  %v3151_v59 = vpop.f32.mrf.mxu1 }
 0x2d1   : > { %v4394_v62 = vadd.f32 %v6158_v6, %v4326_v57  ;;  %4944 = vmatmul.msk.f32.gmra.mxu2 %vm2357_vm1, %v4879_v55  ;;  %v3267_v63 = vmax.f32 %v2685_v58, %v3151_v59  ;;  %5073 = vmatmul.msk.f32.gmra.mxu3 %vm2357_vm1, %v5008_v56  ;;  %v4884_v57 = vld [vmem:[%s5721_s10 + $0x5d8] sm:$0xff] }
 0x2d2   : > { %v5013_v58 = vld [vmem:[%s5721_s10 + $0x7d8] sm:$0xff] }
 0x2d3   : > { %v4458_v0 = vmax.f32 %v4394_v62, 0.0  ;;  %4686 = vmatmul.msk.f32.gmra.mxu0 %vm2357_vm1, %v2347_v60  ;;  %4815 = vmatmul.msk.f32.gmra.mxu1 %vm2357_vm1, %v4750_v61  ;;  %v2352_v62 = vld [vmem:[%s5721_s10 + $0x1d8] sm:$0xff] }
 0x2d4   : > { %v3681_v1 = vpop.f32.mrf.mxu2  ;;  %v4211_v14 = vpop.f32.mrf.mxu3 }
 0x2d5   : > { %4522 = vst [vmem:[%s5876_s20 + $0x128] sm:$0xff] %v4458_v0  ;;  %v3797_v2 = vmax.f32 %v3267_v63, %v3681_v1  ;;  %v4755_v63 = vld [vmem:[%s5721_s10 + $0x3d8] sm:$0xff] }
 0x2d7   : > { %v4327_v5 = vmax.f32 %v3797_v2, %v4211_v14 }
 0x2d8   : > { %v2688_v7 = vpop.f32.mrf.mxu0  ;;  %v3154_v8 = vpop.f32.mrf.mxu1 }
 0x2d9   : > { %v4395_v11 = vadd.f32 %v6158_v6, %v4327_v5  ;;  %4945 = vmatmul.msk.f32.gmra.mxu2 %vm2357_vm1, %v4880_v3  ;;  %v3268_v12 = vmax.f32 %v2688_v7, %v3154_v8  ;;  %5074 = vmatmul.msk.f32.gmra.mxu3 %vm2357_vm1, %v5009_v4  ;;  %v4885_v5 = vld [vmem:[%s5721_s10 + $0x5e0] sm:$0xff] }
 0x2da   : > { %v5014_v7 = vld [vmem:[%s5721_s10 + $0x7e0] sm:$0xff] }
 0x2db   : > { %v4459_v13 = vmax.f32 %v4395_v11, 0.0  ;;  %4687 = vmatmul.msk.f32.gmra.mxu0 %vm2357_vm1, %v2348_v9  ;;  %4816 = vmatmul.msk.f32.gmra.mxu1 %vm2357_vm1, %v4751_v10  ;;  %v2353_v11 = vld [vmem:[%s5721_s10 + $0x1e0] sm:$0xff] }
 0x2dc   : > { %v3684_v15 = vpop.f32.mrf.mxu2  ;;  %v4214_v16 = vpop.f32.mrf.mxu3 }
 0x2dd   : > { %4523 = vst [vmem:[%s5876_s20 + $0x130] sm:$0xff] %v4459_v13  ;;  %v3798_v17 = vmax.f32 %v3268_v12, %v3684_v15  ;;  %v4756_v12 = vld [vmem:[%s5721_s10 + $0x3e0] sm:$0xff] }
 0x2df   : > { %v4328_v20 = vmax.f32 %v3798_v17, %v4214_v16 }
 0x2e0   : > { %v2691_v21 = vpop.f32.mrf.mxu0  ;;  %v3157_v22 = vpop.f32.mrf.mxu1 }
 0x2e1   : > { %v4396_v25 = vadd.f32 %v6158_v6, %v4328_v20  ;;  %4946 = vmatmul.msk.f32.gmra.mxu2 %vm2357_vm1, %v4881_v18  ;;  %v3269_v26 = vmax.f32 %v2691_v21, %v3157_v22  ;;  %5075 = vmatmul.msk.f32.gmra.mxu3 %vm2357_vm1, %v5010_v19  ;;  %v4886_v20 = vld [vmem:[%s5721_s10 + $0x5e8] sm:$0xff] }
 0x2e2   : > { %v5015_v21 = vld [vmem:[%s5721_s10 + $0x7e8] sm:$0xff] }
 0x2e3   : > { %v4460_v27 = vmax.f32 %v4396_v25, 0.0  ;;  %4688 = vmatmul.msk.f32.gmra.mxu0 %vm2357_vm1, %v2349_v23  ;;  %4817 = vmatmul.msk.f32.gmra.mxu1 %vm2357_vm1, %v4752_v24  ;;  %v2354_v25 = vld [vmem:[%s5721_s10 + $0x1e8] sm:$0xff] }
 0x2e4   : > { %v3687_v28 = vpop.f32.mrf.mxu2  ;;  %v4217_v29 = vpop.f32.mrf.mxu3 }
 0x2e5   : > { %4524 = vst [vmem:[%s5876_s20 + $0x138] sm:$0xff] %v4460_v27  ;;  %v3799_v30 = vmax.f32 %v3269_v26, %v3687_v28  ;;  %v4757_v26 = vld [vmem:[%s5721_s10 + $0x3e8] sm:$0xff] }
 0x2e7   : > { %v4329_v33 = vmax.f32 %v3799_v30, %v4217_v29 }
 0x2e8   : > { %v2694_v34 = vpop.f32.mrf.mxu0  ;;  %v3160_v35 = vpop.f32.mrf.mxu1 }
 0x2e9   : > { %v4397_v38 = vadd.f32 %v6158_v6, %v4329_v33  ;;  %4947 = vmatmul.msk.f32.gmra.mxu2 %vm2357_vm1, %v4882_v31  ;;  %v3270_v39 = vmax.f32 %v2694_v34, %v3160_v35  ;;  %5076 = vmatmul.msk.f32.gmra.mxu3 %vm2357_vm1, %v5011_v32  ;;  %v4887_v33 = vld [vmem:[%s5721_s10 + $0x5f0] sm:$0xff] }
 0x2ea   : > { %v5016_v34 = vld [vmem:[%s5721_s10 + $0x7f0] sm:$0xff] }
 0x2eb   : > { %v4461_v40 = vmax.f32 %v4397_v38, 0.0  ;;  %4689 = vmatmul.msk.f32.gmra.mxu0 %vm2357_vm1, %v2350_v36  ;;  %4818 = vmatmul.msk.f32.gmra.mxu1 %vm2357_vm1, %v4753_v37  ;;  %v2355_v38 = vld [vmem:[%s5721_s10 + $0x1f0] sm:$0xff] }
 0x2ec   : > { %v3690_v41 = vpop.f32.mrf.mxu2  ;;  %v4220_v42 = vpop.f32.mrf.mxu3 }
 0x2ed   : > { %4525 = vst [vmem:[%s5876_s20 + $0x140] sm:$0xff] %v4461_v40  ;;  %v3800_v43 = vmax.f32 %v3270_v39, %v3690_v41  ;;  %v4758_v39 = vld [vmem:[%s5721_s10 + $0x3f0] sm:$0xff] }
 0x2ef   : > { %v4330_v46 = vmax.f32 %v3800_v43, %v4220_v42 }
 0x2f0   : > { %v2697_v47 = vpop.f32.mrf.mxu0  ;;  %v3163_v48 = vpop.f32.mrf.mxu1 }
 0x2f1   : > { %v4398_v51 = vadd.f32 %v6158_v6, %v4330_v46  ;;  %4948 = vmatmul.msk.f32.gmra.mxu2 %vm2357_vm1, %v4883_v44  ;;  %v3271_v52 = vmax.f32 %v2697_v47, %v3163_v48  ;;  %5077 = vmatmul.msk.f32.gmra.mxu3 %vm2357_vm1, %v5012_v45  ;;  %v4888_v46 = vld [vmem:[%s5721_s10 + $0x5f8] sm:$0xff] }
 0x2f2   : > { %v5017_v47 = vld [vmem:[%s5721_s10 + $0x7f8] sm:$0xff] }
 0x2f3   : > { %v4462_v53 = vmax.f32 %v4398_v51, 0.0  ;;  %4690 = vmatmul.msk.f32.gmra.mxu0 %vm2357_vm1, %v2351_v49  ;;  %4819 = vmatmul.msk.f32.gmra.mxu1 %vm2357_vm1, %v4754_v50  ;;  %v2356_v51 = vld [vmem:[%s5721_s10 + $0x1f8] sm:$0xff] }
 0x2f4   : > { %v3693_v54 = vpop.f32.mrf.mxu2  ;;  %v4223_v55 = vpop.f32.mrf.mxu3 }
 0x2f5   : > { %4526 = vst [vmem:[%s5876_s20 + $0x148] sm:$0xff] %v4462_v53  ;;  %v3801_v56 = vmax.f32 %v3271_v52, %v3693_v54  ;;  %v4759_v52 = vld [vmem:[%s5721_s10 + $0x3f8] sm:$0xff] }
 0x2f7   : > { %v4331_v59 = vmax.f32 %v3801_v56, %v4223_v55 }
 0x2f8   : > { %v2700_v60 = vpop.f32.mrf.mxu0  ;;  %v3166_v61 = vpop.f32.mrf.mxu1 }
 0x2f9   : > { %v4399_v0 = vadd.f32 %v6158_v6, %v4331_v59  ;;  %4949 = vmatmul.msk.f32.gmra.mxu2 %vm2357_vm1, %v4884_v57  ;;  %v3272_v1 = vmax.f32 %v2700_v60, %v3166_v61  ;;  %5078 = vmatmul.msk.f32.gmra.mxu3 %vm2357_vm1, %v5013_v58 }
 0x2fb   : > { %v4463_v14 = vmax.f32 %v4399_v0, 0.0  ;;  %4691 = vmatmul.msk.f32.gmra.mxu0 %vm2357_vm1, %v2352_v62  ;;  %4820 = vmatmul.msk.f32.gmra.mxu1 %vm2357_vm1, %v4755_v63 }
 0x2fc   : > { %v3696_v2 = vpop.f32.mrf.mxu2  ;;  %v4226_v3 = vpop.f32.mrf.mxu3 }
 0x2fd   : > { %4527 = vst [vmem:[%s5876_s20 + $0x150] sm:$0xff] %v4463_v14  ;;  %v3802_v4 = vmax.f32 %v3272_v1, %v3696_v2 }
 0x2ff   : > { %v4332_v8 = vmax.f32 %v3802_v4, %v4226_v3 }
 0x300   : > { %v2703_v9 = vpop.f32.mrf.mxu0  ;;  %v3169_v10 = vpop.f32.mrf.mxu1 }
 0x301   : > { %v4400_v13 = vadd.f32 %v6158_v6, %v4332_v8  ;;  %4950 = vmatmul.msk.f32.gmra.mxu2 %vm2357_vm1, %v4885_v5  ;;  %v3273_v15 = vmax.f32 %v2703_v9, %v3169_v10  ;;  %5079 = vmatmul.msk.f32.gmra.mxu3 %vm2357_vm1, %v5014_v7 }
 0x303   : > { %v4464_v16 = vmax.f32 %v4400_v13, 0.0  ;;  %4692 = vmatmul.msk.f32.gmra.mxu0 %vm2357_vm1, %v2353_v11  ;;  %4821 = vmatmul.msk.f32.gmra.mxu1 %vm2357_vm1, %v4756_v12 }
 0x304   : > { %v3699_v17 = vpop.f32.mrf.mxu2  ;;  %v4229_v18 = vpop.f32.mrf.mxu3 }
 0x305   : > { %4528 = vst [vmem:[%s5876_s20 + $0x158] sm:$0xff] %v4464_v16  ;;  %v3803_v19 = vmax.f32 %v3273_v15, %v3699_v17 }
 0x307   : > { %v4333_v22 = vmax.f32 %v3803_v19, %v4229_v18 }
 0x308   : > { %v2706_v23 = vpop.f32.mrf.mxu0  ;;  %v3172_v24 = vpop.f32.mrf.mxu1 }
 0x309   : > { %v4401_v27 = vadd.f32 %v6158_v6, %v4333_v22  ;;  %4951 = vmatmul.msk.f32.gmra.mxu2 %vm2357_vm1, %v4886_v20  ;;  %v3274_v28 = vmax.f32 %v2706_v23, %v3172_v24  ;;  %5080 = vmatmul.msk.f32.gmra.mxu3 %vm2357_vm1, %v5015_v21 }
 0x30b   : > { %v4465_v29 = vmax.f32 %v4401_v27, 0.0  ;;  %4693 = vmatmul.msk.f32.gmra.mxu0 %vm2357_vm1, %v2354_v25  ;;  %4822 = vmatmul.msk.f32.gmra.mxu1 %vm2357_vm1, %v4757_v26 }
 0x30c   : > { %v3702_v30 = vpop.f32.mrf.mxu2  ;;  %v4232_v31 = vpop.f32.mrf.mxu3 }
 0x30d   : > { %4529 = vst [vmem:[%s5876_s20 + $0x160] sm:$0xff] %v4465_v29  ;;  %v3804_v32 = vmax.f32 %v3274_v28, %v3702_v30 }
 0x30f   : > { %v4334_v35 = vmax.f32 %v3804_v32, %v4232_v31 }
 0x310   : > { %v2709_v36 = vpop.f32.mrf.mxu0  ;;  %v3175_v37 = vpop.f32.mrf.mxu1 }
 0x311   : > { %v4402_v40 = vadd.f32 %v6158_v6, %v4334_v35  ;;  %4952 = vmatmul.msk.f32.gmra.mxu2 %vm2357_vm1, %v4887_v33  ;;  %v3275_v41 = vmax.f32 %v2709_v36, %v3175_v37  ;;  %5081 = vmatmul.msk.f32.gmra.mxu3 %vm2357_vm1, %v5016_v34 }
 0x313   : > { %v4466_v42 = vmax.f32 %v4402_v40, 0.0  ;;  %4694 = vmatmul.msk.f32.gmra.mxu0 %vm2357_vm1, %v2355_v38  ;;  %4823 = vmatmul.msk.f32.gmra.mxu1 %vm2357_vm1, %v4758_v39 }
 0x314   : > { %v3705_v43 = vpop.f32.mrf.mxu2  ;;  %v4235_v44 = vpop.f32.mrf.mxu3 }
 0x315   : > { %4530 = vst [vmem:[%s5876_s20 + $0x168] sm:$0xff] %v4466_v42  ;;  %v3805_v45 = vmax.f32 %v3275_v41, %v3705_v43 }
 0x317   : > { %v4335_v48 = vmax.f32 %v3805_v45, %v4235_v44 }
 0x318   : > { %v2712_v49 = vpop.f32.mrf.mxu0  ;;  %v3178_v50 = vpop.f32.mrf.mxu1 }
 0x319   : > { %v4403_v53 = vadd.f32 %v6158_v6, %v4335_v48  ;;  %4953 = vmatmul.msk.f32.gmra.mxu2 %vm2357_vm1, %v4888_v46  ;;  %v3276_v54 = vmax.f32 %v2712_v49, %v3178_v50  ;;  %5082 = vmatmul.msk.f32.gmra.mxu3 %vm2357_vm1, %v5017_v47 }
 0x31b   : > { %v4467_v55 = vmax.f32 %v4403_v53, 0.0  ;;  %4695 = vmatmul.msk.f32.gmra.mxu0 %vm2357_vm1, %v2356_v51  ;;  %4824 = vmatmul.msk.f32.gmra.mxu1 %vm2357_vm1, %v4759_v52 }
 0x31c   : > { %v3708_v56 = vpop.f32.mrf.mxu2  ;;  %v4238_v57 = vpop.f32.mrf.mxu3 }
 0x31d   : > { %4531 = vst [vmem:[%s5876_s20 + $0x170] sm:$0xff] %v4467_v55  ;;  %v3806_v58 = vmax.f32 %v3276_v54, %v3708_v56 }
 0x31f   : > { %v4336_v59 = vmax.f32 %v3806_v58, %v4238_v57 }
 0x320   : > { %v2715_v60 = vpop.f32.mrf.mxu0  ;;  %v3181_v61 = vpop.f32.mrf.mxu1 }
 0x321   : > { %v4404_v62 = vadd.f32 %v6158_v6, %v4336_v59  ;;  %v3277_v63 = vmax.f32 %v2715_v60, %v3181_v61 }
 0x323   : > { %v4468_v0 = vmax.f32 %v4404_v62, 0.0 }
 0x324   : > { %v3711_v1 = vpop.f32.mrf.mxu2  ;;  %v4241_v14 = vpop.f32.mrf.mxu3 }
 0x325   : > { %4532 = vst [vmem:[%s5876_s20 + $0x178] sm:$0xff] %v4468_v0  ;;  %v3807_v2 = vmax.f32 %v3277_v63, %v3711_v1 }
 0x327   : > { %v4337_v3 = vmax.f32 %v3807_v2, %v4241_v14 }
 0x328   : > { %v2718_v4 = vpop.f32.mrf.mxu0  ;;  %v3184_v5 = vpop.f32.mrf.mxu1 }
 0x329   : > { %v4405_v7 = vadd.f32 %v6158_v6, %v4337_v3  ;;  %v3278_v8 = vmax.f32 %v2718_v4, %v3184_v5 }
 0x32b   : > { %v4469_v9 = vmax.f32 %v4405_v7, 0.0 }
 0x32c   : > { %v3714_v10 = vpop.f32.mrf.mxu2  ;;  %v4244_v11 = vpop.f32.mrf.mxu3 }
 0x32d   : > { %4533 = vst [vmem:[%s5876_s20 + $0x180] sm:$0xff] %v4469_v9  ;;  %v3808_v12 = vmax.f32 %v3278_v8, %v3714_v10 }
 0x32f   : > { %v4338_v13 = vmax.f32 %v3808_v12, %v4244_v11 }
 0x330   : > { %v2721_v15 = vpop.f32.mrf.mxu0  ;;  %v3187_v16 = vpop.f32.mrf.mxu1 }
 0x331   : > { %v4406_v17 = vadd.f32 %v6158_v6, %v4338_v13  ;;  %v3279_v18 = vmax.f32 %v2721_v15, %v3187_v16 }
 0x333   : > { %v4470_v19 = vmax.f32 %v4406_v17, 0.0 }
 0x334   : > { %v3717_v20 = vpop.f32.mrf.mxu2  ;;  %v4247_v21 = vpop.f32.mrf.mxu3 }
 0x335   : > { %4534 = vst [vmem:[%s5876_s20 + $0x188] sm:$0xff] %v4470_v19  ;;  %v3809_v22 = vmax.f32 %v3279_v18, %v3717_v20 }
 0x337   : > { %v4339_v23 = vmax.f32 %v3809_v22, %v4247_v21 }
 0x338   : > { %v2724_v24 = vpop.f32.mrf.mxu0  ;;  %v3190_v25 = vpop.f32.mrf.mxu1 }
 0x339   : > { %v4407_v26 = vadd.f32 %v6158_v6, %v4339_v23  ;;  %v3280_v27 = vmax.f32 %v2724_v24, %v3190_v25 }
 0x33b   : > { %v4471_v28 = vmax.f32 %v4407_v26, 0.0 }
 0x33c   : > { %v3720_v29 = vpop.f32.mrf.mxu2  ;;  %v4250_v30 = vpop.f32.mrf.mxu3 }
 0x33d   : > { %4535 = vst [vmem:[%s5876_s20 + $0x190] sm:$0xff] %v4471_v28  ;;  %v3810_v31 = vmax.f32 %v3280_v27, %v3720_v29 }
 0x33f   : > { %v4340_v32 = vmax.f32 %v3810_v31, %v4250_v30 }
 0x340   : > { %v2727_v33 = vpop.f32.mrf.mxu0  ;;  %v3193_v34 = vpop.f32.mrf.mxu1 }
 0x341   : > { %v4408_v35 = vadd.f32 %v6158_v6, %v4340_v32  ;;  %v3281_v36 = vmax.f32 %v2727_v33, %v3193_v34 }
 0x343   : > { %v4472_v37 = vmax.f32 %v4408_v35, 0.0 }
 0x344   : > { %v3723_v38 = vpop.f32.mrf.mxu2  ;;  %v4253_v39 = vpop.f32.mrf.mxu3 }
 0x345   : > { %4536 = vst [vmem:[%s5876_s20 + $0x198] sm:$0xff] %v4472_v37  ;;  %v3811_v40 = vmax.f32 %v3281_v36, %v3723_v38 }
 0x347   : > { %v4341_v41 = vmax.f32 %v3811_v40, %v4253_v39 }
 0x348   : > { %v2730_v42 = vpop.f32.mrf.mxu0  ;;  %v3196_v43 = vpop.f32.mrf.mxu1 }
 0x349   : > { %v4409_v44 = vadd.f32 %v6158_v6, %v4341_v41  ;;  %v3282_v45 = vmax.f32 %v2730_v42, %v3196_v43 }
 0x34b   : > { %v4473_v46 = vmax.f32 %v4409_v44, 0.0 }
 0x34c   : > { %v3726_v47 = vpop.f32.mrf.mxu2  ;;  %v4256_v48 = vpop.f32.mrf.mxu3 }
 0x34d   : > { %4537 = vst [vmem:[%s5876_s20 + $0x1a0] sm:$0xff] %v4473_v46  ;;  %v3812_v49 = vmax.f32 %v3282_v45, %v3726_v47 }
 0x34f   : > { %v4342_v50 = vmax.f32 %v3812_v49, %v4256_v48 }
 0x350   : > { %v2733_v51 = vpop.f32.mrf.mxu0  ;;  %v3199_v52 = vpop.f32.mrf.mxu1 }
 0x351   : > { %v4410_v53 = vadd.f32 %v6158_v6, %v4342_v50  ;;  %v3283_v54 = vmax.f32 %v2733_v51, %v3199_v52 }
 0x353   : > { %v4474_v55 = vmax.f32 %v4410_v53, 0.0 }
 0x354   : > { %v3729_v56 = vpop.f32.mrf.mxu2  ;;  %v4259_v57 = vpop.f32.mrf.mxu3 }
 0x355   : > { %4538 = vst [vmem:[%s5876_s20 + $0x1a8] sm:$0xff] %v4474_v55  ;;  %v3813_v58 = vmax.f32 %v3283_v54, %v3729_v56 }
 0x357   : > { %v4343_v59 = vmax.f32 %v3813_v58, %v4259_v57 }
 0x358   : > { %v2736_v60 = vpop.f32.mrf.mxu0  ;;  %v3202_v61 = vpop.f32.mrf.mxu1 }
 0x359   : > { %v4411_v62 = vadd.f32 %v6158_v6, %v4343_v59  ;;  %v3284_v63 = vmax.f32 %v2736_v60, %v3202_v61 }
 0x35b   : > { %v4475_v0 = vmax.f32 %v4411_v62, 0.0 }
 0x35c   : > { %v3732_v1 = vpop.f32.mrf.mxu2  ;;  %v4262_v14 = vpop.f32.mrf.mxu3 }
 0x35d   : > { %4539 = vst [vmem:[%s5876_s20 + $0x1b0] sm:$0xff] %v4475_v0  ;;  %v3814_v2 = vmax.f32 %v3284_v63, %v3732_v1 }
 0x35f   : > { %v4344_v3 = vmax.f32 %v3814_v2, %v4262_v14 }
 0x360   : > { %v2739_v4 = vpop.f32.mrf.mxu0  ;;  %v3205_v5 = vpop.f32.mrf.mxu1 }
 0x361   : > { %v4412_v7 = vadd.f32 %v6158_v6, %v4344_v3  ;;  %v3285_v8 = vmax.f32 %v2739_v4, %v3205_v5 }
 0x363   : > { %v4476_v9 = vmax.f32 %v4412_v7, 0.0 }
 0x364   : > { %v3735_v10 = vpop.f32.mrf.mxu2  ;;  %v4265_v11 = vpop.f32.mrf.mxu3 }
 0x365   : > { %4540 = vst [vmem:[%s5876_s20 + $0x1b8] sm:$0xff] %v4476_v9  ;;  %v3815_v12 = vmax.f32 %v3285_v8, %v3735_v10 }
 0x367   : > { %v4345_v13 = vmax.f32 %v3815_v12, %v4265_v11 }
 0x368   : > { %v2742_v15 = vpop.f32.mrf.mxu0  ;;  %v3208_v16 = vpop.f32.mrf.mxu1 }
 0x369   : > { %v4413_v17 = vadd.f32 %v6158_v6, %v4345_v13  ;;  %v3286_v18 = vmax.f32 %v2742_v15, %v3208_v16 }
 0x36b   : > { %v4477_v19 = vmax.f32 %v4413_v17, 0.0 }
 0x36c   : > { %v3738_v20 = vpop.f32.mrf.mxu2  ;;  %v4268_v21 = vpop.f32.mrf.mxu3 }
 0x36d   : > { %4541 = vst [vmem:[%s5876_s20 + $0x1c0] sm:$0xff] %v4477_v19  ;;  %v3816_v22 = vmax.f32 %v3286_v18, %v3738_v20 }
 0x36f   : > { %v4346_v23 = vmax.f32 %v3816_v22, %v4268_v21 }
 0x370   : > { %v2745_v24 = vpop.f32.mrf.mxu0  ;;  %v3211_v25 = vpop.f32.mrf.mxu1 }
 0x371   : > { %v4414_v26 = vadd.f32 %v6158_v6, %v4346_v23  ;;  %v3287_v27 = vmax.f32 %v2745_v24, %v3211_v25 }
 0x373   : > { %v4478_v28 = vmax.f32 %v4414_v26, 0.0 }
 0x374   : > { %v3741_v29 = vpop.f32.mrf.mxu2  ;;  %v4271_v30 = vpop.f32.mrf.mxu3 }
 0x375   : > { %4542 = vst [vmem:[%s5876_s20 + $0x1c8] sm:$0xff] %v4478_v28  ;;  %v3817_v31 = vmax.f32 %v3287_v27, %v3741_v29 }
 0x377   : > { %v4347_v32 = vmax.f32 %v3817_v31, %v4271_v30 }
 0x378   : > { %v2748_v33 = vpop.f32.mrf.mxu0  ;;  %v3214_v34 = vpop.f32.mrf.mxu1 }
 0x379   : > { %v4415_v35 = vadd.f32 %v6158_v6, %v4347_v32  ;;  %v3288_v36 = vmax.f32 %v2748_v33, %v3214_v34 }
 0x37b   : > { %v4479_v37 = vmax.f32 %v4415_v35, 0.0 }
 0x37c   : > { %v3744_v38 = vpop.f32.mrf.mxu2  ;;  %v4274_v39 = vpop.f32.mrf.mxu3 }
 0x37d   : > { %4543 = vst [vmem:[%s5876_s20 + $0x1d0] sm:$0xff] %v4479_v37  ;;  %v3818_v40 = vmax.f32 %v3288_v36, %v3744_v38 }
 0x37f   : > { %v4348_v41 = vmax.f32 %v3818_v40, %v4274_v39 }
 0x380   : > { %v2751_v42 = vpop.f32.mrf.mxu0  ;;  %v3217_v43 = vpop.f32.mrf.mxu1 }
 0x381   : > { %v4416_v44 = vadd.f32 %v6158_v6, %v4348_v41  ;;  %v3289_v45 = vmax.f32 %v2751_v42, %v3217_v43 }
 0x383   : > { %v4480_v46 = vmax.f32 %v4416_v44, 0.0 }
 0x384   : > { %v3747_v47 = vpop.f32.mrf.mxu2  ;;  %v4277_v48 = vpop.f32.mrf.mxu3 }
 0x385   : > { %4544 = vst [vmem:[%s5876_s20 + $0x1d8] sm:$0xff] %v4480_v46  ;;  %v3819_v49 = vmax.f32 %v3289_v45, %v3747_v47 }
 0x387   : > { %v4349_v50 = vmax.f32 %v3819_v49, %v4277_v48 }
 0x388   : > { %v2754_v51 = vpop.f32.mrf.mxu0  ;;  %v3220_v52 = vpop.f32.mrf.mxu1 }
 0x389   : > { %v4417_v53 = vadd.f32 %v6158_v6, %v4349_v50  ;;  %v3290_v54 = vmax.f32 %v2754_v51, %v3220_v52 }
 0x38b   : > { %v4481_v55 = vmax.f32 %v4417_v53, 0.0 }
 0x38c   : > { %v3750_v56 = vpop.f32.mrf.mxu2  ;;  %v4280_v57 = vpop.f32.mrf.mxu3 }
 0x38d   : > { %4545 = vst [vmem:[%s5876_s20 + $0x1e0] sm:$0xff] %v4481_v55  ;;  %v3820_v58 = vmax.f32 %v3290_v54, %v3750_v56 }
 0x38f   : > { %v4350_v59 = vmax.f32 %v3820_v58, %v4280_v57 }
 0x390   : > { %v2757_v60 = vpop.f32.mrf.mxu0  ;;  %v3223_v61 = vpop.f32.mrf.mxu1 }
 0x391   : > { %v4418_v62 = vadd.f32 %v6158_v6, %v4350_v59  ;;  %v3291_v63 = vmax.f32 %v2757_v60, %v3223_v61 }
 0x393   : > { %v4482_v0 = vmax.f32 %v4418_v62, 0.0 }
 0x394   : > { %v3753_v1 = vpop.f32.mrf.mxu2  ;;  %v4283_v14 = vpop.f32.mrf.mxu3 }
 0x395   : > { %4546 = vst [vmem:[%s5876_s20 + $0x1e8] sm:$0xff] %v4482_v0  ;;  %v3821_v2 = vmax.f32 %v3291_v63, %v3753_v1 }
 0x397   : > { %v4351_v3 = vmax.f32 %v3821_v2, %v4283_v14 }
 0x398   : > { %v2760_v4 = vpop.f32.mrf.mxu0  ;;  %v3226_v5 = vpop.f32.mrf.mxu1 }
 0x399   : > { %v4419_v7 = vadd.f32 %v6158_v6, %v4351_v3  ;;  %v3292_v8 = vmax.f32 %v2760_v4, %v3226_v5 }
 0x39b   : > { %v4483_v9 = vmax.f32 %v4419_v7, 0.0 }
 0x39c   : > { %v3756_v10 = vpop.f32.mrf.mxu2  ;;  %v4286_v11 = vpop.f32.mrf.mxu3 }
 0x39d   : > { %4547 = vst [vmem:[%s5876_s20 + $0x1f0] sm:$0xff] %v4483_v9  ;;  %v3822_v12 = vmax.f32 %v3292_v8, %v3756_v10 }
 0x39f   : > { %v4352_v13 = vmax.f32 %v3822_v12, %v4286_v11 }
 0x3a1   : > { %v4420_v15 = vadd.f32 %v6158_v6, %v4352_v13 }
 0x3a3   : > { %v4484_v16 = vmax.f32 %v4420_v15, 0.0 }
 0x3a5   : > { %4548 = vst [vmem:[%s5876_s20 + $0x1f8] sm:$0xff] %v4484_v16 }
 0x3a6 PF: > { %p10_p9 = scmp.ge.s32.totalorder %s5173_s16, 4   ;;  %s6394_s12 = smov %s5130_s13 }
 0x3a7   : > { %s6395_s13 = smov %s5182_s19  ;;  %s6396_s14 = smov %s5173_s16 }
 0x3a8   :  { %12 = sbr.rel (!%p10_p9) target bundleno = 2 (0x2), region = 128 }

// kernel: cnn_forward.4
= control target key start
LH: loop header
LB: loop body
LE: loop exit
PB: predicated region body
PF: predicated region fallthrough
CT: control target
= control target key end

     0   :  { %s2234_s12 = smov 0   ;;  %s2236_s13 = smov 0   ;;  %s3535_s0 = inlined_call_operand.vmem [shape: f32[4,256,288], index: 0, kind: input, shape index: {}]   ;;  %s3536_s1 = inlined_call_operand.vmem [shape: f32[288,128], index: 1, kind: input, shape index: {}]   ;;  %s3537_s2 = inlined_call_operand.vmem [shape: f32[1,128], index: 2, kind: input, shape index: {}]   ;;  %s3538_s3 = inlined_call_operand.vmem [shape: f32[256,128], index: 3, kind: output, shape index: {}]  }
   0x1   :  { %s2238_s14 = smov 0  }
   0x2 LB: > { %s1942_s15 = sadd.s32 4294967295, %s2212_s14   ;;  %s2251_s16 = sadd.s32 1, %s2212_s14   ;;  %s2212_s14 = sphi %s2238_s14, %s3551_s14   ;;  %s2208_s13 = sphi %s2236_s13, %s3550_s13   ;;  %s2204_s12 = sphi %s2234_s12, %s3549_s12  }
   0x3   : > { %s17_s17 = ssub.s32 %s2212_s14, %s2251_s16  ;;  %s20_s18 = sadd.s32 1, %s2208_s13 }
   0x4   : > { %p18_p0 = scmp.eq.s32.totalorder %s17_s17, 0  ;;  %p27_p1 = scmp.ne.s32.totalorder %s2208_s13, %s2204_s12 }
   0x5   : > { %p28_p2 = scmp.eq.s32.totalorder %s2212_s14, 0  ;;  %p1945_p4 = scmp.ge.s32.totalorder %s2212_s14, 2 }
   0x6   : > { %s2260_s19 = scalar_select %p18_p0, %s2208_s13, %s20_s18  }
   0x7   : > { %p29_p3 = por %p28_p2, %p27_p1  ;;  %127 = sbr.rel (%p1945_p4) target bundleno = 209 (0xd1), region = 24 }
   0xc   : > { %130 = sbr.rel (!%p29_p3) target bundleno = 209 (0xd1), region = 28  ;;  %s132_s20 = sand.u32 (%p29_p3), 1, %s2208_s13  }
   0xd   : > { %s2163_s21 = smul.u32 (%p29_p3), 384, %s2212_s14 }
   0xe   : > { %s2162_s22 = smul.u32 (%p29_p3), 1536, %s132_s20 }
   0xf   : > { %s2268_s25 = scalar_lea.vmem (%p29_p3), %s3535_s0, %s2163_s21 }
  0x10   : > { %v151_v0 = vld [vmem:[%s2268_s25] sm:$0xff] (%p29_p3)  ;;  %v153_v1 = vld [vmem:[%s2268_s25 + $0x8] sm:$0xff] (%p29_p3)  ;;  %v155_v2 = vld [vmem:[%s2268_s25 + $0x10] sm:$0xff] (%p29_p3)  ;;  %s2273_s26 = scalar_lea.vmem (%p29_p3), [#allocation2], %s2162_s22 }
  0x11   : > { %152 = vst [vmem:[%s2273_s26] sm:$0xff] %v151_v0  ;;  %v157_v3 = vld [vmem:[%s2268_s25 + $0x18] sm:$0xff]  ;;  %v159_v4 = vld [vmem:[%s2268_s25 + $0x20] sm:$0xff]  ;;  %v161_v5 = vld [vmem:[%s2268_s25 + $0x28] sm:$0xff] }
  0x12   : > { %154 = vst [vmem:[%s2273_s26 + $0x8] sm:$0xff] %v153_v1  ;;  %v163_v6 = vld [vmem:[%s2268_s25 + $0x30] sm:$0xff]  ;;  %v165_v7 = vld [vmem:[%s2268_s25 + $0x38] sm:$0xff]  ;;  %v167_v8 = vld [vmem:[%s2268_s25 + $0x40] sm:$0xff] }
  0x13   : > { %156 = vst [vmem:[%s2273_s26 + $0x10] sm:$0xff] %v155_v2  ;;  %v169_v9 = vld [vmem:[%s2268_s25 + $0x48] sm:$0xff]  ;;  %v171_v10 = vld [vmem:[%s2268_s25 + $0x50] sm:$0xff]  ;;  %v173_v11 = vld [vmem:[%s2268_s25 + $0x58] sm:$0xff] }
  0x14   : > { %158 = vst [vmem:[%s2273_s26 + $0x18] sm:$0xff] %v157_v3  ;;  %v175_v12 = vld [vmem:[%s2268_s25 + $0x60] sm:$0xff]  ;;  %v177_v13 = vld [vmem:[%s2268_s25 + $0x68] sm:$0xff]  ;;  %v179_v14 = vld [vmem:[%s2268_s25 + $0x70] sm:$0xff] }
  0x15   : > { %160 = vst [vmem:[%s2273_s26 + $0x20] sm:$0xff] %v159_v4  ;;  %v181_v15 = vld [vmem:[%s2268_s25 + $0x78] sm:$0xff]  ;;  %v183_v16 = vld [vmem:[%s2268_s25 + $0x80] sm:$0xff]  ;;  %v185_v17 = vld [vmem:[%s2268_s25 + $0x88] sm:$0xff] }
  0x16   : > { %162 = vst [vmem:[%s2273_s26 + $0x28] sm:$0xff] %v161_v5  ;;  %v187_v18 = vld [vmem:[%s2268_s25 + $0x90] sm:$0xff]  ;;  %v189_v19 = vld [vmem:[%s2268_s25 + $0x98] sm:$0xff]  ;;  %v191_v20 = vld [vmem:[%s2268_s25 + $0xa0] sm:$0xff] }
  0x17   : > { %164 = vst [vmem:[%s2273_s26 + $0x30] sm:$0xff] %v163_v6  ;;  %v193_v21 = vld [vmem:[%s2268_s25 + $0xa8] sm:$0xff]  ;;  %v195_v22 = vld [vmem:[%s2268_s25 + $0xb0] sm:$0xff]  ;;  %v197_v23 = vld [vmem:[%s2268_s25 + $0xb8] sm:$0xff] }
  0x18   : > { %166 = vst [vmem:[%s2273_s26 + $0x38] sm:$0xff] %v165_v7  ;;  %v199_v24 = vld [vmem:[%s2268_s25 + $0xc0] sm:$0xff]  ;;  %v201_v25 = vld [vmem:[%s2268_s25 + $0xc8] sm:$0xff]  ;;  %v203_v26 = vld [vmem:[%s2268_s25 + $0xd0] sm:$0xff] }
  0x19   : > { %168 = vst [vmem:[%s2273_s26 + $0x40] sm:$0xff] %v167_v8  ;;  %v205_v27 = vld [vmem:[%s2268_s25 + $0xd8] sm:$0xff]  ;;  %v207_v28 = vld [vmem:[%s2268_s25 + $0xe0] sm:$0xff]  ;;  %v209_v29 = vld [vmem:[%s2268_s25 + $0xe8] sm:$0xff] }
  0x1a   : > { %170 = vst [vmem:[%s2273_s26 + $0x48] sm:$0xff] %v169_v9  ;;  %v211_v30 = vld [vmem:[%s2268_s25 + $0xf0] sm:$0xff]  ;;  %v213_v31 = vld [vmem:[%s2268_s25 + $0xf8] sm:$0xff]  ;;  %v215_v32 = vld [vmem:[%s2268_s25 + $0x100] sm:$0xff] }
  0x1b   : > { %172 = vst [vmem:[%s2273_s26 + $0x50] sm:$0xff] %v171_v10  ;;  %v217_v33 = vld [vmem:[%s2268_s25 + $0x108] sm:$0xff]  ;;  %v219_v34 = vld [vmem:[%s2268_s25 + $0x110] sm:$0xff]  ;;  %v221_v35 = vld [vmem:[%s2268_s25 + $0x118] sm:$0xff] }
  0x1c   : > { %174 = vst [vmem:[%s2273_s26 + $0x58] sm:$0xff] %v173_v11  ;;  %v223_v36 = vld [vmem:[%s2268_s25 + $0x120] sm:$0xff]  ;;  %v225_v37 = vld [vmem:[%s2268_s25 + $0x128] sm:$0xff]  ;;  %v227_v38 = vld [vmem:[%s2268_s25 + $0x130] sm:$0xff] }
  0x1d   : > { %176 = vst [vmem:[%s2273_s26 + $0x60] sm:$0xff] %v175_v12  ;;  %v229_v39 = vld [vmem:[%s2268_s25 + $0x138] sm:$0xff]  ;;  %v231_v40 = vld [vmem:[%s2268_s25 + $0x140] sm:$0xff]  ;;  %v233_v41 = vld [vmem:[%s2268_s25 + $0x148] sm:$0xff] }
  0x1e   : > { %178 = vst [vmem:[%s2273_s26 + $0x68] sm:$0xff] %v177_v13  ;;  %v235_v42 = vld [vmem:[%s2268_s25 + $0x150] sm:$0xff]  ;;  %v237_v43 = vld [vmem:[%s2268_s25 + $0x158] sm:$0xff]  ;;  %v239_v44 = vld [vmem:[%s2268_s25 + $0x160] sm:$0xff] }
  0x1f   : > { %180 = vst [vmem:[%s2273_s26 + $0x70] sm:$0xff] %v179_v14  ;;  %v241_v45 = vld [vmem:[%s2268_s25 + $0x168] sm:$0xff]  ;;  %v243_v46 = vld [vmem:[%s2268_s25 + $0x170] sm:$0xff]  ;;  %v245_v47 = vld [vmem:[%s2268_s25 + $0x178] sm:$0xff] }
  0x20   : > { %182 = vst [vmem:[%s2273_s26 + $0x78] sm:$0xff] %v181_v15  ;;  %v247_v48 = vld [vmem:[%s2268_s25 + $0x300] sm:$0xff]  ;;  %v249_v49 = vld [vmem:[%s2268_s25 + $0x308] sm:$0xff]  ;;  %v251_v50 = vld [vmem:[%s2268_s25 + $0x310] sm:$0xff] }
  0x21   : > { %184 = vst [vmem:[%s2273_s26 + $0x80] sm:$0xff] %v183_v16  ;;  %v253_v51 = vld [vmem:[%s2268_s25 + $0x318] sm:$0xff]  ;;  %v255_v52 = vld [vmem:[%s2268_s25 + $0x320] sm:$0xff]  ;;  %v257_v53 = vld [vmem:[%s2268_s25 + $0x328] sm:$0xff] }
  0x22   : > { %186 = vst [vmem:[%s2273_s26 + $0x88] sm:$0xff] %v185_v17  ;;  %v259_v54 = vld [vmem:[%s2268_s25 + $0x330] sm:$0xff]  ;;  %v261_v55 = vld [vmem:[%s2268_s25 + $0x338] sm:$0xff]  ;;  %v263_v56 = vld [vmem:[%s2268_s25 + $0x340] sm:$0xff] }
  0x23   : > { %188 = vst [vmem:[%s2273_s26 + $0x90] sm:$0xff] %v187_v18  ;;  %v265_v57 = vld [vmem:[%s2268_s25 + $0x348] sm:$0xff]  ;;  %v267_v58 = vld [vmem:[%s2268_s25 + $0x350] sm:$0xff]  ;;  %v269_v59 = vld [vmem:[%s2268_s25 + $0x358] sm:$0xff] }
  0x24   : > { %190 = vst [vmem:[%s2273_s26 + $0x98] sm:$0xff] %v189_v19  ;;  %v271_v60 = vld [vmem:[%s2268_s25 + $0x360] sm:$0xff]  ;;  %v273_v61 = vld [vmem:[%s2268_s25 + $0x368] sm:$0xff]  ;;  %v275_v62 = vld [vmem:[%s2268_s25 + $0x370] sm:$0xff] }
  0x25   : > { %192 = vst [vmem:[%s2273_s26 + $0xa0] sm:$0xff] %v191_v20  ;;  %v277_v63 = vld [vmem:[%s2268_s25 + $0x378] sm:$0xff]  ;;  %v279_v0 = vld [vmem:[%s2268_s25 + $0x380] sm:$0xff]  ;;  %v281_v1 = vld [vmem:[%s2268_s25 + $0x388] sm:$0xff] }
  0x26   : > { %194 = vst [vmem:[%s2273_s26 + $0xa8] sm:$0xff] %v193_v21  ;;  %v283_v2 = vld [vmem:[%s2268_s25 + $0x390] sm:$0xff]  ;;  %v285_v3 = vld [vmem:[%s2268_s25 + $0x398] sm:$0xff]  ;;  %v287_v4 = vld [vmem:[%s2268_s25 + $0x3a0] sm:$0xff] }
  0x27   : > { %196 = vst [vmem:[%s2273_s26 + $0xb0] sm:$0xff] %v195_v22  ;;  %v289_v5 = vld [vmem:[%s2268_s25 + $0x3a8] sm:$0xff]  ;;  %v291_v6 = vld [vmem:[%s2268_s25 + $0x3b0] sm:$0xff]  ;;  %v293_v7 = vld [vmem:[%s2268_s25 + $0x3b8] sm:$0xff] }
  0x28   : > { %198 = vst [vmem:[%s2273_s26 + $0xb8] sm:$0xff] %v197_v23  ;;  %v295_v8 = vld [vmem:[%s2268_s25 + $0x3c0] sm:$0xff]  ;;  %v297_v9 = vld [vmem:[%s2268_s25 + $0x3c8] sm:$0xff]  ;;  %v299_v10 = vld [vmem:[%s2268_s25 + $0x3d0] sm:$0xff] }
  0x29   : > { %200 = vst [vmem:[%s2273_s26 + $0xc0] sm:$0xff] %v199_v24  ;;  %v301_v11 = vld [vmem:[%s2268_s25 + $0x3d8] sm:$0xff]  ;;  %v303_v12 = vld [vmem:[%s2268_s25 + $0x3e0] sm:$0xff]  ;;  %v305_v13 = vld [vmem:[%s2268_s25 + $0x3e8] sm:$0xff] }
  0x2a   : > { %202 = vst [vmem:[%s2273_s26 + $0xc8] sm:$0xff] %v201_v25  ;;  %v307_v14 = vld [vmem:[%s2268_s25 + $0x3f0] sm:$0xff]  ;;  %v309_v15 = vld [vmem:[%s2268_s25 + $0x3f8] sm:$0xff]  ;;  %v311_v16 = vld [vmem:[%s2268_s25 + $0x400] sm:$0xff] }
  0x2b   : > { %204 = vst [vmem:[%s2273_s26 + $0xd0] sm:$0xff] %v203_v26  ;;  %v313_v17 = vld [vmem:[%s2268_s25 + $0x408] sm:$0xff]  ;;  %v315_v18 = vld [vmem:[%s2268_s25 + $0x410] sm:$0xff]  ;;  %v317_v19 = vld [vmem:[%s2268_s25 + $0x418] sm:$0xff] }
  0x2c   : > { %206 = vst [vmem:[%s2273_s26 + $0xd8] sm:$0xff] %v205_v27  ;;  %v319_v20 = vld [vmem:[%s2268_s25 + $0x420] sm:$0xff]  ;;  %v321_v21 = vld [vmem:[%s2268_s25 + $0x428] sm:$0xff]  ;;  %v323_v22 = vld [vmem:[%s2268_s25 + $0x430] sm:$0xff] }
  0x2d   : > { %208 = vst [vmem:[%s2273_s26 + $0xe0] sm:$0xff] %v207_v28  ;;  %v325_v23 = vld [vmem:[%s2268_s25 + $0x438] sm:$0xff]  ;;  %v327_v24 = vld [vmem:[%s2268_s25 + $0x440] sm:$0xff]  ;;  %v329_v25 = vld [vmem:[%s2268_s25 + $0x448] sm:$0xff] }
  0x2e   : > { %210 = vst [vmem:[%s2273_s26 + $0xe8] sm:$0xff] %v209_v29  ;;  %v331_v26 = vld [vmem:[%s2268_s25 + $0x450] sm:$0xff]  ;;  %v333_v27 = vld [vmem:[%s2268_s25 + $0x458] sm:$0xff]  ;;  %v335_v28 = vld [vmem:[%s2268_s25 + $0x460] sm:$0xff] }
  0x2f   : > { %212 = vst [vmem:[%s2273_s26 + $0xf0] sm:$0xff] %v211_v30  ;;  %v337_v29 = vld [vmem:[%s2268_s25 + $0x468] sm:$0xff]  ;;  %v339_v30 = vld [vmem:[%s2268_s25 + $0x470] sm:$0xff] }
  0x30   : > { %214 = vst [vmem:[%s2273_s26 + $0xf8] sm:$0xff] %v213_v31  ;;  %v341_v31 = vld [vmem:[%s2268_s25 + $0x478] sm:$0xff] }
  0x31   : > { %216 = vst [vmem:[%s2273_s26 + $0x100] sm:$0xff] %v215_v32  ;;  %v343_v32 = vld [vmem:[%s2268_s25 + $0x600] sm:$0xff] }
  0x32   : > { %218 = vst [vmem:[%s2273_s26 + $0x108] sm:$0xff] %v217_v33  ;;  %v345_v33 = vld [vmem:[%s2268_s25 + $0x608] sm:$0xff] }
  0x33   : > { %220 = vst [vmem:[%s2273_s26 + $0x110] sm:$0xff] %v219_v34  ;;  %v347_v34 = vld [vmem:[%s2268_s25 + $0x610] sm:$0xff] }
  0x34   : > { %222 = vst [vmem:[%s2273_s26 + $0x118] sm:$0xff] %v221_v35  ;;  %v349_v35 = vld [vmem:[%s2268_s25 + $0x618] sm:$0xff] }
  0x35   : > { %224 = vst [vmem:[%s2273_s26 + $0x120] sm:$0xff] %v223_v36  ;;  %v351_v36 = vld [vmem:[%s2268_s25 + $0x620] sm:$0xff] }
  0x36   : > { %226 = vst [vmem:[%s2273_s26 + $0x128] sm:$0xff] %v225_v37  ;;  %v353_v37 = vld [vmem:[%s2268_s25 + $0x628] sm:$0xff] }
  0x37   : > { %228 = vst [vmem:[%s2273_s26 + $0x130] sm:$0xff] %v227_v38  ;;  %v355_v38 = vld [vmem:[%s2268_s25 + $0x630] sm:$0xff] }
  0x38   : > { %230 = vst [vmem:[%s2273_s26 + $0x138] sm:$0xff] %v229_v39  ;;  %v357_v39 = vld [vmem:[%s2268_s25 + $0x638] sm:$0xff] }
  0x39   : > { %232 = vst [vmem:[%s2273_s26 + $0x140] sm:$0xff] %v231_v40  ;;  %v359_v40 = vld [vmem:[%s2268_s25 + $0x640] sm:$0xff] }
  0x3a   : > { %234 = vst [vmem:[%s2273_s26 + $0x148] sm:$0xff] %v233_v41  ;;  %v361_v41 = vld [vmem:[%s2268_s25 + $0x648] sm:$0xff] }
  0x3b   : > { %236 = vst [vmem:[%s2273_s26 + $0x150] sm:$0xff] %v235_v42  ;;  %v363_v42 = vld [vmem:[%s2268_s25 + $0x650] sm:$0xff] }
  0x3c   : > { %238 = vst [vmem:[%s2273_s26 + $0x158] sm:$0xff] %v237_v43  ;;  %v365_v43 = vld [vmem:[%s2268_s25 + $0x658] sm:$0xff] }
  0x3d   : > { %240 = vst [vmem:[%s2273_s26 + $0x160] sm:$0xff] %v239_v44  ;;  %v367_v44 = vld [vmem:[%s2268_s25 + $0x660] sm:$0xff] }
  0x3e   : > { %242 = vst [vmem:[%s2273_s26 + $0x168] sm:$0xff] %v241_v45  ;;  %v369_v45 = vld [vmem:[%s2268_s25 + $0x668] sm:$0xff] }
  0x3f   : > { %244 = vst [vmem:[%s2273_s26 + $0x170] sm:$0xff] %v243_v46  ;;  %v371_v46 = vld [vmem:[%s2268_s25 + $0x670] sm:$0xff] }
  0x40   : > { %246 = vst [vmem:[%s2273_s26 + $0x178] sm:$0xff] %v245_v47  ;;  %v373_v47 = vld [vmem:[%s2268_s25 + $0x678] sm:$0xff] }
  0x41   : > { %248 = vst [vmem:[%s2273_s26 + $0x180] sm:$0xff] %v247_v48  ;;  %v375_v48 = vld [vmem:[%s2268_s25 + $0x680] sm:$0xff] }
  0x42   : > { %250 = vst [vmem:[%s2273_s26 + $0x188] sm:$0xff] %v249_v49  ;;  %v377_v49 = vld [vmem:[%s2268_s25 + $0x688] sm:$0xff] }
  0x43   : > { %252 = vst [vmem:[%s2273_s26 + $0x190] sm:$0xff] %v251_v50  ;;  %v379_v50 = vld [vmem:[%s2268_s25 + $0x690] sm:$0xff] }
  0x44   : > { %254 = vst [vmem:[%s2273_s26 + $0x198] sm:$0xff] %v253_v51  ;;  %v381_v51 = vld [vmem:[%s2268_s25 + $0x698] sm:$0xff] }
  0x45   : > { %256 = vst [vmem:[%s2273_s26 + $0x1a0] sm:$0xff] %v255_v52  ;;  %v383_v52 = vld [vmem:[%s2268_s25 + $0x6a0] sm:$0xff] }
  0x46   : > { %258 = vst [vmem:[%s2273_s26 + $0x1a8] sm:$0xff] %v257_v53  ;;  %v385_v53 = vld [vmem:[%s2268_s25 + $0x6a8] sm:$0xff] }
  0x47   : > { %260 = vst [vmem:[%s2273_s26 + $0x1b0] sm:$0xff] %v259_v54  ;;  %v387_v54 = vld [vmem:[%s2268_s25 + $0x6b0] sm:$0xff] }
  0x48   : > { %262 = vst [vmem:[%s2273_s26 + $0x1b8] sm:$0xff] %v261_v55  ;;  %v389_v55 = vld [vmem:[%s2268_s25 + $0x6b8] sm:$0xff] }
  0x49   : > { %264 = vst [vmem:[%s2273_s26 + $0x1c0] sm:$0xff] %v263_v56  ;;  %v391_v56 = vld [vmem:[%s2268_s25 + $0x6c0] sm:$0xff] }
  0x4a   : > { %266 = vst [vmem:[%s2273_s26 + $0x1c8] sm:$0xff] %v265_v57  ;;  %v393_v57 = vld [vmem:[%s2268_s25 + $0x6c8] sm:$0xff] }
  0x4b   : > { %268 = vst [vmem:[%s2273_s26 + $0x1d0] sm:$0xff] %v267_v58  ;;  %v395_v58 = vld [vmem:[%s2268_s25 + $0x6d0] sm:$0xff] }
  0x4c   : > { %270 = vst [vmem:[%s2273_s26 + $0x1d8] sm:$0xff] %v269_v59  ;;  %v397_v59 = vld [vmem:[%s2268_s25 + $0x6d8] sm:$0xff] }
  0x4d   : > { %272 = vst [vmem:[%s2273_s26 + $0x1e0] sm:$0xff] %v271_v60  ;;  %v399_v60 = vld [vmem:[%s2268_s25 + $0x6e0] sm:$0xff] }
  0x4e   : > { %274 = vst [vmem:[%s2273_s26 + $0x1e8] sm:$0xff] %v273_v61  ;;  %v401_v61 = vld [vmem:[%s2268_s25 + $0x6e8] sm:$0xff] }
  0x4f   : > { %276 = vst [vmem:[%s2273_s26 + $0x1f0] sm:$0xff] %v275_v62  ;;  %v403_v62 = vld [vmem:[%s2268_s25 + $0x6f0] sm:$0xff] }
  0x50   : > { %278 = vst [vmem:[%s2273_s26 + $0x1f8] sm:$0xff] %v277_v63  ;;  %v405_v63 = vld [vmem:[%s2268_s25 + $0x6f8] sm:$0xff] }
  0x51   : > { %280 = vst [vmem:[%s2273_s26 + $0x200] sm:$0xff] %v279_v0  ;;  %v407_v0 = vld [vmem:[%s2268_s25 + $0x700] sm:$0xff] }
  0x52   : > { %282 = vst [vmem:[%s2273_s26 + $0x208] sm:$0xff] %v281_v1  ;;  %v409_v1 = vld [vmem:[%s2268_s25 + $0x708] sm:$0xff] }
  0x53   : > { %284 = vst [vmem:[%s2273_s26 + $0x210] sm:$0xff] %v283_v2  ;;  %v411_v2 = vld [vmem:[%s2268_s25 + $0x710] sm:$0xff] }
  0x54   : > { %286 = vst [vmem:[%s2273_s26 + $0x218] sm:$0xff] %v285_v3  ;;  %v413_v3 = vld [vmem:[%s2268_s25 + $0x718] sm:$0xff] }
  0x55   : > { %288 = vst [vmem:[%s2273_s26 + $0x220] sm:$0xff] %v287_v4  ;;  %v415_v4 = vld [vmem:[%s2268_s25 + $0x720] sm:$0xff] }
  0x56   : > { %290 = vst [vmem:[%s2273_s26 + $0x228] sm:$0xff] %v289_v5  ;;  %v417_v5 = vld [vmem:[%s2268_s25 + $0x728] sm:$0xff] }
  0x57   : > { %292 = vst [vmem:[%s2273_s26 + $0x230] sm:$0xff] %v291_v6  ;;  %v419_v6 = vld [vmem:[%s2268_s25 + $0x730] sm:$0xff] }
  0x58   : > { %294 = vst [vmem:[%s2273_s26 + $0x238] sm:$0xff] %v293_v7  ;;  %v421_v7 = vld [vmem:[%s2268_s25 + $0x738] sm:$0xff] }
  0x59   : > { %296 = vst [vmem:[%s2273_s26 + $0x240] sm:$0xff] %v295_v8  ;;  %v423_v8 = vld [vmem:[%s2268_s25 + $0x740] sm:$0xff] }
  0x5a   : > { %298 = vst [vmem:[%s2273_s26 + $0x248] sm:$0xff] %v297_v9  ;;  %v425_v9 = vld [vmem:[%s2268_s25 + $0x748] sm:$0xff] }
  0x5b   : > { %300 = vst [vmem:[%s2273_s26 + $0x250] sm:$0xff] %v299_v10  ;;  %v427_v10 = vld [vmem:[%s2268_s25 + $0x750] sm:$0xff] }
  0x5c   : > { %302 = vst [vmem:[%s2273_s26 + $0x258] sm:$0xff] %v301_v11  ;;  %v429_v11 = vld [vmem:[%s2268_s25 + $0x758] sm:$0xff] }
  0x5d   : > { %304 = vst [vmem:[%s2273_s26 + $0x260] sm:$0xff] %v303_v12  ;;  %v431_v12 = vld [vmem:[%s2268_s25 + $0x760] sm:$0xff] }
  0x5e   : > { %306 = vst [vmem:[%s2273_s26 + $0x268] sm:$0xff] %v305_v13  ;;  %v433_v13 = vld [vmem:[%s2268_s25 + $0x768] sm:$0xff] }
  0x5f   : > { %308 = vst [vmem:[%s2273_s26 + $0x270] sm:$0xff] %v307_v14  ;;  %v435_v14 = vld [vmem:[%s2268_s25 + $0x770] sm:$0xff] }
  0x60   : > { %310 = vst [vmem:[%s2273_s26 + $0x278] sm:$0xff] %v309_v15  ;;  %v437_v15 = vld [vmem:[%s2268_s25 + $0x778] sm:$0xff] }
  0x61   : > { %312 = vst [vmem:[%s2273_s26 + $0x280] sm:$0xff] %v311_v16  ;;  %v439_v16 = vld [vmem:[%s2268_s25 + $0x900] sm:$0xff] }
  0x62   : > { %314 = vst [vmem:[%s2273_s26 + $0x288] sm:$0xff] %v313_v17  ;;  %v441_v17 = vld [vmem:[%s2268_s25 + $0x908] sm:$0xff] }
  0x63   : > { %316 = vst [vmem:[%s2273_s26 + $0x290] sm:$0xff] %v315_v18  ;;  %v443_v18 = vld [vmem:[%s2268_s25 + $0x910] sm:$0xff] }
  0x64   : > { %318 = vst [vmem:[%s2273_s26 + $0x298] sm:$0xff] %v317_v19  ;;  %v445_v19 = vld [vmem:[%s2268_s25 + $0x918] sm:$0xff] }
  0x65   : > { %320 = vst [vmem:[%s2273_s26 + $0x2a0] sm:$0xff] %v319_v20  ;;  %v447_v20 = vld [vmem:[%s2268_s25 + $0x920] sm:$0xff] }
  0x66   : > { %322 = vst [vmem:[%s2273_s26 + $0x2a8] sm:$0xff] %v321_v21  ;;  %v449_v21 = vld [vmem:[%s2268_s25 + $0x928] sm:$0xff] }
  0x67   : > { %324 = vst [vmem:[%s2273_s26 + $0x2b0] sm:$0xff] %v323_v22  ;;  %v451_v22 = vld [vmem:[%s2268_s25 + $0x930] sm:$0xff] }
  0x68   : > { %326 = vst [vmem:[%s2273_s26 + $0x2b8] sm:$0xff] %v325_v23  ;;  %v453_v23 = vld [vmem:[%s2268_s25 + $0x938] sm:$0xff] }
  0x69   : > { %328 = vst [vmem:[%s2273_s26 + $0x2c0] sm:$0xff] %v327_v24  ;;  %v455_v24 = vld [vmem:[%s2268_s25 + $0x940] sm:$0xff] }
  0x6a   : > { %330 = vst [vmem:[%s2273_s26 + $0x2c8] sm:$0xff] %v329_v25  ;;  %v457_v25 = vld [vmem:[%s2268_s25 + $0x948] sm:$0xff] }
  0x6b   : > { %332 = vst [vmem:[%s2273_s26 + $0x2d0] sm:$0xff] %v331_v26  ;;  %v459_v26 = vld [vmem:[%s2268_s25 + $0x950] sm:$0xff] }
  0x6c   : > { %334 = vst [vmem:[%s2273_s26 + $0x2d8] sm:$0xff] %v333_v27  ;;  %v461_v27 = vld [vmem:[%s2268_s25 + $0x958] sm:$0xff] }
  0x6d   : > { %336 = vst [vmem:[%s2273_s26 + $0x2e0] sm:$0xff] %v335_v28  ;;  %v463_v28 = vld [vmem:[%s2268_s25 + $0x960] sm:$0xff] }
  0x6e   : > { %338 = vst [vmem:[%s2273_s26 + $0x2e8] sm:$0xff] %v337_v29  ;;  %v465_v29 = vld [vmem:[%s2268_s25 + $0x968] sm:$0xff] }
  0x6f   : > { %340 = vst [vmem:[%s2273_s26 + $0x2f0] sm:$0xff] %v339_v30  ;;  %v467_v30 = vld [vmem:[%s2268_s25 + $0x970] sm:$0xff] }
  0x70   : > { %342 = vst [vmem:[%s2273_s26 + $0x2f8] sm:$0xff] %v341_v31  ;;  %v469_v31 = vld [vmem:[%s2268_s25 + $0x978] sm:$0xff] }
  0x71   : > { %344 = vst [vmem:[%s2273_s26 + $0x300] sm:$0xff] %v343_v32  ;;  %v471_v32 = vld [vmem:[%s2268_s25 + $0x980] sm:$0xff] }
  0x72   : > { %346 = vst [vmem:[%s2273_s26 + $0x308] sm:$0xff] %v345_v33  ;;  %v473_v33 = vld [vmem:[%s2268_s25 + $0x988] sm:$0xff] }
  0x73   : > { %348 = vst [vmem:[%s2273_s26 + $0x310] sm:$0xff] %v347_v34  ;;  %v475_v34 = vld [vmem:[%s2268_s25 + $0x990] sm:$0xff] }
  0x74   : > { %350 = vst [vmem:[%s2273_s26 + $0x318] sm:$0xff] %v349_v35  ;;  %v477_v35 = vld [vmem:[%s2268_s25 + $0x998] sm:$0xff] }
  0x75   : > { %352 = vst [vmem:[%s2273_s26 + $0x320] sm:$0xff] %v351_v36  ;;  %v479_v36 = vld [vmem:[%s2268_s25 + $0x9a0] sm:$0xff] }
  0x76   : > { %354 = vst [vmem:[%s2273_s26 + $0x328] sm:$0xff] %v353_v37  ;;  %v481_v37 = vld [vmem:[%s2268_s25 + $0x9a8] sm:$0xff] }
  0x77   : > { %356 = vst [vmem:[%s2273_s26 + $0x330] sm:$0xff] %v355_v38  ;;  %v483_v38 = vld [vmem:[%s2268_s25 + $0x9b0] sm:$0xff] }
  0x78   : > { %358 = vst [vmem:[%s2273_s26 + $0x338] sm:$0xff] %v357_v39  ;;  %v485_v39 = vld [vmem:[%s2268_s25 + $0x9b8] sm:$0xff] }
  0x79   : > { %360 = vst [vmem:[%s2273_s26 + $0x340] sm:$0xff] %v359_v40  ;;  %v487_v40 = vld [vmem:[%s2268_s25 + $0x9c0] sm:$0xff] }
  0x7a   : > { %362 = vst [vmem:[%s2273_s26 + $0x348] sm:$0xff] %v361_v41  ;;  %v489_v41 = vld [vmem:[%s2268_s25 + $0x9c8] sm:$0xff] }
  0x7b   : > { %364 = vst [vmem:[%s2273_s26 + $0x350] sm:$0xff] %v363_v42  ;;  %v491_v42 = vld [vmem:[%s2268_s25 + $0x9d0] sm:$0xff] }
  0x7c   : > { %366 = vst [vmem:[%s2273_s26 + $0x358] sm:$0xff] %v365_v43  ;;  %v493_v43 = vld [vmem:[%s2268_s25 + $0x9d8] sm:$0xff] }
  0x7d   : > { %368 = vst [vmem:[%s2273_s26 + $0x360] sm:$0xff] %v367_v44  ;;  %v495_v44 = vld [vmem:[%s2268_s25 + $0x9e0] sm:$0xff] }
  0x7e   : > { %370 = vst [vmem:[%s2273_s26 + $0x368] sm:$0xff] %v369_v45  ;;  %v497_v45 = vld [vmem:[%s2268_s25 + $0x9e8] sm:$0xff] }
  0x7f   : > { %372 = vst [vmem:[%s2273_s26 + $0x370] sm:$0xff] %v371_v46  ;;  %v499_v46 = vld [vmem:[%s2268_s25 + $0x9f0] sm:$0xff] }
  0x80   : > { %374 = vst [vmem:[%s2273_s26 + $0x378] sm:$0xff] %v373_v47  ;;  %v501_v47 = vld [vmem:[%s2268_s25 + $0x9f8] sm:$0xff] }
  0x81   : > { %376 = vst [vmem:[%s2273_s26 + $0x380] sm:$0xff] %v375_v48  ;;  %v503_v48 = vld [vmem:[%s2268_s25 + $0xa00] sm:$0xff] }
  0x82   : > { %378 = vst [vmem:[%s2273_s26 + $0x388] sm:$0xff] %v377_v49  ;;  %v505_v49 = vld [vmem:[%s2268_s25 + $0xa08] sm:$0xff] }
  0x83   : > { %380 = vst [vmem:[%s2273_s26 + $0x390] sm:$0xff] %v379_v50  ;;  %v507_v50 = vld [vmem:[%s2268_s25 + $0xa10] sm:$0xff] }
  0x84   : > { %382 = vst [vmem:[%s2273_s26 + $0x398] sm:$0xff] %v381_v51  ;;  %v509_v51 = vld [vmem:[%s2268_s25 + $0xa18] sm:$0xff] }
  0x85   : > { %384 = vst [vmem:[%s2273_s26 + $0x3a0] sm:$0xff] %v383_v52  ;;  %v511_v52 = vld [vmem:[%s2268_s25 + $0xa20] sm:$0xff] }
  0x86   : > { %386 = vst [vmem:[%s2273_s26 + $0x3a8] sm:$0xff] %v385_v53  ;;  %v513_v53 = vld [vmem:[%s2268_s25 + $0xa28] sm:$0xff] }
  0x87   : > { %388 = vst [vmem:[%s2273_s26 + $0x3b0] sm:$0xff] %v387_v54  ;;  %v515_v54 = vld [vmem:[%s2268_s25 + $0xa30] sm:$0xff] }
  0x88   : > { %390 = vst [vmem:[%s2273_s26 + $0x3b8] sm:$0xff] %v389_v55  ;;  %v517_v55 = vld [vmem:[%s2268_s25 + $0xa38] sm:$0xff] }
  0x89   : > { %392 = vst [vmem:[%s2273_s26 + $0x3c0] sm:$0xff] %v391_v56  ;;  %v519_v56 = vld [vmem:[%s2268_s25 + $0xa40] sm:$0xff] }
  0x8a   : > { %394 = vst [vmem:[%s2273_s26 + $0x3c8] sm:$0xff] %v393_v57  ;;  %v521_v57 = vld [vmem:[%s2268_s25 + $0xa48] sm:$0xff] }
  0x8b   : > { %396 = vst [vmem:[%s2273_s26 + $0x3d0] sm:$0xff] %v395_v58  ;;  %v523_v58 = vld [vmem:[%s2268_s25 + $0xa50] sm:$0xff] }
  0x8c   : > { %398 = vst [vmem:[%s2273_s26 + $0x3d8] sm:$0xff] %v397_v59  ;;  %v525_v59 = vld [vmem:[%s2268_s25 + $0xa58] sm:$0xff] }
  0x8d   : > { %400 = vst [vmem:[%s2273_s26 + $0x3e0] sm:$0xff] %v399_v60  ;;  %v527_v60 = vld [vmem:[%s2268_s25 + $0xa60] sm:$0xff] }
  0x8e   : > { %402 = vst [vmem:[%s2273_s26 + $0x3e8] sm:$0xff] %v401_v61  ;;  %v529_v61 = vld [vmem:[%s2268_s25 + $0xa68] sm:$0xff] }
  0x8f   : > { %404 = vst [vmem:[%s2273_s26 + $0x3f0] sm:$0xff] %v403_v62  ;;  %v531_v62 = vld [vmem:[%s2268_s25 + $0xa70] sm:$0xff] }
  0x90   : > { %406 = vst [vmem:[%s2273_s26 + $0x3f8] sm:$0xff] %v405_v63  ;;  %v533_v63 = vld [vmem:[%s2268_s25 + $0xa78] sm:$0xff] }
  0x91   : > { %408 = vst [vmem:[%s2273_s26 + $0x400] sm:$0xff] %v407_v0 }
  0x92   : > { %410 = vst [vmem:[%s2273_s26 + $0x408] sm:$0xff] %v409_v1 }
  0x93   : > { %412 = vst [vmem:[%s2273_s26 + $0x410] sm:$0xff] %v411_v2 }
  0x94   : > { %414 = vst [vmem:[%s2273_s26 + $0x418] sm:$0xff] %v413_v3 }
  0x95   : > { %416 = vst [vmem:[%s2273_s26 + $0x420] sm:$0xff] %v415_v4 }
  0x96   : > { %418 = vst [vmem:[%s2273_s26 + $0x428] sm:$0xff] %v417_v5 }
  0x97   : > { %420 = vst [vmem:[%s2273_s26 + $0x430] sm:$0xff] %v419_v6 }
  0x98   : > { %422 = vst [vmem:[%s2273_s26 + $0x438] sm:$0xff] %v421_v7 }
  0x99   : > { %424 = vst [vmem:[%s2273_s26 + $0x440] sm:$0xff] %v423_v8 }
  0x9a   : > { %426 = vst [vmem:[%s2273_s26 + $0x448] sm:$0xff] %v425_v9 }
  0x9b   : > { %428 = vst [vmem:[%s2273_s26 + $0x450] sm:$0xff] %v427_v10 }
  0x9c   : > { %430 = vst [vmem:[%s2273_s26 + $0x458] sm:$0xff] %v429_v11 }
  0x9d   : > { %432 = vst [vmem:[%s2273_s26 + $0x460] sm:$0xff] %v431_v12 }
  0x9e   : > { %434 = vst [vmem:[%s2273_s26 + $0x468] sm:$0xff] %v433_v13 }
  0x9f   : > { %436 = vst [vmem:[%s2273_s26 + $0x470] sm:$0xff] %v435_v14 }
  0xa0   : > { %438 = vst [vmem:[%s2273_s26 + $0x478] sm:$0xff] %v437_v15 }
  0xa1   : > { %440 = vst [vmem:[%s2273_s26 + $0x480] sm:$0xff] %v439_v16 }
  0xa2   : > { %442 = vst [vmem:[%s2273_s26 + $0x488] sm:$0xff] %v441_v17 }
  0xa3   : > { %444 = vst [vmem:[%s2273_s26 + $0x490] sm:$0xff] %v443_v18 }
  0xa4   : > { %446 = vst [vmem:[%s2273_s26 + $0x498] sm:$0xff] %v445_v19 }
  0xa5   : > { %448 = vst [vmem:[%s2273_s26 + $0x4a0] sm:$0xff] %v447_v20 }
  0xa6   : > { %450 = vst [vmem:[%s2273_s26 + $0x4a8] sm:$0xff] %v449_v21 }
  0xa7   : > { %452 = vst [vmem:[%s2273_s26 + $0x4b0] sm:$0xff] %v451_v22 }
  0xa8   : > { %454 = vst [vmem:[%s2273_s26 + $0x4b8] sm:$0xff] %v453_v23 }
  0xa9   : > { %456 = vst [vmem:[%s2273_s26 + $0x4c0] sm:$0xff] %v455_v24 }
  0xaa   : > { %458 = vst [vmem:[%s2273_s26 + $0x4c8] sm:$0xff] %v457_v25 }
  0xab   : > { %460 = vst [vmem:[%s2273_s26 + $0x4d0] sm:$0xff] %v459_v26 }
  0xac   : > { %462 = vst [vmem:[%s2273_s26 + $0x4d8] sm:$0xff] %v461_v27 }
  0xad   : > { %464 = vst [vmem:[%s2273_s26 + $0x4e0] sm:$0xff] %v463_v28 }
  0xae   : > { %466 = vst [vmem:[%s2273_s26 + $0x4e8] sm:$0xff] %v465_v29 }
  0xaf   : > { %468 = vst [vmem:[%s2273_s26 + $0x4f0] sm:$0xff] %v467_v30 }
  0xb0   : > { %470 = vst [vmem:[%s2273_s26 + $0x4f8] sm:$0xff] %v469_v31 }
  0xb1   : > { %472 = vst [vmem:[%s2273_s26 + $0x500] sm:$0xff] %v471_v32 }
  0xb2   : > { %474 = vst [vmem:[%s2273_s26 + $0x508] sm:$0xff] %v473_v33 }
  0xb3   : > { %476 = vst [vmem:[%s2273_s26 + $0x510] sm:$0xff] %v475_v34 }
  0xb4   : > { %478 = vst [vmem:[%s2273_s26 + $0x518] sm:$0xff] %v477_v35 }
  0xb5   : > { %480 = vst [vmem:[%s2273_s26 + $0x520] sm:$0xff] %v479_v36 }
  0xb6   : > { %482 = vst [vmem:[%s2273_s26 + $0x528] sm:$0xff] %v481_v37 }
  0xb7   : > { %484 = vst [vmem:[%s2273_s26 + $0x530] sm:$0xff] %v483_v38 }
  0xb8   : > { %486 = vst [vmem:[%s2273_s26 + $0x538] sm:$0xff] %v485_v39 }
  0xb9   : > { %488 = vst [vmem:[%s2273_s26 + $0x540] sm:$0xff] %v487_v40 }
  0xba   : > { %490 = vst [vmem:[%s2273_s26 + $0x548] sm:$0xff] %v489_v41 }
  0xbb   : > { %492 = vst [vmem:[%s2273_s26 + $0x550] sm:$0xff] %v491_v42 }
  0xbc   : > { %494 = vst [vmem:[%s2273_s26 + $0x558] sm:$0xff] %v493_v43 }
  0xbd   : > { %496 = vst [vmem:[%s2273_s26 + $0x560] sm:$0xff] %v495_v44 }
  0xbe   : > { %498 = vst [vmem:[%s2273_s26 + $0x568] sm:$0xff] %v497_v45 }
  0xbf   : > { %500 = vst [vmem:[%s2273_s26 + $0x570] sm:$0xff] %v499_v46 }
  0xc0   : > { %502 = vst [vmem:[%s2273_s26 + $0x578] sm:$0xff] %v501_v47 }
  0xc1   : > { %504 = vst [vmem:[%s2273_s26 + $0x580] sm:$0xff] %v503_v48 }
  0xc2   : > { %506 = vst [vmem:[%s2273_s26 + $0x588] sm:$0xff] %v505_v49 }
  0xc3   : > { %508 = vst [vmem:[%s2273_s26 + $0x590] sm:$0xff] %v507_v50 }
  0xc4   : > { %510 = vst [vmem:[%s2273_s26 + $0x598] sm:$0xff] %v509_v51 }
  0xc5   : > { %512 = vst [vmem:[%s2273_s26 + $0x5a0] sm:$0xff] %v511_v52 }
  0xc6   : > { %514 = vst [vmem:[%s2273_s26 + $0x5a8] sm:$0xff] %v513_v53 }
  0xc7   : > { %516 = vst [vmem:[%s2273_s26 + $0x5b0] sm:$0xff] %v515_v54 }
  0xc8   : > { %518 = vst [vmem:[%s2273_s26 + $0x5b8] sm:$0xff] %v517_v55 }
  0xc9   : > { %520 = vst [vmem:[%s2273_s26 + $0x5c0] sm:$0xff] %v519_v56 }
  0xca   : > { %522 = vst [vmem:[%s2273_s26 + $0x5c8] sm:$0xff] %v521_v57 }
  0xcb   : > { %524 = vst [vmem:[%s2273_s26 + $0x5d0] sm:$0xff] %v523_v58 }
  0xcc   : > { %526 = vst [vmem:[%s2273_s26 + $0x5d8] sm:$0xff] %v525_v59 }
  0xcd   : > { %528 = vst [vmem:[%s2273_s26 + $0x5e0] sm:$0xff] %v527_v60 }
  0xce   : > { %530 = vst [vmem:[%s2273_s26 + $0x5e8] sm:$0xff] %v529_v61 }
  0xcf   : > { %532 = vst [vmem:[%s2273_s26 + $0x5f0] sm:$0xff] %v531_v62 }
  0xd0   : > { %534 = vst [vmem:[%s2273_s26 + $0x5f8] sm:$0xff] %v533_v63 }
  0xd1 PF: > { %p1949_p5 = scmp.ge.s32.totalorder %s2212_s14, 1  ;;  %p539_p6 = scmp.lt.s32.totalorder %s2212_s14, 3 }
  0xd3   : > { %p540_p7 = pnand %p1949_p5, %p539_p6 }
  0xd4   : > { %s546_s6 = sand.u32 (!%p540_p7), 1, %s2204_s12  }
  0xd5   : > { %543 = sbr.rel (%p540_p7) target bundleno = 770 (0x302), region = 51 }
  0xd6   : > { %s2164_s11 = smul.u32 (!%p540_p7), 1536, %s546_s6 }
  0xd8   : > { %s2724_s29 = scalar_lea.vmem (!%p540_p7), [#allocation2], %s2164_s11  ;;  %s1950_s11 = sshll.u32 (!%p540_p7), %s1942_s15, 4 }
  0xd9   : > { %p571_p8 = scmp.lt.s32.totalorder (!%p540_p7), %s1950_s11, 31 }
  0xda   : > { %v2661_v0 = vld [vmem:[%s3536_s1 + $0x78] sm:$0xff]  ;;  %v2671_v2 = vld [vmem:[%s3536_s1 + $0x70] sm:$0xff]  ;;  %v2691_v5 = vld [vmem:[%s3536_s1 + $0x68] sm:$0xff]  ;;  %vm660_vm0 = vcmask 261120  }
  0xdb   : > { %v2666_v1 = vld [vmem:[%s3536_s1 + $0x118] sm:$0xff]  ;;  %709 = vmatpush.msra.mxu0 %v2661_v0  ;;  %v2684_v4 = vld [vmem:[%s3536_s1 + $0x110] sm:$0xff]  ;;  %1001 = vmatpush.msra.mxu3 %v2661_v0  ;;  %v2701_v7 = vld [vmem:[%s3536_s1 + $0x108] sm:$0xff]  ;;  %s3553_s11 = smov (!%p571_p8, %s1950_s11), 31 }
  0xdc   : > { %851 = vmatpush.msra.mxu2 %v2666_v1  ;;  %v2679_v3 = vld [vmem:[%s3536_s1 + $0xf8] sm:$0xff]  ;;  %v2696_v6 = vld [vmem:[%s3536_s1 + $0xf0] sm:$0xff]  ;;  %v2708_v8 = vld [vmem:[%s3536_s1 + $0xe8] sm:$0xff] }
  0xdd   : > { %774 = vmatpush.msra.mxu1 %v2679_v3  ;;  %710 = vmatpush.msra.mxu0 %v2671_v2  ;;  %v2715_v9 = vld [vmem:[%s3536_s1 + $0x60] sm:$0xff]  ;;  %v614_v11 = vld [vmem:[%s2724_s29 + $0x10] sm:$0xff]  ;;  %v2732_v12 = vld [vmem:[%s3536_s1 + $0x58] sm:$0xff] }
  0xde   : > { %852 = vmatpush.msra.mxu2 %v2684_v4  ;;  %1002 = vmatpush.msra.mxu3 %v2671_v2  ;;  %v2720_v10 = vld [vmem:[%s3536_s1 + $0x100] sm:$0xff]  ;;  %v2746_v14 = vld [vmem:[%s3536_s1 + $0x50] sm:$0xff]  ;;  %v2751_v15 = vld [vmem:[%s3536_s1 + $0xd8] sm:$0xff] }
  0xdf   : > { %775 = vmatpush.msra.mxu1 %v2696_v6  ;;  %711 = vmatpush.msra.mxu0 %v2691_v5  ;;  %v2737_v13 = vld [vmem:[%s3536_s1 + $0xe0] sm:$0xff]  ;;  %v2759_v16 = vld [vmem:[%s3536_s1 + $0x48] sm:$0xff]  ;;  %v2764_v17 = vld [vmem:[%s3536_s1 + $0xd0] sm:$0xff] }
  0xe0   : > { %853 = vmatpush.msra.mxu2 %v2701_v7  ;;  %1003 = vmatpush.msra.mxu3 %v2691_v5  ;;  %v2773_v18 = vld [vmem:[%s3536_s1 + $0x40] sm:$0xff]  ;;  %v2778_v19 = vld [vmem:[%s3536_s1 + $0xc8] sm:$0xff]  ;;  %v2788_v21 = vld [vmem:[%s3536_s1 + $0x38] sm:$0xff] }
  0xe1   : > { %776 = vmatpush.msra.mxu1 %v2708_v8  ;;  %712 = vmatpush.msra.mxu0 %v2715_v9  ;;  %v617_v20 = vld [vmem:[%s2724_s29 + $0x28] sm:$0xff]  ;;  %v2793_v22 = vld [vmem:[%s3536_s1 + $0xc0] sm:$0xff]  ;;  %v2803_v23 = vld [vmem:[%s3536_s1 + $0x30] sm:$0xff] }
  0xe2   : > { %854 = vmatpush.msra.mxu2 %v2720_v10  ;;  %1004 = vmatpush.msra.mxu3 %v2715_v9  ;;  %v2808_v24 = vld [vmem:[%s3536_s1 + $0xb8] sm:$0xff]  ;;  %v2816_v25 = vld [vmem:[%s3536_s1 + $0x28] sm:$0xff]  ;;  %v2821_v26 = vld [vmem:[%s3536_s1 + $0xb0] sm:$0xff] }
  0xe3   : > { %1952 = vmatmul.msk.f32.vlgmr.msra.gmra.mxu2 %vm660_vm0, %v614_v11  ;;  %713 = vmatpush.msra.mxu0 %v2732_v12  ;;  %v2830_v27 = vld [vmem:[%s3536_s1 + $0x20] sm:$0xff]  ;;  %v2835_v28 = vld [vmem:[%s3536_s1 + $0xa8] sm:$0xff]  ;;  %v2845_v30 = vld [vmem:[%s3536_s1 + $0x18] sm:$0xff] }
  0xe4   : > { %777 = vmatpush.msra.mxu1 %v2737_v13  ;;  %1005 = vmatpush.msra.mxu3 %v2732_v12  ;;  %v620_v29 = vld [vmem:[%s2724_s29 + $0x40] sm:$0xff]  ;;  %v2860_v32 = vld [vmem:[%s3536_s1 + $0x10] sm:$0xff]  ;;  %v2865_v33 = vld [vmem:[%s3536_s1 + $0x98] sm:$0xff] }
  0xe5   : > { %1066 = vmatpush.msrb.mxu2 %v2679_v3  ;;  %714 = vmatpush.msra.mxu0 %v2746_v14  ;;  %v2850_v31 = vld [vmem:[%s3536_s1 + $0xa0] sm:$0xff]  ;;  %v2873_v34 = vld [vmem:[%s3536_s1 + $0x8] sm:$0xff]  ;;  %v2878_v35 = vld [vmem:[%s3536_s1 + $0x90] sm:$0xff] }
  0xe6   : > { %778 = vmatpush.msra.mxu1 %v2751_v15  ;;  %1006 = vmatpush.msra.mxu3 %v2746_v14  ;;  %v2887_v36 = vld [vmem:[%s3536_s1] sm:$0xff]  ;;  %v2892_v37 = vld [vmem:[%s3536_s1 + $0x88] sm:$0xff]  ;;  %v623_v39 = vld [vmem:[%s2724_s29 + $0x58] sm:$0xff] }
  0xe7   : > { %1067 = vmatpush.msrb.mxu2 %v2696_v6  ;;  %715 = vmatpush.msra.mxu0 %v2759_v16  ;;  %v612_v38 = vld [vmem:[%s2724_s29] sm:$0xff]  ;;  %v613_v42 = vld [vmem:[%s2724_s29 + $0x8] sm:$0xff]  ;;  %v615_v43 = vld [vmem:[%s2724_s29 + $0x18] sm:$0xff] }
  0xe8   : > { %779 = vmatpush.msra.mxu1 %v2764_v17  ;;  %1007 = vmatpush.msra.mxu3 %v2759_v16  ;;  %v1968_v40 = vld [vmem:[%s2724_s29 + $0x180] sm:$0xff]  ;;  %v626_v44 = vld [vmem:[%s2724_s29 + $0x70] sm:$0xff]  ;;  %v1971_v45 = vld [vmem:[%s2724_s29 + $0x198] sm:$0xff] }
  0xe9   : > { %1068 = vmatpush.msrb.mxu2 %v2708_v8  ;;  %716 = vmatpush.msra.mxu0 %v2773_v18  ;;  %v2907_v41 = vld [vmem:[%s3536_s1 + $0x80] sm:$0xff]  ;;  %v618_v47 = vld [vmem:[%s2724_s29 + $0x30] sm:$0xff]  ;;  %v629_v48 = vld [vmem:[%s2724_s29 + $0x88] sm:$0xff] }
  0xea   : > { %780 = vmatpush.msra.mxu1 %v2778_v19  ;;  %1008 = vmatpush.msra.mxu3 %v2773_v18  ;;  %v616_v46 = vld [vmem:[%s2724_s29 + $0x20] sm:$0xff]  ;;  %v1974_v49 = vld [vmem:[%s2724_s29 + $0x1b0] sm:$0xff]  ;;  %v619_v50 = vld [vmem:[%s2724_s29 + $0x38] sm:$0xff] }
  0xeb   : > { %1953 = vmatmul.msk.f32.gmra.mxu2 %vm660_vm0, %v617_v20  ;;  %717 = vmatpush.msra.mxu0 %v2788_v21  ;;  %v621_v51 = vld [vmem:[%s2724_s29 + $0x48] sm:$0xff]  ;;  %v632_v52 = vld [vmem:[%s2724_s29 + $0xa0] sm:$0xff]  ;;  %v622_v54 = vld [vmem:[%s2724_s29 + $0x50] sm:$0xff] }
  0xec   : > { %781 = vmatpush.msra.mxu1 %v2793_v22  ;;  %1009 = vmatpush.msra.mxu3 %v2788_v21  ;;  %v1977_v53 = vld [vmem:[%s2724_s29 + $0x1c8] sm:$0xff]  ;;  %v624_v55 = vld [vmem:[%s2724_s29 + $0x60] sm:$0xff]  ;;  %v635_v56 = vld [vmem:[%s2724_s29 + $0xb8] sm:$0xff] }
  0xed   : > { %1069 = vmatpush.msrb.mxu2 %v2737_v13  ;;  %718 = vmatpush.msra.mxu0 %v2803_v23  ;;  %v1980_v57 = vld [vmem:[%s2724_s29 + $0x1e0] sm:$0xff]  ;;  %v625_v58 = vld [vmem:[%s2724_s29 + $0x68] sm:$0xff]  ;;  %v627_v59 = vld [vmem:[%s2724_s29 + $0x78] sm:$0xff] }
  0xee   : > { %782 = vmatpush.msra.mxu1 %v2808_v24  ;;  %1010 = vmatpush.msra.mxu3 %v2803_v23  ;;  %v638_v60 = vld [vmem:[%s2724_s29 + $0xd0] sm:$0xff]  ;;  %v1983_v61 = vld [vmem:[%s2724_s29 + $0x1f8] sm:$0xff]  ;;  %v628_v62 = vld [vmem:[%s2724_s29 + $0x80] sm:$0xff] }
  0xef   : > { %1070 = vmatpush.msrb.mxu2 %v2751_v15  ;;  %719 = vmatpush.msra.mxu0 %v2816_v25  ;;  %v630_v63 = vld [vmem:[%s2724_s29 + $0x90] sm:$0xff]  ;;  %v639_v11 = vld [vmem:[%s2724_s29 + $0xd8] sm:$0xff]  ;;  %v656_v20 = vld [vmem:[%s2724_s29 + $0x160] sm:$0xff] }
  0xf0   : > { %783 = vmatpush.msra.mxu1 %v2821_v26  ;;  %1011 = vmatpush.msra.mxu3 %v2816_v25 }
  0xf1   : > { %1071 = vmatpush.msrb.mxu2 %v2764_v17  ;;  %720 = vmatpush.msra.mxu0 %v2830_v27 }
  0xf2   : > { %784 = vmatpush.msra.mxu1 %v2835_v28  ;;  %1012 = vmatpush.msra.mxu3 %v2830_v27 }
  0xf3   : > { %1954 = vmatmul.msk.f32.gmra.mxu2 %vm660_vm0, %v620_v29  ;;  %721 = vmatpush.msra.mxu0 %v2845_v30  ;;  %v1969_v29 = vld [vmem:[%s2724_s29 + $0x188] sm:$0xff] }
  0xf4   : > { %785 = vmatpush.msra.mxu1 %v2850_v31  ;;  %1013 = vmatpush.msra.mxu3 %v2845_v30 }
  0xf5   : > { %1072 = vmatpush.msrb.mxu2 %v2778_v19  ;;  %722 = vmatpush.msra.mxu0 %v2860_v32 }
  0xf6   : > { %786 = vmatpush.msra.mxu1 %v2865_v33  ;;  %1014 = vmatpush.msra.mxu3 %v2860_v32 }
  0xf7   : > { %1073 = vmatpush.msrb.mxu2 %v2793_v22  ;;  %723 = vmatpush.msra.mxu0 %v2873_v34 }
  0xf8   : > { %787 = vmatpush.msra.mxu1 %v2878_v35  ;;  %1015 = vmatpush.msra.mxu3 %v2873_v34 }
  0xf9   : > { %1074 = vmatpush.msrb.mxu2 %v2808_v24  ;;  %724 = vmatpush.msra.mxu0 %v2887_v36 }
  0xfa   : > { %788 = vmatpush.msra.mxu1 %v2892_v37  ;;  %1016 = vmatpush.msra.mxu3 %v2887_v36 }
  0xfb   : > { %725 = vmatmul.f32.vlgmr.msra.gmra.mxu0 %v612_v38  ;;  %1955 = vmatmul.msk.f32.gmra.mxu2 %vm660_vm0, %v623_v39  ;;  %v2013_v38 = vld [vmem:[%s2724_s29 + $0x2e8] sm:$0xff]  ;;  %v1975_v39 = vld [vmem:[%s2724_s29 + $0x1b8] sm:$0xff] }
  0xfc   : > { %1017 = vmatmul.f32.vlgmr.msra.gmra.mxu3 %v1968_v40  ;;  %789 = vmatpush.msra.mxu1 %v2907_v41  ;;  %v658_v40 = vld [vmem:[%s2724_s29 + $0x170] sm:$0xff] }
  0xfd   : > { %1374 = vmatpush.msrb.mxu3 %v2679_v3  ;;  %790 = vmatmul.f32.vlgmr.msra.gmra.mxu1 %v613_v42 }
  0xfe   : > { %1143 = vmatpush.msrb.mxu0 %v2666_v1  ;;  %1309 = vmatpush.msrb.mxu1 %v2661_v0 }
  0xff   : > { %1375 = vmatpush.msrb.mxu3 %v2696_v6  ;;  %1075 = vmatpush.msrb.mxu2 %v2821_v26 }
 0x100   : > { %1144 = vmatpush.msrb.mxu0 %v2684_v4  ;;  %1310 = vmatpush.msrb.mxu1 %v2671_v2 }
 0x101   : > { %1376 = vmatpush.msrb.mxu3 %v2708_v8  ;;  %1076 = vmatpush.msrb.mxu2 %v2835_v28 }
 0x102   : > { %1145 = vmatpush.msrb.mxu0 %v2701_v7  ;;  %1311 = vmatpush.msrb.mxu1 %v2691_v5 }
 0x103   : > { %728 = vmatmul.f32.gmra.mxu0 %v615_v43  ;;  %1956 = vmatmul.msk.f32.gmra.mxu2 %vm660_vm0, %v626_v44  ;;  %v1970_v43 = vld [vmem:[%s2724_s29 + $0x190] sm:$0xff] }
 0x104   : > { %1020 = vmatmul.f32.gmra.mxu3 %v1971_v45  ;;  %1312 = vmatpush.msrb.mxu1 %v2715_v9  ;;  %v1978_v44 = vld [vmem:[%s2724_s29 + $0x1d0] sm:$0xff]  ;;  %v2033_v45 = vld [vmem:[%s2724_s29 + $0x308] sm:$0xff] }
 0x105   : > { %1377 = vmatpush.msrb.mxu3 %v2737_v13  ;;  %793 = vmatmul.f32.gmra.mxu1 %v616_v46 }
 0x106   : > { %1077 = vmatpush.msrb.mxu2 %v2850_v31  ;;  %1313 = vmatpush.msrb.mxu1 %v2732_v12 }
 0x107   : > { %1378 = vmatpush.msrb.mxu3 %v2751_v15  ;;  %1146 = vmatpush.msrb.mxu0 %v2720_v10 }
 0x108   : > { %1078 = vmatpush.msrb.mxu2 %v2865_v33  ;;  %1314 = vmatpush.msrb.mxu1 %v2746_v14 }
 0x109   : > { %1379 = vmatpush.msrb.mxu3 %v2764_v17  ;;  %1617 = vmatpush.msra.mxu0 %v2661_v0  ;;  %v641_v0 = vld [vmem:[%s2724_s29 + $0xe8] sm:$0xff] }
 0x10a   : > { %1079 = vmatpush.msrb.mxu2 %v2878_v35  ;;  %1315 = vmatpush.msrb.mxu1 %v2759_v16 }
 0x10b   : > { %731 = vmatmul.f32.gmra.mxu0 %v618_v47  ;;  %1380 = vmatpush.msrb.mxu3 %v2778_v19  ;;  %v2032_v47 = vld [vmem:[%s2724_s29 + $0x300] sm:$0xff] }
 0x10c   : > { %1957 = vmatmul.msk.f32.gmra.mxu2 %vm660_vm0, %v629_v48  ;;  %1023 = vmatmul.f32.gmra.mxu3 %v1974_v49 }
 0x10d   : > { %1381 = vmatpush.msrb.mxu3 %v2793_v22  ;;  %796 = vmatmul.f32.gmra.mxu1 %v619_v50 }
 0x10e   : > { %1080 = vmatpush.msrb.mxu2 %v2892_v37  ;;  %1316 = vmatpush.msrb.mxu1 %v2773_v18 }
 0x10f   : > { %1382 = vmatpush.msrb.mxu3 %v2808_v24  ;;  %1618 = vmatpush.msra.mxu0 %v2671_v2  ;;  %v631_v2 = vld [vmem:[%s2724_s29 + $0x98] sm:$0xff] }
 0x110   : > { %1081 = vmatpush.msrb.mxu2 %v2907_v41  ;;  %1317 = vmatpush.msrb.mxu1 %v2788_v21 }
 0x111   : > { %1383 = vmatpush.msrb.mxu3 %v2821_v26  ;;  %1619 = vmatpush.msra.mxu0 %v2691_v5  ;;  %v1989_v5 = vld [vmem:[%s2724_s29 + $0x228] sm:$0xff] }
 0x112   : > { %1451 = vmatpush.msra.mxu2 %v2666_v1  ;;  %1318 = vmatpush.msrb.mxu1 %v2803_v23 }
 0x113   : > { %734 = vmatmul.f32.gmra.mxu0 %v621_v51  ;;  %1384 = vmatpush.msrb.mxu3 %v2835_v28 }
 0x114   : > { %1958 = vmatmul.msk.f32.gmra.mxu2 %vm660_vm0, %v632_v52  ;;  %1026 = vmatmul.f32.gmra.mxu3 %v1977_v53  ;;  %v1973_v53 = vld [vmem:[%s2724_s29 + $0x1a8] sm:$0xff] }
 0x115   : > { %1319 = vmatpush.msrb.mxu1 %v2816_v25  ;;  %1620 = vmatpush.msra.mxu0 %v2715_v9  ;;  %v1992_v9 = vld [vmem:[%s2724_s29 + $0x240] sm:$0xff] }
 0x116   : > { %799 = vmatmul.f32.gmra.mxu1 %v622_v54  ;;  %1385 = vmatpush.msrb.mxu3 %v2850_v31  ;;  %v1981_v54 = vld [vmem:[%s2724_s29 + $0x1e8] sm:$0xff] }
 0x117   : > { %1320 = vmatpush.msrb.mxu1 %v2830_v27  ;;  %1452 = vmatpush.msra.mxu2 %v2684_v4 }
 0x118   : > { %1621 = vmatpush.msra.mxu0 %v2732_v12  ;;  %1386 = vmatpush.msrb.mxu3 %v2865_v33  ;;  %v650_v12 = vld [vmem:[%s2724_s29 + $0x130] sm:$0xff] }
 0x119   : > { %1321 = vmatpush.msrb.mxu1 %v2845_v30  ;;  %1453 = vmatpush.msra.mxu2 %v2701_v7 }
 0x11a   : > { %1622 = vmatpush.msra.mxu0 %v2746_v14  ;;  %1387 = vmatpush.msrb.mxu3 %v2878_v35  ;;  %v640_v14 = vld [vmem:[%s2724_s29 + $0xe0] sm:$0xff] }
 0x11b   : > { %737 = vmatmul.f32.gmra.mxu0 %v624_v55  ;;  %1322 = vmatpush.msrb.mxu1 %v2860_v32  ;;  %v2036_v55 = vld [vmem:[%s2724_s29 + $0x320] sm:$0xff] }
 0x11c   : > { %1959 = vmatmul.msk.f32.gmra.mxu2 %vm660_vm0, %v635_v56  ;;  %1029 = vmatmul.f32.gmra.mxu3 %v1980_v57  ;;  %v2035_v57 = vld [vmem:[%s2724_s29 + $0x318] sm:$0xff] }
 0x11d   : > { %1388 = vmatpush.msrb.mxu3 %v2892_v37  ;;  %1623 = vmatpush.msra.mxu0 %v2759_v16  ;;  %v653_v16 = vld [vmem:[%s2724_s29 + $0x148] sm:$0xff] }
 0x11e   : > { %802 = vmatmul.f32.gmra.mxu1 %v625_v58  ;;  %1454 = vmatpush.msra.mxu2 %v2720_v10 }
 0x11f   : > { %1323 = vmatpush.msrb.mxu1 %v2873_v34  ;;  %1389 = vmatpush.msrb.mxu3 %v2907_v41 }
 0x120   : > { %1624 = vmatpush.msra.mxu0 %v2773_v18  ;;  %v643_v18 = vld [vmem:[%s2724_s29 + $0xf8] sm:$0xff] }
 0x121   : > { %1759 = vmatpush.msra.mxu3 %v2666_v1  ;;  %1324 = vmatpush.msrb.mxu1 %v2887_v36  ;;  %v1986_v1 = vld [vmem:[%s2724_s29 + $0x210] sm:$0xff] }
 0x122   : > { %1625 = vmatpush.msra.mxu0 %v2788_v21  ;;  %v2001_v21 = vld [vmem:[%s2724_s29 + $0x288] sm:$0xff] }
 0x123   : > { %1682 = vmatpush.msra.mxu1 %v2679_v3  ;;  %1760 = vmatpush.msra.mxu3 %v2684_v4  ;;  %v633_v3 = vld [vmem:[%s2724_s29 + $0xa8] sm:$0xff]  ;;  %v644_v4 = vld [vmem:[%s2724_s29 + $0x100] sm:$0xff] }
 0x124   : > { %740 = vmatmul.f32.gmra.mxu0 %v627_v59  ;;  %1960 = vmatmul.msk.f32.gmra.mxu2 %vm660_vm0, %v638_v60 }
 0x125   : > { %1032 = vmatmul.f32.gmra.mxu3 %v1983_v61  ;;  %1683 = vmatpush.msra.mxu1 %v2696_v6  ;;  %v634_v6 = vld [vmem:[%s2724_s29 + $0xb0] sm:$0xff] }
 0x126   : > { %1761 = vmatpush.msra.mxu3 %v2701_v7  ;;  %805 = vmatmul.f32.gmra.mxu1 %v628_v62  ;;  %v636_v7 = vld [vmem:[%s2724_s29 + $0xc0] sm:$0xff] }
 0x127   : > { %1684 = vmatpush.msra.mxu1 %v2708_v8  ;;  %1626 = vmatpush.msra.mxu0 %v2803_v23  ;;  %v647_v8 = vld [vmem:[%s2724_s29 + $0x118] sm:$0xff]  ;;  %v648_v23 = vld [vmem:[%s2724_s29 + $0x120] sm:$0xff] }
 0x128   : > { %1762 = vmatpush.msra.mxu3 %v2720_v10  ;;  %v637_v10 = vld [vmem:[%s2724_s29 + $0xc8] sm:$0xff] }
 0x129   : > { %1685 = vmatpush.msra.mxu1 %v2737_v13  ;;  %1627 = vmatpush.msra.mxu0 %v2816_v25  ;;  %v1995_v13 = vld [vmem:[%s2724_s29 + $0x258] sm:$0xff]  ;;  %v2004_v25 = vld [vmem:[%s2724_s29 + $0x2a0] sm:$0xff] }
 0x12b   : > { %1686 = vmatpush.msra.mxu1 %v2751_v15  ;;  %1628 = vmatpush.msra.mxu0 %v2830_v27  ;;  %v642_v15 = vld [vmem:[%s2724_s29 + $0xf0] sm:$0xff]  ;;  %v651_v27 = vld [vmem:[%s2724_s29 + $0x138] sm:$0xff] }
 0x12c   : > { %743 = vmatmul.f32.gmra.mxu0 %v630_v63  ;;  %1961 = vmatmul.msk.f32.gmra.mxu2 %vm660_vm0, %v641_v0  ;;  %v1976_v63 = vld [vmem:[%s2724_s29 + $0x1c0] sm:$0xff] }
 0x12d   : > { %1035 = vmatmul.f32.gmra.mxu3 %v1986_v1  ;;  %1687 = vmatpush.msra.mxu1 %v2764_v17  ;;  %v1998_v17 = vld [vmem:[%s2724_s29 + $0x270] sm:$0xff]  ;;  %v1984_v0 = vld [vmem:[%s2724_s29 + $0x200] sm:$0xff]  ;;  %v2039_v1 = vld [vmem:[%s2724_s29 + $0x338] sm:$0xff] }
 0x12e   : > { %808 = vmatmul.f32.gmra.mxu1 %v631_v2  ;;  %1629 = vmatpush.msra.mxu0 %v2845_v30  ;;  %v652_v30 = vld [vmem:[%s2724_s29 + $0x140] sm:$0xff] }
 0x12f   : > { %1688 = vmatpush.msra.mxu1 %v2778_v19  ;;  %v645_v19 = vld [vmem:[%s2724_s29 + $0x108] sm:$0xff] }
 0x130   : > { %1630 = vmatpush.msra.mxu0 %v2860_v32  ;;  %v654_v32 = vld [vmem:[%s2724_s29 + $0x150] sm:$0xff] }
 0x131   : > { %1689 = vmatpush.msra.mxu1 %v2793_v22  ;;  %v646_v22 = vld [vmem:[%s2724_s29 + $0x110] sm:$0xff] }
 0x132   : > { %1631 = vmatpush.msra.mxu0 %v2873_v34  ;;  %v1972_v34 = vld [vmem:[%s2724_s29 + $0x1a0] sm:$0xff] }
 0x133   : > { %1690 = vmatpush.msra.mxu1 %v2808_v24  ;;  %v659_v24 = vld [vmem:[%s2724_s29 + $0x178] sm:$0xff] }
 0x134   : > { %746 = vmatmul.f32.gmra.mxu0 %v633_v3  ;;  %1962 = vmatmul.msk.f32.gmra.mxu2 %vm660_vm0, %v644_v4  ;;  %v2038_v3 = vld [vmem:[%s2724_s29 + $0x330] sm:$0xff] }
 0x135   : > { %1038 = vmatmul.f32.gmra.mxu3 %v1989_v5  ;;  %1691 = vmatpush.msra.mxu1 %v2821_v26  ;;  %v649_v26 = vld [vmem:[%s2724_s29 + $0x128] sm:$0xff] }
 0x136   : > { %811 = vmatmul.f32.gmra.mxu1 %v634_v6  ;;  %1632 = vmatpush.msra.mxu0 %v2887_v36 }
 0x137   : > { %1692 = vmatpush.msra.mxu1 %v2835_v28  ;;  %v2007_v28 = vld [vmem:[%s2724_s29 + $0x2b8] sm:$0xff] }
 0x139   : > { %1693 = vmatpush.msra.mxu1 %v2850_v31 }
 0x13b   : > { %1694 = vmatpush.msra.mxu1 %v2865_v33  ;;  %v2010_v33 = vld [vmem:[%s2724_s29 + $0x2d0] sm:$0xff] }
 0x13c   : > { %749 = vmatmul.f32.gmra.mxu0 %v636_v7  ;;  %1963 = vmatmul.msk.f32.gmra.mxu2 %vm660_vm0, %v647_v8 }
 0x13d   : > { %1041 = vmatmul.f32.gmra.mxu3 %v1992_v9  ;;  %1695 = vmatpush.msra.mxu1 %v2878_v35  ;;  %v655_v35 = vld [vmem:[%s2724_s29 + $0x158] sm:$0xff] }
 0x13e   : > { %814 = vmatmul.f32.gmra.mxu1 %v637_v10  ;;  %v1979_v9 = vld [vmem:[%s2724_s29 + $0x1d8] sm:$0xff] }
 0x13f   : > { %1696 = vmatpush.msra.mxu1 %v2892_v37  ;;  %v657_v37 = vld [vmem:[%s2724_s29 + $0x168] sm:$0xff]  ;;  %v1987_v10 = vld [vmem:[%s2724_s29 + $0x218] sm:$0xff] }
 0x141   : > { %1697 = vmatpush.msra.mxu1 %v2907_v41 }
 0x144   : > { %752 = vmatmul.f32.gmra.mxu0 %v639_v11  ;;  %1964 = vmatmul.msk.f32.gmra.mxu2 %vm660_vm0, %v650_v12  ;;  %v2042_v11 = vld [vmem:[%s2724_s29 + $0x350] sm:$0xff] }
 0x145   : > { %1044 = vmatmul.f32.gmra.mxu3 %v1995_v13  ;;  %v2041_v13 = vld [vmem:[%s2724_s29 + $0x348] sm:$0xff] }
 0x146   : > { %817 = vmatmul.f32.gmra.mxu1 %v640_v14 }
 0x14c   : > { %755 = vmatmul.f32.gmra.mxu0 %v642_v15  ;;  %1965 = vmatmul.msk.f32.gmra.mxu2 %vm660_vm0, %v653_v16 }
 0x14d   : > { %1047 = vmatmul.f32.gmra.mxu3 %v1998_v17 }
 0x14e   : > { %820 = vmatmul.f32.gmra.mxu1 %v643_v18 }
 0x154   : > { %758 = vmatmul.f32.gmra.mxu0 %v645_v19  ;;  %1966 = vmatmul.msk.f32.gmra.mxu2 %vm660_vm0, %v656_v20  ;;  %v1982_v19 = vld [vmem:[%s2724_s29 + $0x1f0] sm:$0xff] }
 0x155   : > { %1050 = vmatmul.f32.gmra.mxu3 %v2001_v21  ;;  %v1990_v20 = vld [vmem:[%s2724_s29 + $0x230] sm:$0xff]  ;;  %v2045_v21 = vld [vmem:[%s2724_s29 + $0x368] sm:$0xff] }
 0x156   : > { %823 = vmatmul.f32.gmra.mxu1 %v646_v22 }
 0x15c   : > { %761 = vmatmul.f32.gmra.mxu0 %v648_v23  ;;  %1967 = vmatmul.msk.f32.gmra.mxu2 %vm660_vm0, %v659_v24  ;;  %v2044_v23 = vld [vmem:[%s2724_s29 + $0x360] sm:$0xff] }
 0x15d   : > { %1053 = vmatmul.f32.gmra.mxu3 %v2004_v25 }
 0x15e   : > { %826 = vmatmul.f32.gmra.mxu1 %v649_v26 }
 0x164   : > { %764 = vmatmul.f32.gmra.mxu0 %v651_v27  ;;  %1082 = vmatmul.f32.vlgmr.msrb.gmra.mxu2 %v1969_v29  ;;  %v1985_v29 = vld [vmem:[%s2724_s29 + $0x208] sm:$0xff] }
 0x165   : > { %1056 = vmatmul.f32.gmra.mxu3 %v2007_v28 }
 0x166   : > { %829 = vmatmul.f32.gmra.mxu1 %v652_v30  ;;  %v856_v31 = vpop.f32.mrf.mxu2  ;;  %v1993_v30 = vld [vmem:[%s2724_s29 + $0x248] sm:$0xff] }
 0x16c   : > { %767 = vmatmul.f32.gmra.mxu0 %v654_v32  ;;  %1085 = vmatmul.f32.gmra.mxu2 %v1972_v34 }
 0x16d   : > { %1059 = vmatmul.f32.gmra.mxu3 %v2010_v33  ;;  %v2047_v33 = vld [vmem:[%s2724_s29 + $0x378] sm:$0xff] }
 0x16e   : > { %832 = vmatmul.f32.gmra.mxu1 %v655_v35  ;;  %v859_v36 = vpop.f32.mrf.mxu2 }
 0x174   : > { %770 = vmatmul.f32.gmra.mxu0 %v657_v37  ;;  %1088 = vmatmul.f32.gmra.mxu2 %v1975_v39  ;;  %v1988_v39 = vld [vmem:[%s2724_s29 + $0x220] sm:$0xff] }
 0x175   : > { %1062 = vmatmul.f32.gmra.mxu3 %v2013_v38 }
 0x176   : > { %835 = vmatmul.f32.gmra.mxu1 %v658_v40  ;;  %v862_v41 = vpop.f32.mrf.mxu2  ;;  %v1996_v40 = vld [vmem:[%s2724_s29 + $0x260] sm:$0xff] }
 0x178   : > { %v726_v42 = vpop.f32.mrf.mxu0 }
 0x17a   : > { %v791_v46 = vpop.f32.mrf.mxu1 }
 0x17b   : > { %v792_v48 = vadd.f32 %v791_v46, %v726_v42 }
 0x17c   : > { %2016 = vmatmul.msk.f32.vlgmr.msrb.gmra.mxu0 %vm660_vm0, %v1970_v43  ;;  %1091 = vmatmul.f32.gmra.mxu2 %v1978_v44  ;;  %v2050_v43 = vld [vmem:[%s2724_s29 + $0x390] sm:$0xff] }
 0x17d   : > { %1390 = vmatmul.f32.vlgmr.msrb.gmra.mxu3 %v2033_v45  ;;  %v3073_v49 = vadd.f32 %v856_v31, %v792_v48  ;;  %v2048_v31 = vld [vmem:[%s2724_s29 + $0x380] sm:$0xff] }
 0x17e   : > { %1325 = vmatmul.f32.vlgmr.msrb.gmra.mxu1 %v2032_v47  ;;  %v865_v50 = vpop.f32.mrf.mxu2 }
 0x17f   : > { %v3075_v51 = vpop.f32.mrf.mxu3 }
 0x180   : > { %v729_v52 = vpop.f32.mrf.mxu0 }
 0x182   : > { %v794_v56 = vpop.f32.mrf.mxu1 }
 0x183   : > { %v795_v58 = vadd.f32 %v794_v56, %v729_v52  ;;  %v1999_v52 = vld [vmem:[%s2724_s29 + $0x278] sm:$0xff] }
 0x184   : > { %2017 = vmatmul.msk.f32.gmra.mxu0 %vm660_vm0, %v1973_v53  ;;  %1094 = vmatmul.f32.gmra.mxu2 %v1981_v54  ;;  %v2054_v53 = vld [vmem:[%s2724_s29 + $0x3b0] sm:$0xff] }
 0x185   : > { %1393 = vmatmul.f32.gmra.mxu3 %v2036_v55  ;;  %v3082_v59 = vadd.f32 %v859_v36, %v795_v58  ;;  %v2053_v55 = vld [vmem:[%s2724_s29 + $0x3a8] sm:$0xff] }
 0x186   : > { %1328 = vmatmul.f32.gmra.mxu1 %v2035_v57  ;;  %v868_v60 = vpop.f32.mrf.mxu2 }
 0x187   : > { %v3084_v61 = vpop.f32.mrf.mxu3 }
 0x188   : > { %v732_v62 = vpop.f32.mrf.mxu0 }
 0x18a   : > { %v797_v2 = vpop.f32.mrf.mxu1 }
 0x18b   : > { %v798_v4 = vadd.f32 %v797_v2, %v732_v62 }
 0x18c   : > { %2018 = vmatmul.msk.f32.gmra.mxu0 %vm660_vm0, %v1976_v63  ;;  %1097 = vmatmul.f32.gmra.mxu2 %v1984_v0  ;;  %v1994_v63 = vld [vmem:[%s2724_s29 + $0x250] sm:$0xff] }
 0x18d   : > { %1396 = vmatmul.f32.gmra.mxu3 %v2039_v1  ;;  %v3091_v5 = vadd.f32 %v862_v41, %v798_v4  ;;  %v2051_v41 = vld [vmem:[%s2724_s29 + $0x398] sm:$0xff]  ;;  %v2002_v0 = vld [vmem:[%s2724_s29 + $0x290] sm:$0xff]  ;;  %v2057_v1 = vld [vmem:[%s2724_s29 + $0x3c8] sm:$0xff] }
 0x18e   : > { %1331 = vmatmul.f32.gmra.mxu1 %v2038_v3  ;;  %v2056_v3 = vld [vmem:[%s2724_s29 + $0x3c0] sm:$0xff] }
 0x18f   : > { %v871_v6 = vpop.f32.mrf.mxu2  ;;  %v3093_v7 = vpop.f32.mrf.mxu3 }
 0x190   : > { %v735_v8 = vpop.f32.mrf.mxu0 }
 0x193   : > { %v800_v12 = vpop.f32.mrf.mxu1 }
 0x194   : > { %2019 = vmatmul.msk.f32.gmra.mxu0 %vm660_vm0, %v1979_v9  ;;  %v801_v14 = vadd.f32 %v800_v12, %v735_v8  ;;  %1100 = vmatmul.f32.gmra.mxu2 %v1987_v10  ;;  %v2005_v12 = vld [vmem:[%s2724_s29 + $0x2a8] sm:$0xff] }
 0x195   : > { %1399 = vmatmul.f32.gmra.mxu3 %v2042_v11  ;;  %v1997_v11 = vld [vmem:[%s2724_s29 + $0x268] sm:$0xff] }
 0x196   : > { %v3100_v15 = vadd.f32 %v865_v50, %v801_v14  ;;  %1334 = vmatmul.f32.gmra.mxu1 %v2041_v13  ;;  %v1991_v50 = vld [vmem:[%s2724_s29 + $0x238] sm:$0xff]  ;;  %v2060_v13 = vld [vmem:[%s2724_s29 + $0x3e0] sm:$0xff] }
 0x197   : > { %v874_v16 = vpop.f32.mrf.mxu2  ;;  %v3102_v17 = vpop.f32.mrf.mxu3 }
 0x198   : > { %v738_v18 = vpop.f32.mrf.mxu0 }
 0x19b   : > { %v803_v22 = vpop.f32.mrf.mxu1 }
 0x19c   : > { %2020 = vmatmul.msk.f32.gmra.mxu0 %vm660_vm0, %v1982_v19  ;;  %v804_v24 = vadd.f32 %v803_v22, %v738_v18  ;;  %1103 = vmatmul.f32.gmra.mxu2 %v1990_v20 }
 0x19d   : > { %1402 = vmatmul.f32.gmra.mxu3 %v2045_v21 }
 0x19e   : > { %v3109_v25 = vadd.f32 %v868_v60, %v804_v24  ;;  %1337 = vmatmul.f32.gmra.mxu1 %v2044_v23  ;;  %v2000_v23 = vld [vmem:[%s2724_s29 + $0x280] sm:$0xff] }
 0x19f   : > { %v877_v26 = vpop.f32.mrf.mxu2  ;;  %v3111_v27 = vpop.f32.mrf.mxu3  ;;  %v2008_v24 = vld [vmem:[%s2724_s29 + $0x2c0] sm:$0xff] }
 0x1a1   : > { %v741_v28 = vpop.f32.mrf.mxu0 }
 0x1a3   : > { %v806_v32 = vpop.f32.mrf.mxu1 }
 0x1a4   : > { %2021 = vmatmul.msk.f32.gmra.mxu0 %vm660_vm0, %v1985_v29  ;;  %v807_v34 = vadd.f32 %v806_v32, %v741_v28  ;;  %1106 = vmatmul.f32.gmra.mxu2 %v1993_v30  ;;  %v2062_v29 = vld [vmem:[%s2724_s29 + $0x3f0] sm:$0xff] }
 0x1a5   : > { %1405 = vmatmul.f32.gmra.mxu3 %v2048_v31 }
 0x1a6   : > { %v3118_v35 = vadd.f32 %v871_v6, %v807_v34  ;;  %1340 = vmatmul.f32.gmra.mxu1 %v2047_v33 }
 0x1a7   : > { %v880_v36 = vpop.f32.mrf.mxu2 }
 0x1a8   : > { %v3120_v37 = vpop.f32.mrf.mxu3 }
 0x1a9   : > { %v744_v38 = vpop.f32.mrf.mxu0 }
 0x1ab   : > { %v809_v42 = vpop.f32.mrf.mxu1 }
 0x1ac   : > { %2022 = vmatmul.msk.f32.gmra.mxu0 %vm660_vm0, %v1988_v39  ;;  %v810_v44 = vadd.f32 %v809_v42, %v744_v38  ;;  %1109 = vmatmul.f32.gmra.mxu2 %v1996_v40  ;;  %v2011_v38 = vld [vmem:[%s2724_s29 + $0x2d8] sm:$0xff]  ;;  %v2066_v39 = vld [vmem:[%s2724_s29 + $0x410] sm:$0xff] }
 0x1ad   : > { %1408 = vmatmul.f32.gmra.mxu3 %v2051_v41  ;;  %v2065_v41 = vld [vmem:[%s2724_s29 + $0x408] sm:$0xff] }
 0x1ae   : > { %v3127_v45 = vadd.f32 %v874_v16, %v810_v44  ;;  %1343 = vmatmul.f32.gmra.mxu1 %v2050_v43  ;;  %v2059_v16 = vld [vmem:[%s2724_s29 + $0x3d8] sm:$0xff] }
 0x1af   : > { %v883_v46 = vpop.f32.mrf.mxu2 }
 0x1b0   : > { %v3129_v47 = vpop.f32.mrf.mxu3 }
 0x1b1   : > { %v747_v48 = vpop.f32.mrf.mxu0 }
 0x1b3   : > { %v812_v54 = vpop.f32.mrf.mxu1 }
 0x1b4   : > { %2023 = vmatmul.msk.f32.gmra.mxu0 %vm660_vm0, %v1991_v50  ;;  %v813_v56 = vadd.f32 %v812_v54, %v747_v48  ;;  %1112 = vmatmul.f32.gmra.mxu2 %v1999_v52  ;;  %v2006_v50 = vld [vmem:[%s2724_s29 + $0x2b0] sm:$0xff] }
 0x1b5   : > { %1411 = vmatmul.f32.gmra.mxu3 %v2054_v53  ;;  %v2014_v52 = vld [vmem:[%s2724_s29 + $0x2f0] sm:$0xff]  ;;  %v2069_v53 = vld [vmem:[%s2724_s29 + $0x428] sm:$0xff] }
 0x1b6   : > { %v3136_v57 = vadd.f32 %v877_v26, %v813_v56  ;;  %1346 = vmatmul.f32.gmra.mxu1 %v2053_v55  ;;  %v2063_v26 = vld [vmem:[%s2724_s29 + $0x3f8] sm:$0xff]  ;;  %v2068_v55 = vld [vmem:[%s2724_s29 + $0x420] sm:$0xff] }
 0x1b7   : > { %v886_v58 = vpop.f32.mrf.mxu2 }
 0x1b8   : > { %v3138_v60 = vpop.f32.mrf.mxu3 }
 0x1b9   : > { %v750_v62 = vpop.f32.mrf.mxu0 }
 0x1bb   : > { %v815_v2 = vpop.f32.mrf.mxu1 }
 0x1bc   : > { %2024 = vmatmul.msk.f32.gmra.mxu0 %vm660_vm0, %v1994_v63  ;;  %v816_v4 = vadd.f32 %v815_v2, %v750_v62  ;;  %1115 = vmatmul.f32.gmra.mxu2 %v2002_v0  ;;  %v2072_v2 = vld [vmem:[%s2724_s29 + $0x440] sm:$0xff] }
 0x1bd   : > { %1414 = vmatmul.f32.gmra.mxu3 %v2057_v1  ;;  %v2009_v1 = vld [vmem:[%s2724_s29 + $0x2c8] sm:$0xff] }
 0x1be   : > { %v3145_v6 = vadd.f32 %v880_v36, %v816_v4  ;;  %1349 = vmatmul.f32.gmra.mxu1 %v2056_v3  ;;  %v2003_v36 = vld [vmem:[%s2724_s29 + $0x298] sm:$0xff]  ;;  %v2034_v3 = vld [vmem:[%s2724_s29 + $0x310] sm:$0xff] }
 0x1bf   : > { %v889_v8 = vpop.f32.mrf.mxu2 }
 0x1c0   : > { %v3147_v9 = vpop.f32.mrf.mxu3 }
 0x1c1   : > { %v753_v10 = vpop.f32.mrf.mxu0 }
 0x1c3   : > { %v818_v14 = vpop.f32.mrf.mxu1 }
 0x1c4   : > { %2025 = vmatmul.msk.f32.gmra.mxu0 %vm660_vm0, %v1997_v11  ;;  %v819_v18 = vadd.f32 %v818_v14, %v753_v10  ;;  %1118 = vmatmul.f32.gmra.mxu2 %v2005_v12 }
 0x1c5   : > { %1417 = vmatmul.f32.gmra.mxu3 %v2060_v13 }
 0x1c6   : > { %v3154_v19 = vadd.f32 %v883_v46, %v819_v18  ;;  %1352 = vmatmul.f32.gmra.mxu1 %v2059_v16  ;;  %v2012_v16 = vld [vmem:[%s2724_s29 + $0x2e0] sm:$0xff]  ;;  %v2075_v18 = vld [vmem:[%s2724_s29 + $0x458] sm:$0xff] }
 0x1c7   : > { %v892_v20 = vpop.f32.mrf.mxu2 }
 0x1c8   : > { %v3156_v21 = vpop.f32.mrf.mxu3 }
 0x1c9   : > { %v756_v22 = vpop.f32.mrf.mxu0 }
 0x1cb   : > { %v821_v28 = vpop.f32.mrf.mxu1 }
 0x1cc   : > { %2026 = vmatmul.msk.f32.gmra.mxu0 %vm660_vm0, %v2000_v23  ;;  %v822_v30 = vadd.f32 %v821_v28, %v756_v22  ;;  %1121 = vmatmul.f32.gmra.mxu2 %v2008_v24  ;;  %v2074_v23 = vld [vmem:[%s2724_s29 + $0x450] sm:$0xff] }
 0x1cd   : > { %1420 = vmatmul.f32.gmra.mxu3 %v2063_v26 }
 0x1ce   : > { %v3163_v31 = vadd.f32 %v886_v58, %v822_v30  ;;  %1355 = vmatmul.f32.gmra.mxu1 %v2062_v29 }
 0x1cf   : > { %v895_v32 = vpop.f32.mrf.mxu2 }
 0x1d0   : > { %v3165_v33 = vpop.f32.mrf.mxu3 }
 0x1d1   : > { %v759_v34 = vpop.f32.mrf.mxu0 }
 0x1d3   : > { %v824_v40 = vpop.f32.mrf.mxu1 }
 0x1d4   : > { %2027 = vmatmul.msk.f32.gmra.mxu0 %vm660_vm0, %v2003_v36  ;;  %v825_v42 = vadd.f32 %v824_v40, %v759_v34  ;;  %1124 = vmatmul.f32.gmra.mxu2 %v2011_v38  ;;  %v2078_v34 = vld [vmem:[%s2724_s29 + $0x470] sm:$0xff]  ;;  %v2040_v36 = vld [vmem:[%s2724_s29 + $0x340] sm:$0xff] }
 0x1d5   : > { %1423 = vmatmul.f32.gmra.mxu3 %v2066_v39  ;;  %v2077_v39 = vld [vmem:[%s2724_s29 + $0x468] sm:$0xff] }
 0x1d6   : > { %v3172_v43 = vadd.f32 %v889_v8, %v825_v42  ;;  %1358 = vmatmul.f32.gmra.mxu1 %v2065_v41  ;;  %v2071_v8 = vld [vmem:[%s2724_s29 + $0x438] sm:$0xff] }
 0x1d7   : > { %v898_v44 = vpop.f32.mrf.mxu2 }
 0x1d8   : > { %v3174_v46 = vpop.f32.mrf.mxu3 }
 0x1d9   : > { %v762_v48 = vpop.f32.mrf.mxu0 }
 0x1db   : > { %v827_v54 = vpop.f32.mrf.mxu1 }
 0x1dc   : > { %2028 = vmatmul.msk.f32.gmra.mxu0 %vm660_vm0, %v2006_v50  ;;  %v828_v56 = vadd.f32 %v827_v54, %v762_v48  ;;  %1127 = vmatmul.f32.gmra.mxu2 %v2014_v52  ;;  %v2096_v52 = vld [vmem:[%s2724_s29 + $0x480] sm:$0xff]  ;;  %v2043_v54 = vld [vmem:[%s2724_s29 + $0x358] sm:$0xff] }
 0x1dd   : > { %1426 = vmatmul.f32.gmra.mxu3 %v2069_v53 }
 0x1de   : > { %v3181_v58 = vadd.f32 %v892_v20, %v828_v56  ;;  %1361 = vmatmul.f32.gmra.mxu1 %v2068_v55  ;;  %v2037_v20 = vld [vmem:[%s2724_s29 + $0x328] sm:$0xff]  ;;  %v2098_v55 = vld [vmem:[%s2724_s29 + $0x490] sm:$0xff] }
 0x1df   : > { %v901_v62 = vpop.f32.mrf.mxu2 }
 0x1e0   : > { %v3183_v63 = vpop.f32.mrf.mxu3 }
 0x1e1   : > { %v765_v0 = vpop.f32.mrf.mxu0 }
 0x1e3   : > { %v830_v4 = vpop.f32.mrf.mxu1 }
 0x1e4   : > { %2029 = vmatmul.msk.f32.gmra.mxu0 %vm660_vm0, %v2009_v1  ;;  %v831_v10 = vadd.f32 %v830_v4, %v765_v0  ;;  %2080 = vmatmul.msk.f32.vlgmr.msra.gmra.mxu2 %vm660_vm0, %v2034_v3  ;;  %v2097_v0 = vld [vmem:[%s2724_s29 + $0x488] sm:$0xff] }
 0x1e5   : > { %1429 = vmatmul.f32.gmra.mxu3 %v2072_v2 }
 0x1e6   : > { %v3191_v11 = vadd.f32 %v895_v32, %v831_v10  ;;  %1364 = vmatmul.f32.gmra.mxu1 %v2071_v8  ;;  %v2015_v32 = vld [vmem:[%s2724_s29 + $0x2f8] sm:$0xff] }
 0x1e7   : > { %v1083_v13 = vpop.f32.mrf.mxu2  ;;  %v2099_v8 = vld [vmem:[%s2724_s29 + $0x498] sm:$0xff] }
 0x1e8   : > { %v3193_v12 = vpop.f32.mrf.mxu3  ;;  %v1084_v42 = vadd.f32 %v1083_v13, %v3075_v51  ;;  %v2046_v13 = vld [vmem:[%s2724_s29 + $0x370] sm:$0xff] }
 0x1e9   : > { %v768_v14 = vpop.f32.mrf.mxu0 }
 0x1eb   : > { %v833_v22 = vpop.f32.mrf.mxu1 }
 0x1ec   : > { %2030 = vmatmul.msk.f32.gmra.mxu0 %vm660_vm0, %v2012_v16  ;;  %v834_v24 = vadd.f32 %v833_v22, %v768_v14  ;;  %2081 = vmatmul.msk.f32.gmra.mxu2 %vm660_vm0, %v2037_v20  ;;  %v2101_v14 = vld [vmem:[%s2724_s29 + $0x4a8] sm:$0xff]  ;;  %v2100_v20 = vld [vmem:[%s2724_s29 + $0x4a0] sm:$0xff] }
 0x1ed   : > { %1432 = vmatmul.f32.gmra.mxu3 %v2075_v18 }
 0x1ee   : > { %v3201_v26 = vadd.f32 %v898_v44, %v834_v24  ;;  %1367 = vmatmul.f32.gmra.mxu1 %v2074_v23 }
 0x1ef   : > { %v1086_v29 = vpop.f32.mrf.mxu2 }
 0x1f0   : > { %v3203_v28 = vpop.f32.mrf.mxu3  ;;  %v1087_v51 = vadd.f32 %v1086_v29, %v3084_v61 }
 0x1f1   : > { %v771_v30 = vpop.f32.mrf.mxu0 }
 0x1f3   : > { %v836_v38 = vpop.f32.mrf.mxu1 }
 0x1f4   : > { %2031 = vmatmul.msk.f32.gmra.mxu0 %vm660_vm0, %v2015_v32  ;;  %v837_v40 = vadd.f32 %v836_v38, %v771_v30  ;;  %2082 = vmatmul.msk.f32.gmra.mxu2 %vm660_vm0, %v2040_v36  ;;  %v2102_v30 = vld [vmem:[%s2724_s29 + $0x4b0] sm:$0xff]  ;;  %v2104_v36 = vld [vmem:[%s2724_s29 + $0x4c0] sm:$0xff] }
 0x1f5   : > { %1435 = vmatmul.f32.gmra.mxu3 %v2078_v34  ;;  %v2049_v34 = vld [vmem:[%s2724_s29 + $0x388] sm:$0xff] }
 0x1f6   : > { %v3211_v41 = vadd.f32 %v901_v62, %v837_v40  ;;  %1370 = vmatmul.f32.gmra.mxu1 %v2077_v39  ;;  %v2103_v40 = vld [vmem:[%s2724_s29 + $0x4b8] sm:$0xff] }
 0x1f7   : > { %v1089_v48 = vpop.f32.mrf.mxu2 }
 0x1f8   : > { %v3214_v44 = vpop.f32.mrf.mxu3  ;;  %v1090_v61 = vadd.f32 %v1089_v48, %v3093_v7 }
 0x1f9   : > { %v1148_v50 = vpop.f32.mrf.mxu0 }
 0x1fa   : > { %v3217_v53 = vadd.f32 %v1148_v50, %v1084_v42 }
 0x1fb   : > { %v1326_v62 = vpop.f32.mrf.mxu1 }
 0x1fc   : > { %v1196_v56 = vmax.f32 %v3073_v49, %v3217_v53  ;;  %1633 = vmatmul.f32.vlgmr.msra.gmra.mxu0 %v2096_v52  ;;  %2083 = vmatmul.msk.f32.gmra.mxu2 %vm660_vm0, %v2043_v54  ;;  %v2105_v54 = vld [vmem:[%s2724_s29 + $0x4c8] sm:$0xff] }
 0x1fd   : > { %2144 = vmatmul.msk.f32.vlgmr.msra.gmra.mxu3 %vm660_vm0, %v2098_v55 }
 0x1fe   : > { %1698 = vmatmul.f32.vlgmr.msra.gmra.mxu1 %v2097_v0  ;;  %v2107_v0 = vld [vmem:[%s2724_s29 + $0x4d8] sm:$0xff] }
 0x1ff   : > { %v1092_v1 = vpop.f32.mrf.mxu2 }
 0x200   : > { %v1391_v2 = vpop.f32.mrf.mxu3  ;;  %v1093_v7 = vadd.f32 %v1092_v1, %v3102_v17 }
 0x201   : > { %v3227_v3 = vadd.f32 %v1391_v2, %v1326_v62  ;;  %v1151_v4 = vpop.f32.mrf.mxu0  ;;  %v2052_v62 = vld [vmem:[%s2724_s29 + $0x3a0] sm:$0xff] }
 0x202   : > { %v3230_v10 = vadd.f32 %v1151_v4, %v1087_v51  ;;  %v2106_v4 = vld [vmem:[%s2724_s29 + $0x4d0] sm:$0xff] }
 0x203   : > { %v1329_v18 = vpop.f32.mrf.mxu1 }
 0x204   : > { %v1197_v16 = vmax.f32 %v3082_v59, %v3230_v10  ;;  %1636 = vmatmul.f32.gmra.mxu0 %v2099_v8  ;;  %2084 = vmatmul.msk.f32.gmra.mxu2 %vm660_vm0, %v2046_v13 }
 0x205   : > { %2145 = vmatmul.msk.f32.gmra.mxu3 %vm660_vm0, %v2101_v14 }
 0x206   : > { %1701 = vmatmul.f32.gmra.mxu1 %v2100_v20 }
 0x207   : > { %v1095_v22 = vpop.f32.mrf.mxu2 }
 0x208   : > { %v1394_v23 = vpop.f32.mrf.mxu3  ;;  %v1096_v17 = vadd.f32 %v1095_v22, %v3111_v27 }
 0x209   : > { %v3240_v24 = vadd.f32 %v1394_v23, %v1329_v18  ;;  %v1154_v29 = vpop.f32.mrf.mxu0  ;;  %v2108_v18 = vld [vmem:[%s2724_s29 + $0x4e0] sm:$0xff]  ;;  %v2110_v23 = vld [vmem:[%s2724_s29 + $0x4f0] sm:$0xff] }
 0x20a   : > { %v3243_v32 = vadd.f32 %v1154_v29, %v1090_v61  ;;  %v2055_v61 = vld [vmem:[%s2724_s29 + $0x3b8] sm:$0xff] }
 0x20b   : > { %v1332_v39 = vpop.f32.mrf.mxu1 }
 0x20c   : > { %v1198_v38 = vmax.f32 %v3091_v5, %v3243_v32  ;;  %1639 = vmatmul.f32.gmra.mxu0 %v2102_v30  ;;  %2085 = vmatmul.msk.f32.gmra.mxu2 %vm660_vm0, %v2049_v34  ;;  %v2109_v34 = vld [vmem:[%s2724_s29 + $0x4e8] sm:$0xff] }
 0x20d   : > { %2146 = vmatmul.msk.f32.gmra.mxu3 %vm660_vm0, %v2104_v36 }
 0x20e   : > { %1704 = vmatmul.f32.gmra.mxu1 %v2103_v40 }
 0x20f   : > { %v1098_v42 = vpop.f32.mrf.mxu2 }
 0x210   : > { %v1397_v48 = vpop.f32.mrf.mxu3  ;;  %v1099_v27 = vadd.f32 %v1098_v42, %v3120_v37 }
 0x211   : > { %v3253_v50 = vadd.f32 %v1397_v48, %v1332_v39  ;;  %v1157_v52 = vpop.f32.mrf.mxu0 }
 0x212   : > { %v3256_v55 = vadd.f32 %v1157_v52, %v1093_v7  ;;  %v2111_v7 = vld [vmem:[%s2724_s29 + $0x4f8] sm:$0xff]  ;;  %v2058_v52 = vld [vmem:[%s2724_s29 + $0x3d0] sm:$0xff] }
 0x213   : > { %v1335_v2 = vpop.f32.mrf.mxu1 }
 0x214   : > { %v1199_v51 = vmax.f32 %v3100_v15, %v3256_v55  ;;  %1642 = vmatmul.f32.gmra.mxu0 %v2105_v54  ;;  %2086 = vmatmul.msk.f32.gmra.mxu2 %vm660_vm0, %v2052_v62  ;;  %v2113_v54 = vld [vmem:[%s2724_s29 + $0x508] sm:$0xff] }
 0x215   : > { %2147 = vmatmul.msk.f32.gmra.mxu3 %vm660_vm0, %v2107_v0 }
 0x216   : > { %1707 = vmatmul.f32.gmra.mxu1 %v2106_v4 }
 0x217   : > { %v1101_v1 = vpop.f32.mrf.mxu2 }
 0x218   : > { %v1400_v8 = vpop.f32.mrf.mxu3  ;;  %v1102_v37 = vadd.f32 %v1101_v1, %v3129_v47 }
 0x219   : > { %v3266_v13 = vadd.f32 %v1400_v8, %v1335_v2  ;;  %v1160_v14 = vpop.f32.mrf.mxu0  ;;  %v2112_v2 = vld [vmem:[%s2724_s29 + $0x500] sm:$0xff] }
 0x21a   : > { %v3269_v20 = vadd.f32 %v1160_v14, %v1096_v17  ;;  %v2114_v14 = vld [vmem:[%s2724_s29 + $0x510] sm:$0xff] }
 0x21b   : > { %v1338_v30 = vpop.f32.mrf.mxu1 }
 0x21c   : > { %1645 = vmatmul.f32.gmra.mxu0 %v2108_v18  ;;  %2087 = vmatmul.msk.f32.gmra.mxu2 %vm660_vm0, %v2055_v61  ;;  %v2061_v61 = vld [vmem:[%s2724_s29 + $0x3e8] sm:$0xff] }
 0x21d   : > { %2148 = vmatmul.msk.f32.gmra.mxu3 %vm660_vm0, %v2110_v23  ;;  %v2116_v23 = vld [vmem:[%s2724_s29 + $0x520] sm:$0xff] }
 0x21e   : > { %1710 = vmatmul.f32.gmra.mxu1 %v2109_v34 }
 0x21f   : > { %v1104_v22 = vpop.f32.mrf.mxu2 }
 0x220   : > { %v1403_v36 = vpop.f32.mrf.mxu3  ;;  %v1105_v47 = vadd.f32 %v1104_v22, %v3138_v60 }
 0x221   : > { %v3279_v39 = vadd.f32 %v1403_v36, %v1338_v30  ;;  %v1163_v40 = vpop.f32.mrf.mxu0 }
 0x222   : > { %v3282_v48 = vadd.f32 %v1163_v40, %v1099_v27  ;;  %v2115_v27 = vld [vmem:[%s2724_s29 + $0x518] sm:$0xff] }
 0x223   : > { %v1341_v0 = vpop.f32.mrf.mxu1 }
 0x224   : > { %1648 = vmatmul.f32.gmra.mxu0 %v2111_v7  ;;  %2088 = vmatmul.msk.f32.gmra.mxu2 %vm660_vm0, %v2058_v52  ;;  %v2117_v52 = vld [vmem:[%s2724_s29 + $0x528] sm:$0xff] }
 0x225   : > { %2149 = vmatmul.msk.f32.gmra.mxu3 %vm660_vm0, %v2113_v54 }
 0x226   : > { %1713 = vmatmul.f32.gmra.mxu1 %v2112_v2  ;;  %v2119_v2 = vld [vmem:[%s2724_s29 + $0x538] sm:$0xff] }
 0x227   : > { %v1107_v42 = vpop.f32.mrf.mxu2 }
 0x228   : > { %v1406_v4 = vpop.f32.mrf.mxu3  ;;  %v1108_v60 = vadd.f32 %v1107_v42, %v3147_v9 }
 0x229   : > { %v3292_v17 = vadd.f32 %v1406_v4, %v1341_v0  ;;  %v1166_v8 = vpop.f32.mrf.mxu0  ;;  %v2064_v0 = vld [vmem:[%s2724_s29 + $0x400] sm:$0xff] }
 0x22a   : > { %v3295_v18 = vadd.f32 %v1166_v8, %v1102_v37  ;;  %v2118_v8 = vld [vmem:[%s2724_s29 + $0x530] sm:$0xff] }
 0x22b   : > { %v1344_v34 = vpop.f32.mrf.mxu1 }
 0x22c   : > { %1651 = vmatmul.f32.gmra.mxu0 %v2114_v14  ;;  %2089 = vmatmul.msk.f32.gmra.mxu2 %vm660_vm0, %v2061_v61 }
 0x22d   : > { %2150 = vmatmul.msk.f32.gmra.mxu3 %vm660_vm0, %v2116_v23 }
 0x22e   : > { %1716 = vmatmul.f32.gmra.mxu1 %v2115_v27 }
 0x22f   : > { %v1110_v1 = vpop.f32.mrf.mxu2 }
 0x230   : > { %v1409_v36 = vpop.f32.mrf.mxu3  ;;  %v1111_v9 = vadd.f32 %v1110_v1, %v3156_v21 }
 0x231   : > { %v3305_v40 = vadd.f32 %v1409_v36, %v1344_v34  ;;  %v1169_v7 = vpop.f32.mrf.mxu0  ;;  %v2120_v34 = vld [vmem:[%s2724_s29 + $0x540] sm:$0xff]  ;;  %v2122_v36 = vld [vmem:[%s2724_s29 + $0x550] sm:$0xff] }
 0x232   : > { %v3308_v54 = vadd.f32 %v1169_v7, %v1105_v47  ;;  %v2067_v47 = vld [vmem:[%s2724_s29 + $0x418] sm:$0xff] }
 0x233   : > { %v1347_v4 = vpop.f32.mrf.mxu1 }
 0x234   : > { %1654 = vmatmul.f32.gmra.mxu0 %v2117_v52  ;;  %2090 = vmatmul.msk.f32.gmra.mxu2 %vm660_vm0, %v2064_v0  ;;  %v2121_v0 = vld [vmem:[%s2724_s29 + $0x548] sm:$0xff] }
 0x235   : > { %2151 = vmatmul.msk.f32.gmra.mxu3 %vm660_vm0, %v2119_v2 }
 0x236   : > { %1719 = vmatmul.f32.gmra.mxu1 %v2118_v8 }
 0x237   : > { %v1113_v22 = vpop.f32.mrf.mxu2 }
 0x238   : > { %v1412_v14 = vpop.f32.mrf.mxu3  ;;  %v1114_v21 = vadd.f32 %v1113_v22, %v3165_v33 }
 0x239   : > { %v3318_v61 = vadd.f32 %v1412_v14, %v1347_v4  ;;  %v1172_v23 = vpop.f32.mrf.mxu0 }
 0x23a   : > { %v3321_v27 = vadd.f32 %v1172_v23, %v1108_v60  ;;  %v2123_v60 = vld [vmem:[%s2724_s29 + $0x558] sm:$0xff]  ;;  %v2070_v23 = vld [vmem:[%s2724_s29 + $0x430] sm:$0xff] }
 0x23b   : > { %v1350_v52 = vpop.f32.mrf.mxu1 }
 0x23c   : > { %1657 = vmatmul.f32.gmra.mxu0 %v2120_v34  ;;  %2091 = vmatmul.msk.f32.gmra.mxu2 %vm660_vm0, %v2067_v47  ;;  %v2125_v34 = vld [vmem:[%s2724_s29 + $0x568] sm:$0xff] }
 0x23d   : > { %2152 = vmatmul.msk.f32.gmra.mxu3 %vm660_vm0, %v2122_v36  ;;  %v2073_v47 = vld [vmem:[%s2724_s29 + $0x448] sm:$0xff] }
 0x23e   : > { %1722 = vmatmul.f32.gmra.mxu1 %v2121_v0  ;;  %v2124_v0 = vld [vmem:[%s2724_s29 + $0x560] sm:$0xff] }
 0x23f   : > { %v1116_v42 = vpop.f32.mrf.mxu2 }
 0x240   : > { %v1415_v2 = vpop.f32.mrf.mxu3  ;;  %v1117_v33 = vadd.f32 %v1116_v42, %v3174_v46 }
 0x241   : > { %v3331_v4 = vadd.f32 %v1415_v2, %v1350_v52  ;;  %v1175_v8 = vpop.f32.mrf.mxu0 }
 0x242   : > { %v3334_v14 = vadd.f32 %v1175_v8, %v1111_v9  ;;  %v2126_v8 = vld [vmem:[%s2724_s29 + $0x570] sm:$0xff] }
 0x243   : > { %v1353_v36 = vpop.f32.mrf.mxu1 }
 0x244   : > { %1660 = vmatmul.f32.gmra.mxu0 %v2123_v60  ;;  %2092 = vmatmul.msk.f32.gmra.mxu2 %vm660_vm0, %v2070_v23  ;;  %v2128_v60 = vld [vmem:[%s2724_s29 + $0x580] sm:$0xff] }
 0x245   : > { %2153 = vmatmul.msk.f32.gmra.mxu3 %vm660_vm0, %v2125_v34  ;;  %v2076_v23 = vld [vmem:[%s2724_s29 + $0x460] sm:$0xff] }
 0x246   : > { %1725 = vmatmul.f32.gmra.mxu1 %v2124_v0  ;;  %v2127_v0 = vld [vmem:[%s2724_s29 + $0x578] sm:$0xff] }
 0x247   : > { %v1119_v1 = vpop.f32.mrf.mxu2 }
 0x248   : > { %v1418_v52 = vpop.f32.mrf.mxu3  ;;  %v1120_v46 = vadd.f32 %v1119_v1, %v3183_v63 }
 0x249   : > { %v3344_v9 = vadd.f32 %v1418_v52, %v1353_v36  ;;  %v1178_v2 = vpop.f32.mrf.mxu0 }
 0x24a   : > { %v3347_v7 = vadd.f32 %v1178_v2, %v1114_v21  ;;  %v2129_v2 = vld [vmem:[%s2724_s29 + $0x588] sm:$0xff] }
 0x24b   : > { %v1356_v34 = vpop.f32.mrf.mxu1 }
 0x24c   : > { %1663 = vmatmul.f32.gmra.mxu0 %v2126_v8  ;;  %2093 = vmatmul.msk.f32.gmra.mxu2 %vm660_vm0, %v2073_v47  ;;  %v2131_v8 = vld [vmem:[%s2724_s29 + $0x598] sm:$0xff] }
 0x24d   : > { %2154 = vmatmul.msk.f32.gmra.mxu3 %vm660_vm0, %v2128_v60  ;;  %v2079_v47 = vld [vmem:[%s2724_s29 + $0x478] sm:$0xff] }
 0x24e   : > { %1728 = vmatmul.f32.gmra.mxu1 %v2127_v0  ;;  %v2130_v0 = vld [vmem:[%s2724_s29 + $0x590] sm:$0xff] }
 0x24f   : > { %v1122_v22 = vpop.f32.mrf.mxu2 }
 0x250   : > { %v1421_v36 = vpop.f32.mrf.mxu3  ;;  %v1123_v63 = vadd.f32 %v1122_v22, %v3193_v12 }
 0x251   : > { %v3357_v21 = vadd.f32 %v1421_v36, %v1356_v34  ;;  %v1181_v52 = vpop.f32.mrf.mxu0 }
 0x252   : > { %v3360_v37 = vadd.f32 %v1181_v52, %v1117_v33  ;;  %v2132_v52 = vld [vmem:[%s2724_s29 + $0x5a0] sm:$0xff] }
 0x253   : > { %v1359_v60 = vpop.f32.mrf.mxu1 }
 0x254   : > { %1666 = vmatmul.f32.gmra.mxu0 %v2129_v2  ;;  %2094 = vmatmul.msk.f32.gmra.mxu2 %vm660_vm0, %v2076_v23  ;;  %v2134_v2 = vld [vmem:[%s2724_s29 + $0x5b0] sm:$0xff]  ;;  %v2140_v23 = vld [vmem:[%s2724_s29 + $0x5e0] sm:$0xff] }
 0x255   : > { %2155 = vmatmul.msk.f32.gmra.mxu3 %vm660_vm0, %v2131_v8  ;;  %v2133_v8 = vld [vmem:[%s2724_s29 + $0x5a8] sm:$0xff] }
 0x256   : > { %1731 = vmatmul.f32.gmra.mxu1 %v2130_v0 }
 0x257   : > { %v1125_v42 = vpop.f32.mrf.mxu2 }
 0x258   : > { %v1424_v34 = vpop.f32.mrf.mxu3  ;;  %v1126_v12 = vadd.f32 %v1125_v42, %v3203_v28 }
 0x259   : > { %v3370_v33 = vadd.f32 %v1424_v34, %v1359_v60  ;;  %v1184_v36 = vpop.f32.mrf.mxu0  ;;  %v2135_v34 = vld [vmem:[%s2724_s29 + $0x5b8] sm:$0xff] }
 0x25a   : > { %v3373_v30 = vadd.f32 %v1184_v36, %v1120_v46 }
 0x25b   : > { %v1362_v62 = vpop.f32.mrf.mxu1 }
 0x25c   : > { %1669 = vmatmul.f32.gmra.mxu0 %v2132_v52  ;;  %2095 = vmatmul.msk.f32.gmra.mxu2 %vm660_vm0, %v2079_v47  ;;  %v2137_v52 = vld [vmem:[%s2724_s29 + $0x5c8] sm:$0xff] }
 0x25d   : > { %2156 = vmatmul.msk.f32.gmra.mxu3 %vm660_vm0, %v2134_v2  ;;  %v2136_v2 = vld [vmem:[%s2724_s29 + $0x5c0] sm:$0xff] }
 0x25e   : > { %1734 = vmatmul.f32.gmra.mxu1 %v2133_v8 }
 0x25f   : > { %v1128_v1 = vpop.f32.mrf.mxu2 }
 0x260   : > { %v1427_v60 = vpop.f32.mrf.mxu3 }
 0x261   : > { %v3383_v0 = vadd.f32 %v1427_v60, %v1362_v62  ;;  %v1187_v46 = vpop.f32.mrf.mxu0 }
 0x262   : > { %v3386_v36 = vadd.f32 %v1187_v46, %v1123_v63  ;;  %v2138_v46 = vld [vmem:[%s2724_s29 + $0x5d0] sm:$0xff] }
 0x263   : > { %v1365_v47 = vpop.f32.mrf.mxu1 }
 0x264   : > { %1672 = vmatmul.f32.gmra.mxu0 %v2135_v34 }
 0x265   : > { %2157 = vmatmul.msk.f32.gmra.mxu3 %vm660_vm0, %v2137_v52  ;;  %v2139_v52 = vld [vmem:[%s2724_s29 + $0x5d8] sm:$0xff] }
 0x266   : > { %1737 = vmatmul.f32.gmra.mxu1 %v2136_v2 }
 0x267   : > { %v1456_v22 = vpop.f32.mrf.mxu2 }
 0x268   : > { %v1430_v62 = vpop.f32.mrf.mxu3  ;;  %v1457_v63 = vadd.f32 %v1456_v22, %v3227_v3  ;;  %v1129_v3 = vadd.f32 %v1128_v1, %v3214_v44  ;;  %v2143_v22 = vld [vmem:[%s2724_s29 + $0x5f8] sm:$0xff]  ;;  %v2142_v1 = vld [vmem:[%s2724_s29 + $0x5f0] sm:$0xff] }
 0x269   : > { %v3394_v8 = vadd.f32 %v1430_v62, %v1365_v47  ;;  %v1190_v60 = vpop.f32.mrf.mxu0 }
 0x26a   : > { %v3398_v29 = vadd.f32 %v1190_v60, %v1126_v12  ;;  %v1504_v34 = vmax.f32 %v1196_v56, %v1457_v63  ;;  %v2141_v56 = vld [vmem:[%s2724_s29 + $0x5e8] sm:$0xff]  ;;  %s1951_s29 = sshll.u32 %s3553_s11, 3 }
 0x26b   : > { %v1368_v42 = vpop.f32.mrf.mxu1  ;;  %s3444_s18 = scalar_lea.vmem %s3538_s3, %s1951_s29 }
 0x26c   : > { %v1210_v28 = vmax.f32 %v3201_v26, %v3398_v29  ;;  %1675 = vmatmul.f32.gmra.mxu0 %v2138_v46 }
 0x26d   : > { %2158 = vmatmul.msk.f32.gmra.mxu3 %vm660_vm0, %v2140_v23 }
 0x26e   : > { %1740 = vmatmul.f32.gmra.mxu1 %v2139_v52 }
 0x26f   : > { %v1459_v2 = vpop.f32.mrf.mxu2 }
 0x270   : > { %v1433_v47 = vpop.f32.mrf.mxu3  ;;  %v1460_v49 = vadd.f32 %v1459_v2, %v3240_v24 }
 0x271   : > { %v3409_v12 = vadd.f32 %v1433_v47, %v1368_v42  ;;  %v1193_v53 = vpop.f32.mrf.mxu0 }
 0x272   : > { %v3413_v62 = vadd.f32 %v1193_v53, %v1129_v3  ;;  %v1505_v63 = vmax.f32 %v1197_v16, %v1460_v49  ;;  %v3435_v53 = vld [vmem:[%s3537_s2] ss:$0 sm:$0xff] }
 0x273   : > { %v1371_v44 = vpop.f32.mrf.mxu1 }
 0x274   : > { %v1211_v23 = vmax.f32 %v3211_v41, %v3413_v62  ;;  %1678 = vmatmul.f32.gmra.mxu0 %v2141_v56 }
 0x275   : > { %2159 = vmatmul.msk.f32.gmra.mxu3 %vm660_vm0, %v2143_v22 }
 0x276   : > { %1743 = vmatmul.f32.gmra.mxu1 %v2142_v1 }
 0x277   : > { %v1462_v24 = vpop.f32.mrf.mxu2 }
 0x278   : > { %v1436_v60 = vpop.f32.mrf.mxu3  ;;  %v1463_v42 = vadd.f32 %v1462_v24, %v3253_v50 }
 0x279   : > { %v3425_v46 = vadd.f32 %v1436_v60, %v1371_v44  ;;  %v1634_v52 = vpop.f32.mrf.mxu0 }
 0x27a   : > { %v1506_v59 = vmax.f32 %v1198_v38, %v1463_v42 }
 0x27b   : > { %v1699_v10 = vpop.f32.mrf.mxu1 }
 0x27c   : > { %v1700_v16 = vadd.f32 %v1699_v10, %v1634_v52 }
 0x27f   : > { %v1465_v3 = vpop.f32.mrf.mxu2 }
 0x280   : > { %v1764_v47 = vpop.f32.mrf.mxu3  ;;  %v1466_v2 = vadd.f32 %v1465_v3, %v3266_v13 }
 0x281   : > { %v1765_v49 = vadd.f32 %v1764_v47, %v1700_v16  ;;  %v1637_v50 = vpop.f32.mrf.mxu0 }
 0x282   : > { %v1507_v5 = vmax.f32 %v1199_v51, %v1466_v2 }
 0x283   : > { %v1812_v32 = vmax.f32 %v1504_v34, %v1765_v49  ;;  %v1702_v38 = vpop.f32.mrf.mxu1  ;;  %v3539_v34 = vmax.f32 %v3109_v25, %v3269_v20 }
 0x284   : > { %v1703_v22 = vadd.f32 %v1702_v38, %v1637_v50  ;;  %v3540_v50 = vmax.f32 %v3118_v35, %v3282_v48 }
 0x285   : > { %v1832_v56 = vadd.f32 %v3435_v53, %v1812_v32 }
 0x287   : > { %v1848_v13 = vmax.f32 %v1832_v56, 0.0  ;;  %v1468_v44 = vpop.f32.mrf.mxu2 }
 0x288   : > { %v1767_v1 = vpop.f32.mrf.mxu3  ;;  %v1469_v15 = vadd.f32 %v1468_v44, %v3279_v39 }
 0x289   : > { %1864 = vst [vmem:[%s3444_s18] sm:$0xff] %v1848_v13  ;;  %v1768_v55 = vadd.f32 %v1767_v1, %v1703_v22  ;;  %v1640_v51 = vpop.f32.mrf.mxu0 }
 0x28a   : > { %v1508_v60 = vmax.f32 %v3539_v34, %v1469_v15  ;;  %v3541_v15 = vmax.f32 %v3127_v45, %v3295_v18 }
 0x28b   : > { %v1813_v24 = vmax.f32 %v1505_v63, %v1768_v55  ;;  %v1705_v42 = vpop.f32.mrf.mxu1 }
 0x28c   : > { %v1706_v10 = vadd.f32 %v1705_v42, %v1640_v51 }
 0x28d   : > { %v1833_v52 = vadd.f32 %v3435_v53, %v1813_v24 }
 0x28f   : > { %v1849_v16 = vmax.f32 %v1833_v52, 0.0  ;;  %v1471_v3 = vpop.f32.mrf.mxu2 }
 0x290   : > { %v1770_v47 = vpop.f32.mrf.mxu3  ;;  %v1472_v2 = vadd.f32 %v1471_v3, %v3292_v17 }
 0x291   : > { %1865 = vst [vmem:[%s3444_s18 + $0x8] sm:$0xff] %v1849_v16  ;;  %v1771_v49 = vadd.f32 %v1770_v47, %v1706_v10  ;;  %v1643_v39 = vpop.f32.mrf.mxu0  ;;  %v3542_v16 = vmax.f32 %v3136_v57, %v3308_v54 }
 0x292   : > { %v1509_v32 = vmax.f32 %v3540_v50, %v1472_v2 }
 0x293   : > { %v1814_v25 = vmax.f32 %v1506_v59, %v1771_v49  ;;  %v1708_v20 = vpop.f32.mrf.mxu1 }
 0x294   : > { %v1709_v38 = vadd.f32 %v1708_v20, %v1643_v39  ;;  %v3543_v20 = vmax.f32 %v3145_v6, %v3321_v27 }
 0x295   : > { %v1834_v63 = vadd.f32 %v3435_v53, %v1814_v25 }
 0x297   : > { %v1850_v56 = vmax.f32 %v1834_v63, 0.0  ;;  %v1474_v22 = vpop.f32.mrf.mxu2 }
 0x298   : > { %v1773_v13 = vpop.f32.mrf.mxu3  ;;  %v1475_v44 = vadd.f32 %v1474_v22, %v3305_v40 }
 0x299   : > { %1866 = vst [vmem:[%s3444_s18 + $0x10] sm:$0xff] %v1850_v56  ;;  %v1774_v1 = vadd.f32 %v1773_v13, %v1709_v38  ;;  %v1646_v17 = vpop.f32.mrf.mxu0 }
 0x29a   : > { %v1510_v55 = vmax.f32 %v3541_v15, %v1475_v44 }
 0x29b   : > { %v1815_v35 = vmax.f32 %v1507_v5, %v1774_v1  ;;  %v1711_v48 = vpop.f32.mrf.mxu1 }
 0x29c   : > { %v1712_v51 = vadd.f32 %v1711_v48, %v1646_v17  ;;  %v3544_v17 = vmax.f32 %v3154_v19, %v3334_v14 }
 0x29d   : > { %v1835_v59 = vadd.f32 %v3435_v53, %v1815_v35 }
 0x29f   : > { %v1851_v34 = vmax.f32 %v1835_v59, 0.0  ;;  %v1477_v24 = vpop.f32.mrf.mxu2 }
 0x2a0   : > { %v1776_v42 = vpop.f32.mrf.mxu3  ;;  %v1478_v52 = vadd.f32 %v1477_v24, %v3318_v61 }
 0x2a1   : > { %1867 = vst [vmem:[%s3444_s18 + $0x18] sm:$0xff] %v1851_v34  ;;  %v1777_v10 = vadd.f32 %v1776_v42, %v1712_v51  ;;  %v1649_v40 = vpop.f32.mrf.mxu0  ;;  %v3545_v42 = vmax.f32 %v3163_v31, %v3347_v7 }
 0x2a2   : > { %v1511_v3 = vmax.f32 %v3542_v16, %v1478_v52 }
 0x2a3   : > { %v1816_v45 = vmax.f32 %v1508_v60, %v1777_v10  ;;  %v1714_v18 = vpop.f32.mrf.mxu1 }
 0x2a4   : > { %v1715_v47 = vadd.f32 %v1714_v18, %v1649_v40 }
 0x2a5   : > { %v1836_v5 = vadd.f32 %v3435_v53, %v1816_v45 }
 0x2a7   : > { %v1852_v2 = vmax.f32 %v1836_v5, 0.0  ;;  %v1480_v49 = vpop.f32.mrf.mxu2 }
 0x2a8   : > { %v1779_v39 = vpop.f32.mrf.mxu3  ;;  %v1481_v50 = vadd.f32 %v1480_v49, %v3331_v4 }
 0x2a9   : > { %1868 = vst [vmem:[%s3444_s18 + $0x20] sm:$0xff] %v1852_v2  ;;  %v1780_v25 = vadd.f32 %v1779_v39, %v1715_v47  ;;  %v1652_v61 = vpop.f32.mrf.mxu0  ;;  %v3546_v47 = vmax.f32 %v3172_v43, %v3360_v37 }
 0x2aa   : > { %v1512_v63 = vmax.f32 %v3543_v20, %v1481_v50 }
 0x2ab   : > { %v1817_v57 = vmax.f32 %v1509_v32, %v1780_v25  ;;  %v1717_v54 = vpop.f32.mrf.mxu1 }
 0x2ac   : > { %v1718_v38 = vadd.f32 %v1717_v54, %v1652_v61 }
 0x2ad   : > { %v1837_v60 = vadd.f32 %v3435_v53, %v1817_v57  ;;  %v3547_v57 = vmax.f32 %v3181_v58, %v3373_v30 }
 0x2af   : > { %v1853_v56 = vmax.f32 %v1837_v60, 0.0  ;;  %v1483_v22 = vpop.f32.mrf.mxu2 }
 0x2b0   : > { %v1782_v13 = vpop.f32.mrf.mxu3  ;;  %v1484_v44 = vadd.f32 %v1483_v22, %v3344_v9 }
 0x2b1   : > { %1869 = vst [vmem:[%s3444_s18 + $0x28] sm:$0xff] %v1853_v56  ;;  %v1783_v1 = vadd.f32 %v1782_v13, %v1718_v38  ;;  %v1655_v4 = vpop.f32.mrf.mxu0 }
 0x2b2   : > { %v1513_v15 = vmax.f32 %v3544_v17, %v1484_v44 }
 0x2b3   : > { %v1818_v6 = vmax.f32 %v1510_v55, %v1783_v1  ;;  %v1720_v27 = vpop.f32.mrf.mxu1  ;;  %v3548_v1 = vmax.f32 %v3191_v11, %v3386_v36 }
 0x2b4   : > { %v1721_v35 = vadd.f32 %v1720_v27, %v1655_v4 }
 0x2b5   : > { %v1838_v32 = vadd.f32 %v3435_v53, %v1818_v6 }
 0x2b7   : > { %v1854_v48 = vmax.f32 %v1838_v32, 0.0  ;;  %v1486_v59 = vpop.f32.mrf.mxu2 }
 0x2b8   : > { %v1785_v51 = vpop.f32.mrf.mxu3  ;;  %v1487_v34 = vadd.f32 %v1486_v59, %v3357_v21 }
 0x2b9   : > { %1870 = vst [vmem:[%s3444_s18 + $0x30] sm:$0xff] %v1854_v48  ;;  %v1786_v24 = vadd.f32 %v1785_v51, %v1721_v35  ;;  %v1658_v9 = vpop.f32.mrf.mxu0 }
 0x2ba   : > { %v1514_v52 = vmax.f32 %v3545_v42, %v1487_v34 }
 0x2bb   : > { %v1819_v19 = vmax.f32 %v1511_v3, %v1786_v24  ;;  %v1723_v14 = vpop.f32.mrf.mxu1 }
 0x2bc   : > { %v1724_v10 = vadd.f32 %v1723_v14, %v1658_v9 }
 0x2bd   : > { %v1839_v55 = vadd.f32 %v3435_v53, %v1819_v19 }
 0x2bf   : > { %v1855_v40 = vmax.f32 %v1839_v55, 0.0  ;;  %v1489_v16 = vpop.f32.mrf.mxu2 }
 0x2c0   : > { %v1788_v45 = vpop.f32.mrf.mxu3  ;;  %v1490_v18 = vadd.f32 %v1489_v16, %v3370_v33 }
 0x2c1   : > { %1871 = vst [vmem:[%s3444_s18 + $0x38] sm:$0xff] %v1855_v40  ;;  %v1789_v5 = vadd.f32 %v1788_v45, %v1724_v10  ;;  %v1661_v21 = vpop.f32.mrf.mxu0 }
 0x2c2   : > { %v1515_v2 = vmax.f32 %v3546_v47, %v1490_v18 }
 0x2c3   : > { %v1820_v31 = vmax.f32 %v1512_v63, %v1789_v5  ;;  %v1726_v7 = vpop.f32.mrf.mxu1 }
 0x2c4   : > { %v1727_v49 = vadd.f32 %v1726_v7, %v1661_v21 }
 0x2c5   : > { %v1840_v3 = vadd.f32 %v3435_v53, %v1820_v31 }
 0x2c7   : > { %v1856_v39 = vmax.f32 %v1840_v3, 0.0  ;;  %v1492_v50 = vpop.f32.mrf.mxu2 }
 0x2c8   : > { %v1791_v25 = vpop.f32.mrf.mxu3  ;;  %v1493_v61 = vadd.f32 %v1492_v50, %v3383_v0 }
 0x2c9   : > { %1872 = vst [vmem:[%s3444_s18 + $0x40] sm:$0xff] %v1856_v39  ;;  %v1792_v20 = vadd.f32 %v1791_v25, %v1727_v49  ;;  %v1664_v33 = vpop.f32.mrf.mxu0 }
 0x2ca   : > { %v1516_v54 = vmax.f32 %v3547_v57, %v1493_v61 }
 0x2cb   : > { %v1821_v43 = vmax.f32 %v1513_v15, %v1792_v20  ;;  %v1729_v37 = vpop.f32.mrf.mxu1 }
 0x2cc   : > { %v1730_v60 = vadd.f32 %v1729_v37, %v1664_v33 }
 0x2cd   : > { %v1841_v63 = vadd.f32 %v3435_v53, %v1821_v43 }
 0x2cf   : > { %v1857_v38 = vmax.f32 %v1841_v63, 0.0  ;;  %v1495_v56 = vpop.f32.mrf.mxu2 }
 0x2d0   : > { %v1794_v22 = vpop.f32.mrf.mxu3  ;;  %v1496_v13 = vadd.f32 %v1495_v56, %v3394_v8 }
 0x2d1   : > { %1873 = vst [vmem:[%s3444_s18 + $0x48] sm:$0xff] %v1857_v38  ;;  %v1795_v44 = vadd.f32 %v1794_v22, %v1730_v60  ;;  %v1667_v0 = vpop.f32.mrf.mxu0 }
 0x2d2   : > { %v1517_v4 = vmax.f32 %v3548_v1, %v1496_v13 }
 0x2d3   : > { %v1822_v58 = vmax.f32 %v1514_v52, %v1795_v44  ;;  %v1732_v30 = vpop.f32.mrf.mxu1 }
 0x2d4   : > { %v1733_v15 = vadd.f32 %v1732_v30, %v1667_v0 }
 0x2d5   : > { %v1842_v17 = vadd.f32 %v3435_v53, %v1822_v58 }
 0x2d7   : > { %v1858_v6 = vmax.f32 %v1842_v17, 0.0  ;;  %v1498_v27 = vpop.f32.mrf.mxu2 }
 0x2d8   : > { %v1797_v32 = vpop.f32.mrf.mxu3  ;;  %v1499_v35 = vadd.f32 %v1498_v27, %v3409_v12 }
 0x2d9   : > { %1874 = vst [vmem:[%s3444_s18 + $0x50] sm:$0xff] %v1858_v6  ;;  %v1798_v48 = vadd.f32 %v1797_v32, %v1733_v15  ;;  %v1670_v8 = vpop.f32.mrf.mxu0 }
 0x2da   : > { %v1518_v59 = vmax.f32 %v1210_v28, %v1499_v35 }
 0x2db   : > { %v1823_v11 = vmax.f32 %v1515_v2, %v1798_v48  ;;  %v1735_v36 = vpop.f32.mrf.mxu1 }
 0x2dc   : > { %v1736_v34 = vadd.f32 %v1735_v36, %v1670_v8 }
 0x2dd   : > { %v1843_v51 = vadd.f32 %v3435_v53, %v1823_v11 }
 0x2df   : > { %v1859_v24 = vmax.f32 %v1843_v51, 0.0  ;;  %v1501_v9 = vpop.f32.mrf.mxu2 }
 0x2e0   : > { %v1800_v42 = vpop.f32.mrf.mxu3  ;;  %v1502_v52 = vadd.f32 %v1501_v9, %v3425_v46 }
 0x2e1   : > { %1875 = vst [vmem:[%s3444_s18 + $0x58] sm:$0xff] %v1859_v24  ;;  %v1801_v19 = vadd.f32 %v1800_v42, %v1736_v34  ;;  %v1673_v12 = vpop.f32.mrf.mxu0 }
 0x2e2   : > { %v1519_v14 = vmax.f32 %v1211_v23, %v1502_v52 }
 0x2e3   : > { %v1824_v26 = vmax.f32 %v1516_v54, %v1801_v19  ;;  %v1738_v29 = vpop.f32.mrf.mxu1 }
 0x2e4   : > { %v1739_v55 = vadd.f32 %v1738_v29, %v1673_v12 }
 0x2e5   : > { %v1844_v28 = vadd.f32 %v3435_v53, %v1824_v26 }
 0x2e7   : > { %v1860_v10 = vmax.f32 %v1844_v28, 0.0 }
 0x2e8   : > { %v1803_v40 = vpop.f32.mrf.mxu3 }
 0x2e9   : > { %1876 = vst [vmem:[%s3444_s18 + $0x60] sm:$0xff] %v1860_v10  ;;  %v1804_v16 = vadd.f32 %v1803_v40, %v1739_v55  ;;  %v1676_v45 = vpop.f32.mrf.mxu0 }
 0x2eb   : > { %v1825_v18 = vmax.f32 %v1517_v4, %v1804_v16  ;;  %v1741_v46 = vpop.f32.mrf.mxu1 }
 0x2ec   : > { %v1742_v21 = vadd.f32 %v1741_v46, %v1676_v45 }
 0x2ed   : > { %v1845_v5 = vadd.f32 %v3435_v53, %v1825_v18 }
 0x2ef   : > { %v1861_v47 = vmax.f32 %v1845_v5, 0.0 }
 0x2f0   : > { %v1806_v41 = vpop.f32.mrf.mxu3 }
 0x2f1   : > { %1877 = vst [vmem:[%s3444_s18 + $0x68] sm:$0xff] %v1861_v47  ;;  %v1807_v62 = vadd.f32 %v1806_v41, %v1742_v21  ;;  %v1679_v23 = vpop.f32.mrf.mxu0 }
 0x2f3   : > { %v1826_v2 = vmax.f32 %v1518_v59, %v1807_v62  ;;  %v1744_v31 = vpop.f32.mrf.mxu1 }
 0x2f4   : > { %v1745_v3 = vadd.f32 %v1744_v31, %v1679_v23 }
 0x2f5   : > { %v1846_v7 = vadd.f32 %v3435_v53, %v1826_v2 }
 0x2f7   : > { %v1862_v49 = vmax.f32 %v1846_v7, 0.0 }
 0x2f8   : > { %v1809_v39 = vpop.f32.mrf.mxu3 }
 0x2f9   : > { %1878 = vst [vmem:[%s3444_s18 + $0x70] sm:$0xff] %v1862_v49  ;;  %v1810_v50 = vadd.f32 %v1809_v39, %v1745_v3 }
 0x2fb   : > { %v1827_v25 = vmax.f32 %v1519_v14, %v1810_v50 }
 0x2fd   : > { %v1847_v61 = vadd.f32 %v3435_v53, %v1827_v25 }
 0x2ff   : > { %v1863_v20 = vmax.f32 %v1847_v61, 0.0 }
 0x301   : > { %1879 = vst [vmem:[%s3444_s18 + $0x78] sm:$0xff] %v1863_v20 }
 0x302 PF: > { %p10_p9 = scmp.ge.s32.totalorder %s2251_s16, 4   ;;  %s3549_s12 = smov %s2208_s13 }
 0x303   : > { %s3550_s13 = smov %s2260_s19  ;;  %s3551_s14 = smov %s2251_s16 }
 0x304   :  { %12 = sbr.rel (!%p10_p9) target bundleno = 2 (0x2), region = 93 }

// kernel: cnn_forward.5
= control target key start
LH: loop header
LB: loop body
LE: loop exit
PB: predicated region body
PF: predicated region fallthrough
CT: control target
= control target key end

     0   :  { %10 = vsyncpa [#allocation4], 0  ;;  %s1081_s18 = smov 0   ;;  %s1447_s0 = inlined_call_operand.vmem [shape: f32[2,8192], index: 0, kind: input, shape index: {}]   ;;  %s1448_s1 = inlined_call_operand.vmem [shape: f32[8192,128], index: 1, kind: input, shape index: {}]   ;;  %s1449_s2 = inlined_call_operand.vmem [shape: f32[1,128], index: 2, kind: input, shape index: {}]   ;;  %s1450_s3 = inlined_call_operand.vmem [shape: f32[128,10], index: 3, kind: input, shape index: {}]   ;;  %s1451_s4 = inlined_call_operand.vmem [shape: f32[1,10], index: 4, kind: input, shape index: {}]   ;;  %s1452_s5 = inlined_call_operand.hbm [shape: f32[2,10], index: 5, kind: output, shape index: {}]  }
   0x1 LB: > { %s1087_s19 = sadd.s32 4294967295, %s1047_s18   ;;  %p980_p0 = scmp.ge.s32.totalorder %s1047_s18, 1  ;;  %s1047_s18 = sphi %s1081_s18, %s16_s18  }
   0x2   : > { %p195_p1 = scmp.lt.s32.totalorder %s1047_s18, 5 }
   0x4   : > { %p196_p2 = pnand %p980_p0, %p195_p1 }
   0x5   : > { %s981_s20 = sshll.u32 (!%p196_p2), %s1087_s19, 4  ;;  %s983_s21 = sshll.u32 (!%p196_p2), %s1087_s19, 8 }
   0x6   : > { %199 = sbr.rel (%p196_p2) target bundleno = 461 (0x1cd), region = 40  ;;  %p224_p3 = scmp.lt.s32.totalorder (!%p196_p2), %s981_s20, 63 }
   0x7   : > { %p230_p4 = scmp.lt.s32.totalorder (!%p196_p2), %s983_s21, 1023  ;;  %p985_p5 = scmp.ne.s32.totalorder (!%p196_p2), %s1087_s19, 0 }
   0xb   : > { %s1454_s20 = smov (!%p224_p3, %s981_s20), 63  ;;  %s1456_s21 = smov (!%p230_p4, %s983_s21), 1023 }
   0xc   : > { %s982_s22 = sshll.u32 %s1454_s20, 1  ;;  %s984_s26 = sshll.u32 %s1456_s21, 3 }
   0xd   : > { %s1096_s25 = scalar_lea.vmem %s1447_s0, %s982_s22  ;;  %s1101_s29 = scalar_lea.vmem %s1448_s1, %s984_s26 }
   0xe   : > { %238 = sbr.rel (%p985_p5) target bundleno = 21 (0x15), region = 44 }
  0x13   : > { %v1049_v0 = vmov 0.0  }
  0x14   : > { %239 = vst [vmem:[#allocation2] sm:$0x3] %v1049_v0 }
  0x15 PF: > { %v260_v1 = vld [vmem:[%s1101_s29 + $0x78] sm:$0xff]  ;;  %v259_v3 = vld [vmem:[%s1101_s29 + $0x70] sm:$0xff]  ;;  %v258_v7 = vld [vmem:[%s1101_s29 + $0x68] sm:$0xff]  ;;  %p986_p6 = scmp.ne.s32.totalorder %s1087_s19, 3 }
  0x16   : > { %v292_v2 = vld [vmem:[%s1101_s29 + $0x178] sm:$0xff]  ;;  %542 = vmatpush.msra.mxu0 %v260_v1  ;;  %v291_v5 = vld [vmem:[%s1101_s29 + $0x170] sm:$0xff]  ;;  %v290_v9 = vld [vmem:[%s1101_s29 + $0x168] sm:$0xff] }
  0x17   : > { %582 = vmatpush.msra.mxu2 %v292_v2  ;;  %v276_v4 = vld [vmem:[%s1101_s29 + $0xf8] sm:$0xff]  ;;  %v275_v8 = vld [vmem:[%s1101_s29 + $0xf0] sm:$0xff]  ;;  %v274_v11 = vld [vmem:[%s1101_s29 + $0xe8] sm:$0xff] }
  0x18   : > { %v308_v6 = vld [vmem:[%s1101_s29 + $0x1f8] sm:$0xff]  ;;  %562 = vmatpush.msra.mxu1 %v276_v4  ;;  %543 = vmatpush.msra.mxu0 %v259_v3  ;;  %v307_v10 = vld [vmem:[%s1101_s29 + $0x1f0] sm:$0xff]  ;;  %v257_v12 = vld [vmem:[%s1101_s29 + $0x60] sm:$0xff] }
  0x19   : > { %602 = vmatpush.msra.mxu3 %v308_v6  ;;  %583 = vmatpush.msra.mxu2 %v291_v5  ;;  %v289_v13 = vld [vmem:[%s1101_s29 + $0x160] sm:$0xff]  ;;  %v306_v14 = vld [vmem:[%s1101_s29 + $0x1e8] sm:$0xff]  ;;  %v256_v17 = vld [vmem:[%s1101_s29 + $0x58] sm:$0xff] }
  0x1a   : > { %563 = vmatpush.msra.mxu1 %v275_v8  ;;  %544 = vmatpush.msra.mxu0 %v258_v7  ;;  %v273_v15 = vld [vmem:[%s1101_s29 + $0xe0] sm:$0xff]  ;;  %v288_v18 = vld [vmem:[%s1101_s29 + $0x158] sm:$0xff]  ;;  %v255_v21 = vld [vmem:[%s1101_s29 + $0x50] sm:$0xff] }
  0x1b   : > { %603 = vmatpush.msra.mxu3 %v307_v10  ;;  %584 = vmatpush.msra.mxu2 %v290_v9  ;;  %v305_v16 = vld [vmem:[%s1101_s29 + $0x1e0] sm:$0xff]  ;;  %v272_v19 = vld [vmem:[%s1101_s29 + $0xd8] sm:$0xff]  ;;  %v287_v22 = vld [vmem:[%s1101_s29 + $0x150] sm:$0xff] }
  0x1c   : > { %564 = vmatpush.msra.mxu1 %v274_v11  ;;  %545 = vmatpush.msra.mxu0 %v257_v12  ;;  %v304_v20 = vld [vmem:[%s1101_s29 + $0x1d8] sm:$0xff]  ;;  %v271_v23 = vld [vmem:[%s1101_s29 + $0xd0] sm:$0xff]  ;;  %v254_v25 = vld [vmem:[%s1101_s29 + $0x48] sm:$0xff] }
  0x1d   : > { %604 = vmatpush.msra.mxu3 %v306_v14  ;;  %585 = vmatpush.msra.mxu2 %v289_v13  ;;  %v303_v24 = vld [vmem:[%s1101_s29 + $0x1d0] sm:$0xff]  ;;  %v286_v26 = vld [vmem:[%s1101_s29 + $0x148] sm:$0xff]  ;;  %v253_v29 = vld [vmem:[%s1101_s29 + $0x40] sm:$0xff] }
  0x1e   : > { %565 = vmatpush.msra.mxu1 %v273_v15  ;;  %546 = vmatpush.msra.mxu0 %v256_v17  ;;  %v270_v27 = vld [vmem:[%s1101_s29 + $0xc8] sm:$0xff]  ;;  %v285_v30 = vld [vmem:[%s1101_s29 + $0x140] sm:$0xff]  ;;  %v252_v33 = vld [vmem:[%s1101_s29 + $0x38] sm:$0xff] }
  0x1f   : > { %605 = vmatpush.msra.mxu3 %v305_v16  ;;  %586 = vmatpush.msra.mxu2 %v288_v18  ;;  %v302_v28 = vld [vmem:[%s1101_s29 + $0x1c8] sm:$0xff]  ;;  %v269_v31 = vld [vmem:[%s1101_s29 + $0xc0] sm:$0xff]  ;;  %v284_v34 = vld [vmem:[%s1101_s29 + $0x138] sm:$0xff] }
  0x20   : > { %566 = vmatpush.msra.mxu1 %v272_v19  ;;  %547 = vmatpush.msra.mxu0 %v255_v21  ;;  %v301_v32 = vld [vmem:[%s1101_s29 + $0x1c0] sm:$0xff]  ;;  %v268_v35 = vld [vmem:[%s1101_s29 + $0xb8] sm:$0xff]  ;;  %v251_v37 = vld [vmem:[%s1101_s29 + $0x30] sm:$0xff] }
  0x21   : > { %606 = vmatpush.msra.mxu3 %v304_v20  ;;  %587 = vmatpush.msra.mxu2 %v287_v22  ;;  %v300_v36 = vld [vmem:[%s1101_s29 + $0x1b8] sm:$0xff]  ;;  %v283_v38 = vld [vmem:[%s1101_s29 + $0x130] sm:$0xff]  ;;  %v250_v41 = vld [vmem:[%s1101_s29 + $0x28] sm:$0xff] }
  0x22   : > { %567 = vmatpush.msra.mxu1 %v271_v23  ;;  %548 = vmatpush.msra.mxu0 %v254_v25  ;;  %v267_v39 = vld [vmem:[%s1101_s29 + $0xb0] sm:$0xff]  ;;  %v282_v42 = vld [vmem:[%s1101_s29 + $0x128] sm:$0xff]  ;;  %v249_v45 = vld [vmem:[%s1101_s29 + $0x20] sm:$0xff] }
  0x23   : > { %607 = vmatpush.msra.mxu3 %v303_v24  ;;  %588 = vmatpush.msra.mxu2 %v286_v26  ;;  %v299_v40 = vld [vmem:[%s1101_s29 + $0x1b0] sm:$0xff]  ;;  %v266_v43 = vld [vmem:[%s1101_s29 + $0xa8] sm:$0xff]  ;;  %v281_v46 = vld [vmem:[%s1101_s29 + $0x120] sm:$0xff] }
  0x24   : > { %568 = vmatpush.msra.mxu1 %v270_v27  ;;  %549 = vmatpush.msra.mxu0 %v253_v29  ;;  %v298_v44 = vld [vmem:[%s1101_s29 + $0x1a8] sm:$0xff]  ;;  %v265_v47 = vld [vmem:[%s1101_s29 + $0xa0] sm:$0xff]  ;;  %v248_v49 = vld [vmem:[%s1101_s29 + $0x18] sm:$0xff] }
  0x25   : > { %608 = vmatpush.msra.mxu3 %v302_v28  ;;  %589 = vmatpush.msra.mxu2 %v285_v30  ;;  %v297_v48 = vld [vmem:[%s1101_s29 + $0x1a0] sm:$0xff]  ;;  %v280_v50 = vld [vmem:[%s1101_s29 + $0x118] sm:$0xff]  ;;  %v247_v53 = vld [vmem:[%s1101_s29 + $0x10] sm:$0xff] }
  0x26   : > { %569 = vmatpush.msra.mxu1 %v269_v31  ;;  %550 = vmatpush.msra.mxu0 %v252_v33  ;;  %v264_v51 = vld [vmem:[%s1101_s29 + $0x98] sm:$0xff]  ;;  %v279_v54 = vld [vmem:[%s1101_s29 + $0x110] sm:$0xff]  ;;  %v246_v57 = vld [vmem:[%s1101_s29 + $0x8] sm:$0xff] }
  0x27   : > { %609 = vmatpush.msra.mxu3 %v301_v32  ;;  %590 = vmatpush.msra.mxu2 %v284_v34  ;;  %v296_v52 = vld [vmem:[%s1101_s29 + $0x198] sm:$0xff]  ;;  %v263_v55 = vld [vmem:[%s1101_s29 + $0x90] sm:$0xff]  ;;  %v278_v58 = vld [vmem:[%s1101_s29 + $0x108] sm:$0xff] }
  0x28   : > { %570 = vmatpush.msra.mxu1 %v268_v35  ;;  %551 = vmatpush.msra.mxu0 %v251_v37  ;;  %v295_v56 = vld [vmem:[%s1101_s29 + $0x190] sm:$0xff]  ;;  %v262_v59 = vld [vmem:[%s1101_s29 + $0x88] sm:$0xff]  ;;  %v245_v61 = vld [vmem:[%s1101_s29] sm:$0xff] }
  0x29   : > { %610 = vmatpush.msra.mxu3 %v300_v36  ;;  %591 = vmatpush.msra.mxu2 %v283_v38  ;;  %v294_v60 = vld [vmem:[%s1101_s29 + $0x188] sm:$0xff]  ;;  %v277_v62 = vld [vmem:[%s1101_s29 + $0x100] sm:$0xff]  ;;  %v324_v63 = vld [vmem:[%s1101_s29 + $0x278] sm:$0xff] }
  0x2a   : > { %571 = vmatpush.msra.mxu1 %v267_v39  ;;  %552 = vmatpush.msra.mxu0 %v250_v41  ;;  %v356_v0 = vld [vmem:[%s1101_s29 + $0x378] sm:$0xff]  ;;  %v261_v1 = vld [vmem:[%s1101_s29 + $0x80] sm:$0xff]  ;;  %v323_v3 = vld [vmem:[%s1101_s29 + $0x270] sm:$0xff] }
  0x2b   : > { %611 = vmatpush.msra.mxu3 %v299_v40  ;;  %592 = vmatpush.msra.mxu2 %v282_v42  ;;  %v293_v2 = vld [vmem:[%s1101_s29 + $0x180] sm:$0xff]  ;;  %v340_v4 = vld [vmem:[%s1101_s29 + $0x2f8] sm:$0xff]  ;;  %v355_v5 = vld [vmem:[%s1101_s29 + $0x370] sm:$0xff] }
  0x2c   : > { %572 = vmatpush.msra.mxu1 %v266_v43  ;;  %553 = vmatpush.msra.mxu0 %v249_v45  ;;  %v372_v6 = vld [vmem:[%s1101_s29 + $0x3f8] sm:$0xff]  ;;  %v322_v7 = vld [vmem:[%s1101_s29 + $0x268] sm:$0xff]  ;;  %v339_v8 = vld [vmem:[%s1101_s29 + $0x2f0] sm:$0xff] }
  0x2d   : > { %612 = vmatpush.msra.mxu3 %v298_v44  ;;  %593 = vmatpush.msra.mxu2 %v281_v46  ;;  %v354_v9 = vld [vmem:[%s1101_s29 + $0x368] sm:$0xff]  ;;  %v371_v10 = vld [vmem:[%s1101_s29 + $0x3f0] sm:$0xff]  ;;  %v321_v11 = vld [vmem:[%s1101_s29 + $0x260] sm:$0xff] }
  0x2e   : > { %573 = vmatpush.msra.mxu1 %v265_v47  ;;  %554 = vmatpush.msra.mxu0 %v248_v49  ;;  %v338_v12 = vld [vmem:[%s1101_s29 + $0x2e8] sm:$0xff]  ;;  %v353_v13 = vld [vmem:[%s1101_s29 + $0x360] sm:$0xff]  ;;  %v320_v15 = vld [vmem:[%s1101_s29 + $0x258] sm:$0xff] }
  0x2f   : > { %613 = vmatpush.msra.mxu3 %v297_v48  ;;  %594 = vmatpush.msra.mxu2 %v280_v50  ;;  %v370_v14 = vld [vmem:[%s1101_s29 + $0x3e8] sm:$0xff]  ;;  %v337_v16 = vld [vmem:[%s1101_s29 + $0x2e0] sm:$0xff]  ;;  %v352_v17 = vld [vmem:[%s1101_s29 + $0x358] sm:$0xff] }
  0x30   : > { %574 = vmatpush.msra.mxu1 %v264_v51  ;;  %555 = vmatpush.msra.mxu0 %v247_v53  ;;  %v369_v18 = vld [vmem:[%s1101_s29 + $0x3e0] sm:$0xff]  ;;  %v319_v19 = vld [vmem:[%s1101_s29 + $0x250] sm:$0xff]  ;;  %v336_v20 = vld [vmem:[%s1101_s29 + $0x2d8] sm:$0xff] }
  0x31   : > { %614 = vmatpush.msra.mxu3 %v296_v52  ;;  %595 = vmatpush.msra.mxu2 %v279_v54  ;;  %v351_v21 = vld [vmem:[%s1101_s29 + $0x350] sm:$0xff]  ;;  %v368_v22 = vld [vmem:[%s1101_s29 + $0x3d8] sm:$0xff]  ;;  %v241_v23 = vld [vmem:[%s1096_s25] sm:$0xff] }
  0x32   : > { %575 = vmatpush.msra.mxu1 %v263_v55  ;;  %556 = vmatpush.msra.mxu0 %v246_v57  ;;  %v318_v24 = vld [vmem:[%s1101_s29 + $0x248] sm:$0xff]  ;;  %v335_v25 = vld [vmem:[%s1101_s29 + $0x2d0] sm:$0xff]  ;;  %505 = vst [vmem:[#allocation1] ss:$4 sm:$0xff] %v241_v23  ;;  %v317_v28 = vld [vmem:[%s1101_s29 + $0x240] sm:$0xff] }
  0x33   : > { %615 = vmatpush.msra.mxu3 %v295_v56  ;;  %596 = vmatpush.msra.mxu2 %v278_v58  ;;  %v350_v26 = vld [vmem:[%s1101_s29 + $0x348] sm:$0xff]  ;;  %v367_v27 = vld [vmem:[%s1101_s29 + $0x3d0] sm:$0xff]  ;;  %v349_v30 = vld [vmem:[%s1101_s29 + $0x340] sm:$0xff] }
  0x34   : > { %576 = vmatpush.msra.mxu1 %v262_v59  ;;  %557 = vmatpush.msra.mxu0 %v245_v61  ;;  %v334_v29 = vld [vmem:[%s1101_s29 + $0x2c8] sm:$0xff]  ;;  %v316_v32 = vld [vmem:[%s1101_s29 + $0x238] sm:$0xff]  ;;  %v333_v33 = vld [vmem:[%s1101_s29 + $0x2c0] sm:$0xff] }
  0x35   : > { %616 = vmatpush.msra.mxu3 %v294_v60  ;;  %597 = vmatpush.msra.mxu2 %v277_v62  ;;  %v366_v31 = vld [vmem:[%s1101_s29 + $0x3c8] sm:$0xff]  ;;  %v348_v34 = vld [vmem:[%s1101_s29 + $0x338] sm:$0xff]  ;;  %v365_v35 = vld [vmem:[%s1101_s29 + $0x3c0] sm:$0xff] }
  0x36   : > { %622 = vmatpush.msrb.mxu0 %v324_v63  ;;  %577 = vmatpush.msra.mxu1 %v261_v1  ;;  %v315_v36 = vld [vmem:[%s1101_s29 + $0x230] sm:$0xff]  ;;  %v332_v37 = vld [vmem:[%s1101_s29 + $0x2b8] sm:$0xff]  ;;  %v242_v40 = vld [vmem:[%s1096_s25 + $0x8] sm:$0xff] }
  0x37   : > { %662 = vmatpush.msrb.mxu2 %v356_v0  ;;  %617 = vmatpush.msra.mxu3 %v293_v2  ;;  %v347_v38 = vld [vmem:[%s1101_s29 + $0x330] sm:$0xff]  ;;  %v364_v39 = vld [vmem:[%s1101_s29 + $0x3b8] sm:$0xff]  ;;  %v314_v41 = vld [vmem:[%s1101_s29 + $0x228] sm:$0xff]  ;;  %507 = vst [vmem:[#allocation1 + $0x20] ss:$4 sm:$0xff] %v242_v40 }
  0x38   : > { %623 = vmatpush.msrb.mxu0 %v323_v3  ;;  %642 = vmatpush.msrb.mxu1 %v340_v4  ;;  %v331_v42 = vld [vmem:[%s1101_s29 + $0x2b0] sm:$0xff]  ;;  %v346_v44 = vld [vmem:[%s1101_s29 + $0x328] sm:$0xff]  ;;  %v313_v50 = vld [vmem:[%s1101_s29 + $0x220] sm:$0xff] }
  0x39   : > { %663 = vmatpush.msrb.mxu2 %v355_v5  ;;  %682 = vmatpush.msrb.mxu3 %v372_v6  ;;  %v243_v43 = vld [vmem:[%s1096_s25 + $0x10] sm:$0xff]  ;;  %v1212_v46 = vld.sshfl [vmem:[#allocation1] sm:$0xff pattern:$0x73625140]  ;;  %v330_v51 = vld [vmem:[%s1101_s29 + $0x2a8] sm:$0xff] }
  0x3a   : > { %624 = vmatpush.msrb.mxu0 %v322_v7  ;;  %643 = vmatpush.msrb.mxu1 %v339_v8  ;;  %v510_v45 = vld.sshfl [vmem:[#allocation1 + $0x10] sm:$0xff pattern:$0x73625140]  ;;  %v1214_v47 = vld.sshfl [vmem:[#allocation1 + $0x18] sm:$0xff pattern:$0x73625140] }
  0x3b   : > { %664 = vmatpush.msrb.mxu2 %v354_v9  ;;  %683 = vmatpush.msrb.mxu3 %v371_v10  ;;  %v1216_v48 = vld.sshfl [vmem:[#allocation1 + $0x8] sm:$0xff pattern:$0x73625140]  ;;  %v363_v49 = vld [vmem:[%s1101_s29 + $0x3b0] sm:$0xff]  ;;  %v345_v52 = vld [vmem:[%s1101_s29 + $0x320] sm:$0xff] }
  0x3c   : > { %625 = vmatpush.msrb.mxu0 %v321_v11  ;;  %644 = vmatpush.msrb.mxu1 %v338_v12  ;;  %516 = vst [vmem:[#allocation1] ss:$4 sm:$0xff] %v243_v43  ;;  %v362_v53 = vld [vmem:[%s1101_s29 + $0x3a8] sm:$0xff]  ;;  %v312_v54 = vld [vmem:[%s1101_s29 + $0x218] sm:$0xff]  ;;  %v329_v55 = vld [vmem:[%s1101_s29 + $0x2a0] sm:$0xff] }
  0x3d   : > { %665 = vmatpush.msrb.mxu2 %v353_v13  ;;  %684 = vmatpush.msrb.mxu3 %v370_v14  ;;  %v344_v56 = vld [vmem:[%s1101_s29 + $0x318] sm:$0xff]  ;;  %v361_v57 = vld [vmem:[%s1101_s29 + $0x3a0] sm:$0xff]  ;;  %v311_v58 = vld [vmem:[%s1101_s29 + $0x210] sm:$0xff] }
  0x3e   : > { %626 = vmatpush.msrb.mxu0 %v320_v15  ;;  %645 = vmatpush.msrb.mxu1 %v337_v16  ;;  %v328_v59 = vld [vmem:[%s1101_s29 + $0x298] sm:$0xff]  ;;  %v1230_v61 = vld.sshfl [vmem:[#allocation1 + $0x30] sm:$0xff pattern:$0x73625140]  ;;  %v310_v3 = vld [vmem:[%s1101_s29 + $0x208] sm:$0xff] }
  0x3f   : > { %666 = vmatpush.msrb.mxu2 %v352_v17  ;;  %685 = vmatpush.msrb.mxu3 %v369_v18  ;;  %v244_v60 = vld [vmem:[%s1096_s25 + $0x18] sm:$0xff]  ;;  %v1232_v62 = vld.sshfl [vmem:[#allocation1 + $0x20] sm:$0xff pattern:$0x73625140]  ;;  %v343_v1 = vld [vmem:[%s1101_s29 + $0x310] sm:$0xff] }
  0x40   : > { %627 = vmatpush.msrb.mxu0 %v319_v19  ;;  %646 = vmatpush.msrb.mxu1 %v336_v20  ;;  %v1234_v63 = vld.sshfl [vmem:[#allocation1 + $0x38] sm:$0xff pattern:$0x73625140]  ;;  %v1236_v0 = vld.sshfl [vmem:[#allocation1 + $0x28] sm:$0xff pattern:$0x73625140] }
  0x41   : > { %667 = vmatpush.msrb.mxu2 %v351_v21  ;;  %686 = vmatpush.msrb.mxu3 %v368_v22  ;;  %v360_v2 = vld [vmem:[%s1101_s29 + $0x398] sm:$0xff]  ;;  %517 = vst [vmem:[#allocation1 + $0x20] ss:$4 sm:$0xff] %v244_v60  ;;  %v327_v4 = vld [vmem:[%s1101_s29 + $0x290] sm:$0xff]  ;;  %v342_v5 = vld [vmem:[%s1101_s29 + $0x308] sm:$0xff] }
  0x42   : > { %628 = vmatpush.msrb.mxu0 %v318_v24  ;;  %647 = vmatpush.msrb.mxu1 %v335_v25  ;;  %v359_v6 = vld [vmem:[%s1101_s29 + $0x390] sm:$0xff]  ;;  %v309_v7 = vld [vmem:[%s1101_s29 + $0x200] sm:$0xff]  ;;  %v326_v8 = vld [vmem:[%s1101_s29 + $0x288] sm:$0xff] }
  0x43   : > { %668 = vmatpush.msrb.mxu2 %v350_v26  ;;  %687 = vmatpush.msrb.mxu3 %v367_v27  ;;  %v341_v9 = vld [vmem:[%s1101_s29 + $0x300] sm:$0xff]  ;;  %v358_v10 = vld [vmem:[%s1101_s29 + $0x388] sm:$0xff]  ;;  %v388_v11 = vld [vmem:[%s1101_s29 + $0x478] sm:$0xff] }
  0x44   : > { %629 = vmatpush.msrb.mxu0 %v317_v28  ;;  %648 = vmatpush.msrb.mxu1 %v334_v29  ;;  %v420_v12 = vld [vmem:[%s1101_s29 + $0x578] sm:$0xff]  ;;  %v325_v13 = vld [vmem:[%s1101_s29 + $0x280] sm:$0xff]  ;;  %v387_v15 = vld [vmem:[%s1101_s29 + $0x470] sm:$0xff] }
  0x45   : > { %669 = vmatpush.msrb.mxu2 %v349_v30  ;;  %688 = vmatpush.msrb.mxu3 %v366_v31  ;;  %v357_v14 = vld [vmem:[%s1101_s29 + $0x380] sm:$0xff]  ;;  %v404_v16 = vld [vmem:[%s1101_s29 + $0x4f8] sm:$0xff]  ;;  %v419_v17 = vld [vmem:[%s1101_s29 + $0x570] sm:$0xff] }
  0x46   : > { %630 = vmatpush.msrb.mxu0 %v316_v32  ;;  %649 = vmatpush.msrb.mxu1 %v333_v33  ;;  %v436_v18 = vld [vmem:[%s1101_s29 + $0x5f8] sm:$0xff]  ;;  %v386_v19 = vld [vmem:[%s1101_s29 + $0x468] sm:$0xff]  ;;  %v403_v20 = vld [vmem:[%s1101_s29 + $0x4f0] sm:$0xff] }
  0x47   : > { %670 = vmatpush.msrb.mxu2 %v348_v34  ;;  %689 = vmatpush.msrb.mxu3 %v365_v35  ;;  %v418_v21 = vld [vmem:[%s1101_s29 + $0x568] sm:$0xff]  ;;  %v435_v22 = vld [vmem:[%s1101_s29 + $0x5f0] sm:$0xff]  ;;  %v385_v23 = vld [vmem:[%s1101_s29 + $0x460] sm:$0xff] }
  0x48   : > { %631 = vmatpush.msrb.mxu0 %v315_v36  ;;  %650 = vmatpush.msrb.mxu1 %v332_v37  ;;  %v402_v24 = vld [vmem:[%s1101_s29 + $0x4e8] sm:$0xff]  ;;  %v417_v25 = vld [vmem:[%s1101_s29 + $0x560] sm:$0xff]  ;;  %v384_v27 = vld [vmem:[%s1101_s29 + $0x458] sm:$0xff] }
  0x49   : > { %671 = vmatpush.msrb.mxu2 %v347_v38  ;;  %690 = vmatpush.msrb.mxu3 %v364_v39  ;;  %v434_v26 = vld [vmem:[%s1101_s29 + $0x5e8] sm:$0xff]  ;;  %v401_v28 = vld [vmem:[%s1101_s29 + $0x4e0] sm:$0xff]  ;;  %v416_v29 = vld [vmem:[%s1101_s29 + $0x558] sm:$0xff] }
  0x4a   : > { %632 = vmatpush.msrb.mxu0 %v314_v41  ;;  %651 = vmatpush.msrb.mxu1 %v331_v42  ;;  %v433_v30 = vld [vmem:[%s1101_s29 + $0x5e0] sm:$0xff]  ;;  %v383_v31 = vld [vmem:[%s1101_s29 + $0x450] sm:$0xff]  ;;  %v400_v32 = vld [vmem:[%s1101_s29 + $0x4d8] sm:$0xff] }
  0x4b   : > { %672 = vmatpush.msrb.mxu2 %v346_v44  ;;  %691 = vmatpush.msrb.mxu3 %v363_v49  ;;  %v415_v33 = vld [vmem:[%s1101_s29 + $0x550] sm:$0xff]  ;;  %v432_v34 = vld [vmem:[%s1101_s29 + $0x5d8] sm:$0xff]  ;;  %v382_v35 = vld [vmem:[%s1101_s29 + $0x448] sm:$0xff] }
  0x4c   : > { %633 = vmatpush.msrb.mxu0 %v313_v50  ;;  %652 = vmatpush.msrb.mxu1 %v330_v51  ;;  %v399_v36 = vld [vmem:[%s1101_s29 + $0x4d0] sm:$0xff]  ;;  %v414_v37 = vld [vmem:[%s1101_s29 + $0x548] sm:$0xff]  ;;  %v381_v39 = vld [vmem:[%s1101_s29 + $0x440] sm:$0xff] }
  0x4d   : > { %673 = vmatpush.msrb.mxu2 %v345_v52  ;;  %692 = vmatpush.msrb.mxu3 %v362_v53  ;;  %v431_v38 = vld [vmem:[%s1101_s29 + $0x5d0] sm:$0xff]  ;;  %v398_v40 = vld [vmem:[%s1101_s29 + $0x4c8] sm:$0xff]  ;;  %v413_v41 = vld [vmem:[%s1101_s29 + $0x540] sm:$0xff] }
  0x4e   : > { %634 = vmatpush.msrb.mxu0 %v312_v54  ;;  %653 = vmatpush.msrb.mxu1 %v329_v55  ;;  %v430_v42 = vld [vmem:[%s1101_s29 + $0x5c8] sm:$0xff]  ;;  %v380_v43 = vld [vmem:[%s1101_s29 + $0x438] sm:$0xff]  ;;  %v397_v44 = vld [vmem:[%s1101_s29 + $0x4c0] sm:$0xff] }
  0x4f   : > { %674 = vmatpush.msrb.mxu2 %v344_v56  ;;  %693 = vmatpush.msrb.mxu3 %v361_v57  ;;  %v411_v49 = vld [vmem:[%s1101_s29 + $0x530] sm:$0xff]  ;;  %v428_v50 = vld [vmem:[%s1101_s29 + $0x5b8] sm:$0xff]  ;;  %v378_v51 = vld [vmem:[%s1101_s29 + $0x428] sm:$0xff] }
  0x50   : > { %635 = vmatpush.msrb.mxu0 %v311_v58  ;;  %654 = vmatpush.msrb.mxu1 %v328_v59  ;;  %v395_v52 = vld [vmem:[%s1101_s29 + $0x4b0] sm:$0xff]  ;;  %v410_v53 = vld [vmem:[%s1101_s29 + $0x528] sm:$0xff]  ;;  %v377_v55 = vld [vmem:[%s1101_s29 + $0x420] sm:$0xff] }
  0x51   : > { %675 = vmatpush.msrb.mxu2 %v343_v1  ;;  %694 = vmatpush.msrb.mxu3 %v360_v2  ;;  %v427_v54 = vld [vmem:[%s1101_s29 + $0x5b0] sm:$0xff]  ;;  %v394_v56 = vld [vmem:[%s1101_s29 + $0x4a8] sm:$0xff]  ;;  %v409_v57 = vld [vmem:[%s1101_s29 + $0x520] sm:$0xff] }
  0x52   : > { %636 = vmatpush.msrb.mxu0 %v310_v3  ;;  %655 = vmatpush.msrb.mxu1 %v327_v4  ;;  %v426_v58 = vld [vmem:[%s1101_s29 + $0x5a8] sm:$0xff]  ;;  %v376_v59 = vld [vmem:[%s1101_s29 + $0x418] sm:$0xff]  ;;  %v393_v60 = vld [vmem:[%s1101_s29 + $0x4a0] sm:$0xff] }
  0x53   : > { %676 = vmatpush.msrb.mxu2 %v342_v5  ;;  %695 = vmatpush.msrb.mxu3 %v359_v6  ;;  %v407_v1 = vld [vmem:[%s1101_s29 + $0x510] sm:$0xff]  ;;  %v424_v2 = vld [vmem:[%s1101_s29 + $0x598] sm:$0xff]  ;;  %v374_v3 = vld [vmem:[%s1101_s29 + $0x408] sm:$0xff] }
  0x54   : > { %598 = vmatmul.f32.vlgmr.msra.gmra.mxu2 %v510_v45  ;;  %637 = vmatpush.msrb.mxu0 %v309_v7  ;;  %v412_v45 = vld [vmem:[%s1101_s29 + $0x538] sm:$0xff]  ;;  %v391_v4 = vld [vmem:[%s1101_s29 + $0x490] sm:$0xff]  ;;  %v406_v5 = vld [vmem:[%s1101_s29 + $0x508] sm:$0xff] }
  0x55   : > { %656 = vmatpush.msrb.mxu1 %v326_v8  ;;  %677 = vmatpush.msrb.mxu2 %v341_v9  ;;  %v423_v6 = vld [vmem:[%s1101_s29 + $0x590] sm:$0xff]  ;;  %v373_v7 = vld [vmem:[%s1101_s29 + $0x400] sm:$0xff]  ;;  %v390_v8 = vld [vmem:[%s1101_s29 + $0x488] sm:$0xff] }
  0x56   : > { %696 = vmatpush.msrb.mxu3 %v358_v10  ;;  %558 = vmatmul.f32.vlgmr.msra.gmra.mxu0 %v1212_v46  ;;  %v429_v46 = vld [vmem:[%s1101_s29 + $0x5c0] sm:$0xff]  ;;  %v422_v10 = vld [vmem:[%s1101_s29 + $0x588] sm:$0xff] }
  0x57   : > { %618 = vmatmul.f32.vlgmr.msra.gmra.mxu3 %v1214_v47  ;;  %702 = vmatpush.msra.mxu0 %v388_v11  ;;  %v379_v47 = vld [vmem:[%s1101_s29 + $0x430] sm:$0xff]  ;;  %v405_v9 = vld [vmem:[%s1101_s29 + $0x500] sm:$0xff] }
  0x58   : > { %742 = vmatpush.msra.mxu2 %v420_v12  ;;  %657 = vmatpush.msrb.mxu1 %v325_v13  ;;  %v518_v11 = vld.sshfl [vmem:[#allocation1] sm:$0xff pattern:$0x73625140]  ;;  %v520_v12 = vld.sshfl [vmem:[#allocation1 + $0x10] sm:$0xff pattern:$0x73625140] }
  0x59   : > { %697 = vmatpush.msrb.mxu3 %v357_v14  ;;  %578 = vmatmul.f32.vlgmr.msra.gmra.mxu1 %v1216_v48  ;;  %v396_v48 = vld [vmem:[%s1101_s29 + $0x4b8] sm:$0xff] }
  0x5a   : > { %703 = vmatpush.msra.mxu0 %v387_v15  ;;  %722 = vmatpush.msra.mxu1 %v404_v16  ;;  %v452_v13 = vld [vmem:[%s1101_s29 + $0x678] sm:$0xff]  ;;  %v389_v15 = vld [vmem:[%s1101_s29 + $0x480] sm:$0xff] }
  0x5b   : > { %743 = vmatpush.msra.mxu2 %v419_v17  ;;  %762 = vmatpush.msra.mxu3 %v436_v18  ;;  %v484_v14 = vld [vmem:[%s1101_s29 + $0x778] sm:$0xff]  ;;  %v421_v16 = vld [vmem:[%s1101_s29 + $0x580] sm:$0xff]  ;;  %v519_v17 = vld.sshfl [vmem:[#allocation1 + $0x8] sm:$0xff pattern:$0x73625140] }
  0x5c   : > { %704 = vmatpush.msra.mxu0 %v386_v19  ;;  %723 = vmatpush.msra.mxu1 %v403_v20  ;;  %v521_v18 = vld.sshfl [vmem:[#allocation1 + $0x18] sm:$0xff pattern:$0x73625140]  ;;  %v451_v19 = vld [vmem:[%s1101_s29 + $0x670] sm:$0xff] }
  0x5d   : > { %744 = vmatpush.msra.mxu2 %v418_v21  ;;  %763 = vmatpush.msra.mxu3 %v435_v22  ;;  %v468_v20 = vld [vmem:[%s1101_s29 + $0x6f8] sm:$0xff]  ;;  %v483_v21 = vld [vmem:[%s1101_s29 + $0x770] sm:$0xff] }
  0x5e   : > { %678 = vmatmul.f32.vlgmr.msrb.gmra.mxu2 %v1230_v61  ;;  %705 = vmatpush.msra.mxu0 %v385_v23  ;;  %v408_v61 = vld [vmem:[%s1101_s29 + $0x518] sm:$0xff]  ;;  %v450_v23 = vld [vmem:[%s1101_s29 + $0x668] sm:$0xff] }
  0x5f   : > { %724 = vmatpush.msra.mxu1 %v402_v24  ;;  %745 = vmatpush.msra.mxu2 %v417_v25  ;;  %v500_v22 = vld [vmem:[%s1101_s29 + $0x7f8] sm:$0xff]  ;;  %v467_v24 = vld [vmem:[%s1101_s29 + $0x6f0] sm:$0xff]  ;;  %v482_v25 = vld [vmem:[%s1101_s29 + $0x768] sm:$0xff] }
  0x60   : > { %764 = vmatpush.msra.mxu3 %v434_v26  ;;  %638 = vmatmul.f32.vlgmr.msrb.gmra.mxu0 %v1232_v62  ;;  %v425_v62 = vld [vmem:[%s1101_s29 + $0x5a0] sm:$0xff]  ;;  %v499_v26 = vld [vmem:[%s1101_s29 + $0x7f0] sm:$0xff] }
  0x61   : > { %698 = vmatmul.f32.vlgmr.msrb.gmra.mxu3 %v1234_v63  ;;  %706 = vmatpush.msra.mxu0 %v384_v27  ;;  %v375_v63 = vld [vmem:[%s1101_s29 + $0x410] sm:$0xff]  ;;  %v449_v27 = vld [vmem:[%s1101_s29 + $0x660] sm:$0xff] }
  0x62   : > { %725 = vmatpush.msra.mxu1 %v401_v28  ;;  %746 = vmatpush.msra.mxu2 %v416_v29  ;;  %v466_v28 = vld [vmem:[%s1101_s29 + $0x6e8] sm:$0xff]  ;;  %v481_v29 = vld [vmem:[%s1101_s29 + $0x760] sm:$0xff] }
  0x63   : > { %765 = vmatpush.msra.mxu3 %v433_v30  ;;  %658 = vmatmul.f32.vlgmr.msrb.gmra.mxu1 %v1236_v0  ;;  %v392_v0 = vld [vmem:[%s1101_s29 + $0x498] sm:$0xff]  ;;  %v498_v30 = vld [vmem:[%s1101_s29 + $0x7e8] sm:$0xff] }
  0x64   : > { %707 = vmatpush.msra.mxu0 %v383_v31  ;;  %726 = vmatpush.msra.mxu1 %v400_v32  ;;  %v448_v31 = vld [vmem:[%s1101_s29 + $0x658] sm:$0xff]  ;;  %v465_v32 = vld [vmem:[%s1101_s29 + $0x6e0] sm:$0xff] }
  0x65   : > { %747 = vmatpush.msra.mxu2 %v415_v33  ;;  %766 = vmatpush.msra.mxu3 %v432_v34  ;;  %v480_v33 = vld [vmem:[%s1101_s29 + $0x758] sm:$0xff]  ;;  %v497_v34 = vld [vmem:[%s1101_s29 + $0x7e0] sm:$0xff] }
  0x66   : > { %708 = vmatpush.msra.mxu0 %v382_v35  ;;  %727 = vmatpush.msra.mxu1 %v399_v36  ;;  %v447_v35 = vld [vmem:[%s1101_s29 + $0x650] sm:$0xff]  ;;  %v464_v36 = vld [vmem:[%s1101_s29 + $0x6d8] sm:$0xff] }
  0x67   : > { %748 = vmatpush.msra.mxu2 %v414_v37  ;;  %767 = vmatpush.msra.mxu3 %v431_v38  ;;  %v479_v37 = vld [vmem:[%s1101_s29 + $0x750] sm:$0xff]  ;;  %v496_v38 = vld [vmem:[%s1101_s29 + $0x7d8] sm:$0xff] }
  0x68   : > { %709 = vmatpush.msra.mxu0 %v381_v39  ;;  %728 = vmatpush.msra.mxu1 %v398_v40  ;;  %v446_v39 = vld [vmem:[%s1101_s29 + $0x648] sm:$0xff]  ;;  %v463_v40 = vld [vmem:[%s1101_s29 + $0x6d0] sm:$0xff] }
  0x69   : > { %749 = vmatpush.msra.mxu2 %v413_v41  ;;  %768 = vmatpush.msra.mxu3 %v430_v42  ;;  %v478_v41 = vld [vmem:[%s1101_s29 + $0x748] sm:$0xff]  ;;  %v495_v42 = vld [vmem:[%s1101_s29 + $0x7d0] sm:$0xff] }
  0x6a   : > { %710 = vmatpush.msra.mxu0 %v380_v43  ;;  %729 = vmatpush.msra.mxu1 %v397_v44  ;;  %v445_v43 = vld [vmem:[%s1101_s29 + $0x640] sm:$0xff]  ;;  %v462_v44 = vld [vmem:[%s1101_s29 + $0x6c8] sm:$0xff] }
  0x6b   : > { %750 = vmatpush.msra.mxu2 %v412_v45  ;;  %769 = vmatpush.msra.mxu3 %v429_v46  ;;  %v477_v45 = vld [vmem:[%s1101_s29 + $0x740] sm:$0xff]  ;;  %v494_v46 = vld [vmem:[%s1101_s29 + $0x7c8] sm:$0xff] }
  0x6c   : > { %711 = vmatpush.msra.mxu0 %v379_v47  ;;  %730 = vmatpush.msra.mxu1 %v396_v48  ;;  %v444_v47 = vld [vmem:[%s1101_s29 + $0x638] sm:$0xff]  ;;  %v461_v48 = vld [vmem:[%s1101_s29 + $0x6c0] sm:$0xff] }
  0x6d   : > { %751 = vmatpush.msra.mxu2 %v411_v49  ;;  %770 = vmatpush.msra.mxu3 %v428_v50  ;;  %v476_v49 = vld [vmem:[%s1101_s29 + $0x738] sm:$0xff]  ;;  %v493_v50 = vld [vmem:[%s1101_s29 + $0x7c0] sm:$0xff] }
  0x6e   : > { %712 = vmatpush.msra.mxu0 %v378_v51  ;;  %731 = vmatpush.msra.mxu1 %v395_v52  ;;  %v443_v51 = vld [vmem:[%s1101_s29 + $0x630] sm:$0xff]  ;;  %v460_v52 = vld [vmem:[%s1101_s29 + $0x6b8] sm:$0xff] }
  0x6f   : > { %752 = vmatpush.msra.mxu2 %v410_v53  ;;  %771 = vmatpush.msra.mxu3 %v427_v54  ;;  %v475_v53 = vld [vmem:[%s1101_s29 + $0x730] sm:$0xff]  ;;  %v492_v54 = vld [vmem:[%s1101_s29 + $0x7b8] sm:$0xff] }
  0x70   : > { %713 = vmatpush.msra.mxu0 %v377_v55  ;;  %732 = vmatpush.msra.mxu1 %v394_v56  ;;  %v442_v55 = vld [vmem:[%s1101_s29 + $0x628] sm:$0xff]  ;;  %v459_v56 = vld [vmem:[%s1101_s29 + $0x6b0] sm:$0xff] }
  0x71   : > { %753 = vmatpush.msra.mxu2 %v409_v57  ;;  %772 = vmatpush.msra.mxu3 %v426_v58  ;;  %v474_v57 = vld [vmem:[%s1101_s29 + $0x728] sm:$0xff]  ;;  %v491_v58 = vld [vmem:[%s1101_s29 + $0x7b0] sm:$0xff] }
  0x72   : > { %714 = vmatpush.msra.mxu0 %v376_v59  ;;  %733 = vmatpush.msra.mxu1 %v393_v60  ;;  %v441_v59 = vld [vmem:[%s1101_s29 + $0x620] sm:$0xff]  ;;  %v458_v60 = vld [vmem:[%s1101_s29 + $0x6a8] sm:$0xff] }
  0x73   : > { %754 = vmatpush.msra.mxu2 %v408_v61  ;;  %773 = vmatpush.msra.mxu3 %v425_v62  ;;  %v473_v61 = vld [vmem:[%s1101_s29 + $0x720] sm:$0xff]  ;;  %v490_v62 = vld [vmem:[%s1101_s29 + $0x7a8] sm:$0xff] }
  0x74   : > { %715 = vmatpush.msra.mxu0 %v375_v63  ;;  %734 = vmatpush.msra.mxu1 %v392_v0  ;;  %v440_v63 = vld [vmem:[%s1101_s29 + $0x618] sm:$0xff]  ;;  %v457_v0 = vld [vmem:[%s1101_s29 + $0x6a0] sm:$0xff] }
  0x75   : > { %755 = vmatpush.msra.mxu2 %v407_v1  ;;  %774 = vmatpush.msra.mxu3 %v424_v2  ;;  %v472_v1 = vld [vmem:[%s1101_s29 + $0x718] sm:$0xff]  ;;  %v489_v2 = vld [vmem:[%s1101_s29 + $0x7a0] sm:$0xff] }
  0x76   : > { %716 = vmatpush.msra.mxu0 %v374_v3  ;;  %735 = vmatpush.msra.mxu1 %v391_v4  ;;  %v439_v3 = vld [vmem:[%s1101_s29 + $0x610] sm:$0xff]  ;;  %v456_v4 = vld [vmem:[%s1101_s29 + $0x698] sm:$0xff] }
  0x77   : > { %756 = vmatpush.msra.mxu2 %v406_v5  ;;  %775 = vmatpush.msra.mxu3 %v423_v6  ;;  %v471_v5 = vld [vmem:[%s1101_s29 + $0x710] sm:$0xff]  ;;  %v488_v6 = vld [vmem:[%s1101_s29 + $0x798] sm:$0xff] }
  0x78   : > { %717 = vmatpush.msra.mxu0 %v373_v7  ;;  %736 = vmatpush.msra.mxu1 %v390_v8  ;;  %v438_v7 = vld [vmem:[%s1101_s29 + $0x608] sm:$0xff]  ;;  %v455_v8 = vld [vmem:[%s1101_s29 + $0x690] sm:$0xff] }
  0x79   : > { %757 = vmatpush.msra.mxu2 %v405_v9  ;;  %776 = vmatpush.msra.mxu3 %v422_v10  ;;  %v470_v9 = vld [vmem:[%s1101_s29 + $0x708] sm:$0xff]  ;;  %v487_v10 = vld [vmem:[%s1101_s29 + $0x790] sm:$0xff] }
  0x7a   : > { %718 = vmatmul.f32.vlgmr.msra.gmra.mxu0 %v518_v11  ;;  %758 = vmatmul.f32.vlgmr.msra.gmra.mxu2 %v520_v12  ;;  %v437_v11 = vld [vmem:[%s1101_s29 + $0x600] sm:$0xff]  ;;  %v454_v12 = vld [vmem:[%s1101_s29 + $0x688] sm:$0xff] }
  0x7b   : > { %782 = vmatpush.msrb.mxu0 %v452_v13  ;;  %822 = vmatpush.msrb.mxu2 %v484_v14  ;;  %v469_v13 = vld [vmem:[%s1101_s29 + $0x700] sm:$0xff]  ;;  %v486_v14 = vld [vmem:[%s1101_s29 + $0x788] sm:$0xff] }
  0x7c   : > { %737 = vmatpush.msra.mxu1 %v389_v15  ;;  %777 = vmatpush.msra.mxu3 %v421_v16  ;;  %v522_v15 = vld.sshfl [vmem:[#allocation1 + $0x20] sm:$0xff pattern:$0x73625140]  ;;  %v524_v16 = vld.sshfl [vmem:[#allocation1 + $0x30] sm:$0xff pattern:$0x73625140] }
  0x7d   : > { %738 = vmatmul.f32.vlgmr.msra.gmra.mxu1 %v519_v17  ;;  %778 = vmatmul.f32.vlgmr.msra.gmra.mxu3 %v521_v18  ;;  %v453_v17 = vld [vmem:[%s1101_s29 + $0x680] sm:$0xff] }
  0x7e   : > { %783 = vmatpush.msrb.mxu0 %v451_v19  ;;  %802 = vmatpush.msrb.mxu1 %v468_v20  ;;  %v485_v18 = vld [vmem:[%s1101_s29 + $0x780] sm:$0xff]  ;;  %v523_v19 = vld.sshfl [vmem:[#allocation1 + $0x28] sm:$0xff pattern:$0x73625140] }
  0x7f   : > { %823 = vmatpush.msrb.mxu2 %v483_v21  ;;  %842 = vmatpush.msrb.mxu3 %v500_v22  ;;  %v525_v20 = vld.sshfl [vmem:[#allocation1 + $0x38] sm:$0xff pattern:$0x73625140] }
  0x80   : > { %784 = vmatpush.msrb.mxu0 %v450_v23  ;;  %803 = vmatpush.msrb.mxu1 %v467_v24 }
  0x81   : > { %824 = vmatpush.msrb.mxu2 %v482_v25  ;;  %843 = vmatpush.msrb.mxu3 %v499_v26 }
  0x82   : > { %785 = vmatpush.msrb.mxu0 %v449_v27  ;;  %804 = vmatpush.msrb.mxu1 %v466_v28 }
  0x83   : > { %825 = vmatpush.msrb.mxu2 %v481_v29  ;;  %844 = vmatpush.msrb.mxu3 %v498_v30 }
  0x84   : > { %786 = vmatpush.msrb.mxu0 %v448_v31  ;;  %805 = vmatpush.msrb.mxu1 %v465_v32 }
  0x85   : > { %826 = vmatpush.msrb.mxu2 %v480_v33  ;;  %845 = vmatpush.msrb.mxu3 %v497_v34 }
  0x86   : > { %787 = vmatpush.msrb.mxu0 %v447_v35  ;;  %806 = vmatpush.msrb.mxu1 %v464_v36 }
  0x87   : > { %827 = vmatpush.msrb.mxu2 %v479_v37  ;;  %846 = vmatpush.msrb.mxu3 %v496_v38 }
  0x88   : > { %788 = vmatpush.msrb.mxu0 %v446_v39  ;;  %807 = vmatpush.msrb.mxu1 %v463_v40 }
  0x89   : > { %828 = vmatpush.msrb.mxu2 %v478_v41  ;;  %847 = vmatpush.msrb.mxu3 %v495_v42 }
  0x8a   : > { %789 = vmatpush.msrb.mxu0 %v445_v43  ;;  %808 = vmatpush.msrb.mxu1 %v462_v44 }
  0x8b   : > { %829 = vmatpush.msrb.mxu2 %v477_v45  ;;  %848 = vmatpush.msrb.mxu3 %v494_v46 }
  0x8c   : > { %790 = vmatpush.msrb.mxu0 %v444_v47  ;;  %809 = vmatpush.msrb.mxu1 %v461_v48 }
  0x8d   : > { %830 = vmatpush.msrb.mxu2 %v476_v49  ;;  %849 = vmatpush.msrb.mxu3 %v493_v50  ;;  %v240_v50 = vld [vmem:[#allocation2] sm:$0x3] }
  0x8e   : > { %791 = vmatpush.msrb.mxu0 %v443_v51  ;;  %810 = vmatpush.msrb.mxu1 %v460_v52 }
  0x8f   : > { %831 = vmatpush.msrb.mxu2 %v475_v53  ;;  %850 = vmatpush.msrb.mxu3 %v492_v54 }
  0x90   : > { %792 = vmatpush.msrb.mxu0 %v442_v55  ;;  %811 = vmatpush.msrb.mxu1 %v459_v56 }
  0x91   : > { %832 = vmatpush.msrb.mxu2 %v474_v57  ;;  %851 = vmatpush.msrb.mxu3 %v491_v58 }
  0x92   : > { %793 = vmatpush.msrb.mxu0 %v441_v59  ;;  %812 = vmatpush.msrb.mxu1 %v458_v60 }
  0x93   : > { %833 = vmatpush.msrb.mxu2 %v473_v61  ;;  %852 = vmatpush.msrb.mxu3 %v490_v62 }
  0x94   : > { %794 = vmatpush.msrb.mxu0 %v440_v63  ;;  %813 = vmatpush.msrb.mxu1 %v457_v0 }
  0x95   : > { %834 = vmatpush.msrb.mxu2 %v472_v1  ;;  %853 = vmatpush.msrb.mxu3 %v489_v2 }
  0x96   : > { %795 = vmatpush.msrb.mxu0 %v439_v3  ;;  %814 = vmatpush.msrb.mxu1 %v456_v4 }
  0x97   : > { %835 = vmatpush.msrb.mxu2 %v471_v5  ;;  %854 = vmatpush.msrb.mxu3 %v488_v6 }
  0x98   : > { %796 = vmatpush.msrb.mxu0 %v438_v7  ;;  %815 = vmatpush.msrb.mxu1 %v455_v8 }
  0x99   : > { %836 = vmatpush.msrb.mxu2 %v470_v9  ;;  %855 = vmatpush.msrb.mxu3 %v487_v10 }
  0x9a   : > { %797 = vmatpush.msrb.mxu0 %v437_v11  ;;  %816 = vmatpush.msrb.mxu1 %v454_v12 }
  0x9b   : > { %837 = vmatpush.msrb.mxu2 %v469_v13  ;;  %856 = vmatpush.msrb.mxu3 %v486_v14 }
  0x9c   : > { %798 = vmatmul.f32.vlgmr.msrb.gmra.mxu0 %v522_v15  ;;  %838 = vmatmul.f32.vlgmr.msrb.gmra.mxu2 %v524_v16 }
  0x9d   : > { %817 = vmatpush.msrb.mxu1 %v453_v17  ;;  %857 = vmatpush.msrb.mxu3 %v485_v18 }
  0x9e   : > { %818 = vmatmul.f32.vlgmr.msrb.gmra.mxu1 %v523_v19  ;;  %858 = vmatmul.f32.vlgmr.msrb.gmra.mxu3 %v525_v20 }
  0xd3   : > { %v559_v22 = vpop.f32.mrf.mxu0 }
  0xd6   : > { %v579_v21 = vpop.f32.mrf.mxu1 }
  0xd7   : > { %v580_v23 = vadd.f32 %v579_v21, %v559_v22  ;;  %v599_v24 = vpop.f32.mrf.mxu2 }
  0xd9   : > { %v600_v25 = vadd.f32 %v599_v24, %v580_v23 }
  0xda   : > { %v619_v26 = vpop.f32.mrf.mxu3 }
  0xdb   : > { %v620_v27 = vadd.f32 %v619_v26, %v600_v25 }
  0xdd   : > { %v639_v28 = vpop.f32.mrf.mxu0 }
  0xde   : > { %v640_v29 = vadd.f32 %v639_v28, %v620_v27 }
  0xe0   : > { %v659_v30 = vpop.f32.mrf.mxu1 }
  0xe1   : > { %v660_v31 = vadd.f32 %v659_v30, %v640_v29  ;;  %v679_v32 = vpop.f32.mrf.mxu2 }
  0xe3   : > { %v680_v33 = vadd.f32 %v679_v32, %v660_v31 }
  0xe4   : > { %v699_v34 = vpop.f32.mrf.mxu3 }
  0xe5   : > { %v700_v36 = vadd.f32 %v699_v34, %v680_v33 }
  0xf7   : > { %v719_v35 = vpop.f32.mrf.mxu0 }
  0xf8   : > { %v720_v37 = vadd.f32 %v719_v35, %v700_v36 }
  0xfa   : > { %v739_v38 = vpop.f32.mrf.mxu1 }
  0xfb   : > { %v740_v40 = vadd.f32 %v739_v38, %v720_v37 }
  0xfd   : > { %v759_v39 = vpop.f32.mrf.mxu2 }
  0xfe   : > { %v760_v41 = vadd.f32 %v759_v39, %v740_v40 }
 0x100   : > { %v779_v42 = vpop.f32.mrf.mxu3 }
 0x101   : > { %v780_v43 = vadd.f32 %v779_v42, %v760_v41 }
 0x119   : > { %v799_v44 = vpop.f32.mrf.mxu0 }
 0x11a   : > { %v800_v45 = vadd.f32 %v799_v44, %v780_v43 }
 0x11b   : > { %v819_v46 = vpop.f32.mrf.mxu1 }
 0x11c   : > { %v820_v47 = vadd.f32 %v819_v46, %v800_v45 }
 0x11f   : > { %v839_v48 = vpop.f32.mrf.mxu2 }
 0x120   : > { %v840_v49 = vadd.f32 %v839_v48, %v820_v47 }
 0x121   : > { %v859_v51 = vpop.f32.mrf.mxu3 }
 0x122   : > { %v860_v52 = vadd.f32 %v859_v51, %v840_v49  ;;  %867 = sbr.rel (%p986_p6) target bundleno = 456 (0x1c8), region = 48 }
 0x124   : > { %v862_v53 = vadd.f32 %v860_v52, %v240_v50 }
 0x126   : > { %863 = vst [vmem:[#allocation2] sm:$0x3] %v862_v53 }
 0x127   : > { %v890_v54 = vld [vmem:[%s1450_s3 + $0x78] sm:$0xff]  ;;  %v889_v55 = vld [vmem:[%s1450_s3 + $0x70] sm:$0xff]  ;;  %v888_v56 = vld [vmem:[%s1450_s3 + $0x68] sm:$0xff]  ;;  %vm915_vm0 = vcmask 74752  }
 0x128   : > { %895 = vmatpush.msra.mxu0 %v890_v54  ;;  %v887_v57 = vld [vmem:[%s1450_s3 + $0x60] sm:$0xff]  ;;  %v886_v58 = vld [vmem:[%s1450_s3 + $0x58] sm:$0xff]  ;;  %v885_v59 = vld [vmem:[%s1450_s3 + $0x50] sm:$0xff] }
 0x129   : > { %v884_v60 = vld [vmem:[%s1450_s3 + $0x48] sm:$0xff]  ;;  %v883_v61 = vld [vmem:[%s1450_s3 + $0x40] sm:$0xff]  ;;  %v882_v62 = vld [vmem:[%s1450_s3 + $0x38] sm:$0xff] }
 0x12a   : > { %896 = vmatpush.msra.mxu0 %v889_v55  ;;  %v881_v63 = vld [vmem:[%s1450_s3 + $0x30] sm:$0xff]  ;;  %v880_v0 = vld [vmem:[%s1450_s3 + $0x28] sm:$0xff]  ;;  %v879_v1 = vld [vmem:[%s1450_s3 + $0x20] sm:$0xff] }
 0x12b   : > { %v1007_v2 = vld [vmem:[%s1449_s2] ss:$0 sm:$0xff]  ;;  %v878_v4 = vld [vmem:[%s1450_s3 + $0x18] sm:$0xff]  ;;  %v877_v5 = vld [vmem:[%s1450_s3 + $0x10] sm:$0xff] }
 0x12c   : > { %897 = vmatpush.msra.mxu0 %v888_v56  ;;  %v876_v7 = vld [vmem:[%s1450_s3 + $0x8] sm:$0xff]  ;;  %v875_v8 = vld [vmem:[%s1450_s3] sm:$0xff] }
 0x12d   : > { %v868_v3 = vld [vmem:[#allocation2] sm:$0x3]  ;;  %v1008_v10 = vld [vmem:[%s1451_s4] ss:$0 sm:$0xff] }
 0x12e   : > { %898 = vmatpush.msra.mxu0 %v887_v57  ;;  %v873_v6 = vadd.f32 %v1007_v2, %v868_v3 }
 0x130   : > { %899 = vmatpush.msra.mxu0 %v886_v58  ;;  %v874_v9 = vmax.f32 %v873_v6, 0.0 }
 0x132   : > { %900 = vmatpush.msra.mxu0 %v885_v59 }
 0x134   : > { %901 = vmatpush.msra.mxu0 %v884_v60 }
 0x136   : > { %902 = vmatpush.msra.mxu0 %v883_v61 }
 0x138   : > { %903 = vmatpush.msra.mxu0 %v882_v62 }
 0x13a   : > { %904 = vmatpush.msra.mxu0 %v881_v63 }
 0x13c   : > { %905 = vmatpush.msra.mxu0 %v880_v0 }
 0x13e   : > { %906 = vmatpush.msra.mxu0 %v879_v1 }
 0x140   : > { %907 = vmatpush.msra.mxu0 %v878_v4 }
 0x142   : > { %908 = vmatpush.msra.mxu0 %v877_v5 }
 0x144   : > { %909 = vmatpush.msra.mxu0 %v876_v7 }
 0x146   : > { %910 = vmatpush.msra.mxu0 %v875_v8 }
 0x147   : > { %911 = vmatmul.f32.vlgmr.msra.gmra.mxu0 %v874_v9 }
 0x1c4   : > { %v912_v11 = vpop.f32.mrf.mxu0 }
 0x1c5   : > { %v913_v12 = vadd.f32 %v1008_v10, %v912_v11 }
 0x1c7   : > { %916 = vst.msk [vmem:[#allocation3] sm:$0x3] %vm915_vm0, %v913_v12 }
 0x1c8 PF: > { %p995_p7 = scmp.eq.s32.totalorder %s1087_s19, 3  ;;  %s1050_s20 = smov [#allocation3]  }
 0x1c9   : > { %s923_s21 = sshll.u32 %s1050_s20, 4  ;;  %s925_s24 = sshll.u32 %s1452_s5, 4  ;;  %s924_s21 = int_to_ptr.vmem [resolvable:$true] %s923_s21  ;;  %s926_s24 = int_to_ptr.hbm [resolvable:$true] %s925_s24 }
 0x1ca   : > { %992 = dma.vmem_to_hbm [thread:$0]  (%p995_p7), %s924_s21, 32, %s926_s24, [#allocation4]  }
 0x1cb   : > { %1042 = dma.done.wait (%p995_p7), [#allocation4], 32  }
 0x1cc   : > { %1044 = vsyncadd (%p995_p7), [#allocation4], 4294967264 }
 0x1cd PF: > { %s16_s18 = sadd.s32 1, %s1047_s18  }
 0x1ce   : > { %p13_p8 = scmp.ge.s32.totalorder %s16_s18, 6  }
 0x1d0   :  { %15 = sbr.rel (!%p13_p8) target bundleno = 1 (0x1), region = 79 }
 0x1d5   :  { %939 = vsyncpa [#allocation4], 1 }
 0x1d6   :  { %941 = vsyncpa [#allocation4 + $0x1], 1 }

</bundles_post_ra>
